<compile_context>
chip_gen: v5e
topology: v5e:2x2
jax: 0.10.0
libtpu: 0.0.40
codegen_flags: <defaults>
</compile_context>

<pallas_src>
import functools

import jax
import jax.numpy as jnp
from jax.experimental import pallas as pl
from jax.experimental.pallas import tpu as pltpu


_LANES = 128   # lane width: channels are padded to a multiple of this
_SLACK = 8     # zero slack rows so the dx-1 tap offsets stay in bounds


# ----------------------------------------------------------------------------
# Fused kernel: (conv3x3 + BN + ReLU) x 2 for one batch element.
# ----------------------------------------------------------------------------
def _fused_conv_bn_relu_kernel(xp_ref, w1_ref, s1_ref, t1_ref,
                               w2_ref, s2_ref, t2_ref,
                               o_ref, mpad_ref, *, H, W, Wp, base):
    # xp_ref  : (1, R, Cin_p)  bf16   flat zero-padded input rows,
    #                                 R = (H+2)*Wp + 2*base, image at [base, ...)
    # w*_ref  : (3, 3, Cin*, Cout*) bf16  HWIO weights, channel-padded
    # s*/t*   : (1, C*)        f32   folded BN scale / shift (bias included)
    # o_ref   : (1, H, W, Cout_p) f32
    # mpad_ref: (R, Cmid_p)    bf16  VMEM scratch: zero-padded mid activation
    HW = H * Wp
    f32 = jnp.float32
    c_mid = w1_ref.shape[-1]
    c_out = w2_ref.shape[-1]

    def conv3x3(load, w_ref, n_out):
        acc = jnp.zeros((HW, n_out), f32)
        for dy in range(3):
            for dx in range(3):
                start = base + dy * Wp + (dx - 1)      # static offset
                acc = acc + jnp.dot(load(start), w_ref[dy, dx],
                                    preferred_element_type=f32)
        return acc

    # ---- stage 1: conv1 + BN1 + ReLU -----------------------------------
    acc1 = conv3x3(lambda s: xp_ref[0, pl.ds(s, HW), :], w1_ref, c_mid)
    y1 = jnp.maximum(acc1 * s1_ref[...] + t1_ref[...], 0.0)

    # Zero the wide-frame columns outside [1, W]: they become the left/right
    # conv padding of stage 2.
    jcol = jax.lax.broadcasted_iota(jnp.int32, (H, Wp, c_mid), 1)
    y1 = jnp.where((jcol >= 1) & (jcol <= W), y1.reshape(H, Wp, c_mid), 0.0)

    mpad_ref[...] = jnp.zeros(mpad_ref.shape, mpad_ref.dtype)
    mpad_ref[pl.ds(base + Wp, HW), :] = (
        y1.reshape(HW, c_mid).astype(mpad_ref.dtype))

    # ---- stage 2: conv2 + BN2 + ReLU -----------------------------------
    acc2 = conv3x3(lambda s: mpad_ref[pl.ds(s, HW), :], w2_ref, c_out)
    y2 = jnp.maximum(acc2 * s2_ref[...] + t2_ref[...], 0.0)

    # Drop the wide-frame padding columns and store a lane-dense (W, 128) tile.
    o_ref[0] = y2.reshape(H, Wp, c_out)[:, 1:W + 1, :].astype(o_ref.dtype)


# ----------------------------------------------------------------------------
# Wrapper: layout prep (channel/halo padding, bf16 cast, BN fold) + pallas_call
# ----------------------------------------------------------------------------
def _round_up(v, m):
    return (v + m - 1) // m * m


def _fold_bn(bias, gamma, beta, mean, var, eps, c_pad):
    scale = gamma / jnp.sqrt(var + eps)
    shift = (bias - mean) * scale + beta
    pad = c_pad - scale.shape[0]
    scale = jnp.pad(scale, (0, pad)).reshape(1, c_pad).astype(jnp.float32)
    shift = jnp.pad(shift, (0, pad)).reshape(1, c_pad).astype(jnp.float32)
    return scale, shift


def _pad_weight(w, cin_p, cout_p):
    _, _, cin, cout = w.shape
    w = jnp.pad(w, ((0, 0), (0, 0), (0, cin_p - cin), (0, cout_p - cout)))
    return w.astype(jnp.bfloat16)


def conv_block_nested_fused(x_nhwc, params, eps=1e-5):
    """NHWC float32 in -> (N, H, W, Cout_p) float32 out (channel-padded)."""
    N, H, W, Cin = x_nhwc.shape
    Cmid = params["w1"].shape[-1]
    Cout = params["w2"].shape[-1]
    Cin_p, Cmid_p, Cout_p = (_round_up(c, _LANES) for c in (Cin, Cmid, Cout))
    Hp = H + 2
    Wp = _round_up(W + 2, 8)
    R = Hp * Wp + 2 * _SLACK

    w1 = _pad_weight(params["w1"], Cin_p, Cmid_p)
    w2 = _pad_weight(params["w2"], Cmid_p, Cout_p)
    s1, t1 = _fold_bn(params["b1"], params["bn1_gamma"], params["bn1_beta"],
                      params["bn1_mean"], params["bn1_var"], eps, Cmid_p)
    s2, t2 = _fold_bn(params["b2"], params["bn2_gamma"], params["bn2_beta"],
                      params["bn2_mean"], params["bn2_var"], eps, Cout_p)

    # One combined pad: conv halo on H/W + lane padding on C, then flatten the
    # spatial dims and add zero slack rows so every 3x3 tap inside the kernel
    # is a contiguous, lane-dense row slice.
    xp = jnp.pad(x_nhwc.astype(jnp.bfloat16),
                 ((0, 0), (1, 1), (1, Wp - W - 1), (0, Cin_p - Cin)))
    xp = xp.reshape(N, Hp * Wp, Cin_p)
    xp = jnp.pad(xp, ((0, 0), (_SLACK, _SLACK), (0, 0)))

    kernel = functools.partial(_fused_conv_bn_relu_kernel,
                               H=H, W=W, Wp=Wp, base=_SLACK)

    out = pl.pallas_call(
        kernel,
        out_shape=jax.ShapeDtypeStruct((N, H, W, Cout_p), jnp.float32),
        grid=(N,),
        in_specs=[
            pl.BlockSpec((1, R, Cin_p), lambda n: (n, 0, 0)),
            pl.BlockSpec((3, 3, Cin_p, Cmid_p), lambda n: (0, 0, 0, 0)),
            pl.BlockSpec((1, Cmid_p), lambda n: (0, 0)),
            pl.BlockSpec((1, Cmid_p), lambda n: (0, 0)),
            pl.BlockSpec((3, 3, Cmid_p, Cout_p), lambda n: (0, 0, 0, 0)),
            pl.BlockSpec((1, Cout_p), lambda n: (0, 0)),
            pl.BlockSpec((1, Cout_p), lambda n: (0, 0)),
        ],
        out_specs=pl.BlockSpec((1, H, W, Cout_p), lambda n: (n, 0, 0, 0)),
        scratch_shapes=[pltpu.VMEM((R, Cmid_p), jnp.bfloat16)],
        compiler_params=pltpu.CompilerParams(
            dimension_semantics=("parallel",)),
    )(xp, w1, s1, t1, w2, s2, t2)

    return out[..., :Cout]


@jax.jit
def conv_block_nested_forward(x_nchw, params):
    """Matches conv_block_nested.forward. Input/output are NCHW (PyTorch)."""
    x = jnp.transpose(x_nchw, (0, 2, 3, 1)).astype(jnp.float32)  # NCHW -> NHWC
    y = conv_block_nested_fused(x, params)
    return jnp.transpose(y, (0, 3, 1, 2))                        # NHWC -> NCHW


# ----------------------------------------------------------------------------
# Pure-JAX reference (same bf16 quantization of conv operands) + params.
# ----------------------------------------------------------------------------
def _reference_forward(x_nchw, params, eps=1e-5):
    f32, bf16 = jnp.float32, jnp.bfloat16

    def layer(x, w, b, gamma, beta, mean, var):
        xq = x.astype(bf16).astype(f32)
        wq = w.astype(bf16).astype(f32)
        y = jax.lax.conv_general_dilated(
            xq, wq, window_strides=(1, 1), padding="SAME",
            dimension_numbers=("NHWC", "HWIO", "NHWC"),
            precision=jax.lax.Precision.HIGHEST) + b
        y = (y - mean) / jnp.sqrt(var + eps) * gamma + beta
        return jnp.maximum(y, 0.0)

    x = jnp.transpose(x_nchw, (0, 2, 3, 1)).astype(f32)
    y = layer(x, params["w1"], params["b1"], params["bn1_gamma"],
              params["bn1_beta"], params["bn1_mean"], params["bn1_var"])
    y = layer(y, params["w2"], params["b2"], params["bn2_gamma"],
              params["bn2_beta"], params["bn2_mean"], params["bn2_var"])
    return jnp.transpose(y, (0, 3, 1, 2))


def init_conv_block_nested_params(key, in_ch, mid_ch, out_ch):
    ks = jax.random.split(key, 4)
    return {
        "w1": 0.1 * jax.random.normal(ks[0], (3, 3, in_ch, mid_ch), jnp.float32),
        "b1": 0.05 * jax.random.normal(ks[1], (mid_ch,), jnp.float32),
        "bn1_gamma": jnp.linspace(0.9, 1.1, mid_ch, dtype=jnp.float32),
        "bn1_beta": jnp.linspace(-0.1, 0.1, mid_ch, dtype=jnp.float32),
        "bn1_mean": 0.01 * jnp.arange(mid_ch, dtype=jnp.float32),
        "bn1_var": jnp.linspace(0.5, 1.5, mid_ch, dtype=jnp.float32),
        "w2": 0.1 * jax.random.normal(ks[2], (3, 3, mid_ch, out_ch), jnp.float32),
        "b2": 0.05 * jax.random.normal(ks[3], (out_ch,), jnp.float32),
        "bn2_gamma": jnp.linspace(1.1, 0.9, out_ch, dtype=jnp.float32),
        "bn2_beta": jnp.linspace(0.1, -0.1, out_ch, dtype=jnp.float32),
        "bn2_mean": 0.02 * jnp.arange(out_ch, dtype=jnp.float32),
        "bn2_var": jnp.linspace(1.5, 0.5, out_ch, dtype=jnp.float32),
    }


if __name__ == "__main__":
    key = jax.random.PRNGKey(0)
    k_x, k_p = jax.random.split(key)

    in_ch, mid_ch, out_ch = 4, 8, 4
    x = jax.random.normal(k_x, (2, in_ch, 16, 16), jnp.float32)
    params = init_conv_block_nested_params(k_p, in_ch, mid_ch, out_ch)

    out = conv_block_nested_forward(x, params)
    jax.block_until_ready(out)
    assert out.shape == (2, out_ch, 16, 16)
    assert bool(jnp.all(out >= 0.0))  # final ReLU

    ref = _reference_forward(x, params)
    max_err = float(jnp.max(jnp.abs(out - ref)))
    assert bool(jnp.allclose(out, ref, atol=1e-2, rtol=1e-2)), max_err
    print("KERNEL_OK")
</pallas_src>

<mosaic_0001>
module attributes {stable_mosaic.version = 11 : i64} {
  func.func @_fused_conv_bn_relu_kernel(%arg0: i32, %arg1: memref<1x448x128xbf16, #tpu.memory_space<vmem>>, %arg2: memref<3x3x128x128xbf16, #tpu.memory_space<vmem>>, %arg3: memref<1x128xf32, #tpu.memory_space<vmem>>, %arg4: memref<1x128xf32, #tpu.memory_space<vmem>>, %arg5: memref<3x3x128x128xbf16, #tpu.memory_space<vmem>>, %arg6: memref<1x128xf32, #tpu.memory_space<vmem>>, %arg7: memref<1x128xf32, #tpu.memory_space<vmem>>, %arg8: memref<1x16x16x128xf32, #tpu.memory_space<vmem>>, %arg9: memref<448x128xbf16, #tpu.memory_space<vmem>>) attributes {dimension_semantics = [#tpu.dimension_semantics<parallel>], iteration_bounds = array<i64: 2>, scalar_prefetch = 0 : i64, scratch_operands = 1 : i64, tpu.core_type = #tpu.core_type<tc>, window_params = [{transform_indices = @transform_0, window_bounds = array<i64: 1, 448, 128>}, {pipeline_mode = #tpu.pipeline_mode<synchronous>, transform_indices = @transform_1, window_bounds = array<i64: 3, 3, 128, 128>}, {pipeline_mode = #tpu.pipeline_mode<synchronous>, transform_indices = @transform_2, window_bounds = array<i64: 1, 128>}, {pipeline_mode = #tpu.pipeline_mode<synchronous>, transform_indices = @transform_3, window_bounds = array<i64: 1, 128>}, {pipeline_mode = #tpu.pipeline_mode<synchronous>, transform_indices = @transform_4, window_bounds = array<i64: 3, 3, 128, 128>}, {pipeline_mode = #tpu.pipeline_mode<synchronous>, transform_indices = @transform_5, window_bounds = array<i64: 1, 128>}, {pipeline_mode = #tpu.pipeline_mode<synchronous>, transform_indices = @transform_6, window_bounds = array<i64: 1, 128>}, {transform_indices = @transform_7, window_bounds = array<i64: 1, 16, 16, 128>}]} {
    %cst = arith.constant 0.000000e+00 : f32
    %0 = vector.broadcast %cst : f32 to vector<384x128xf32>
    %c0 = arith.constant 0 : index
    %c7 = arith.constant 7 : index
    %c0_0 = arith.constant 0 : index
    %1 = vector.load %arg1[%c0, %c7, %c0_0] : memref<1x448x128xbf16, #tpu.memory_space<vmem>>, vector<1x384x128xbf16>
    %2 = vector.shape_cast %1 : vector<1x384x128xbf16> to vector<384x128xbf16>
    %c0_1 = arith.constant 0 : index
    %c0_2 = arith.constant 0 : index
    %c0_3 = arith.constant 0 : index
    %c0_4 = arith.constant 0 : index
    %3 = vector.load %arg2[%c0_1, %c0_2, %c0_3, %c0_4] : memref<3x3x128x128xbf16, #tpu.memory_space<vmem>>, vector<1x1x128x128xbf16>
    %4 = vector.shape_cast %3 : vector<1x1x128x128xbf16> to vector<128x128xbf16>
    %cst_5 = arith.constant dense<0.000000e+00> : vector<384x128xf32>
    %5 = tpu.matmul %2, %4, %cst_5 {dimension_numbers = #tpu.dot_dimension_numbers<[1], [0], [0], [1], [0, 0, 1, 1], [], []>} : vector<384x128xbf16>, vector<128x128xbf16>, vector<384x128xf32> -> vector<384x128xf32>
    %6 = arith.addf %0, %5 : vector<384x128xf32>
    %c0_6 = arith.constant 0 : index
    %c8 = arith.constant 8 : index
    %c0_7 = arith.constant 0 : index
    %7 = vector.load %arg1[%c0_6, %c8, %c0_7] : memref<1x448x128xbf16, #tpu.memory_space<vmem>>, vector<1x384x128xbf16>
    %8 = vector.shape_cast %7 : vector<1x384x128xbf16> to vector<384x128xbf16>
    %c0_8 = arith.constant 0 : index
    %c1 = arith.constant 1 : index
    %c0_9 = arith.constant 0 : index
    %c0_10 = arith.constant 0 : index
    %9 = vector.load %arg2[%c0_8, %c1, %c0_9, %c0_10] : memref<3x3x128x128xbf16, #tpu.memory_space<vmem>>, vector<1x1x128x128xbf16>
    %10 = vector.shape_cast %9 : vector<1x1x128x128xbf16> to vector<128x128xbf16>
    %cst_11 = arith.constant dense<0.000000e+00> : vector<384x128xf32>
    %11 = tpu.matmul %8, %10, %cst_11 {dimension_numbers = #tpu.dot_dimension_numbers<[1], [0], [0], [1], [0, 0, 1, 1], [], []>} : vector<384x128xbf16>, vector<128x128xbf16>, vector<384x128xf32> -> vector<384x128xf32>
    %12 = arith.addf %6, %11 : vector<384x128xf32>
    %c0_12 = arith.constant 0 : index
    %c9 = arith.constant 9 : index
    %c0_13 = arith.constant 0 : index
    %13 = vector.load %arg1[%c0_12, %c9, %c0_13] : memref<1x448x128xbf16, #tpu.memory_space<vmem>>, vector<1x384x128xbf16>
    %14 = vector.shape_cast %13 : vector<1x384x128xbf16> to vector<384x128xbf16>
    %c0_14 = arith.constant 0 : index
    %c2 = arith.constant 2 : index
    %c0_15 = arith.constant 0 : index
    %c0_16 = arith.constant 0 : index
    %15 = vector.load %arg2[%c0_14, %c2, %c0_15, %c0_16] : memref<3x3x128x128xbf16, #tpu.memory_space<vmem>>, vector<1x1x128x128xbf16>
    %16 = vector.shape_cast %15 : vector<1x1x128x128xbf16> to vector<128x128xbf16>
    %cst_17 = arith.constant dense<0.000000e+00> : vector<384x128xf32>
    %17 = tpu.matmul %14, %16, %cst_17 {dimension_numbers = #tpu.dot_dimension_numbers<[1], [0], [0], [1], [0, 0, 1, 1], [], []>} : vector<384x128xbf16>, vector<128x128xbf16>, vector<384x128xf32> -> vector<384x128xf32>
    %18 = arith.addf %12, %17 : vector<384x128xf32>
    %c0_18 = arith.constant 0 : index
    %c31 = arith.constant 31 : index
    %c0_19 = arith.constant 0 : index
    %19 = vector.load %arg1[%c0_18, %c31, %c0_19] : memref<1x448x128xbf16, #tpu.memory_space<vmem>>, vector<1x384x128xbf16>
    %20 = vector.shape_cast %19 : vector<1x384x128xbf16> to vector<384x128xbf16>
    %c1_20 = arith.constant 1 : index
    %c0_21 = arith.constant 0 : index
    %c0_22 = arith.constant 0 : index
    %c0_23 = arith.constant 0 : index
    %21 = vector.load %arg2[%c1_20, %c0_21, %c0_22, %c0_23] : memref<3x3x128x128xbf16, #tpu.memory_space<vmem>>, vector<1x1x128x128xbf16>
    %22 = vector.shape_cast %21 : vector<1x1x128x128xbf16> to vector<128x128xbf16>
    %cst_24 = arith.constant dense<0.000000e+00> : vector<384x128xf32>
    %23 = tpu.matmul %20, %22, %cst_24 {dimension_numbers = #tpu.dot_dimension_numbers<[1], [0], [0], [1], [0, 0, 1, 1], [], []>} : vector<384x128xbf16>, vector<128x128xbf16>, vector<384x128xf32> -> vector<384x128xf32>
    %24 = arith.addf %18, %23 : vector<384x128xf32>
    %c0_25 = arith.constant 0 : index
    %c32 = arith.constant 32 : index
    %c0_26 = arith.constant 0 : index
    %25 = vector.load %arg1[%c0_25, %c32, %c0_26] : memref<1x448x128xbf16, #tpu.memory_space<vmem>>, vector<1x384x128xbf16>
    %26 = vector.shape_cast %25 : vector<1x384x128xbf16> to vector<384x128xbf16>
    %c1_27 = arith.constant 1 : index
    %c1_28 = arith.constant 1 : index
    %c0_29 = arith.constant 0 : index
    %c0_30 = arith.constant 0 : index
    %27 = vector.load %arg2[%c1_27, %c1_28, %c0_29, %c0_30] : memref<3x3x128x128xbf16, #tpu.memory_space<vmem>>, vector<1x1x128x128xbf16>
    %28 = vector.shape_cast %27 : vector<1x1x128x128xbf16> to vector<128x128xbf16>
    %cst_31 = arith.constant dense<0.000000e+00> : vector<384x128xf32>
    %29 = tpu.matmul %26, %28, %cst_31 {dimension_numbers = #tpu.dot_dimension_numbers<[1], [0], [0], [1], [0, 0, 1, 1], [], []>} : vector<384x128xbf16>, vector<128x128xbf16>, vector<384x128xf32> -> vector<384x128xf32>
    %30 = arith.addf %24, %29 : vector<384x128xf32>
    %c0_32 = arith.constant 0 : index
    %c33 = arith.constant 33 : index
    %c0_33 = arith.constant 0 : index
    %31 = vector.load %arg1[%c0_32, %c33, %c0_33] : memref<1x448x128xbf16, #tpu.memory_space<vmem>>, vector<1x384x128xbf16>
    %32 = vector.shape_cast %31 : vector<1x384x128xbf16> to vector<384x128xbf16>
    %c1_34 = arith.constant 1 : index
    %c2_35 = arith.constant 2 : index
    %c0_36 = arith.constant 0 : index
    %c0_37 = arith.constant 0 : index
    %33 = vector.load %arg2[%c1_34, %c2_35, %c0_36, %c0_37] : memref<3x3x128x128xbf16, #tpu.memory_space<vmem>>, vector<1x1x128x128xbf16>
    %34 = vector.shape_cast %33 : vector<1x1x128x128xbf16> to vector<128x128xbf16>
    %cst_38 = arith.constant dense<0.000000e+00> : vector<384x128xf32>
    %35 = tpu.matmul %32, %34, %cst_38 {dimension_numbers = #tpu.dot_dimension_numbers<[1], [0], [0], [1], [0, 0, 1, 1], [], []>} : vector<384x128xbf16>, vector<128x128xbf16>, vector<384x128xf32> -> vector<384x128xf32>
    %36 = arith.addf %30, %35 : vector<384x128xf32>
    %c0_39 = arith.constant 0 : index
    %c55 = arith.constant 55 : index
    %c0_40 = arith.constant 0 : index
    %37 = vector.load %arg1[%c0_39, %c55, %c0_40] : memref<1x448x128xbf16, #tpu.memory_space<vmem>>, vector<1x384x128xbf16>
    %38 = vector.shape_cast %37 : vector<1x384x128xbf16> to vector<384x128xbf16>
    %c2_41 = arith.constant 2 : index
    %c0_42 = arith.constant 0 : index
    %c0_43 = arith.constant 0 : index
    %c0_44 = arith.constant 0 : index
    %39 = vector.load %arg2[%c2_41, %c0_42, %c0_43, %c0_44] : memref<3x3x128x128xbf16, #tpu.memory_space<vmem>>, vector<1x1x128x128xbf16>
    %40 = vector.shape_cast %39 : vector<1x1x128x128xbf16> to vector<128x128xbf16>
    %cst_45 = arith.constant dense<0.000000e+00> : vector<384x128xf32>
    %41 = tpu.matmul %38, %40, %cst_45 {dimension_numbers = #tpu.dot_dimension_numbers<[1], [0], [0], [1], [0, 0, 1, 1], [], []>} : vector<384x128xbf16>, vector<128x128xbf16>, vector<384x128xf32> -> vector<384x128xf32>
    %42 = arith.addf %36, %41 : vector<384x128xf32>
    %c0_46 = arith.constant 0 : index
    %c56 = arith.constant 56 : index
    %c0_47 = arith.constant 0 : index
    %43 = vector.load %arg1[%c0_46, %c56, %c0_47] : memref<1x448x128xbf16, #tpu.memory_space<vmem>>, vector<1x384x128xbf16>
    %44 = vector.shape_cast %43 : vector<1x384x128xbf16> to vector<384x128xbf16>
    %c2_48 = arith.constant 2 : index
    %c1_49 = arith.constant 1 : index
    %c0_50 = arith.constant 0 : index
    %c0_51 = arith.constant 0 : index
    %45 = vector.load %arg2[%c2_48, %c1_49, %c0_50, %c0_51] : memref<3x3x128x128xbf16, #tpu.memory_space<vmem>>, vector<1x1x128x128xbf16>
    %46 = vector.shape_cast %45 : vector<1x1x128x128xbf16> to vector<128x128xbf16>
    %cst_52 = arith.constant dense<0.000000e+00> : vector<384x128xf32>
    %47 = tpu.matmul %44, %46, %cst_52 {dimension_numbers = #tpu.dot_dimension_numbers<[1], [0], [0], [1], [0, 0, 1, 1], [], []>} : vector<384x128xbf16>, vector<128x128xbf16>, vector<384x128xf32> -> vector<384x128xf32>
    %48 = arith.addf %42, %47 : vector<384x128xf32>
    %c0_53 = arith.constant 0 : index
    %c57 = arith.constant 57 : index
    %c0_54 = arith.constant 0 : index
    %49 = vector.load %arg1[%c0_53, %c57, %c0_54] : memref<1x448x128xbf16, #tpu.memory_space<vmem>>, vector<1x384x128xbf16>
    %50 = vector.shape_cast %49 : vector<1x384x128xbf16> to vector<384x128xbf16>
    %c2_55 = arith.constant 2 : index
    %c2_56 = arith.constant 2 : index
    %c0_57 = arith.constant 0 : index
    %c0_58 = arith.constant 0 : index
    %51 = vector.load %arg2[%c2_55, %c2_56, %c0_57, %c0_58] : memref<3x3x128x128xbf16, #tpu.memory_space<vmem>>, vector<1x1x128x128xbf16>
    %52 = vector.shape_cast %51 : vector<1x1x128x128xbf16> to vector<128x128xbf16>
    %cst_59 = arith.constant dense<0.000000e+00> : vector<384x128xf32>
    %53 = tpu.matmul %50, %52, %cst_59 {dimension_numbers = #tpu.dot_dimension_numbers<[1], [0], [0], [1], [0, 0, 1, 1], [], []>} : vector<384x128xbf16>, vector<128x128xbf16>, vector<384x128xf32> -> vector<384x128xf32>
    %54 = arith.addf %48, %53 : vector<384x128xf32>
    %c0_60 = arith.constant 0 : index
    %c0_61 = arith.constant 0 : index
    %55 = vector.load %arg3[%c0_60, %c0_61] : memref<1x128xf32, #tpu.memory_space<vmem>>, vector<1x128xf32>
    %56 = vector.broadcast %55 : vector<1x128xf32> to vector<384x128xf32>
    %57 = arith.mulf %54, %56 : vector<384x128xf32>
    %c0_62 = arith.constant 0 : index
    %c0_63 = arith.constant 0 : index
    %58 = vector.load %arg4[%c0_62, %c0_63] : memref<1x128xf32, #tpu.memory_space<vmem>>, vector<1x128xf32>
    %59 = vector.broadcast %58 : vector<1x128xf32> to vector<384x128xf32>
    %60 = arith.addf %57, %59 : vector<384x128xf32>
    %cst_64 = arith.constant 0.000000e+00 : f32
    %61 = vector.broadcast %cst_64 : f32 to vector<384x128xf32>
    %62 = arith.maximumf %60, %61 : vector<384x128xf32>
    %63 = tpu.iota {dimensions = array<i32: 1>} : vector<16x24x128xi32>
    %c1_i32 = arith.constant 1 : i32
    %64 = vector.broadcast %c1_i32 : i32 to vector<16x24x128xi32>
    %65 = arith.cmpi sge, %63, %64 : vector<16x24x128xi32>
    %c16_i32 = arith.constant 16 : i32
    %66 = vector.broadcast %c16_i32 : i32 to vector<16x24x128xi32>
    %67 = arith.cmpi sle, %63, %66 : vector<16x24x128xi32>
    %68 = arith.andi %65, %67 : vector<16x24x128xi1>
    %69 = vector.shape_cast %62 : vector<384x128xf32> to vector<16x24x128xf32>
    %cst_65 = arith.constant 0.000000e+00 : f32
    %70 = vector.broadcast %cst_65 : f32 to vector<16x24x128xf32>
    %71 = arith.select %68, %69, %70 : vector<16x24x128xi1>, vector<16x24x128xf32>
    %cst_66 = arith.constant 0.000000e+00 : bf16
    %72 = vector.broadcast %cst_66 : bf16 to vector<448x128xbf16>
    %c0_67 = arith.constant 0 : index
    %c0_68 = arith.constant 0 : index
    %73 = vector.load %arg9[%c0_67, %c0_68] : memref<448x128xbf16, #tpu.memory_space<vmem>>, vector<448x128xbf16>
    tpu.vector_store %arg9[%c0_67, %c0_68], %72 {strides = array<i32>} : memref<448x128xbf16, #tpu.memory_space<vmem>>, vector<448x128xbf16>,
    %74 = vector.shape_cast %71 : vector<16x24x128xf32> to vector<384x128xf32>
    %75 = arith.truncf %74 : vector<384x128xf32> to vector<384x128xbf16>
    %c32_69 = arith.constant 32 : index
    %c0_70 = arith.constant 0 : index
    %76 = vector.load %arg9[%c32_69, %c0_70] : memref<448x128xbf16, #tpu.memory_space<vmem>>, vector<384x128xbf16>
    tpu.vector_store %arg9[%c32_69, %c0_70], %75 {strides = array<i32>} : memref<448x128xbf16, #tpu.memory_space<vmem>>, vector<384x128xbf16>,
    %cst_71 = arith.constant 0.000000e+00 : f32
    %77 = vector.broadcast %cst_71 : f32 to vector<384x128xf32>
    %c7_72 = arith.constant 7 : index
    %c0_73 = arith.constant 0 : index
    %78 = vector.load %arg9[%c7_72, %c0_73] : memref<448x128xbf16, #tpu.memory_space<vmem>>, vector<384x128xbf16>
    %c0_74 = arith.constant 0 : index
    %c0_75 = arith.constant 0 : index
    %c0_76 = arith.constant 0 : index
    %c0_77 = arith.constant 0 : index
    %79 = vector.load %arg5[%c0_74, %c0_75, %c0_76, %c0_77] : memref<3x3x128x128xbf16, #tpu.memory_space<vmem>>, vector<1x1x128x128xbf16>
    %80 = vector.shape_cast %79 : vector<1x1x128x128xbf16> to vector<128x128xbf16>
    %cst_78 = arith.constant dense<0.000000e+00> : vector<384x128xf32>
    %81 = tpu.matmul %78, %80, %cst_78 {dimension_numbers = #tpu.dot_dimension_numbers<[1], [0], [0], [1], [0, 0, 1, 1], [], []>} : vector<384x128xbf16>, vector<128x128xbf16>, vector<384x128xf32> -> vector<384x128xf32>
    %82 = arith.addf %77, %81 : vector<384x128xf32>
    %c8_79 = arith.constant 8 : index
    %c0_80 = arith.constant 0 : index
    %83 = vector.load %arg9[%c8_79, %c0_80] : memref<448x128xbf16, #tpu.memory_space<vmem>>, vector<384x128xbf16>
    %c0_81 = arith.constant 0 : index
    %c1_82 = arith.constant 1 : index
    %c0_83 = arith.constant 0 : index
    %c0_84 = arith.constant 0 : index
    %84 = vector.load %arg5[%c0_81, %c1_82, %c0_83, %c0_84] : memref<3x3x128x128xbf16, #tpu.memory_space<vmem>>, vector<1x1x128x128xbf16>
    %85 = vector.shape_cast %84 : vector<1x1x128x128xbf16> to vector<128x128xbf16>
    %cst_85 = arith.constant dense<0.000000e+00> : vector<384x128xf32>
    %86 = tpu.matmul %83, %85, %cst_85 {dimension_numbers = #tpu.dot_dimension_numbers<[1], [0], [0], [1], [0, 0, 1, 1], [], []>} : vector<384x128xbf16>, vector<128x128xbf16>, vector<384x128xf32> -> vector<384x128xf32>
    %87 = arith.addf %82, %86 : vector<384x128xf32>
    %c9_86 = arith.constant 9 : index
    %c0_87 = arith.constant 0 : index
    %88 = vector.load %arg9[%c9_86, %c0_87] : memref<448x128xbf16, #tpu.memory_space<vmem>>, vector<384x128xbf16>
    %c0_88 = arith.constant 0 : index
    %c2_89 = arith.constant 2 : index
    %c0_90 = arith.constant 0 : index
    %c0_91 = arith.constant 0 : index
    %89 = vector.load %arg5[%c0_88, %c2_89, %c0_90, %c0_91] : memref<3x3x128x128xbf16, #tpu.memory_space<vmem>>, vector<1x1x128x128xbf16>
    %90 = vector.shape_cast %89 : vector<1x1x128x128xbf16> to vector<128x128xbf16>
    %cst_92 = arith.constant dense<0.000000e+00> : vector<384x128xf32>
    %91 = tpu.matmul %88, %90, %cst_92 {dimension_numbers = #tpu.dot_dimension_numbers<[1], [0], [0], [1], [0, 0, 1, 1], [], []>} : vector<384x128xbf16>, vector<128x128xbf16>, vector<384x128xf32> -> vector<384x128xf32>
    %92 = arith.addf %87, %91 : vector<384x128xf32>
    %c31_93 = arith.constant 31 : index
    %c0_94 = arith.constant 0 : index
    %93 = vector.load %arg9[%c31_93, %c0_94] : memref<448x128xbf16, #tpu.memory_space<vmem>>, vector<384x128xbf16>
    %c1_95 = arith.constant 1 : index
    %c0_96 = arith.constant 0 : index
    %c0_97 = arith.constant 0 : index
    %c0_98 = arith.constant 0 : index
    %94 = vector.load %arg5[%c1_95, %c0_96, %c0_97, %c0_98] : memref<3x3x128x128xbf16, #tpu.memory_space<vmem>>, vector<1x1x128x128xbf16>
    %95 = vector.shape_cast %94 : vector<1x1x128x128xbf16> to vector<128x128xbf16>
    %cst_99 = arith.constant dense<0.000000e+00> : vector<384x128xf32>
    %96 = tpu.matmul %93, %95, %cst_99 {dimension_numbers = #tpu.dot_dimension_numbers<[1], [0], [0], [1], [0, 0, 1, 1], [], []>} : vector<384x128xbf16>, vector<128x128xbf16>, vector<384x128xf32> -> vector<384x128xf32>
    %97 = arith.addf %92, %96 : vector<384x128xf32>
    %c32_100 = arith.constant 32 : index
    %c0_101 = arith.constant 0 : index
    %98 = vector.load %arg9[%c32_100, %c0_101] : memref<448x128xbf16, #tpu.memory_space<vmem>>, vector<384x128xbf16>
    %c1_102 = arith.constant 1 : index
    %c1_103 = arith.constant 1 : index
    %c0_104 = arith.constant 0 : index
    %c0_105 = arith.constant 0 : index
    %99 = vector.load %arg5[%c1_102, %c1_103, %c0_104, %c0_105] : memref<3x3x128x128xbf16, #tpu.memory_space<vmem>>, vector<1x1x128x128xbf16>
    %100 = vector.shape_cast %99 : vector<1x1x128x128xbf16> to vector<128x128xbf16>
    %cst_106 = arith.constant dense<0.000000e+00> : vector<384x128xf32>
    %101 = tpu.matmul %98, %100, %cst_106 {dimension_numbers = #tpu.dot_dimension_numbers<[1], [0], [0], [1], [0, 0, 1, 1], [], []>} : vector<384x128xbf16>, vector<128x128xbf16>, vector<384x128xf32> -> vector<384x128xf32>
    %102 = arith.addf %97, %101 : vector<384x128xf32>
    %c33_107 = arith.constant 33 : index
    %c0_108 = arith.constant 0 : index
    %103 = vector.load %arg9[%c33_107, %c0_108] : memref<448x128xbf16, #tpu.memory_space<vmem>>, vector<384x128xbf16>
    %c1_109 = arith.constant 1 : index
    %c2_110 = arith.constant 2 : index
    %c0_111 = arith.constant 0 : index
    %c0_112 = arith.constant 0 : index
    %104 = vector.load %arg5[%c1_109, %c2_110, %c0_111, %c0_112] : memref<3x3x128x128xbf16, #tpu.memory_space<vmem>>, vector<1x1x128x128xbf16>
    %105 = vector.shape_cast %104 : vector<1x1x128x128xbf16> to vector<128x128xbf16>
    %cst_113 = arith.constant dense<0.000000e+00> : vector<384x128xf32>
    %106 = tpu.matmul %103, %105, %cst_113 {dimension_numbers = #tpu.dot_dimension_numbers<[1], [0], [0], [1], [0, 0, 1, 1], [], []>} : vector<384x128xbf16>, vector<128x128xbf16>, vector<384x128xf32> -> vector<384x128xf32>
    %107 = arith.addf %102, %106 : vector<384x128xf32>
    %c55_114 = arith.constant 55 : index
    %c0_115 = arith.constant 0 : index
    %108 = vector.load %arg9[%c55_114, %c0_115] : memref<448x128xbf16, #tpu.memory_space<vmem>>, vector<384x128xbf16>
    %c2_116 = arith.constant 2 : index
    %c0_117 = arith.constant 0 : index
    %c0_118 = arith.constant 0 : index
    %c0_119 = arith.constant 0 : index
    %109 = vector.load %arg5[%c2_116, %c0_117, %c0_118, %c0_119] : memref<3x3x128x128xbf16, #tpu.memory_space<vmem>>, vector<1x1x128x128xbf16>
    %110 = vector.shape_cast %109 : vector<1x1x128x128xbf16> to vector<128x128xbf16>
    %cst_120 = arith.constant dense<0.000000e+00> : vector<384x128xf32>
    %111 = tpu.matmul %108, %110, %cst_120 {dimension_numbers = #tpu.dot_dimension_numbers<[1], [0], [0], [1], [0, 0, 1, 1], [], []>} : vector<384x128xbf16>, vector<128x128xbf16>, vector<384x128xf32> -> vector<384x128xf32>
    %112 = arith.addf %107, %111 : vector<384x128xf32>
    %c56_121 = arith.constant 56 : index
    %c0_122 = arith.constant 0 : index
    %113 = vector.load %arg9[%c56_121, %c0_122] : memref<448x128xbf16, #tpu.memory_space<vmem>>, vector<384x128xbf16>
    %c2_123 = arith.constant 2 : index
    %c1_124 = arith.constant 1 : index
    %c0_125 = arith.constant 0 : index
    %c0_126 = arith.constant 0 : index
    %114 = vector.load %arg5[%c2_123, %c1_124, %c0_125, %c0_126] : memref<3x3x128x128xbf16, #tpu.memory_space<vmem>>, vector<1x1x128x128xbf16>
    %115 = vector.shape_cast %114 : vector<1x1x128x128xbf16> to vector<128x128xbf16>
    %cst_127 = arith.constant dense<0.000000e+00> : vector<384x128xf32>
    %116 = tpu.matmul %113, %115, %cst_127 {dimension_numbers = #tpu.dot_dimension_numbers<[1], [0], [0], [1], [0, 0, 1, 1], [], []>} : vector<384x128xbf16>, vector<128x128xbf16>, vector<384x128xf32> -> vector<384x128xf32>
    %117 = arith.addf %112, %116 : vector<384x128xf32>
    %c57_128 = arith.constant 57 : index
    %c0_129 = arith.constant 0 : index
    %118 = vector.load %arg9[%c57_128, %c0_129] : memref<448x128xbf16, #tpu.memory_space<vmem>>, vector<384x128xbf16>
    %c2_130 = arith.constant 2 : index
    %c2_131 = arith.constant 2 : index
    %c0_132 = arith.constant 0 : index
    %c0_133 = arith.constant 0 : index
    %119 = vector.load %arg5[%c2_130, %c2_131, %c0_132, %c0_133] : memref<3x3x128x128xbf16, #tpu.memory_space<vmem>>, vector<1x1x128x128xbf16>
    %120 = vector.shape_cast %119 : vector<1x1x128x128xbf16> to vector<128x128xbf16>
    %cst_134 = arith.constant dense<0.000000e+00> : vector<384x128xf32>
    %121 = tpu.matmul %118, %120, %cst_134 {dimension_numbers = #tpu.dot_dimension_numbers<[1], [0], [0], [1], [0, 0, 1, 1], [], []>} : vector<384x128xbf16>, vector<128x128xbf16>, vector<384x128xf32> -> vector<384x128xf32>
    %122 = arith.addf %117, %121 : vector<384x128xf32>
    %c0_135 = arith.constant 0 : index
    %c0_136 = arith.constant 0 : index
    %123 = vector.load %arg6[%c0_135, %c0_136] : memref<1x128xf32, #tpu.memory_space<vmem>>, vector<1x128xf32>
    %124 = vector.broadcast %123 : vector<1x128xf32> to vector<384x128xf32>
    %125 = arith.mulf %122, %124 : vector<384x128xf32>
    %c0_137 = arith.constant 0 : index
    %c0_138 = arith.constant 0 : index
    %126 = vector.load %arg7[%c0_137, %c0_138] : memref<1x128xf32, #tpu.memory_space<vmem>>, vector<1x128xf32>
    %127 = vector.broadcast %126 : vector<1x128xf32> to vector<384x128xf32>
    %128 = arith.addf %125, %127 : vector<384x128xf32>
    %cst_139 = arith.constant 0.000000e+00 : f32
    %129 = vector.broadcast %cst_139 : f32 to vector<384x128xf32>
    %130 = arith.maximumf %128, %129 : vector<384x128xf32>
    %131 = vector.shape_cast %130 : vector<384x128xf32> to vector<16x24x128xf32>
    %132 = vector.extract_strided_slice %131 {offsets = [0, 1, 0], sizes = [16, 16, 128], strides = [1, 1, 1]} : vector<16x24x128xf32> to vector<16x16x128xf32>
    %c0_140 = arith.constant 0 : index
    %c0_141 = arith.constant 0 : index
    %c0_142 = arith.constant 0 : index
    %c0_143 = arith.constant 0 : index
    %133 = vector.load %arg8[%c0_140, %c0_141, %c0_142, %c0_143] : memref<1x16x16x128xf32, #tpu.memory_space<vmem>>, vector<1x16x16x128xf32>
    %134 = vector.shape_cast %133 : vector<1x16x16x128xf32> to vector<16x16x128xf32>
    %135 = vector.shape_cast %132 : vector<16x16x128xf32> to vector<1x16x16x128xf32>
    tpu.vector_store %arg8[%c0_140, %c0_141, %c0_142, %c0_143], %135 {strides = array<i32>} : memref<1x16x16x128xf32, #tpu.memory_space<vmem>>, vector<1x16x16x128xf32>,
    return
  }
  func.func @transform_0(%arg0: i32) -> (i32, i32, i32) {
    %c0_i32 = arith.constant 0 : i32
    %c0_i32_0 = arith.constant 0 : i32
    %c0_i32_1 = arith.constant 0 : i32
    return %arg0, %c0_i32, %c0_i32_0 : i32, i32, i32
  }
  func.func @transform_1(%arg0: i32) -> (i32, i32, i32, i32) {
    %c0_i32 = arith.constant 0 : i32
    %c0_i32_0 = arith.constant 0 : i32
    %c0_i32_1 = arith.constant 0 : i32
    %c0_i32_2 = arith.constant 0 : i32
    %c0_i32_3 = arith.constant 0 : i32
    return %c0_i32, %c0_i32_0, %c0_i32_1, %c0_i32_2 : i32, i32, i32, i32
  }
  func.func @transform_2(%arg0: i32) -> (i32, i32) {
    %c0_i32 = arith.constant 0 : i32
    %c0_i32_0 = arith.constant 0 : i32
    %c0_i32_1 = arith.constant 0 : i32
    return %c0_i32, %c0_i32_0 : i32, i32
  }
  func.func @transform_3(%arg0: i32) -> (i32, i32) {
    %c0_i32 = arith.constant 0 : i32
    %c0_i32_0 = arith.constant 0 : i32
    %c0_i32_1 = arith.constant 0 : i32
    return %c0_i32, %c0_i32_0 : i32, i32
  }
  func.func @transform_4(%arg0: i32) -> (i32, i32, i32, i32) {
    %c0_i32 = arith.constant 0 : i32
    %c0_i32_0 = arith.constant 0 : i32
    %c0_i32_1 = arith.constant 0 : i32
    %c0_i32_2 = arith.constant 0 : i32
    %c0_i32_3 = arith.constant 0 : i32
    return %c0_i32, %c0_i32_0, %c0_i32_1, %c0_i32_2 : i32, i32, i32, i32
  }
  func.func @transform_5(%arg0: i32) -> (i32, i32) {
    %c0_i32 = arith.constant 0 : i32
    %c0_i32_0 = arith.constant 0 : i32
    %c0_i32_1 = arith.constant 0 : i32
    return %c0_i32, %c0_i32_0 : i32, i32
  }
  func.func @transform_6(%arg0: i32) -> (i32, i32) {
    %c0_i32 = arith.constant 0 : i32
    %c0_i32_0 = arith.constant 0 : i32
    %c0_i32_1 = arith.constant 0 : i32
    return %c0_i32, %c0_i32_0 : i32, i32
  }
  func.func @transform_7(%arg0: i32) -> (i32, i32, i32, i32) {
    %c0_i32 = arith.constant 0 : i32
    %c0_i32_0 = arith.constant 0 : i32
    %c0_i32_1 = arith.constant 0 : i32
    %c0_i32_2 = arith.constant 0 : i32
    return %arg0, %c0_i32, %c0_i32_0, %c0_i32_1 : i32, i32, i32, i32
  }
}

</mosaic_0001>

<bundles_post_ra>
// kernel: conv_block_nested_forward.1
= control target key start
LH: loop header
LB: loop body
LE: loop exit
PB: predicated region body
PF: predicated region fallthrough
CT: control target
= control target key end

     0   :  { %s13809_s24 = smov 0   ;;  %s16667_s0 = inlined_call_operand.vmem [shape: bf16[2,448,128], index: 0, kind: input, shape index: {}]   ;;  %s16668_s1 = inlined_call_operand.vmem [shape: bf16[3,3,128,128], index: 1, kind: input, shape index: {}]   ;;  %s16669_s2 = inlined_call_operand.vmem [shape: f32[1,128], index: 2, kind: input, shape index: {}]   ;;  %s16670_s3 = inlined_call_operand.vmem [shape: f32[1,128], index: 3, kind: input, shape index: {}]   ;;  %s16671_s4 = inlined_call_operand.vmem [shape: bf16[3,3,128,128], index: 4, kind: input, shape index: {}]   ;;  %s16672_s5 = inlined_call_operand.vmem [shape: f32[1,128], index: 5, kind: input, shape index: {}]   ;;  %s16673_s6 = inlined_call_operand.vmem [shape: f32[1,128], index: 6, kind: input, shape index: {}]   ;;  %s16674_s7 = inlined_call_operand.vmem [shape: f32[2,16,16,128], index: 7, kind: output, shape index: {}]  }
   0x1 LB: > { %s10224_s25 = sadd.s32 4294967295, %s13766_s24   ;;  %p10228_p0 = scmp.ge.s32.totalorder %s13766_s24, 1  ;;  %s13766_s24 = sphi %s13809_s24, %s17_s24  }
   0x2   : > { %p237_p1 = scmp.lt.s32.totalorder %s13766_s24, 3 }
   0x4   : > { %p238_p2 = pnand %p10228_p0, %p237_p1 }
   0x6   : > { %241 = sbr.rel (%p238_p2) target bundleno = 2049 (0x801), region = 48 }
   0xb   : > { %v11658_v0 = vld [vmem:[%s16668_s1 + $0x78] sm:$0xff]  ;;  %p269_p3 = scmp.lt.s32.totalorder %s10224_s25, 1  ;;  %v11657_v2 = vld [vmem:[%s16668_s1 + $0x70] sm:$0xff]  ;;  %v11656_v4 = vld [vmem:[%s16668_s1 + $0x68] sm:$0xff]  ;;  %vm710_vm0 = vsmask.f32 4352 }
   0xc   : > { %v11650_v1 = vld [vmem:[%s16668_s1 + $0x38] sm:$0xff]  ;;  %554 = vmatpush.bf16.msra.mxu0 %v11658_v0  ;;  %13541 = vmatpush.bf16.msra.mxu2 %v11658_v0  ;;  %v11649_v3 = vld [vmem:[%s16668_s1 + $0x30] sm:$0xff]  ;;  %v11648_v5 = vld [vmem:[%s16668_s1 + $0x28] sm:$0xff]  ;;  %vm1325_vm1 = vsmask.f32 7424 }
   0xd   : > { %s16826_s25 = smov (!%p269_p3, %s10224_s25), 1  ;;  %13549 = vmatpush.bf16.msra.mxu3 %v11650_v1  ;;  %1007 = vmatpush.bf16.msra.mxu1 %v11650_v1  ;;  %v11655_v8 = vld [vmem:[%s16668_s1 + $0x60] sm:$0xff]  ;;  %v11654_v12 = vld [vmem:[%s16668_s1 + $0x58] sm:$0xff]  ;;  %v11653_v18 = vld [vmem:[%s16668_s1 + $0x50] sm:$0xff] }
   0xe   : > { %s13739_s11 = smul.u32 224, %s16826_s25  ;;  %v11647_v9 = vld [vmem:[%s16668_s1 + $0x20] sm:$0xff]  ;;  %v11646_v13 = vld [vmem:[%s16668_s1 + $0x18] sm:$0xff]  ;;  %v11645_v23 = vld [vmem:[%s16668_s1 + $0x10] sm:$0xff]  ;;  %s11642_s29 = sshll.u32 %s16826_s25, 8 }
   0xf   : > { %v11652_v28 = vld [vmem:[%s16668_s1 + $0x48] sm:$0xff]  ;;  %v11651_v39 = vld [vmem:[%s16668_s1 + $0x40] sm:$0xff]  ;;  %v11690_v45 = vld [vmem:[%s16668_s1 + $0xb8] sm:$0xff]  ;;  %s16313_s9 = scalar_lea.vmem %s16674_s7, %s11642_s29 }
  0x10   : > { %555 = vmatpush.bf16.msra.mxu0 %v11657_v2  ;;  %13542 = vmatpush.bf16.msra.mxu2 %v11657_v2  ;;  %s13838_s16 = scalar_lea.vmem %s16667_s0, %s13739_s11  ;;  %v11644_v33 = vld [vmem:[%s16668_s1 + $0x8] sm:$0xff]  ;;  %v11643_v41 = vld [vmem:[%s16668_s1] sm:$0xff]  ;;  %v11698_v46 = vld [vmem:[%s16668_s1 + $0xf8] sm:$0xff] }
  0x11   : > { %13550 = vmatpush.bf16.msra.mxu3 %v11649_v3  ;;  %1008 = vmatpush.bf16.msra.mxu1 %v11649_v3  ;;  %v280_v6 = vld [vmem:[%s13838_s16] sm:$0x8]  ;;  %v281_v7 = vld [vmem:[%s13838_s16 + $0x4] sm:$0xf]  ;;  %v12611_v14 = vld [vmem:[%s13838_s16 + $0x8] sm:$0xff]  }
  0x12   : > { %v410_v10 = vunpack.c.l.b16 %v281_v7  ;;  %v684_v11 = vunpack.c.l.b16 %v280_v6  ;;  %v12622_v16 = vld [vmem:[%s13838_s16 + $0x60] sm:$0xff]   ;;  %v12623_v17 = vld [vmem:[%s13838_s16 + $0x68] sm:$0xff]   ;;  %v720_v22 = vshrl.u32 %v12611_v14, 16  ;;  %v723_v27 = vshll.u32 %v12611_v14, 16  ;;  %v11706_v51 = vld [vmem:[%s16668_s1 + $0x138] sm:$0xff] }
  0x13   : > { %v819_v19 = vshrl.u32 %v12622_v16, 16  ;;  %v822_v20 = vshll.u32 %v12622_v16, 16  ;;  %v828_v21 = vshrl.u32 %v12623_v17, 16  ;;  %v831_v24 = vshll.u32 %v12623_v17, 16  ;;  %v13581_v48 = vld [vmem:[%s13838_s16 + $0x64] sm:$0xff]   ;;  %v12624_v52 = vld [vmem:[%s13838_s16 + $0x70] sm:$0xff]  }
  0x14   : > { %556 = vmatpush.bf16.msra.mxu0 %v11656_v4  ;;  %13543 = vmatpush.bf16.msra.mxu2 %v11656_v4  ;;  %v685_v15 = vpack.c.b16 %v410_v10, %v684_v11  ;;  %v722_v32 = vrot.slane %v720_v22, 3  ;;  %v725_v37 = vrot.slane %v723_v27, 4  ;;  %v11933_v38 = vunpack.c.l.b16 %v12611_v14  ;;  %v13895_v53 = vld [vmem:[%s13838_s16 + $0x10] sm:$0xff]   ;;  %v12625_v7 = vld [vmem:[%s13838_s16 + $0x78] sm:$0xff]   ;;  %v11704_v11 = vld [vmem:[%s16668_s1 + $0x128] sm:$0xff] }
  0x15   : > { %13551 = vmatpush.bf16.msra.mxu3 %v11648_v5  ;;  %1009 = vmatpush.bf16.msra.mxu1 %v11648_v5  ;;  %v821_v29 = vrot.slane %v819_v19, 3  ;;  %v824_v30 = vrot.slane %v822_v20, 4  ;;  %v830_v31 = vrot.slane %v828_v21, 3  ;;  %v833_v34 = vrot.slane %v831_v24, 4  ;;  %v11689_v54 = vld [vmem:[%s16668_s1 + $0xb0] sm:$0xff]  ;;  %v13933_v27 = vld [vmem:[%s13838_s16 + $0x20] sm:$0xff]  }
  0x16   : > { %v712_v25 = vshrl.u32 %v685_v15, 16  ;;  %v715_v26 = vshll.u32 %v685_v15, 16  ;;  %v726_v44 = vor.u32 %v725_v37, %v722_v32  ;;  %v458_v47 = vpack.c.b16 %v11933_v38, %v410_v10  ;;  %v11697_v55 = vld [vmem:[%s16668_s1 + $0xf0] sm:$0xff]  ;;  %v11696_v10 = vld [vmem:[%s16668_s1 + $0xe8] sm:$0xff] }
  0x17   : > { %v13875_v40 = vor.u32 %v824_v30, %v821_v29  ;;  %v834_v42 = vor.u32 %v833_v34, %v830_v31  ;;  %v837_v56 = vshrl.u32 %v12624_v52, 16  ;;  %v840_v57 = vshll.u32 %v12624_v52, 16  ;;  %v11705_v60 = vld [vmem:[%s16668_s1 + $0x130] sm:$0xff]  ;;  %v11695_v29 = vld [vmem:[%s16668_s1 + $0xe0] sm:$0xff] }
  0x18   : > { %557 = vmatpush.bf16.msra.mxu0 %v11655_v8  ;;  %13544 = vmatpush.bf16.msra.mxu2 %v11655_v8  ;;  %v714_v35 = vrot.slane %v712_v25, 3  ;;  %v717_v36 = vrot.slane %v715_v26, 4  ;;  %v729_v58 = vshrl.u32 %v13895_v53, 16  ;;  %v732_v59 = vshll.u32 %v13895_v53, 16  ;;  %v13559_v3 = vld [vmem:[%s13838_s16 + $0xc] sm:$0xff]   ;;  %v13914_v8 = vld [vmem:[%s13838_s16 + $0x18] sm:$0xff]  }
  0x19   : > { %13552 = vmatpush.bf16.msra.mxu3 %v11647_v9  ;;  %1010 = vmatpush.bf16.msra.mxu1 %v11647_v9  ;;  %v835_v49 = vsel %vm710_vm0, %v13875_v40, %v834_v42  ;;  %v839_v61 = vrot.slane %v837_v56, 3  ;;  %v842_v62 = vrot.slane %v840_v57, 4  ;;  %v13583_v4 = vld [vmem:[%s13838_s16 + $0x6c] sm:$0xff]   ;;  %v738_v14 = vshrl.u32 %v13914_v8, 16  ;;  %v13561_v22 = vld [vmem:[%s13838_s16 + $0x14] sm:$0xff]   ;;  %v12626_v26 = vld [vmem:[%s13838_s16 + $0x80] sm:$0xff]  }
  0x1a   : > { %v718_v43 = vor.u32 %v717_v36, %v714_v35  ;;  %v731_v63 = vrot.slane %v729_v58, 3  ;;  %v734_v0 = vrot.slane %v732_v59, 4  ;;  %v11688_v9 = vld [vmem:[%s16668_s1 + $0xa8] sm:$0xff]  ;;  %v741_v15 = vshll.u32 %v13914_v8, 16 }
  0x1b   : > { %v843_v1 = vor.u32 %v842_v62, %v839_v61  ;;  %v855_v30 = vshrl.u32 %v12626_v26, 16  ;;  %v858_v31 = vshll.u32 %v12626_v26, 16  ;;  %v747_v32 = vshrl.u32 %v13933_v27, 16  ;;  %v13565_v59 = vld [vmem:[%s13838_s16 + $0x24] sm:$0xff]  }
  0x1c   : > { %558 = vmatpush.bf16.msra.mxu0 %v11654_v12  ;;  %13545 = vmatpush.bf16.msra.mxu2 %v11654_v12  ;;  %v727_v50 = vsel %vm710_vm0, %v718_v43, %v726_v44  ;;  %v735_v2 = vor.u32 %v734_v0, %v731_v63  ;;  %v846_v12 = vshrl.u32 %v12625_v7, 16  ;;  %v743_v19 = vrot.slane %v741_v15, 4  ;;  %v12628_v63 = vld [vmem:[%s13838_s16 + $0x90] sm:$0xff]  }
  0x1d   : > { %13553 = vmatpush.bf16.msra.mxu3 %v11646_v13  ;;  %1011 = vmatpush.bf16.msra.mxu1 %v11646_v13  ;;  %v844_v5 = vsel %vm710_vm0, %v834_v42, %v843_v1  ;;  %v849_v13 = vshll.u32 %v12625_v7, 16  ;;  %v857_v34 = vrot.slane %v855_v30, 3  ;;  %v860_v35 = vrot.slane %v858_v31, 4  ;;  %v13587_v42 = vld [vmem:[%s13838_s16 + $0x7c] sm:$0xff]   ;;  %v13962_v0 = vld [vmem:[%s13838_s16 + $0x30] sm:$0xff]  }
  0x1e   : > { %v736_v6 = vsel %vm710_vm0, %v726_v44, %v735_v2  ;;  %v848_v16 = vrot.slane %v846_v12, 3  ;;  %v749_v36 = vrot.slane %v747_v32, 3  ;;  %v768_v7 = vshll.u32 %v13962_v0, 16  ;;  %v13567_v15 = vld [vmem:[%s13838_s16 + $0x2c] sm:$0xff]  }
  0x1f   : > { %v851_v17 = vrot.slane %v849_v13, 4  ;;  %v861_v38 = vor.u32 %v860_v35, %v857_v34  ;;  %v13569_v34 = vld [vmem:[%s13838_s16 + $0x34] sm:$0xff]  }
  0x20   : > { %559 = vmatpush.bf16.msra.mxu0 %v11653_v18  ;;  %13546 = vmatpush.bf16.msra.mxu2 %v11653_v18  ;;  %v740_v18 = vrot.slane %v738_v14, 3  ;;  %v770_v12 = vrot.slane %v768_v7, 4  ;;  %v13593_v35 = vld [vmem:[%s13838_s16 + $0x94] sm:$0xff]  }
  0x21   : > { %13554 = vmatpush.bf16.msra.mxu3 %v11645_v23  ;;  %1012 = vmatpush.bf16.msra.mxu1 %v11645_v23  ;;  %v852_v20 = vor.u32 %v851_v17, %v848_v16  ;;  %v13585_v23 = vld [vmem:[%s13838_s16 + $0x74] sm:$0xff]   ;;  %v13591_v16 = vld [vmem:[%s13838_s16 + $0x8c] sm:$0xff]  }
  0x22   : > { %v744_v21 = vor.u32 %v743_v19, %v740_v18  ;;  %v12629_v19 = vld [vmem:[%s13838_s16 + $0x98] sm:$0xff]  }
  0x23   : > { %v853_v24 = vsel %vm710_vm0, %v843_v1, %v852_v20  ;;  %v862_v43 = vsel %vm710_vm0, %v852_v20, %v861_v38  ;;  %v11686_v1 = vld [vmem:[%s16668_s1 + $0x98] sm:$0xff] }
  0x24   : > { %560 = vmatpush.bf16.msra.mxu0 %v11652_v28  ;;  %13547 = vmatpush.bf16.msra.mxu2 %v11652_v28  ;;  %v745_v25 = vsel %vm710_vm0, %v735_v2, %v744_v21  ;;  %v11687_v28 = vld [vmem:[%s16668_s1 + $0xa0] sm:$0xff]  ;;  %v11694_v2 = vld [vmem:[%s16668_s1 + $0xd8] sm:$0xff] }
  0x25   : > { %13555 = vmatpush.bf16.msra.mxu3 %v11644_v33  ;;  %1013 = vmatpush.bf16.msra.mxu1 %v11644_v33  ;;  %v750_v33 = vshll.u32 %v13933_v27, 16  ;;  %v12617_v20 = vld [vmem:[%s13838_s16 + $0x38] sm:$0xff]  }
  0x26   : > { %v777_v26 = vshll.u32 %v12617_v20, 16  ;;  %v11738_v7 = vld [vmem:[%s16668_s1 + $0x178] sm:$0xff] }
  0x27   : > { %v752_v37 = vrot.slane %v750_v33, 4 }
  0x28   : > { %561 = vmatpush.bf16.msra.mxu0 %v11651_v39  ;;  %13548 = vmatpush.bf16.msra.mxu2 %v11651_v39  ;;  %v779_v31 = vrot.slane %v777_v26, 4 }
  0x29   : > { %13556 = vmatpush.bf16.msra.mxu3 %v11643_v41  ;;  %1014 = vmatpush.bf16.msra.mxu1 %v11643_v41  ;;  %v753_v39 = vor.u32 %v752_v37, %v749_v36  ;;  %v13563_v41 = vld [vmem:[%s13838_s16 + $0x1c] sm:$0xff]  }
  0x2b   : > { %562 = vmatmul.bf16.vlgmr.msra.gmra.mxu0 %v458_v47  ;;  %622 = vmatmul.bf16.vlgmr.msra.gmra.mxu2 %v13581_v48  ;;  %v754_v44 = vsel %vm710_vm0, %v744_v21, %v753_v39  ;;  %v11703_v47 = vld [vmem:[%s16668_s1 + $0x120] sm:$0xff]  ;;  %v11685_v21 = vld [vmem:[%s16668_s1 + $0x90] sm:$0xff] }
  0x2c   : > { %1594 = vmatpush.bf16.msrb.mxu2 %v11690_v45  ;;  %1075 = vmatmul.bf16.vlgmr.msra.gmra.mxu3 %v835_v49  ;;  %v12627_v45 = vld [vmem:[%s13838_s16 + $0x88] sm:$0xff]  }
  0x2d   : > { %2256 = vmatpush.bf16.msrb.mxu3 %v11698_v46  ;;  %1015 = vmatmul.bf16.vlgmr.msra.gmra.mxu1 %v727_v50  ;;  %v13949_v46 = vld [vmem:[%s13838_s16 + $0x28] sm:$0xff]   ;;  %v864_v48 = vshrl.u32 %v12627_v45, 16  ;;  %v867_v49 = vshll.u32 %v12627_v45, 16 }
  0x2e   : > { %2546 = vmatpush.bf16.msrb.mxu0 %v11706_v51  ;;  %v756_v50 = vshrl.u32 %v13949_v46, 16  ;;  %v759_v51 = vshll.u32 %v13949_v46, 16  ;;  %3180 = vmatpush.bf16.msrb.mxu1 %v11738_v7 }
  0x2f   : > { %v866_v52 = vrot.slane %v864_v48, 3 }
  0x30   : > { %1595 = vmatpush.bf16.msrb.mxu2 %v11689_v54  ;;  %v869_v54 = vrot.slane %v867_v49, 4  ;;  %v761_v56 = vrot.slane %v759_v51, 4 }
  0x31   : > { %2257 = vmatpush.bf16.msrb.mxu3 %v11697_v55  ;;  %v758_v55 = vrot.slane %v756_v50, 3 }
  0x32   : > { %2547 = vmatpush.bf16.msrb.mxu0 %v11705_v60  ;;  %v870_v57 = vor.u32 %v869_v54, %v866_v52  ;;  %v13589_v60 = vld [vmem:[%s13838_s16 + $0x84] sm:$0xff]   ;;  %v13571_v54 = vld [vmem:[%s13838_s16 + $0x3c] sm:$0xff]  }
  0x33   : > { %v762_v58 = vor.u32 %v761_v56, %v758_v55  ;;  %v13595_v55 = vld [vmem:[%s13838_s16 + $0x9c] sm:$0xff]  }
  0x34   : > { %1596 = vmatpush.bf16.msrb.mxu2 %v11688_v9  ;;  %v871_v61 = vsel %vm710_vm0, %v861_v38, %v870_v57  ;;  %v12630_v38 = vld [vmem:[%s13838_s16 + $0xa0] sm:$0xff]  }
  0x35   : > { %2258 = vmatpush.bf16.msrb.mxu3 %v11696_v10  ;;  %v763_v62 = vsel %vm710_vm0, %v753_v39, %v762_v58  ;;  %v12618_v39 = vld [vmem:[%s13838_s16 + $0x40] sm:$0xff]  }
  0x36   : > { %2548 = vmatpush.bf16.msrb.mxu0 %v11704_v11  ;;  %v786_v45 = vshll.u32 %v12618_v39, 16 }
  0x38   : > { %1597 = vmatpush.bf16.msrb.mxu2 %v11687_v28  ;;  %v788_v50 = vrot.slane %v786_v45, 4 }
  0x39   : > { %2259 = vmatpush.bf16.msrb.mxu3 %v11695_v29 }
  0x3a   : > { %2549 = vmatpush.bf16.msrb.mxu0 %v11703_v47 }
  0x3b   : > { %567 = vmatmul.bf16.gmra.mxu0 %v13559_v3  ;;  %627 = vmatmul.bf16.gmra.mxu2 %v13583_v4  ;;  %v11702_v3 = vld [vmem:[%s16668_s1 + $0x118] sm:$0xff]  ;;  %v873_v4 = vshrl.u32 %v12628_v63, 16 }
  0x3c   : > { %1080 = vmatmul.bf16.gmra.mxu3 %v844_v5  ;;  %v876_v5 = vshll.u32 %v12628_v63, 16  ;;  %1598 = vmatpush.bf16.msrb.mxu2 %v11686_v1 }
  0x3d   : > { %1020 = vmatmul.bf16.gmra.mxu1 %v736_v6  ;;  %v765_v6 = vshrl.u32 %v13962_v0, 16  ;;  %2260 = vmatpush.bf16.msrb.mxu3 %v11694_v2  ;;  %v875_v9 = vrot.slane %v873_v4, 3 }
  0x3e   : > { %2550 = vmatpush.bf16.msrb.mxu0 %v11702_v3  ;;  %v878_v10 = vrot.slane %v876_v5, 4 }
  0x3f   : > { %v767_v11 = vrot.slane %v765_v6, 3 }
  0x40   : > { %v879_v13 = vor.u32 %v878_v10, %v875_v9  ;;  %1599 = vmatpush.bf16.msrb.mxu2 %v11685_v21  ;;  %v11700_v9 = vld [vmem:[%s16668_s1 + $0x108] sm:$0xff] }
  0x41   : > { %v771_v14 = vor.u32 %v770_v12, %v767_v11  ;;  %v13573_v12 = vld [vmem:[%s13838_s16 + $0x44] sm:$0xff]  }
  0x42   : > { %v880_v17 = vsel %vm710_vm0, %v870_v57, %v879_v13 }
  0x43   : > { %v772_v18 = vsel %vm710_vm0, %v762_v58, %v771_v14  ;;  %v12631_v58 = vld [vmem:[%s13838_s16 + $0xa8] sm:$0xff]  }
  0x44   : > { %v903_v63 = vshll.u32 %v12631_v58, 16 }
  0x46   : > { %v905_v4 = vrot.slane %v903_v63, 4  ;;  %v11736_v63 = vld [vmem:[%s16668_s1 + $0x168] sm:$0xff] }
  0x4b   : > { %572 = vmatmul.bf16.gmra.mxu0 %v13561_v22  ;;  %632 = vmatmul.bf16.gmra.mxu2 %v13585_v23  ;;  %v11693_v22 = vld [vmem:[%s16668_s1 + $0xd0] sm:$0xff]  ;;  %v882_v23 = vshrl.u32 %v12629_v19, 16 }
  0x4c   : > { %1085 = vmatmul.bf16.gmra.mxu3 %v853_v24  ;;  %v885_v24 = vshll.u32 %v12629_v19, 16  ;;  %v12632_v19 = vld [vmem:[%s13838_s16 + $0xb0] sm:$0xff]  }
  0x4d   : > { %1025 = vmatmul.bf16.gmra.mxu1 %v745_v25  ;;  %v774_v25 = vshrl.u32 %v12617_v20, 16  ;;  %2261 = vmatpush.bf16.msrb.mxu3 %v11693_v22  ;;  %v884_v28 = vrot.slane %v882_v23, 3  ;;  %v12620_v20 = vld [vmem:[%s13838_s16 + $0x50] sm:$0xff]   ;;  %v909_v21 = vshrl.u32 %v12632_v19, 16  ;;  %v912_v22 = vshll.u32 %v12632_v19, 16 }
  0x4e   : > { %v887_v29 = vrot.slane %v885_v24, 4  ;;  %v801_v23 = vshrl.u32 %v12620_v20, 16  ;;  %v804_v24 = vshll.u32 %v12620_v20, 16  ;;  %v13600_v19 = vld [vmem:[%s13838_s16 + $0xb4] sm:$0xff]  }
  0x4f   : > { %v776_v30 = vrot.slane %v774_v25, 3  ;;  %v11734_v20 = vld [vmem:[%s16668_s1 + $0x158] sm:$0xff] }
  0x50   : > { %v888_v32 = vor.u32 %v887_v29, %v884_v28 }
  0x51   : > { %v780_v33 = vor.u32 %v779_v31, %v776_v30  ;;  %v911_v31 = vrot.slane %v909_v21, 3 }
  0x52   : > { %v889_v36 = vsel %vm710_vm0, %v879_v13, %v888_v32  ;;  %v13597_v13 = vld [vmem:[%s13838_s16 + $0xa4] sm:$0xff]  }
  0x53   : > { %v781_v37 = vsel %vm710_vm0, %v771_v14, %v780_v33 }
  0x5b   : > { %577 = vmatmul.bf16.gmra.mxu0 %v13563_v41  ;;  %637 = vmatmul.bf16.gmra.mxu2 %v13587_v42  ;;  %v11701_v41 = vld [vmem:[%s16668_s1 + $0x110] sm:$0xff]  ;;  %v891_v42 = vshrl.u32 %v12630_v38, 16 }
  0x5c   : > { %1090 = vmatmul.bf16.gmra.mxu3 %v862_v43  ;;  %v894_v43 = vshll.u32 %v12630_v38, 16  ;;  %2551 = vmatpush.bf16.msrb.mxu0 %v11701_v41 }
  0x5d   : > { %1030 = vmatmul.bf16.gmra.mxu1 %v754_v44  ;;  %v783_v44 = vshrl.u32 %v12618_v39, 16  ;;  %v893_v47 = vrot.slane %v891_v42, 3 }
  0x5e   : > { %v896_v48 = vrot.slane %v894_v43, 4  ;;  %v13575_v43 = vld [vmem:[%s13838_s16 + $0x4c] sm:$0xff]  }
  0x5f   : > { %v785_v49 = vrot.slane %v783_v44, 3  ;;  %v13599_v44 = vld [vmem:[%s13838_s16 + $0xac] sm:$0xff]  }
  0x60   : > { %v897_v51 = vor.u32 %v896_v48, %v893_v47  ;;  %2552 = vmatpush.bf16.msrb.mxu0 %v11700_v9 }
  0x61   : > { %v789_v52 = vor.u32 %v788_v50, %v785_v49 }
  0x62   : > { %v898_v56 = vsel %vm710_vm0, %v888_v32, %v897_v51  ;;  %v914_v32 = vrot.slane %v912_v22, 4 }
  0x63   : > { %v790_v57 = vsel %vm710_vm0, %v780_v33, %v789_v52  ;;  %v803_v33 = vrot.slane %v801_v23, 3 }
  0x64   : > { %v915_v38 = vor.u32 %v914_v32, %v911_v31  ;;  %v11746_v31 = vld [vmem:[%s16668_s1 + $0x1b8] sm:$0xff] }
  0x65   : > { %v11754_v32 = vld [vmem:[%s16668_s1 + $0x1f8] sm:$0xff] }
  0x6b   : > { %582 = vmatmul.bf16.gmra.mxu0 %v13565_v59  ;;  %642 = vmatmul.bf16.gmra.mxu2 %v13589_v60  ;;  %v12619_v59 = vld [vmem:[%s13838_s16 + $0x48] sm:$0xff]  }
  0x6c   : > { %1095 = vmatmul.bf16.gmra.mxu3 %v871_v61  ;;  %v11684_v60 = vld [vmem:[%s16668_s1 + $0x88] sm:$0xff]  ;;  %v792_v1 = vshrl.u32 %v12619_v59, 16  ;;  %v795_v2 = vshll.u32 %v12619_v59, 16 }
  0x6d   : > { %1035 = vmatmul.bf16.gmra.mxu1 %v763_v62  ;;  %v11692_v61 = vld [vmem:[%s16668_s1 + $0xc8] sm:$0xff]  ;;  %v900_v62 = vshrl.u32 %v12631_v58, 16  ;;  %1600 = vmatpush.bf16.msrb.mxu2 %v11684_v60 }
  0x6e   : > { %2262 = vmatpush.bf16.msrb.mxu3 %v11692_v61  ;;  %v794_v5 = vrot.slane %v792_v1, 3  ;;  %v797_v6 = vrot.slane %v795_v2, 4 }
  0x6f   : > { %v902_v3 = vrot.slane %v900_v62, 3 }
  0x70   : > { %v798_v11 = vor.u32 %v797_v6, %v794_v5 }
  0x71   : > { %v906_v10 = vor.u32 %v905_v4, %v902_v3 }
  0x73   : > { %v916_v49 = vsel %vm710_vm0, %v906_v10, %v915_v38 }
  0x7b   : > { %587 = vmatmul.bf16.gmra.mxu0 %v13567_v15  ;;  %647 = vmatmul.bf16.gmra.mxu2 %v13591_v16  ;;  %v907_v16 = vsel %vm710_vm0, %v897_v51, %v906_v10  ;;  %v328_v10 = vld [vmem:[%s13838_s16 + $0xc0] sm:$0xf] }
  0x7c   : > { %1100 = vmatmul.bf16.gmra.mxu3 %v880_v17  ;;  %v799_v17 = vsel %vm710_vm0, %v789_v52, %v798_v11  ;;  %v14041_v52 = vld [vmem:[%s13838_s16 + $0xb8] sm:$0xff]  }
  0x7d   : > { %1040 = vmatmul.bf16.gmra.mxu1 %v772_v18  ;;  %v921_v58 = vshll.u32 %v14041_v52, 16 }
  0x7f   : > { %v923_v5 = vrot.slane %v921_v58, 4 }
  0x8b   : > { %592 = vmatmul.bf16.gmra.mxu0 %v13569_v34  ;;  %652 = vmatmul.bf16.gmra.mxu2 %v13593_v35  ;;  %v806_v34 = vrot.slane %v804_v24, 4 }
  0x8c   : > { %1105 = vmatmul.bf16.gmra.mxu3 %v889_v36  ;;  %v11683_v36 = vld [vmem:[%s16668_s1 + $0x80] sm:$0xff] }
  0x8d   : > { %1045 = vmatmul.bf16.gmra.mxu1 %v781_v37  ;;  %v11691_v37 = vld [vmem:[%s16668_s1 + $0xc0] sm:$0xff]  ;;  %1601 = vmatpush.bf16.msrb.mxu2 %v11683_v36  ;;  %v807_v39 = vor.u32 %v806_v34, %v803_v33 }
  0x8e   : > { %2263 = vmatpush.bf16.msrb.mxu3 %v11691_v37 }
  0x8f   : > { %v808_v50 = vsel %vm710_vm0, %v798_v11, %v807_v39  ;;  %v11735_v11 = vld [vmem:[%s16668_s1 + $0x160] sm:$0xff] }
  0x91   : > { %3842 = vmatpush.bf16.msra.mxu2 %v11746_v31 }
  0x92   : > { %4132 = vmatpush.bf16.msra.mxu3 %v11754_v32 }
  0x9b   : > { %597 = vmatmul.bf16.gmra.mxu0 %v13571_v54  ;;  %657 = vmatmul.bf16.gmra.mxu2 %v13595_v55  ;;  %v12621_v54 = vld [vmem:[%s13838_s16 + $0x58] sm:$0xff]   ;;  %v11737_v55 = vld [vmem:[%s16668_s1 + $0x170] sm:$0xff] }
  0x9c   : > { %1110 = vmatmul.bf16.gmra.mxu3 %v898_v56  ;;  %v11699_v56 = vld [vmem:[%s16668_s1 + $0x100] sm:$0xff]  ;;  %v810_v59 = vshrl.u32 %v12621_v54, 16  ;;  %v813_v60 = vshll.u32 %v12621_v54, 16  ;;  %3181 = vmatpush.bf16.msrb.mxu1 %v11737_v55  ;;  %v13107_v55 = vld [vmem:[%s13838_s16 + $0xc] sm:$0x8] }
  0x9d   : > { %1050 = vmatmul.bf16.gmra.mxu1 %v790_v57  ;;  %v918_v57 = vshrl.u32 %v14041_v52, 16  ;;  %2553 = vmatpush.bf16.msrb.mxu0 %v11699_v56  ;;  %v13602_v56 = vld [vmem:[%s13838_s16 + $0xc] sm:$0xf0]  }
  0x9e   : > { %v812_v6 = vrot.slane %v810_v59, 3  ;;  %v815_v7 = vrot.slane %v813_v60, 4  ;;  %v13579_v59 = vld [vmem:[%s13838_s16 + $0x5c] sm:$0xff]  }
  0x9f   : > { %v920_v4 = vrot.slane %v918_v57, 3 }
  0xa0   : > { %3182 = vmatpush.bf16.msrb.mxu1 %v11736_v63 }
  0xa4   : > { %3183 = vmatpush.bf16.msrb.mxu1 %v11735_v11 }
  0xa8   : > { %v563_v14 = vpop.f32.mrf.mxu0  ;;  %3184 = vmatpush.bf16.msrb.mxu1 %v11734_v20 }
  0xaa   : > { %v1016_v15 = vpop.f32.mrf.mxu1 }
  0xab   : > { %v14018_v18 = vadd.f32 %v1016_v15, %v563_v14  ;;  %602 = vmatmul.bf16.gmra.mxu0 %v13573_v12  ;;  %662 = vmatmul.bf16.gmra.mxu2 %v13597_v13  ;;  %v924_v12 = vor.u32 %v923_v5, %v920_v4  ;;  %v816_v13 = vor.u32 %v815_v7, %v812_v6  ;;  %v457_v14 = vunpack.c.l.b16 %v328_v10  ;;  %v11707_v6 = vld [vmem:[%s13838_s16 + $0x10] sm:$0xff] }
  0xac   : > { %1115 = vmatmul.bf16.gmra.mxu3 %v907_v16  ;;  %v14111_v10 = vld [vmem:[%s13838_s16 + $0xc] sm:$0xff]  ;;  %v2915_v20 = vshll.u32 %v11707_v6, 16 }
  0xad   : > { %1055 = vmatmul.bf16.gmra.mxu1 %v799_v17  ;;  %v13577_v17 = vld [vmem:[%s13838_s16 + $0x54] sm:$0xff]   ;;  %v925_v24 = vsel %vm710_vm0, %v915_v38, %v924_v12  ;;  %v11732_v38 = vld [vmem:[%s16668_s1 + $0x148] sm:$0xff]  ;;  %v826_v5 = vsel %vm710_vm0, %v816_v13, %v13875_v40 }
  0xae   : > { %v623_v25 = vpop.f32.mrf.mxu2 }
  0xaf   : > { %v1076_v26 = vpop.f32.mrf.mxu3 }
  0xb0   : > { %v14022_v28 = vadd.f32 %v1076_v26, %v623_v25  ;;  %v565_v29 = vpop.f32.mrf.mxu0  ;;  %v817_v25 = vsel %vm710_vm0, %v807_v39, %v816_v13  ;;  %v709_v26 = vpack.c.b16 %v457_v14, %v457_v14  ;;  %v1334_v13 = vshll.u32 %v14111_v10, 16 }
  0xb2   : > { %v1018_v30 = vpop.f32.mrf.mxu1  ;;  %v927_v33 = vshrl.u32 %v709_v26, 16  ;;  %v930_v34 = vshll.u32 %v709_v26, 16 }
  0xb3   : > { %v14024_v35 = vadd.f32 %v1018_v30, %v565_v29  ;;  %v11733_v30 = vld [vmem:[%s16668_s1 + $0x150] sm:$0xff] }
  0xb4   : > { %3185 = vmatpush.bf16.msrb.mxu1 %v11733_v30 }
  0xb6   : > { %v625_v41 = vpop.f32.mrf.mxu2 }
  0xb7   : > { %v1078_v42 = vpop.f32.mrf.mxu3 }
  0xb8   : > { %v14034_v45 = vadd.f32 %v1078_v42, %v625_v41  ;;  %v568_v47 = vpop.f32.mrf.mxu0  ;;  %3186 = vmatpush.bf16.msrb.mxu1 %v11732_v38 }
  0xba   : > { %v1021_v48 = vpop.f32.mrf.mxu1 }
  0xbb   : > { %v14038_v51 = vadd.f32 %v1021_v48, %v568_v47  ;;  %607 = vmatmul.bf16.gmra.mxu0 %v13575_v43  ;;  %667 = vmatmul.bf16.gmra.mxu2 %v13599_v44  ;;  %v929_v43 = vrot.slane %v927_v33, 3  ;;  %v932_v44 = vrot.slane %v930_v34, 4  ;;  %v11731_v48 = vld [vmem:[%s16668_s1 + $0x140] sm:$0xff]  ;;  %v2913_v34 = vshrl.u32 %v11707_v6, 16 }
  0xbc   : > { %1120 = vmatmul.bf16.gmra.mxu3 %v916_v49  ;;  %v11786_v49 = vld [vmem:[%s16668_s1 + $0x238] sm:$0xff]  ;;  %3187 = vmatpush.bf16.msrb.mxu1 %v11731_v48 }
  0xbd   : > { %1060 = vmatmul.bf16.gmra.mxu1 %v808_v50  ;;  %v12022_v50 = vunpack.c.h.b16 %v14041_v52  ;;  %4766 = vmatpush.bf16.msra.mxu0 %v11786_v49  ;;  %v933_v54 = vor.u32 %v932_v44, %v929_v43 }
  0xbe   : > { %v628_v61 = vpop.f32.mrf.mxu2 }
  0xbf   : > { %v1081_v62 = vpop.f32.mrf.mxu3  ;;  %v481_v60 = vpack.c.b16 %v457_v14, %v12022_v50  ;;  %v934_v52 = vsel %vm710_vm0, %v924_v12, %v933_v54 }
  0xc0   : > { %v14055_v1 = vadd.f32 %v1081_v62, %v628_v61  ;;  %v570_v2 = vpop.f32.mrf.mxu0  ;;  %v11659_v61 = vld [vmem:[%s13838_s16 + $0x4] sm:$0xff] }
  0xc1   : > { %v1329_v11 = vshll.u32 %v11659_v61, 16 }
  0xc2   : > { %v1023_v3 = vpop.f32.mrf.mxu1 }
  0xc3   : > { %v14057_v9 = vadd.f32 %v1023_v3, %v570_v2  ;;  %v13604_v2 = vld [vmem:[%s13838_s16 + $0x14] sm:$0xff]   ;;  %v13108_v3 = vor.u32 %v13602_v56, %v13107_v55  ;;  %v1331_v40 = vrot.slane %v1329_v11, 1 }
  0xc5   : > { %v1961_v14 = vshrl.u32 %v13108_v3, 16 }
  0xc6   : > { %v630_v15 = vpop.f32.mrf.mxu2 }
  0xc7   : > { %v1083_v16 = vpop.f32.mrf.mxu3  ;;  %v1963_v26 = vrot.slane %v1961_v14, 3 }
  0xc8   : > { %v14068_v21 = vadd.f32 %v1083_v16, %v630_v15  ;;  %v573_v22 = vpop.f32.mrf.mxu0  ;;  %v1964_v15 = vshll.u32 %v13108_v3, 16  ;;  %v1969_v16 = vshrl.u32 %v13604_v2, 16 }
  0xca   : > { %v1026_v23 = vpop.f32.mrf.mxu1  ;;  %v1966_v30 = vrot.slane %v1964_v15, 4  ;;  %v1971_v31 = vrot.slane %v1969_v16, 3  ;;  %v1338_v15 = vshrl.u32 %v14111_v10, 16 }
  0xcb   : > { %v14072_v29 = vadd.f32 %v1026_v23, %v573_v22  ;;  %612 = vmatmul.bf16.gmra.mxu0 %v13577_v17  ;;  %672 = vmatmul.bf16.gmra.mxu2 %v13600_v19  ;;  %v1972_v17 = vshll.u32 %v13604_v2, 16  ;;  %v11708_v19 = vld [vmem:[%s13838_s16 + $0x18] sm:$0xff]  ;;  %v1327_v23 = vshrl.u32 %v11659_v61, 16 }
  0xcc   : > { %1125 = vmatmul.bf16.gmra.mxu3 %v925_v24  ;;  %v1967_v43 = vor.u32 %v1966_v30, %v1963_v26  ;;  %v13606_v61 = vld [vmem:[%s13838_s16 + $0x1c] sm:$0xff]   ;;  %v11661_v2 = vld [vmem:[%s13838_s16 + $0x14] sm:$0xff] }
  0xcd   : > { %1065 = vmatmul.bf16.gmra.mxu1 %v817_v25  ;;  %v1974_v33 = vrot.slane %v1972_v17, 4  ;;  %v1978_v3 = vshrl.u32 %v13606_v61, 16  ;;  %v1342_v16 = vshll.u32 %v11661_v2, 16 }
  0xce   : > { %v633_v36 = vpop.f32.mrf.mxu2 }
  0xcf   : > { %v1086_v37 = vpop.f32.mrf.mxu3  ;;  %v1975_v44 = vor.u32 %v1974_v33, %v1971_v31 }
  0xd0   : > { %v14086_v39 = vadd.f32 %v1086_v37, %v633_v36  ;;  %v575_v41 = vpop.f32.mrf.mxu0  ;;  %v2917_v36 = vrot.slane %v2915_v20, 1  ;;  %v2920_v37 = vshll.u32 %v11708_v19, 16  ;;  %v1980_v20 = vrot.slane %v1978_v3, 3 }
  0xd2   : > { %v1028_v42 = vpop.f32.mrf.mxu1  ;;  %v2918_v48 = vor.u32 %v2917_v36, %v2913_v34  ;;  %v2922_v49 = vrot.slane %v2920_v37, 1 }
  0xd3   : > { %v14088_v47 = vadd.f32 %v1028_v42, %v575_v41  ;;  %v1332_v41 = vor.u32 %v1331_v40, %v1327_v23  ;;  %v1336_v42 = vrot.slane %v1334_v13, 1  ;;  %v1344_v13 = vrot.slane %v1342_v16, 1 }
  0xd5   : > { %v1340_v40 = vor.u32 %v1338_v15, %v1336_v42  ;;  %v11785_v15 = vld [vmem:[%s16668_s1 + $0x230] sm:$0xff] }
  0xd6   : > { %v635_v57 = vpop.f32.mrf.mxu2  ;;  %4767 = vmatpush.bf16.msra.mxu0 %v11785_v15 }
  0xd7   : > { %v1088_v58 = vpop.f32.mrf.mxu3  ;;  %v1345_v34 = vsel %vm1325_vm1, %v1340_v40, %v1344_v13 }
  0xd8   : > { %v14101_v62 = vadd.f32 %v1088_v58, %v635_v57  ;;  %v578_v63 = vpop.f32.mrf.mxu0  ;;  %v1337_v57 = vsel %vm1325_vm1, %v1332_v41, %v1336_v42  ;;  %v13608_v41 = vld [vmem:[%s13838_s16 + $0x24] sm:$0xff]  }
  0xda   : > { %v1031_v4 = vpop.f32.mrf.mxu1 }
  0xdb   : > { %v14108_v7 = vadd.f32 %v1031_v4, %v578_v63  ;;  %617 = vmatmul.bf16.gmra.mxu0 %v13579_v59  ;;  %677 = vmatmul.bf16.gmra.mxu2 %v481_v60  ;;  %v1976_v59 = vsel %vm710_vm0, %v1967_v43, %v1975_v44  ;;  %v2923_v60 = vsel %vm1325_vm1, %v2918_v48, %v2922_v49  ;;  %v1981_v4 = vshll.u32 %v13606_v61, 16  ;;  %v11662_v43 = vld [vmem:[%s13838_s16 + $0x1c] sm:$0xff]  ;;  %v11745_v48 = vld [vmem:[%s16668_s1 + $0x1b0] sm:$0xff] }
  0xdc   : > { %1130 = vmatmul.bf16.gmra.mxu3 %v934_v52  ;;  %v11709_v52 = vld [vmem:[%s13838_s16 + $0x20] sm:$0xff]  ;;  %3843 = vmatpush.bf16.msra.mxu2 %v11745_v48 }
  0xdd   : > { %1070 = vmatmul.bf16.gmra.mxu1 %v826_v5 }
  0xde   : > { %v638_v12 = vpop.f32.mrf.mxu2 }
  0xdf   : > { %v1091_v22 = vpop.f32.mrf.mxu3 }
  0xe0   : > { %v14115_v24 = vadd.f32 %v1091_v22, %v638_v12  ;;  %v580_v25 = vpop.f32.mrf.mxu0  ;;  %v1983_v12 = vrot.slane %v1981_v4, 4  ;;  %v2924_v22 = vshrl.u32 %v11708_v19, 16 }
  0xe2   : > { %v1033_v32 = vpop.f32.mrf.mxu1  ;;  %v2926_v26 = vor.u32 %v2924_v22, %v2922_v49  ;;  %v11753_v49 = vld [vmem:[%s16668_s1 + $0x1f0] sm:$0xff] }
  0xe3   : > { %v14117_v38 = vadd.f32 %v1033_v32, %v580_v25  ;;  %v1984_v25 = vor.u32 %v1983_v12, %v1980_v20  ;;  %4133 = vmatpush.bf16.msra.mxu3 %v11753_v49 }
  0xe5   : > { %v1985_v19 = vsel %vm710_vm0, %v1975_v44, %v1984_v25  ;;  %v1987_v44 = vshrl.u32 %v13608_v41, 16 }
  0xe6   : > { %v640_v50 = vpop.f32.mrf.mxu2 }
  0xe7   : > { %v1093_v54 = vpop.f32.mrf.mxu3  ;;  %v1989_v3 = vrot.slane %v1987_v44, 3 }
  0xe8   : > { %v14119_v55 = vadd.f32 %v1093_v54, %v640_v50  ;;  %v583_v56 = vpop.f32.mrf.mxu0  ;;  %v1990_v50 = vshll.u32 %v13608_v41, 16  ;;  %v11710_v54 = vld [vmem:[%s13838_s16 + $0x28] sm:$0xff] }
  0xea   : > { %v1036_v58 = vpop.f32.mrf.mxu1  ;;  %v1992_v4 = vrot.slane %v1990_v50, 4 }
  0xeb   : > { %v14125_v63 = vadd.f32 %v1036_v58, %v583_v56  ;;  %1602 = vmatmul.bf16.vlgmr.msrb.gmra.mxu2 %v1337_v57  ;;  %2554 = vmatmul.bf16.vlgmr.msrb.gmra.mxu0 %v13895_v53  ;;  %v2928_v53 = vshll.u32 %v11709_v52, 16 }
  0xec   : > { %2264 = vmatmul.bf16.vlgmr.msrb.gmra.mxu3 %v1976_v59  ;;  %v1346_v59 = vshrl.u32 %v11661_v2, 16  ;;  %v1993_v20 = vor.u32 %v1992_v4, %v1989_v3 }
  0xed   : > { %3188 = vmatmul.bf16.vlgmr.msrb.gmra.mxu1 %v2923_v60  ;;  %v2930_v30 = vrot.slane %v2928_v53, 1  ;;  %v1350_v60 = vshll.u32 %v11662_v43, 16 }
  0xee   : > { %v643_v5 = vpop.f32.mrf.mxu2  ;;  %v1348_v16 = vor.u32 %v1346_v59, %v1344_v13  ;;  %v13610_v13 = vld [vmem:[%s13838_s16 + $0x2c] sm:$0xff]   ;;  %v2940_v59 = vshrl.u32 %v11710_v54, 16 }
  0xef   : > { %v1096_v6 = vpop.f32.mrf.mxu3  ;;  %v2931_v37 = vsel %vm1325_vm1, %v2926_v26, %v2930_v30 }
  0xf0   : > { %v14130_v11 = vadd.f32 %v1096_v6, %v643_v5  ;;  %v585_v14 = vpop.f32.mrf.mxu0  ;;  %v2932_v5 = vshrl.u32 %v11709_v52, 16  ;;  %v2936_v6 = vshll.u32 %v11710_v54, 16 }
  0xf2   : > { %v1038_v17 = vpop.f32.mrf.mxu1  ;;  %v2934_v12 = vor.u32 %v2932_v5, %v2930_v30  ;;  %v2938_v2 = vrot.slane %v2936_v6, 1  ;;  %v11663_v30 = vld [vmem:[%s13838_s16 + $0x24] sm:$0xff] }
  0xf3   : > { %v14133_v23 = vadd.f32 %v1038_v17, %v585_v14  ;;  %v1352_v17 = vrot.slane %v1350_v60, 1  ;;  %v1358_v50 = vshll.u32 %v11663_v30, 16 }
  0xf4   : > { %v2942_v5 = vor.u32 %v2940_v59, %v2938_v2 }
  0xf5   : > { %v1353_v26 = vsel %vm1325_vm1, %v1348_v16, %v1352_v17  ;;  %v1360_v3 = vrot.slane %v1358_v50, 1 }
  0xf6   : > { %v645_v31 = vpop.f32.mrf.mxu2 }
  0xf7   : > { %v1098_v32 = vpop.f32.mrf.mxu3 }
  0xf8   : > { %v14135_v33 = vadd.f32 %v1098_v32, %v645_v31  ;;  %v588_v10 = vpop.f32.mrf.mxu0  ;;  %v1994_v32 = vsel %vm710_vm0, %v1984_v25, %v1993_v20  ;;  %v1354_v25 = vshrl.u32 %v11662_v43, 16 }
  0xfa   : > { %v1041_v36 = vpop.f32.mrf.mxu1 }
  0xfb   : > { %v14141_v42 = vadd.f32 %v1041_v36, %v588_v10  ;;  %1607 = vmatmul.bf16.gmra.mxu2 %v1345_v34  ;;  %2559 = vmatmul.bf16.gmra.mxu0 %v13914_v8  ;;  %v2939_v10 = vsel %vm1325_vm1, %v2934_v12, %v2938_v2  ;;  %v1996_v36 = vshrl.u32 %v13610_v13, 16  ;;  %v11664_v2 = vld [vmem:[%s13838_s16 + $0x2c] sm:$0xff] }
  0xfc   : > { %2269 = vmatmul.bf16.gmra.mxu3 %v1985_v19  ;;  %v1999_v19 = vshll.u32 %v13610_v13, 16 }
  0xfd   : > { %3193 = vmatmul.bf16.gmra.mxu1 %v2931_v37  ;;  %v11711_v37 = vld [vmem:[%s13838_s16 + $0x30] sm:$0xff] }
  0xfe   : > { %v648_v56 = vpop.f32.mrf.mxu2  ;;  %v2944_v60 = vshll.u32 %v11711_v37, 16 }
  0xff   : > { %v1101_v57 = vpop.f32.mrf.mxu3 }
 0x100   : > { %v14152_v58 = vadd.f32 %v1101_v57, %v648_v56  ;;  %v590_v8 = vpop.f32.mrf.mxu0  ;;  %v1998_v57 = vrot.slane %v1996_v36, 3  ;;  %v2946_v6 = vrot.slane %v2944_v60, 1 }
 0x102   : > { %16676 = vst [vmem:[#allocation3_spill] sm:$0xff] %v14152_v58  ;;  %v1043_v61 = vpop.f32.mrf.mxu1 }
 0x103   : > { %v14154_v14 = vadd.f32 %v1043_v61, %v590_v8  ;;  %v2001_v8 = vrot.slane %v1999_v19, 4  ;;  %v1356_v61 = vor.u32 %v1354_v25, %v1352_v17 }
 0x105   : > { %v2002_v4 = vor.u32 %v2001_v8, %v1998_v57 }
 0x106   : > { %v650_v22 = vpop.f32.mrf.mxu2 }
 0x107   : > { %v1103_v53 = vpop.f32.mrf.mxu3  ;;  %v2003_v54 = vsel %vm710_vm0, %v1993_v20, %v2002_v4  ;;  %v1362_v20 = vshrl.u32 %v11663_v30, 16 }
 0x108   : > { %v14159_v40 = vadd.f32 %v1103_v53, %v650_v22  ;;  %v593_v52 = vpop.f32.mrf.mxu0  ;;  %v1361_v22 = vsel %vm1325_vm1, %v1356_v61, %v1360_v3 }
 0x109   : > { %v1364_v8 = vor.u32 %v1362_v20, %v1360_v3 }
 0x10a   : > { %16677 = vst [vmem:[#allocation4_spill] sm:$0xff] %v14159_v40  ;;  %v1046_v31 = vpop.f32.mrf.mxu1 }
 0x10b   : > { %v14165_v34 = vadd.f32 %v1046_v31, %v593_v52  ;;  %1612 = vmatmul.bf16.gmra.mxu2 %v1353_v26  ;;  %2564 = vmatmul.bf16.gmra.mxu0 %v13933_v27  ;;  %v2947_v52 = vsel %vm1325_vm1, %v2942_v5, %v2946_v6  ;;  %v13612_v26 = vld [vmem:[%s13838_s16 + $0x34] sm:$0xff]  }
 0x10c   : > { %2274 = vmatmul.bf16.gmra.mxu3 %v1994_v32  ;;  %v2005_v31 = vshrl.u32 %v13612_v26, 16  ;;  %v2008_v32 = vshll.u32 %v13612_v26, 16  ;;  %v11744_v26 = vld [vmem:[%s16668_s1 + $0x1a8] sm:$0xff] }
 0x10d   : > { %3198 = vmatmul.bf16.gmra.mxu1 %v2939_v10  ;;  %v11712_v10 = vld [vmem:[%s13838_s16 + $0x38] sm:$0xff]  ;;  %3844 = vmatpush.bf16.msra.mxu2 %v11744_v26 }
 0x10e   : > { %v653_v41 = vpop.f32.mrf.mxu2  ;;  %v2007_v25 = vrot.slane %v2005_v31, 3  ;;  %v2010_v50 = vrot.slane %v2008_v32, 4  ;;  %v2952_v57 = vshll.u32 %v11712_v10, 16  ;;  %v11752_v31 = vld [vmem:[%s16668_s1 + $0x1e8] sm:$0xff] }
 0x10f   : > { %v1106_v48 = vpop.f32.mrf.mxu3  ;;  %4134 = vmatpush.bf16.msra.mxu3 %v11752_v31  ;;  %v12639_v31 = vld [vmem:[%s13838_s16 + $0x38] sm:$0xff]  }
 0x110   : > { %v14170_v49 = vadd.f32 %v1106_v48, %v653_v41  ;;  %v595_v44 = vpop.f32.mrf.mxu0  ;;  %v1366_v48 = vshll.u32 %v11664_v2, 16  ;;  %v2011_v60 = vor.u32 %v2010_v50, %v2007_v25  ;;  %v2954_v5 = vrot.slane %v2952_v57, 1 }
 0x111   : > { %v2956_v57 = vshrl.u32 %v11712_v10, 16 }
 0x112   : > { %16678 = vst [vmem:[#allocation5_spill] sm:$0xff] %v14170_v49  ;;  %v1048_v56 = vpop.f32.mrf.mxu1  ;;  %v1368_v59 = vrot.slane %v1366_v48, 1  ;;  %v1370_v48 = vshrl.u32 %v11664_v2, 16 }
 0x113   : > { %v14172_v27 = vadd.f32 %v1048_v56, %v595_v44  ;;  %v2948_v56 = vshrl.u32 %v11711_v37, 16  ;;  %v2012_v37 = vsel %vm710_vm0, %v2002_v4, %v2011_v60 }
 0x115   : > { %v2950_v61 = vor.u32 %v2948_v56, %v2946_v6  ;;  %v11665_v6 = vld [vmem:[%s13838_s16 + $0x34] sm:$0xff] }
 0x116   : > { %v655_v15 = vpop.f32.mrf.mxu2 }
 0x117   : > { %v1108_v16 = vpop.f32.mrf.mxu3 }
 0x118   : > { %v14174_v12 = vadd.f32 %v1108_v16, %v655_v15  ;;  %v598_v43 = vpop.f32.mrf.mxu0 }
 0x11a   : > { %16679 = vst [vmem:[#allocation6_spill] sm:$0xff] %v14174_v12  ;;  %v1051_v53 = vpop.f32.mrf.mxu1 }
 0x11b   : > { %v14180_v17 = vadd.f32 %v1051_v53, %v598_v43  ;;  %1617 = vmatmul.bf16.gmra.mxu2 %v1361_v22  ;;  %2569 = vmatmul.bf16.gmra.mxu0 %v13949_v46  ;;  %v1369_v22 = vsel %vm1325_vm1, %v1364_v8, %v1368_v59 }
 0x11c   : > { %2279 = vmatmul.bf16.gmra.mxu3 %v2003_v54  ;;  %v2955_v54 = vsel %vm1325_vm1, %v2950_v61, %v2954_v5 }
 0x11d   : > { %3203 = vmatmul.bf16.gmra.mxu1 %v2947_v52  ;;  %v13614_v52 = vld [vmem:[%s13838_s16 + $0x3c] sm:$0xff]  }
 0x11e   : > { %v658_v13 = vpop.f32.mrf.mxu2  ;;  %v2014_v4 = vshrl.u32 %v13614_v52, 16  ;;  %v2017_v32 = vshll.u32 %v13614_v52, 16 }
 0x11f   : > { %v1111_v36 = vpop.f32.mrf.mxu3 }
 0x120   : > { %v14185_v19 = vadd.f32 %v1111_v36, %v658_v13  ;;  %v600_v41 = vpop.f32.mrf.mxu0  ;;  %v11713_v13 = vld [vmem:[%s13838_s16 + $0x40] sm:$0xff]  ;;  %v2016_v50 = vrot.slane %v2014_v4, 3  ;;  %v2019_v56 = vrot.slane %v2017_v32, 4 }
 0x121   : > { %v2960_v8 = vshll.u32 %v11713_v13, 16 }
 0x122   : > { %16680 = vst [vmem:[#allocation7_spill] sm:$0xff] %v14185_v19  ;;  %v1053_v44 = vpop.f32.mrf.mxu1 }
 0x123   : > { %v14187_v46 = vadd.f32 %v1053_v44, %v600_v41  ;;  %v1374_v44 = vshll.u32 %v11665_v6, 16  ;;  %v2962_v2 = vrot.slane %v2960_v8, 1  ;;  %v1378_v8 = vshrl.u32 %v11665_v6, 16 }
 0x126   : > { %v660_v15 = vpop.f32.mrf.mxu2 }
 0x127   : > { %v1113_v16 = vpop.f32.mrf.mxu3 }
 0x128   : > { %v14189_v43 = vadd.f32 %v1113_v16, %v660_v15  ;;  %v603_v30 = vpop.f32.mrf.mxu0  ;;  %v11784_v15 = vld [vmem:[%s16668_s1 + $0x228] sm:$0xff]  ;;  %v1372_v16 = vor.u32 %v1370_v48, %v1368_v59 }
 0x129   : > { %4768 = vmatpush.bf16.msra.mxu0 %v11784_v15 }
 0x12a   : > { %16681 = vst [vmem:[#allocation8_spill] sm:$0xff] %v14189_v43  ;;  %v1056_v53 = vpop.f32.mrf.mxu1 }
 0x12b   : > { %v14195_v3 = vadd.f32 %v1056_v53, %v603_v30  ;;  %1622 = vmatmul.bf16.gmra.mxu2 %v1369_v22  ;;  %2574 = vmatmul.bf16.gmra.mxu0 %v13962_v0  ;;  %v1376_v30 = vrot.slane %v1374_v44, 1  ;;  %v2020_v22 = vor.u32 %v2019_v56, %v2016_v50  ;;  %v2958_v53 = vor.u32 %v2956_v57, %v2954_v5  ;;  %v11666_v5 = vld [vmem:[%s13838_s16 + $0x3c] sm:$0xff]  ;;  %v11714_v44 = vld [vmem:[%s13838_s16 + $0x48] sm:$0xff] }
 0x12c   : > { %2284 = vmatmul.bf16.gmra.mxu3 %v2012_v37 }
 0x12d   : > { %3208 = vmatmul.bf16.gmra.mxu1 %v2955_v54  ;;  %v1377_v26 = vsel %vm1325_vm1, %v1372_v16, %v1376_v30  ;;  %v2021_v32 = vsel %vm710_vm0, %v2011_v60, %v2020_v22  ;;  %v2963_v59 = vsel %vm1325_vm1, %v2958_v53, %v2962_v2  ;;  %v1382_v60 = vshll.u32 %v11666_v5, 16 }
 0x12e   : > { %v663_v36 = vpop.f32.mrf.mxu2 }
 0x12f   : > { %v1116_v41 = vpop.f32.mrf.mxu3 }
 0x130   : > { %v14206_v20 = vadd.f32 %v1116_v41, %v663_v36  ;;  %v605_v0 = vpop.f32.mrf.mxu0  ;;  %v13616_v36 = vld [vmem:[%s13838_s16 + $0x44] sm:$0xff]  }
 0x131   : > { %v2026_v48 = vshll.u32 %v13616_v36, 16 }
 0x132   : > { %16682 = vst [vmem:[#allocation9_spill] sm:$0xff] %v14206_v20  ;;  %v1058_v25 = vpop.f32.mrf.mxu1 }
 0x133   : > { %v14208_v61 = vadd.f32 %v1058_v25, %v605_v0  ;;  %v2023_v0 = vshrl.u32 %v13616_v36, 16  ;;  %v2028_v53 = vrot.slane %v2026_v48, 4  ;;  %v12640_v48 = vld [vmem:[%s13838_s16 + $0x40] sm:$0xff]  }
 0x135   : > { %v2025_v16 = vrot.slane %v2023_v0, 3 }
 0x136   : > { %v665_v37 = vpop.f32.mrf.mxu2 }
 0x137   : > { %v1118_v54 = vpop.f32.mrf.mxu3 }
 0x138   : > { %v14213_v52 = vadd.f32 %v1118_v54, %v665_v37  ;;  %v608_v10 = vpop.f32.mrf.mxu0  ;;  %v2964_v37 = vshrl.u32 %v11713_v13, 16  ;;  %v2968_v54 = vshll.u32 %v11714_v44, 16 }
 0x13a   : > { %16683 = vst [vmem:[#allocation10_spill] sm:$0xff] %v14213_v52  ;;  %v1061_v4 = vpop.f32.mrf.mxu1 }
 0x13b   : > { %v14220_v41 = vadd.f32 %v1061_v4, %v608_v10  ;;  %1627 = vmatmul.bf16.gmra.mxu2 %v1377_v26  ;;  %2579 = vmatmul.bf16.gmra.mxu0 %v12639_v31  ;;  %v1380_v26 = vor.u32 %v1378_v8, %v1376_v30  ;;  %v1384_v31 = vrot.slane %v1382_v60, 1  ;;  %v2029_v4 = vor.u32 %v2028_v53, %v2025_v16  ;;  %v13618_v30 = vld [vmem:[%s13838_s16 + $0x4c] sm:$0xff]  }
 0x13c   : > { %2289 = vmatmul.bf16.gmra.mxu3 %v2021_v32  ;;  %v2966_v32 = vor.u32 %v2964_v37, %v2962_v2  ;;  %v11667_v2 = vld [vmem:[%s13838_s16 + $0x44] sm:$0xff]  ;;  %v2032_v60 = vshrl.u32 %v13618_v30, 16  ;;  %v11715_v16 = vld [vmem:[%s13838_s16 + $0x50] sm:$0xff] }
 0x13d   : > { %3213 = vmatmul.bf16.gmra.mxu1 %v2963_v59  ;;  %v2970_v59 = vrot.slane %v2968_v54, 1  ;;  %v1385_v0 = vsel %vm1325_vm1, %v1380_v26, %v1384_v31 }
 0x13e   : > { %v668_v25 = vpop.f32.mrf.mxu2 }
 0x13f   : > { %v1121_v50 = vpop.f32.mrf.mxu3 }
 0x140   : > { %v14224_v56 = vadd.f32 %v1121_v50, %v668_v25  ;;  %v610_v57 = vpop.f32.mrf.mxu0 }
 0x142   : > { %16684 = vst [vmem:[#allocation11_spill] sm:$0xff] %v14224_v56  ;;  %v1063_v15 = vpop.f32.mrf.mxu1  ;;  %v2030_v56 = vsel %vm710_vm0, %v2020_v22, %v2029_v4  ;;  %v1390_v22 = vshll.u32 %v11667_v2, 16 }
 0x143   : > { %v14226_v10 = vadd.f32 %v1063_v15, %v610_v57  ;;  %v2971_v57 = vsel %vm1325_vm1, %v2966_v32, %v2970_v59  ;;  %v2035_v15 = vshll.u32 %v13618_v30, 16  ;;  %v2034_v32 = vrot.slane %v2032_v60, 3 }
 0x146   : > { %v670_v36 = vpop.f32.mrf.mxu2 }
 0x147   : > { %v1123_v25 = vpop.f32.mrf.mxu3 }
 0x148   : > { %v14228_v50 = vadd.f32 %v1123_v25, %v670_v36  ;;  %v613_v6 = vpop.f32.mrf.mxu0  ;;  %v1386_v36 = vshrl.u32 %v11666_v5, 16 }
 0x14a   : > { %16685 = vst [vmem:[#allocation12_spill] sm:$0xff] %v14228_v50  ;;  %v1066_v13 = vpop.f32.mrf.mxu1 }
 0x14b   : > { %v14235_v8 = vadd.f32 %v1066_v13, %v613_v6  ;;  %1632 = vmatmul.bf16.gmra.mxu2 %v1385_v0  ;;  %2584 = vmatmul.bf16.gmra.mxu0 %v12640_v48  ;;  %v2037_v6 = vrot.slane %v2035_v15, 4  ;;  %v2972_v13 = vshrl.u32 %v11714_v44, 16  ;;  %v2976_v0 = vshll.u32 %v11715_v16, 16  ;;  %v12641_v15 = vld [vmem:[%s13838_s16 + $0x48] sm:$0xff]  }
 0x14c   : > { %2294 = vmatmul.bf16.gmra.mxu3 %v2030_v56  ;;  %v1388_v48 = vor.u32 %v1386_v36, %v1384_v31  ;;  %v13620_v31 = vld [vmem:[%s13838_s16 + $0x54] sm:$0xff]  }
 0x14d   : > { %3218 = vmatmul.bf16.gmra.mxu1 %v2971_v57  ;;  %v1392_v57 = vrot.slane %v1390_v22, 1  ;;  %v2038_v30 = vor.u32 %v2037_v6, %v2034_v32  ;;  %v2974_v50 = vor.u32 %v2972_v13, %v2970_v59  ;;  %v2978_v52 = vrot.slane %v2976_v0, 1  ;;  %v11668_v59 = vld [vmem:[%s13838_s16 + $0x4c] sm:$0xff]  ;;  %v11743_v22 = vld [vmem:[%s16668_s1 + $0x1a0] sm:$0xff]  ;;  %v11716_v6 = vld [vmem:[%s13838_s16 + $0x58] sm:$0xff] }
 0x14e   : > { %v673_v53 = vpop.f32.mrf.mxu2  ;;  %v2044_v32 = vshll.u32 %v13620_v31, 16  ;;  %3845 = vmatpush.bf16.msra.mxu2 %v11743_v22 }
 0x14f   : > { %v1126_v37 = vpop.f32.mrf.mxu3  ;;  %v1393_v60 = vsel %vm1325_vm1, %v1388_v48, %v1392_v57  ;;  %v2039_v20 = vsel %vm710_vm0, %v2029_v4, %v2038_v30  ;;  %v11751_v4 = vld [vmem:[%s16668_s1 + $0x1e0] sm:$0xff]  ;;  %v1394_v48 = vshrl.u32 %v11667_v2, 16 }
 0x150   : > { %v14239_v54 = vadd.f32 %v1126_v37, %v673_v53  ;;  %v615_v26 = vpop.f32.mrf.mxu0  ;;  %4135 = vmatpush.bf16.msra.mxu3 %v11751_v4 }
 0x151   : > { %v1396_v22 = vor.u32 %v1394_v48, %v1392_v57  ;;  %v13622_v57 = vld [vmem:[%s13838_s16 + $0x5c] sm:$0xff]  }
 0x152   : > { %16686 = vst [vmem:[#allocation13_spill] sm:$0xff] %v14239_v54  ;;  %v1068_v25 = vpop.f32.mrf.mxu1 }
 0x153   : > { %v14241_v56 = vadd.f32 %v1068_v25, %v615_v26  ;;  %v2979_v26 = vsel %vm1325_vm1, %v2974_v50, %v2978_v52  ;;  %v2041_v25 = vshrl.u32 %v13620_v31, 16 }
 0x156   : > { %v675_v53 = vpop.f32.mrf.mxu2 }
 0x157   : > { %v1128_v37 = vpop.f32.mrf.mxu3 }
 0x158   : > { %v14243_v54 = vadd.f32 %v1128_v37, %v675_v53  ;;  %v618_v5 = vpop.f32.mrf.mxu0  ;;  %v1398_v53 = vshll.u32 %v11668_v59, 16 }
 0x15a   : > { %16687 = vst [vmem:[#allocation14_spill] sm:$0xff] %v14243_v54  ;;  %v1071_v44 = vpop.f32.mrf.mxu1  ;;  %v1400_v4 = vrot.slane %v1398_v53, 1 }
 0x15b   : > { %v14250_v36 = vadd.f32 %v1071_v44, %v618_v5  ;;  %1637 = vmatmul.bf16.gmra.mxu2 %v1393_v60  ;;  %2589 = vmatmul.bf16.gmra.mxu0 %v12641_v15  ;;  %v2043_v5 = vrot.slane %v2041_v25, 3  ;;  %v2046_v60 = vrot.slane %v2044_v32, 4  ;;  %v2980_v15 = vshrl.u32 %v11715_v16, 16  ;;  %v11783_v25 = vld [vmem:[%s16668_s1 + $0x220] sm:$0xff] }
 0x15c   : > { %2299 = vmatmul.bf16.gmra.mxu3 %v2039_v20  ;;  %v2984_v44 = vshll.u32 %v11716_v6, 16  ;;  %4769 = vmatpush.bf16.msra.mxu0 %v11783_v25 }
 0x15d   : > { %3223 = vmatmul.bf16.gmra.mxu1 %v2979_v26  ;;  %v11802_v26 = vld [vmem:[%s16671_s4 + $0x78] sm:$0xff] }
 0x15e   : > { %v678_v50 = vpop.f32.mrf.mxu2  ;;  %5582 = vmatpush.bf16.msra.mxu1 %v11802_v26  ;;  %v2986_v2 = vrot.slane %v2984_v44, 1  ;;  %v11717_v44 = vld [vmem:[%s13838_s16 + $0x60] sm:$0xff] }
 0x15f   : > { %v1131_v13 = vpop.f32.mrf.mxu3 }
 0x160   : > { %v14260_v0 = vadd.f32 %v1131_v13, %v678_v50  ;;  %v620_v20 = vpop.f32.mrf.mxu0  ;;  %v2047_v50 = vor.u32 %v2046_v60, %v2043_v5  ;;  %v2982_v13 = vor.u32 %v2980_v15, %v2978_v52  ;;  %v11669_v5 = vld [vmem:[%s13838_s16 + $0x54] sm:$0xff]  ;;  %v2050_v60 = vshrl.u32 %v13622_v57, 16 }
 0x161   : > { %v2053_v15 = vshll.u32 %v13622_v57, 16 }
 0x162   : > { %16688 = vst [vmem:[#allocation15_spill] sm:$0xff] %v14260_v0  ;;  %v1073_v37 = vpop.f32.mrf.mxu1  ;;  %v2048_v48 = vsel %vm710_vm0, %v2038_v30, %v2047_v50  ;;  %v2987_v53 = vsel %vm1325_vm1, %v2982_v13, %v2986_v2  ;;  %v2052_v43 = vrot.slane %v2050_v60, 3 }
 0x163   : > { %v14265_v31 = vadd.f32 %v1073_v37, %v620_v20  ;;  %v1401_v20 = vsel %vm1325_vm1, %v1396_v22, %v1400_v4  ;;  %v12642_v37 = vld [vmem:[%s13838_s16 + $0x50] sm:$0xff]   ;;  %v2055_v19 = vrot.slane %v2053_v15, 4 }
 0x165   : > { %v2056_v49 = vor.u32 %v2055_v19, %v2052_v43  ;;  %v14289_v43 = vld [vmem:[%s13838_s16 + $0x5c] sm:$0xff] }
 0x166   : > { %v680_v16 = vpop.f32.mrf.mxu2 }
 0x167   : > { %v1133_v32 = vpop.f32.mrf.mxu3 }
 0x168   : > { %v14270_v0 = vadd.f32 %v1133_v32, %v680_v16  ;;  %v2555_v54 = vpop.f32.mrf.mxu0  ;;  %v1402_v32 = vshrl.u32 %v11668_v59, 16 }
 0x16a   : > { %16689 = vst [vmem:[#allocation16_spill] sm:$0xff] %v14270_v0  ;;  %v3189_v52 = vpop.f32.mrf.mxu1  ;;  %v1406_v0 = vshll.u32 %v11669_v5, 16 }
 0x16b   : > { %1642 = vmatmul.bf16.gmra.mxu2 %v1401_v20  ;;  %2594 = vmatmul.bf16.gmra.mxu0 %v12642_v37  ;;  %v2988_v20 = vshrl.u32 %v11716_v6, 16  ;;  %v2992_v37 = vshll.u32 %v11717_v44, 16  ;;  %v13624_v6 = vld [vmem:[%s13838_s16 + $0x64] sm:$0xff]  }
 0x16c   : > { %2304 = vmatmul.bf16.gmra.mxu3 %v2048_v48  ;;  %v1408_v12 = vrot.slane %v1406_v0, 1 }
 0x16d   : > { %3228 = vmatmul.bf16.gmra.mxu1 %v2987_v53  ;;  %v1404_v53 = vor.u32 %v1402_v32, %v1400_v4  ;;  %v2990_v40 = vor.u32 %v2988_v20, %v2986_v2  ;;  %v14294_v32 = vld [vmem:[%s13838_s16 + $0x68] sm:$0xff] }
 0x16e   : > { %v1603_v26 = vpop.f32.mrf.mxu2 }
 0x16f   : > { %v1723_v25 = vadd.f32 %v1603_v26, %v14018_v18  ;;  %v2265_v16 = vpop.f32.mrf.mxu3  ;;  %v2994_v18 = vrot.slane %v2992_v37, 1  ;;  %v1409_v15 = vsel %vm1325_vm1, %v1404_v53, %v1408_v12 }
 0x170   : > { %v2557_v22 = vpop.f32.mrf.mxu0 }
 0x171   : > { %v2385_v30 = vadd.f32 %v2265_v16, %v1723_v25  ;;  %v12643_v16 = vld [vmem:[%s13838_s16 + $0x58] sm:$0xff]   ;;  %v2995_v4 = vsel %vm1325_vm1, %v2990_v40, %v2994_v18  ;;  %v1414_v40 = vshll.u32 %v14289_v43, 16 }
 0x172   : > { %v3191_v13 = vpop.f32.mrf.mxu1 }
 0x173   : > { %v2675_v48 = vadd.f32 %v2555_v54, %v2385_v30  ;;  %v2057_v54 = vsel %vm710_vm0, %v2047_v50, %v2056_v49 }
 0x175   : > { %v14280_v57 = vadd.f32 %v3189_v52, %v2675_v48  ;;  %v2062_v52 = vshll.u32 %v13624_v6, 16  ;;  %v1410_v48 = vshrl.u32 %v11669_v5, 16 }
 0x176   : > { %v1605_v26 = vpop.f32.mrf.mxu2 }
 0x177   : > { %v1724_v59 = vadd.f32 %v1605_v26, %v14024_v35  ;;  %v2267_v60 = vpop.f32.mrf.mxu3  ;;  %v2059_v35 = vshrl.u32 %v13624_v6, 16 }
 0x178   : > { %v2560_v25 = vpop.f32.mrf.mxu0 }
 0x179   : > { %v2386_v58 = vadd.f32 %v2267_v60, %v1724_v59  ;;  %v2061_v53 = vrot.slane %v2059_v35, 3  ;;  %v2996_v59 = vshrl.u32 %v11717_v44, 16  ;;  %v13626_v44 = vld [vmem:[%s13838_s16 + $0x6c] sm:$0xff]  }
 0x17a   : > { %v3194_v0 = vpop.f32.mrf.mxu1 }
 0x17b   : > { %1647 = vmatmul.bf16.gmra.mxu2 %v1409_v15  ;;  %2599 = vmatmul.bf16.gmra.mxu0 %v12643_v16  ;;  %v2676_v19 = vadd.f32 %v2557_v22, %v2386_v58  ;;  %v2064_v22 = vrot.slane %v2062_v52, 4  ;;  %v1412_v15 = vor.u32 %v1410_v48, %v1408_v12  ;;  %v1416_v16 = vrot.slane %v1414_v40, 1  ;;  %v14308_v48 = vld [vmem:[%s13838_s16 + $0x64] sm:$0xff]  ;;  %v11742_v40 = vld [vmem:[%s16668_s1 + $0x198] sm:$0xff] }
 0x17c   : > { %2309 = vmatmul.bf16.gmra.mxu3 %v2057_v54  ;;  %v2998_v54 = vor.u32 %v2996_v59, %v2994_v18  ;;  %3846 = vmatpush.bf16.msra.mxu2 %v11742_v40 }
 0x17d   : > { %3233 = vmatmul.bf16.gmra.mxu1 %v2995_v4  ;;  %v14291_v2 = vadd.f32 %v3191_v13, %v2676_v19  ;;  %v3000_v13 = vshll.u32 %v14294_v32, 16 }
 0x17e   : > { %v1608_v30 = vpop.f32.mrf.mxu2 }
 0x17f   : > { %v1725_v20 = vadd.f32 %v1608_v30, %v14038_v51  ;;  %v2270_v50 = vpop.f32.mrf.mxu3  ;;  %v2065_v51 = vor.u32 %v2064_v22, %v2061_v53  ;;  %v3002_v4 = vrot.slane %v3000_v13, 1  ;;  %v1417_v30 = vsel %vm1325_vm1, %v1412_v15, %v1416_v16  ;;  %v14316_v22 = vld [vmem:[%s13838_s16 + $0x70] sm:$0xff] }
 0x180   : > { %v2562_v37 = vpop.f32.mrf.mxu0  ;;  %v1418_v15 = vshrl.u32 %v14289_v43, 16 }
 0x181   : > { %v2387_v58 = vadd.f32 %v2270_v50, %v1725_v20  ;;  %v12644_v20 = vld [vmem:[%s13838_s16 + $0x60] sm:$0xff]   ;;  %v2066_v12 = vsel %vm710_vm0, %v2056_v49, %v2065_v51  ;;  %v11750_v49 = vld [vmem:[%s16668_s1 + $0x1d8] sm:$0xff] }
 0x182   : > { %v3196_v26 = vpop.f32.mrf.mxu1  ;;  %4136 = vmatpush.bf16.msra.mxu3 %v11750_v49 }
 0x183   : > { %v2677_v60 = vadd.f32 %v2560_v25, %v2387_v58  ;;  %v2071_v58 = vshll.u32 %v13626_v44, 16 }
 0x185   : > { %v14299_v6 = vadd.f32 %v3194_v0, %v2677_v60  ;;  %v3003_v0 = vsel %vm1325_vm1, %v2998_v54, %v3002_v4  ;;  %v1422_v54 = vshll.u32 %v14308_v48, 16 }
 0x186   : > { %v1610_v5 = vpop.f32.mrf.mxu2 }
 0x187   : > { %v1726_v19 = vadd.f32 %v1610_v5, %v14057_v9  ;;  %v2272_v35 = vpop.f32.mrf.mxu3  ;;  %v2068_v9 = vshrl.u32 %v13626_v44, 16  ;;  %v11801_v44 = vld [vmem:[%s16671_s4 + $0x70] sm:$0xff]  ;;  %v1424_v43 = vrot.slane %v1422_v54, 1 }
 0x188   : > { %v2565_v52 = vpop.f32.mrf.mxu0  ;;  %5583 = vmatpush.bf16.msra.mxu1 %v11801_v44 }
 0x189   : > { %v2388_v50 = vadd.f32 %v2272_v35, %v1726_v19  ;;  %v2073_v19 = vrot.slane %v2071_v58, 4 }
 0x18a   : > { %v3199_v25 = vpop.f32.mrf.mxu1 }
 0x18b   : > { %1652 = vmatmul.bf16.gmra.mxu2 %v1417_v30  ;;  %2604 = vmatmul.bf16.gmra.mxu0 %v12644_v20  ;;  %v2678_v18 = vadd.f32 %v2562_v37, %v2388_v50  ;;  %v3004_v30 = vshrl.u32 %v14294_v32, 16  ;;  %v3008_v20 = vshll.u32 %v14316_v22, 16  ;;  %v1420_v50 = vor.u32 %v1418_v15, %v1416_v16  ;;  %v11782_v32 = vld [vmem:[%s16668_s1 + $0x218] sm:$0xff]  ;;  %v12645_v16 = vld [vmem:[%s13838_s16 + $0x68] sm:$0xff]  }
 0x18c   : > { %2314 = vmatmul.bf16.gmra.mxu3 %v2066_v12  ;;  %4770 = vmatpush.bf16.msra.mxu0 %v11782_v32 }
 0x18d   : > { %3238 = vmatmul.bf16.gmra.mxu1 %v3003_v0  ;;  %v14313_v53 = vadd.f32 %v3196_v26, %v2678_v18  ;;  %v2070_v26 = vrot.slane %v2068_v9, 3  ;;  %v3006_v18 = vor.u32 %v3004_v30, %v3002_v4  ;;  %v3010_v9 = vrot.slane %v3008_v20, 1  ;;  %v11720_v30 = vld [vmem:[%s13838_s16 + $0x78] sm:$0xff] }
 0x18e   : > { %v1613_v59 = vpop.f32.mrf.mxu2 }
 0x18f   : > { %v1727_v37 = vadd.f32 %v1613_v59, %v14072_v29  ;;  %v2275_v13 = vpop.f32.mrf.mxu3  ;;  %v2074_v0 = vor.u32 %v2073_v19, %v2070_v26  ;;  %v1425_v59 = vsel %vm1325_vm1, %v1420_v50, %v1424_v43  ;;  %v3011_v15 = vsel %vm1325_vm1, %v3006_v18, %v3010_v9 }
 0x190   : > { %v2567_v60 = vpop.f32.mrf.mxu0 }
 0x191   : > { %v2389_v5 = vadd.f32 %v2275_v13, %v1727_v37  ;;  %v2075_v4 = vsel %vm710_vm0, %v2065_v51, %v2074_v0  ;;  %v1426_v51 = vshrl.u32 %v14308_v48, 16 }
 0x192   : > { %v3201_v35 = vpop.f32.mrf.mxu1 }
 0x193   : > { %v2679_v29 = vadd.f32 %v2565_v52, %v2389_v5 }
 0x195   : > { %v14329_v12 = vadd.f32 %v3199_v25, %v2679_v29  ;;  %v13628_v25 = vld [vmem:[%s13838_s16 + $0x74] sm:$0xff]  }
 0x196   : > { %v1615_v40 = vpop.f32.mrf.mxu2  ;;  %v2077_v26 = vshrl.u32 %v13628_v25, 16  ;;  %v2080_v19 = vshll.u32 %v13628_v25, 16 }
 0x197   : > { %v1728_v58 = vadd.f32 %v1615_v40, %v14088_v47  ;;  %v2277_v49 = vpop.f32.mrf.mxu3  ;;  %v11672_v47 = vld [vmem:[%s13838_s16 + $0x6c] sm:$0xff] }
 0x198   : > { %v2570_v52 = vpop.f32.mrf.mxu0  ;;  %v1430_v32 = vshll.u32 %v11672_v47, 16  ;;  %v2079_v18 = vrot.slane %v2077_v26, 3 }
 0x199   : > { %v2390_v37 = vadd.f32 %v2277_v49, %v1728_v58  ;;  %v2082_v58 = vrot.slane %v2080_v19, 4  ;;  %v3012_v49 = vshrl.u32 %v14316_v22, 16  ;;  %v13630_v22 = vld [vmem:[%s13838_s16 + $0x7c] sm:$0xff]  }
 0x19a   : > { %v3204_v13 = vpop.f32.mrf.mxu1  ;;  %v1432_v25 = vrot.slane %v1430_v32, 1 }
 0x19b   : > { %1657 = vmatmul.bf16.gmra.mxu2 %v1425_v59  ;;  %2609 = vmatmul.bf16.gmra.mxu0 %v12645_v16  ;;  %v2680_v54 = vadd.f32 %v2567_v60, %v2390_v37  ;;  %v1428_v16 = vor.u32 %v1426_v51, %v1424_v43  ;;  %v14356_v51 = vld [vmem:[%s13838_s16 + $0x74] sm:$0xff] }
 0x19c   : > { %2319 = vmatmul.bf16.gmra.mxu3 %v2075_v4  ;;  %v3014_v4 = vor.u32 %v3012_v49, %v3010_v9 }
 0x19d   : > { %3243 = vmatmul.bf16.gmra.mxu1 %v3011_v15  ;;  %v14341_v5 = vadd.f32 %v3201_v35, %v2680_v54  ;;  %v3016_v35 = vshll.u32 %v11720_v30, 16 }
 0x19e   : > { %v1618_v20 = vpop.f32.mrf.mxu2 }
 0x19f   : > { %v1729_v44 = vadd.f32 %v1618_v20, %v14108_v7  ;;  %v2280_v29 = vpop.f32.mrf.mxu3  ;;  %v2083_v7 = vor.u32 %v2082_v58, %v2079_v18  ;;  %v3018_v15 = vrot.slane %v3016_v35, 1  ;;  %v1433_v20 = vsel %vm1325_vm1, %v1428_v16, %v1432_v25 }
 0x1a0   : > { %v2572_v50 = vpop.f32.mrf.mxu0  ;;  %v2089_v18 = vshll.u32 %v13630_v22, 16  ;;  %v1438_v16 = vshll.u32 %v14356_v51, 16 }
 0x1a1   : > { %v2391_v40 = vadd.f32 %v2280_v29, %v1729_v44  ;;  %v12646_v44 = vld [vmem:[%s13838_s16 + $0x70] sm:$0xff]   ;;  %v2084_v43 = vsel %vm710_vm0, %v2074_v0, %v2083_v7 }
 0x1a2   : > { %v3206_v60 = vpop.f32.mrf.mxu1 }
 0x1a3   : > { %v2681_v59 = vadd.f32 %v2570_v52, %v2391_v40  ;;  %v14361_v40 = vld [vmem:[%s13838_s16 + $0x80] sm:$0xff] }
 0x1a5   : > { %v14347_v37 = vadd.f32 %v3204_v13, %v2681_v59  ;;  %v3019_v13 = vsel %vm1325_vm1, %v3014_v4, %v3018_v15  ;;  %v1434_v59 = vshrl.u32 %v11672_v47, 16 }
 0x1a6   : > { %v1620_v54 = vpop.f32.mrf.mxu2 }
 0x1a7   : > { %v1730_v48 = vadd.f32 %v1620_v54, %v14117_v38  ;;  %v2282_v26 = vpop.f32.mrf.mxu3  ;;  %v2086_v38 = vshrl.u32 %v13630_v22, 16  ;;  %v2091_v54 = vrot.slane %v2089_v18, 4  ;;  %v1440_v22 = vrot.slane %v1438_v16, 1  ;;  %v11741_v16 = vld [vmem:[%s16668_s1 + $0x190] sm:$0xff] }
 0x1a8   : > { %v2575_v19 = vpop.f32.mrf.mxu0  ;;  %3847 = vmatpush.bf16.msra.mxu2 %v11741_v16 }
 0x1a9   : > { %v2392_v29 = vadd.f32 %v2282_v26, %v1730_v48  ;;  %v2088_v4 = vrot.slane %v2086_v38, 3  ;;  %v3020_v26 = vshrl.u32 %v11720_v30, 16  ;;  %v13632_v30 = vld [vmem:[%s13838_s16 + $0x84] sm:$0xff]  }
 0x1aa   : > { %v3209_v52 = vpop.f32.mrf.mxu1 }
 0x1ab   : > { %1662 = vmatmul.bf16.gmra.mxu2 %v1433_v20  ;;  %2614 = vmatmul.bf16.gmra.mxu0 %v12646_v44  ;;  %v2682_v9 = vadd.f32 %v2572_v50, %v2392_v29  ;;  %v1436_v44 = vor.u32 %v1434_v59, %v1432_v25  ;;  %v14375_v59 = vld [vmem:[%s13838_s16 + $0x7c] sm:$0xff] }
 0x1ac   : > { %2324 = vmatmul.bf16.gmra.mxu3 %v2084_v43  ;;  %v3022_v43 = vor.u32 %v3020_v26, %v3018_v15 }
 0x1ad   : > { %3248 = vmatmul.bf16.gmra.mxu1 %v3019_v13  ;;  %v14358_v32 = vadd.f32 %v3206_v60, %v2682_v9  ;;  %v3024_v60 = vshll.u32 %v14361_v40, 16 }
 0x1ae   : > { %v1623_v58 = vpop.f32.mrf.mxu2 }
 0x1af   : > { %v1731_v49 = vadd.f32 %v1623_v58, %v14125_v63  ;;  %v2285_v0 = vpop.f32.mrf.mxu3  ;;  %v2092_v63 = vor.u32 %v2091_v54, %v2088_v4  ;;  %v3026_v13 = vrot.slane %v3024_v60, 1  ;;  %v1441_v58 = vsel %vm1325_vm1, %v1436_v44, %v1440_v22  ;;  %v14383_v54 = vld [vmem:[%s13838_s16 + $0x88] sm:$0xff] }
 0x1b0   : > { %v2577_v35 = vpop.f32.mrf.mxu0  ;;  %v1442_v44 = vshrl.u32 %v14356_v51, 16 }
 0x1b1   : > { %v2393_v50 = vadd.f32 %v2285_v0, %v1731_v49  ;;  %v12647_v49 = vld [vmem:[%s13838_s16 + $0x78] sm:$0xff]   ;;  %v2093_v25 = vsel %vm710_vm0, %v2083_v7, %v2092_v63  ;;  %v11749_v7 = vld [vmem:[%s16668_s1 + $0x1d0] sm:$0xff] }
 0x1b2   : > { %v3211_v48 = vpop.f32.mrf.mxu1  ;;  %4137 = vmatpush.bf16.msra.mxu3 %v11749_v7 }
 0x1b3   : > { %v2683_v20 = vadd.f32 %v2575_v19, %v2393_v50  ;;  %v2098_v50 = vshll.u32 %v13632_v30, 16 }
 0x1b5   : > { %v14366_v29 = vadd.f32 %v3209_v52, %v2683_v20  ;;  %v3027_v52 = vsel %vm1325_vm1, %v3022_v43, %v3026_v13  ;;  %v1446_v43 = vshll.u32 %v14375_v59, 16 }
 0x1b6   : > { %v1625_v47 = vpop.f32.mrf.mxu2 }
 0x1b7   : > { %v1732_v9 = vadd.f32 %v1625_v47, %v14133_v23  ;;  %v2287_v38 = vpop.f32.mrf.mxu3  ;;  %v2095_v23 = vshrl.u32 %v13632_v30, 16  ;;  %v11800_v30 = vld [vmem:[%s16671_s4 + $0x68] sm:$0xff]  ;;  %v1448_v51 = vrot.slane %v1446_v43, 1 }
 0x1b8   : > { %v2580_v18 = vpop.f32.mrf.mxu0  ;;  %5584 = vmatpush.bf16.msra.mxu1 %v11800_v30 }
 0x1b9   : > { %v2394_v0 = vadd.f32 %v2287_v38, %v1732_v9  ;;  %v2100_v9 = vrot.slane %v2098_v50, 4 }
 0x1ba   : > { %v3214_v19 = vpop.f32.mrf.mxu1 }
 0x1bb   : > { %1667 = vmatmul.bf16.gmra.mxu2 %v1441_v58  ;;  %2619 = vmatmul.bf16.gmra.mxu0 %v12647_v49  ;;  %v2684_v15 = vadd.f32 %v2577_v35, %v2394_v0  ;;  %v3028_v58 = vshrl.u32 %v14361_v40, 16  ;;  %v3032_v49 = vshll.u32 %v14383_v54, 16  ;;  %v1444_v0 = vor.u32 %v1442_v44, %v1440_v22  ;;  %v11781_v40 = vld [vmem:[%s16668_s1 + $0x210] sm:$0xff]  ;;  %v12648_v22 = vld [vmem:[%s13838_s16 + $0x80] sm:$0xff]  }
 0x1bc   : > { %2329 = vmatmul.bf16.gmra.mxu3 %v2093_v25  ;;  %4771 = vmatpush.bf16.msra.mxu0 %v11781_v40 }
 0x1bd   : > { %3253 = vmatmul.bf16.gmra.mxu1 %v3027_v52  ;;  %v14380_v4 = vadd.f32 %v3211_v48, %v2684_v15  ;;  %v2097_v48 = vrot.slane %v2095_v23, 3  ;;  %v3030_v15 = vor.u32 %v3028_v58, %v3026_v13  ;;  %v3034_v23 = vrot.slane %v3032_v49, 1  ;;  %v11723_v58 = vld [vmem:[%s13838_s16 + $0x90] sm:$0xff] }
 0x1be   : > { %v1628_v26 = vpop.f32.mrf.mxu2 }
 0x1bf   : > { %v1733_v35 = vadd.f32 %v1628_v26, %v14141_v42  ;;  %v2290_v60 = vpop.f32.mrf.mxu3  ;;  %v2101_v52 = vor.u32 %v2100_v9, %v2097_v48  ;;  %v1449_v26 = vsel %vm1325_vm1, %v1444_v0, %v1448_v51  ;;  %v3035_v44 = vsel %vm1325_vm1, %v3030_v15, %v3034_v23 }
 0x1c0   : > { %v2582_v20 = vpop.f32.mrf.mxu0 }
 0x1c1   : > { %v2395_v47 = vadd.f32 %v2290_v60, %v1733_v35  ;;  %v2102_v13 = vsel %vm710_vm0, %v2092_v63, %v2101_v52  ;;  %v1450_v63 = vshrl.u32 %v14375_v59, 16 }
 0x1c2   : > { %v3216_v38 = vpop.f32.mrf.mxu1 }
 0x1c3   : > { %v2685_v42 = vadd.f32 %v2580_v18, %v2395_v47 }
 0x1c5   : > { %v14396_v25 = vadd.f32 %v3214_v19, %v2685_v42  ;;  %v13634_v19 = vld [vmem:[%s13838_s16 + $0x8c] sm:$0xff]  }
 0x1c6   : > { %v1630_v16 = vpop.f32.mrf.mxu2  ;;  %v2104_v48 = vshrl.u32 %v13634_v19, 16  ;;  %v2107_v9 = vshll.u32 %v13634_v19, 16 }
 0x1c7   : > { %v1734_v50 = vadd.f32 %v1630_v16, %v14154_v14  ;;  %v2292_v7 = vpop.f32.mrf.mxu3  ;;  %v11675_v14 = vld [vmem:[%s13838_s16 + $0x84] sm:$0xff] }
 0x1c8   : > { %v2585_v18 = vpop.f32.mrf.mxu0  ;;  %v1454_v40 = vshll.u32 %v11675_v14, 16  ;;  %v2106_v15 = vrot.slane %v2104_v48, 3 }
 0x1c9   : > { %v2396_v35 = vadd.f32 %v2292_v7, %v1734_v50  ;;  %v2109_v50 = vrot.slane %v2107_v9, 4  ;;  %v3036_v7 = vshrl.u32 %v14383_v54, 16  ;;  %v13636_v54 = vld [vmem:[%s13838_s16 + $0x94] sm:$0xff]  }
 0x1ca   : > { %v3219_v60 = vpop.f32.mrf.mxu1  ;;  %v1456_v19 = vrot.slane %v1454_v40, 1 }
 0x1cb   : > { %1672 = vmatmul.bf16.gmra.mxu2 %v1449_v26  ;;  %2624 = vmatmul.bf16.gmra.mxu0 %v12648_v22  ;;  %v2686_v43 = vadd.f32 %v2582_v20, %v2396_v35  ;;  %v1452_v22 = vor.u32 %v1450_v63, %v1448_v51  ;;  %v14423_v63 = vld [vmem:[%s13838_s16 + $0x8c] sm:$0xff] }
 0x1cc   : > { %2334 = vmatmul.bf16.gmra.mxu3 %v2102_v13  ;;  %v3038_v13 = vor.u32 %v3036_v7, %v3034_v23 }
 0x1cd   : > { %3258 = vmatmul.bf16.gmra.mxu1 %v3035_v44  ;;  %v14408_v47 = vadd.f32 %v3216_v38, %v2686_v43  ;;  %v3040_v38 = vshll.u32 %v11723_v58, 16 }
 0x1ce   : > { %v1633_v49 = vpop.f32.mrf.mxu2 }
 0x1cf   : > { %v1735_v30 = vadd.f32 %v1633_v49, %v14165_v34  ;;  %v2295_v42 = vpop.f32.mrf.mxu3  ;;  %v2110_v34 = vor.u32 %v2109_v50, %v2106_v15  ;;  %v3042_v44 = vrot.slane %v3040_v38, 1  ;;  %v1457_v49 = vsel %vm1325_vm1, %v1452_v22, %v1456_v19 }
 0x1d0   : > { %v2587_v0 = vpop.f32.mrf.mxu0  ;;  %v2116_v15 = vshll.u32 %v13636_v54, 16  ;;  %v1462_v22 = vshll.u32 %v14423_v63, 16 }
 0x1d1   : > { %v2397_v16 = vadd.f32 %v2295_v42, %v1735_v30  ;;  %v12649_v30 = vld [vmem:[%s13838_s16 + $0x88] sm:$0xff]   ;;  %v2111_v51 = vsel %vm710_vm0, %v2101_v52, %v2110_v34 }
 0x1d2   : > { %v3221_v20 = vpop.f32.mrf.mxu1 }
 0x1d3   : > { %v2687_v26 = vadd.f32 %v2585_v18, %v2397_v16  ;;  %v14428_v16 = vld [vmem:[%s13838_s16 + $0x98] sm:$0xff] }
 0x1d5   : > { %v14414_v35 = vadd.f32 %v3219_v60, %v2687_v26  ;;  %v3043_v60 = vsel %vm1325_vm1, %v3038_v13, %v3042_v44  ;;  %v1458_v26 = vshrl.u32 %v11675_v14, 16 }
 0x1d6   : > { %v1635_v43 = vpop.f32.mrf.mxu2 }
 0x1d7   : > { %v1736_v59 = vadd.f32 %v1635_v43, %v14172_v27  ;;  %v2297_v48 = vpop.f32.mrf.mxu3  ;;  %v2113_v27 = vshrl.u32 %v13636_v54, 16  ;;  %v2118_v43 = vrot.slane %v2116_v15, 4  ;;  %v1464_v54 = vrot.slane %v1462_v22, 1  ;;  %v11740_v22 = vld [vmem:[%s16668_s1 + $0x188] sm:$0xff] }
 0x1d8   : > { %v2590_v9 = vpop.f32.mrf.mxu0  ;;  %3848 = vmatpush.bf16.msra.mxu2 %v11740_v22 }
 0x1d9   : > { %v2398_v42 = vadd.f32 %v2297_v48, %v1736_v59  ;;  %v2115_v13 = vrot.slane %v2113_v27, 3  ;;  %v3044_v48 = vshrl.u32 %v11723_v58, 16  ;;  %v13638_v58 = vld [vmem:[%s13838_s16 + $0x9c] sm:$0xff]  }
 0x1da   : > { %v3224_v18 = vpop.f32.mrf.mxu1 }
 0x1db   : > { %1677 = vmatmul.bf16.gmra.mxu2 %v1457_v49  ;;  %2629 = vmatmul.bf16.gmra.mxu0 %v12649_v30  ;;  %v2688_v23 = vadd.f32 %v2587_v0, %v2398_v42  ;;  %v1460_v30 = vor.u32 %v1458_v26, %v1456_v19  ;;  %v14442_v26 = vld [vmem:[%s13838_s16 + $0x94] sm:$0xff] }
 0x1dc   : > { %2339 = vmatmul.bf16.gmra.mxu3 %v2111_v51  ;;  %v3046_v51 = vor.u32 %v3044_v48, %v3042_v44 }
 0x1dd   : > { %3263 = vmatmul.bf16.gmra.mxu1 %v3043_v60  ;;  %v14425_v40 = vadd.f32 %v3221_v20, %v2688_v23  ;;  %v3048_v20 = vshll.u32 %v14428_v16, 16 }
 0x1de   : > { %v1638_v50 = vpop.f32.mrf.mxu2 }
 0x1df   : > { %v1737_v7 = vadd.f32 %v1638_v50, %v14180_v17  ;;  %v2300_v52 = vpop.f32.mrf.mxu3  ;;  %v2119_v17 = vor.u32 %v2118_v43, %v2115_v13  ;;  %v3050_v60 = vrot.slane %v3048_v20, 1  ;;  %v1465_v50 = vsel %vm1325_vm1, %v1460_v30, %v1464_v54  ;;  %v14450_v43 = vld [vmem:[%s13838_s16 + $0xa0] sm:$0xff] }
 0x1e0   : > { %v2592_v38 = vpop.f32.mrf.mxu0  ;;  %v1466_v30 = vshrl.u32 %v14423_v63, 16 }
 0x1e1   : > { %v2399_v0 = vadd.f32 %v2300_v52, %v1737_v7  ;;  %v12650_v7 = vld [vmem:[%s13838_s16 + $0x90] sm:$0xff]   ;;  %v2120_v19 = vsel %vm710_vm0, %v2110_v34, %v2119_v17  ;;  %v11748_v34 = vld [vmem:[%s16668_s1 + $0x1c8] sm:$0xff] }
 0x1e2   : > { %v3226_v59 = vpop.f32.mrf.mxu1  ;;  %4138 = vmatpush.bf16.msra.mxu3 %v11748_v34 }
 0x1e3   : > { %v2689_v49 = vadd.f32 %v2590_v9, %v2399_v0  ;;  %v2125_v0 = vshll.u32 %v13638_v58, 16 }
 0x1e5   : > { %v14433_v42 = vadd.f32 %v3224_v18, %v2689_v49  ;;  %v3051_v18 = vsel %vm1325_vm1, %v3046_v51, %v3050_v60  ;;  %v1470_v51 = vshll.u32 %v14442_v26, 16 }
 0x1e6   : > { %v1640_v14 = vpop.f32.mrf.mxu2 }
 0x1e7   : > { %v1738_v23 = vadd.f32 %v1640_v14, %v14187_v46  ;;  %v2302_v27 = vpop.f32.mrf.mxu3  ;;  %v2122_v46 = vshrl.u32 %v13638_v58, 16  ;;  %v11799_v58 = vld [vmem:[%s16671_s4 + $0x60] sm:$0xff]  ;;  %v1472_v63 = vrot.slane %v1470_v51, 1 }
 0x1e8   : > { %v2595_v15 = vpop.f32.mrf.mxu0  ;;  %5585 = vmatpush.bf16.msra.mxu1 %v11799_v58 }
 0x1e9   : > { %v2400_v52 = vadd.f32 %v2302_v27, %v1738_v23  ;;  %v2127_v23 = vrot.slane %v2125_v0, 4 }
 0x1ea   : > { %v3229_v9 = vpop.f32.mrf.mxu1 }
 0x1eb   : > { %1682 = vmatmul.bf16.gmra.mxu2 %v1465_v50  ;;  %2634 = vmatmul.bf16.gmra.mxu0 %v12650_v7  ;;  %v2690_v44 = vadd.f32 %v2592_v38, %v2400_v52  ;;  %v3052_v50 = vshrl.u32 %v14428_v16, 16  ;;  %v3056_v7 = vshll.u32 %v14450_v43, 16  ;;  %v1468_v52 = vor.u32 %v1466_v30, %v1464_v54  ;;  %v11780_v16 = vld [vmem:[%s16668_s1 + $0x208] sm:$0xff]  ;;  %v12651_v54 = vld [vmem:[%s13838_s16 + $0x98] sm:$0xff]  }
 0x1ec   : > { %2344 = vmatmul.bf16.gmra.mxu3 %v2120_v19  ;;  %4772 = vmatpush.bf16.msra.mxu0 %v11780_v16 }
 0x1ed   : > { %3268 = vmatmul.bf16.gmra.mxu1 %v3051_v18  ;;  %v14447_v13 = vadd.f32 %v3226_v59, %v2690_v44  ;;  %v2124_v59 = vrot.slane %v2122_v46, 3  ;;  %v3054_v44 = vor.u32 %v3052_v50, %v3050_v60  ;;  %v3058_v46 = vrot.slane %v3056_v7, 1  ;;  %v11726_v50 = vld [vmem:[%s13838_s16 + $0xa8] sm:$0xff] }
 0x1ee   : > { %v1643_v48 = vpop.f32.mrf.mxu2 }
 0x1ef   : > { %v1739_v38 = vadd.f32 %v1643_v48, %v14195_v3  ;;  %v2305_v20 = vpop.f32.mrf.mxu3  ;;  %v2128_v18 = vor.u32 %v2127_v23, %v2124_v59  ;;  %v1473_v48 = vsel %vm1325_vm1, %v1468_v52, %v1472_v63  ;;  %v3059_v30 = vsel %vm1325_vm1, %v3054_v44, %v3058_v46 }
 0x1f0   : > { %v2597_v49 = vpop.f32.mrf.mxu0 }
 0x1f1   : > { %v2401_v14 = vadd.f32 %v2305_v20, %v1739_v38  ;;  %v2129_v60 = vsel %vm710_vm0, %v2119_v17, %v2128_v18  ;;  %v1474_v17 = vshrl.u32 %v14442_v26, 16 }
 0x1f2   : > { %v3231_v27 = vpop.f32.mrf.mxu1 }
 0x1f3   : > { %v2691_v3 = vadd.f32 %v2595_v15, %v2401_v14 }
 0x1f5   : > { %v14463_v19 = vadd.f32 %v3229_v9, %v2691_v3  ;;  %v13640_v9 = vld [vmem:[%s13838_s16 + $0xa4] sm:$0xff]  }
 0x1f6   : > { %v1645_v22 = vpop.f32.mrf.mxu2  ;;  %v2131_v59 = vshrl.u32 %v13640_v9, 16  ;;  %v2134_v23 = vshll.u32 %v13640_v9, 16 }
 0x1f7   : > { %v1740_v0 = vadd.f32 %v1645_v22, %v14208_v61  ;;  %v2307_v34 = vpop.f32.mrf.mxu3  ;;  %v11678_v61 = vld [vmem:[%s13838_s16 + $0x9c] sm:$0xff] }
 0x1f8   : > { %v2600_v15 = vpop.f32.mrf.mxu0  ;;  %v1478_v16 = vshll.u32 %v11678_v61, 16  ;;  %v2133_v44 = vrot.slane %v2131_v59, 3 }
 0x1f9   : > { %v2402_v38 = vadd.f32 %v2307_v34, %v1740_v0  ;;  %v2136_v0 = vrot.slane %v2134_v23, 4  ;;  %v3060_v34 = vshrl.u32 %v14450_v43, 16  ;;  %v13642_v43 = vld [vmem:[%s13838_s16 + $0xac] sm:$0xff]  }
 0x1fa   : > { %v3234_v20 = vpop.f32.mrf.mxu1  ;;  %v1480_v9 = vrot.slane %v1478_v16, 1 }
 0x1fb   : > { %1687 = vmatmul.bf16.gmra.mxu2 %v1473_v48  ;;  %2639 = vmatmul.bf16.gmra.mxu0 %v12651_v54  ;;  %v2692_v51 = vadd.f32 %v2597_v49, %v2402_v38  ;;  %v1476_v54 = vor.u32 %v1474_v17, %v1472_v63  ;;  %v14490_v17 = vld [vmem:[%s13838_s16 + $0xa4] sm:$0xff] }
 0x1fc   : > { %2349 = vmatmul.bf16.gmra.mxu3 %v2129_v60  ;;  %v3062_v60 = vor.u32 %v3060_v34, %v3058_v46 }
 0x1fd   : > { %3273 = vmatmul.bf16.gmra.mxu1 %v3059_v30  ;;  %v14475_v14 = vadd.f32 %v3231_v27, %v2692_v51  ;;  %v3064_v27 = vshll.u32 %v11726_v50, 16 }
 0x1fe   : > { %v1648_v7 = vpop.f32.mrf.mxu2 }
 0x1ff   : > { %v1741_v58 = vadd.f32 %v1648_v7, %v14220_v41  ;;  %v2310_v3 = vpop.f32.mrf.mxu3  ;;  %v2137_v41 = vor.u32 %v2136_v0, %v2133_v44  ;;  %v3066_v30 = vrot.slane %v3064_v27, 1  ;;  %v1481_v7 = vsel %vm1325_vm1, %v1476_v54, %v1480_v9 }
 0x200   : > { %v2602_v52 = vpop.f32.mrf.mxu0  ;;  %v2143_v44 = vshll.u32 %v13642_v43, 16  ;;  %v1486_v54 = vshll.u32 %v14490_v17, 16 }
 0x201   : > { %v2403_v22 = vadd.f32 %v2310_v3, %v1741_v58  ;;  %v12652_v58 = vld [vmem:[%s13838_s16 + $0xa0] sm:$0xff]   ;;  %v2138_v63 = vsel %vm710_vm0, %v2128_v18, %v2137_v41 }
 0x202   : > { %v3236_v49 = vpop.f32.mrf.mxu1 }
 0x203   : > { %v2693_v48 = vadd.f32 %v2600_v15, %v2403_v22  ;;  %v14495_v22 = vld [vmem:[%s13838_s16 + $0xb0] sm:$0xff] }
 0x205   : > { %v14481_v38 = vadd.f32 %v3234_v20, %v2693_v48  ;;  %v3067_v20 = vsel %vm1325_vm1, %v3062_v60, %v3066_v30  ;;  %v1482_v48 = vshrl.u32 %v11678_v61, 16 }
 0x206   : > { %v1650_v51 = vpop.f32.mrf.mxu2 }
 0x207   : > { %v1742_v26 = vadd.f32 %v1650_v51, %v14226_v10  ;;  %v2312_v59 = vpop.f32.mrf.mxu3  ;;  %v2140_v10 = vshrl.u32 %v13642_v43, 16  ;;  %v2145_v51 = vrot.slane %v2143_v44, 4  ;;  %v1488_v43 = vrot.slane %v1486_v54, 1  ;;  %v11739_v54 = vld [vmem:[%s16668_s1 + $0x180] sm:$0xff] }
 0x208   : > { %v2605_v23 = vpop.f32.mrf.mxu0  ;;  %3849 = vmatpush.bf16.msra.mxu2 %v11739_v54 }
 0x209   : > { %v2404_v3 = vadd.f32 %v2312_v59, %v1742_v26  ;;  %v2142_v60 = vrot.slane %v2140_v10, 3  ;;  %v3068_v59 = vshrl.u32 %v11726_v50, 16  ;;  %v13644_v50 = vld [vmem:[%s13838_s16 + $0xb4] sm:$0xff]  }
 0x20a   : > { %v3239_v15 = vpop.f32.mrf.mxu1 }
 0x20b   : > { %1692 = vmatmul.bf16.gmra.mxu2 %v1481_v7  ;;  %2644 = vmatmul.bf16.gmra.mxu0 %v12652_v58  ;;  %v2694_v46 = vadd.f32 %v2602_v52, %v2404_v3  ;;  %v1484_v58 = vor.u32 %v1482_v48, %v1480_v9  ;;  %v14509_v48 = vld [vmem:[%s13838_s16 + $0xac] sm:$0xff] }
 0x20c   : > { %2354 = vmatmul.bf16.gmra.mxu3 %v2138_v63  ;;  %v3070_v63 = vor.u32 %v3068_v59, %v3066_v30 }
 0x20d   : > { %3278 = vmatmul.bf16.gmra.mxu1 %v3067_v20  ;;  %v14492_v16 = vadd.f32 %v3236_v49, %v2694_v46  ;;  %v3072_v49 = vshll.u32 %v14495_v22, 16 }
 0x20e   : > { %v1653_v0 = vpop.f32.mrf.mxu2 }
 0x20f   : > { %v1743_v34 = vadd.f32 %v1653_v0, %v14235_v8  ;;  %v2315_v18 = vpop.f32.mrf.mxu3  ;;  %v2146_v8 = vor.u32 %v2145_v51, %v2142_v60  ;;  %v3074_v20 = vrot.slane %v3072_v49, 1  ;;  %v1489_v0 = vsel %vm1325_vm1, %v1484_v58, %v1488_v43  ;;  %v14517_v51 = vld [vmem:[%s13838_s16 + $0xb8] sm:$0xff] }
 0x210   : > { %v2607_v27 = vpop.f32.mrf.mxu0  ;;  %v1490_v58 = vshrl.u32 %v14490_v17, 16 }
 0x211   : > { %v2405_v52 = vadd.f32 %v2315_v18, %v1743_v34  ;;  %v12653_v34 = vld [vmem:[%s13838_s16 + $0xa8] sm:$0xff]   ;;  %v2147_v9 = vsel %vm710_vm0, %v2137_v41, %v2146_v8  ;;  %v11747_v41 = vld [vmem:[%s16668_s1 + $0x1c0] sm:$0xff] }
 0x212   : > { %v3241_v26 = vpop.f32.mrf.mxu1  ;;  %4139 = vmatpush.bf16.msra.mxu3 %v11747_v41 }
 0x213   : > { %v2695_v7 = vadd.f32 %v2605_v23, %v2405_v52  ;;  %v2152_v52 = vshll.u32 %v13644_v50, 16 }
 0x215   : > { %v14500_v3 = vadd.f32 %v3239_v15, %v2695_v7  ;;  %v3075_v15 = vsel %vm1325_vm1, %v3070_v63, %v3074_v20  ;;  %v1494_v63 = vshll.u32 %v14509_v48, 16 }
 0x216   : > { %v1655_v61 = vpop.f32.mrf.mxu2 }
 0x217   : > { %v1744_v46 = vadd.f32 %v1655_v61, %v14241_v56  ;;  %v2317_v10 = vpop.f32.mrf.mxu3  ;;  %v2149_v56 = vshrl.u32 %v13644_v50, 16  ;;  %v11798_v50 = vld [vmem:[%s16671_s4 + $0x58] sm:$0xff]  ;;  %v1496_v17 = vrot.slane %v1494_v63, 1 }
 0x218   : > { %v2610_v44 = vpop.f32.mrf.mxu0  ;;  %5586 = vmatpush.bf16.msra.mxu1 %v11798_v50 }
 0x219   : > { %v2406_v18 = vadd.f32 %v2317_v10, %v1744_v46  ;;  %v2154_v46 = vrot.slane %v2152_v52, 4 }
 0x21a   : > { %v3244_v23 = vpop.f32.mrf.mxu1 }
 0x21b   : > { %1697 = vmatmul.bf16.gmra.mxu2 %v1489_v0  ;;  %2649 = vmatmul.bf16.gmra.mxu0 %v12653_v34  ;;  %v2696_v30 = vadd.f32 %v2607_v27, %v2406_v18  ;;  %v3076_v0 = vshrl.u32 %v14495_v22, 16  ;;  %v3080_v34 = vshll.u32 %v14517_v51, 16  ;;  %v1492_v18 = vor.u32 %v1490_v58, %v1488_v43  ;;  %v11779_v22 = vld [vmem:[%s16668_s1 + $0x200] sm:$0xff]  ;;  %v12654_v43 = vld [vmem:[%s13838_s16 + $0xb0] sm:$0xff]  }
 0x21c   : > { %2359 = vmatmul.bf16.gmra.mxu3 %v2147_v9  ;;  %4773 = vmatpush.bf16.msra.mxu0 %v11779_v22 }
 0x21d   : > { %3283 = vmatmul.bf16.gmra.mxu1 %v3075_v15  ;;  %v14514_v60 = vadd.f32 %v3241_v26, %v2696_v30  ;;  %v2151_v26 = vrot.slane %v2149_v56, 3  ;;  %v3078_v30 = vor.u32 %v3076_v0, %v3074_v20  ;;  %v3082_v56 = vrot.slane %v3080_v34, 1  ;;  %v11729_v0 = vld [vmem:[%s13838_s16 + $0xc0] sm:$0xff] }
 0x21e   : > { %v1658_v59 = vpop.f32.mrf.mxu2 }
 0x21f   : > { %v1745_v27 = vadd.f32 %v1658_v59, %v14250_v36  ;;  %v2320_v49 = vpop.f32.mrf.mxu3  ;;  %v2155_v15 = vor.u32 %v2154_v46, %v2151_v26  ;;  %v1497_v59 = vsel %vm1325_vm1, %v1492_v18, %v1496_v17  ;;  %v3083_v58 = vsel %vm1325_vm1, %v3078_v30, %v3082_v56 }
 0x220   : > { %v2612_v7 = vpop.f32.mrf.mxu0 }
 0x221   : > { %v2407_v61 = vadd.f32 %v2320_v49, %v1745_v27  ;;  %v2156_v20 = vsel %vm710_vm0, %v2146_v8, %v2155_v15  ;;  %v1498_v8 = vshrl.u32 %v14509_v48, 16 }
 0x222   : > { %v3246_v10 = vpop.f32.mrf.mxu1 }
 0x223   : > { %v2697_v36 = vadd.f32 %v2610_v44, %v2407_v61 }
 0x225   : > { %v14530_v9 = vadd.f32 %v3244_v23, %v2697_v36  ;;  %v13646_v23 = vld [vmem:[%s13838_s16 + $0xbc] sm:$0xff]  }
 0x226   : > { %v1660_v54 = vpop.f32.mrf.mxu2  ;;  %v2158_v26 = vshrl.u32 %v13646_v23, 16  ;;  %v2161_v46 = vshll.u32 %v13646_v23, 16 }
 0x227   : > { %v1746_v52 = vadd.f32 %v1660_v54, %v14265_v31  ;;  %v2322_v41 = vpop.f32.mrf.mxu3  ;;  %v11681_v31 = vld [vmem:[%s13838_s16 + $0xb4] sm:$0xff] }
 0x228   : > { %v2615_v44 = vpop.f32.mrf.mxu0  ;;  %v1502_v22 = vshll.u32 %v11681_v31, 16  ;;  %v2160_v30 = vrot.slane %v2158_v26, 3 }
 0x229   : > { %v2408_v27 = vadd.f32 %v2322_v41, %v1746_v52  ;;  %v2163_v52 = vrot.slane %v2161_v46, 4  ;;  %v3088_v41 = vshll.u32 %v11729_v0, 16 }
 0x22a   : > { %v3249_v49 = vpop.f32.mrf.mxu1  ;;  %v1504_v23 = vrot.slane %v1502_v22, 1 }
 0x22b   : > { %1702 = vmatmul.bf16.gmra.mxu2 %v1497_v59  ;;  %2654 = vmatmul.bf16.gmra.mxu0 %v12654_v43  ;;  %v2698_v63 = vadd.f32 %v2612_v7, %v2408_v27  ;;  %v1500_v43 = vor.u32 %v1498_v8, %v1496_v17 }
 0x22c   : > { %2364 = vmatmul.bf16.gmra.mxu3 %v2156_v20 }
 0x22d   : > { %3288 = vmatmul.bf16.gmra.mxu1 %v3083_v58  ;;  %v14542_v61 = vadd.f32 %v3246_v10, %v2698_v63  ;;  %v3084_v10 = vshrl.u32 %v14517_v51, 16  ;;  %v3090_v58 = vrot.slane %v3088_v41, 1  ;;  %v13647_v51 = vld [vmem:[%s13838_s16 + $0xc4] sm:$0xff]   ;;  %v1506_v41 = vshrl.u32 %v11681_v31, 16 }
 0x22e   : > { %v1663_v34 = vpop.f32.mrf.mxu2  ;;  %v2167_v8 = vshrl.u32 %v13647_v51, 16  ;;  %v2170_v22 = vshll.u32 %v13647_v51, 16 }
 0x22f   : > { %v1747_v50 = vadd.f32 %v1663_v34, %v14022_v28  ;;  %v2325_v36 = vpop.f32.mrf.mxu3  ;;  %v2164_v28 = vor.u32 %v2163_v52, %v2160_v30  ;;  %v3086_v20 = vor.u32 %v3084_v10, %v3082_v56  ;;  %v1505_v34 = vsel %vm1325_vm1, %v1500_v43, %v1504_v23  ;;  %v14564_v30 = vld [vmem:[%s13838_s16 + $0xc8] sm:$0xff] }
 0x230   : > { %v2617_v18 = vpop.f32.mrf.mxu0 }
 0x231   : > { %v2409_v54 = vadd.f32 %v2325_v36, %v1747_v50  ;;  %v12655_v50 = vld [vmem:[%s13838_s16 + $0xb8] sm:$0xff]   ;;  %v2165_v17 = vsel %vm710_vm0, %v2155_v15, %v2164_v28 }
 0x232   : > { %v14547_v7 = vpop.f32.mrf.mxu1 }
 0x233   : > { %16690 = vst [vmem:[#allocation17_spill] sm:$0xff] %v14547_v7  ;;  %v2699_v59 = vadd.f32 %v2615_v44, %v2409_v54 }
 0x235   : > { %v14550_v27 = vadd.f32 %v3249_v49, %v2699_v59  ;;  %v3091_v49 = vsel %vm1325_vm1, %v3086_v20, %v3090_v58  ;;  %v2172_v20 = vrot.slane %v2170_v22, 4 }
 0x236   : > { %v1665_v48 = vpop.f32.mrf.mxu2 }
 0x237   : > { %v1748_v63 = vadd.f32 %v1665_v48, %v14034_v45  ;;  %v2327_v26 = vpop.f32.mrf.mxu3  ;;  %v14561_v45 = vld [vmem:[%s13838_s16 + $0xbc] sm:$0xff] }
 0x238   : > { %v2620_v46 = vpop.f32.mrf.mxu0  ;;  %v1510_v59 = vshll.u32 %v14561_v45, 16 }
 0x239   : > { %v2410_v36 = vadd.f32 %v2327_v26, %v1748_v63  ;;  %v3092_v63 = vshrl.u32 %v11729_v0, 16  ;;  %v3096_v26 = vshll.u32 %v14564_v30, 16 }
 0x23a   : > { %v3254_v44 = vpop.f32.mrf.mxu1  ;;  %v1512_v51 = vrot.slane %v1510_v59, 1 }
 0x23b   : > { %1707 = vmatmul.bf16.gmra.mxu2 %v1505_v34  ;;  %2659 = vmatmul.bf16.gmra.mxu0 %v12655_v50  ;;  %v14558_v56 = vadd.f32 %v2617_v18, %v2410_v36  ;;  %v2169_v18 = vrot.slane %v2167_v8, 3  ;;  %v14572_v34 = vld [vmem:[%s13838_s16 + $0xc8] sm:$0xff]   ;;  %v3098_v8 = vrot.slane %v3096_v26, 1 }
 0x23c   : > { %2369 = vmatmul.bf16.gmra.mxu3 %v2165_v17  ;;  %v12118_v31 = vunpack.c.h.b16 %v14572_v34 }
 0x23d   : > { %16691 = vst [vmem:[#allocation18_spill] sm:$0xff] %v14558_v56  ;;  %3293 = vmatmul.bf16.gmra.mxu1 %v3091_v49  ;;  %v2173_v17 = vor.u32 %v2172_v20, %v2169_v18  ;;  %v3094_v49 = vor.u32 %v3092_v63, %v3090_v58  ;;  %v12656_v56 = vld [vmem:[%s13838_s16 + $0xc0] sm:$0xff]  }
 0x23e   : > { %v1668_v54 = vpop.f32.mrf.mxu2 }
 0x23f   : > { %v1749_v52 = vadd.f32 %v1668_v54, %v14055_v1  ;;  %v2330_v15 = vpop.f32.mrf.mxu3  ;;  %v1508_v1 = vor.u32 %v1506_v41, %v1504_v23  ;;  %v1184_v54 = vld [vmem:[%s13838_s16 + $0xc4] sm:$0x1]  ;;  %v1959_v23 = vpack.c.b16 %v12118_v31, %v12118_v31  ;;  %v2174_v59 = vsel %vm710_vm0, %v2164_v28, %v2173_v17 }
 0x240   : > { %v2622_v10 = vpop.f32.mrf.mxu0  ;;  %v3099_v18 = vsel %vm1325_vm1, %v3094_v49, %v3098_v8  ;;  %v1514_v31 = vshrl.u32 %v14561_v45, 16 }
 0x241   : > { %v2411_v43 = vadd.f32 %v2330_v15, %v1749_v52  ;;  %v2771_v52 = vld [vmem:[%s13838_s16 + $0xd0] sm:$0x1]  ;;  %v1513_v7 = vsel %vm1325_vm1, %v1508_v1, %v1512_v51  ;;  %v2176_v20 = vshrl.u32 %v1959_v23, 16  ;;  %v2179_v63 = vshll.u32 %v1959_v23, 16 }
 0x242   : > { %v14568_v48 = vpop.f32.mrf.mxu1  ;;  %v2886_v58 = vunpack.c.l.b16 %v2771_v52 }
 0x243   : > { %16692 = vst [vmem:[#allocation19_spill] sm:$0xff] %v14568_v48  ;;  %v2701_v50 = vadd.f32 %v2620_v46, %v2411_v43  ;;  %v1299_v46 = vunpack.c.l.b16 %v1184_v54  ;;  %v2181_v52 = vrot.slane %v2179_v63, 4 }
 0x244   : > { %v2911_v26 = vpack.c.b16 %v2886_v58, %v2886_v58 }
 0x245   : > { %v14575_v36 = vadd.f32 %v3254_v44, %v2701_v50 }
 0x246   : > { %v1670_v22 = vpop.f32.mrf.mxu2 }
 0x247   : > { %v1750_v0 = vadd.f32 %v1670_v22, %v14068_v21  ;;  %v2332_v15 = vpop.f32.mrf.mxu3  ;;  %v1324_v21 = vpack.c.b16 %v1299_v46, %v1299_v46  ;;  %v3357_v22 = vld [vmem:[%s13838_s16 + $0x18] sm:$0x8]  ;;  %v3104_v46 = vshll.u32 %v2911_v26, 16 }
 0x248   : > { %v2625_v48 = vpop.f32.mrf.mxu0  ;;  %v3472_v45 = vunpack.c.l.b16 %v3357_v22  ;;  %v11755_v22 = vld [vmem:[%s13838_s16 + $0x1c] sm:$0xff] }
 0x249   : > { %v2412_v41 = vadd.f32 %v2332_v15, %v1750_v0  ;;  %v1518_v54 = vshll.u32 %v1324_v21, 16  ;;  %v3100_v15 = vshrl.u32 %v14564_v30, 16  ;;  %v3106_v63 = vrot.slane %v3104_v46, 1 }
 0x24a   : > { %v3259_v44 = vpop.f32.mrf.mxu1  ;;  %v4501_v46 = vshll.u32 %v11755_v22, 16 }
 0x24b   : > { %1712 = vmatmul.bf16.gmra.mxu2 %v1513_v7  ;;  %2664 = vmatmul.bf16.gmra.mxu0 %v12656_v56  ;;  %v14584_v43 = vadd.f32 %v2622_v10, %v2412_v41  ;;  %v2178_v7 = vrot.slane %v2176_v20, 3  ;;  %v14590_v56 = vld [vmem:[%s13838_s16 + $0x1c] sm:$0xf]  ;;  %v3102_v20 = vor.u32 %v3100_v15, %v3098_v8  ;;  %v11756_v15 = vld [vmem:[%s13838_s16 + $0x24] sm:$0xff] }
 0x24c   : > { %2374 = vmatmul.bf16.gmra.mxu3 %v2174_v59  ;;  %v3473_v41 = vunpack.c.l.b16 %v14590_v56  ;;  %v1516_v59 = vor.u32 %v1514_v31, %v1512_v51 }
 0x24d   : > { %3298 = vmatmul.bf16.gmra.mxu1 %v3099_v18  ;;  %v1520_v18 = vrot.slane %v1518_v54, 1  ;;  %v2182_v21 = vor.u32 %v2181_v52, %v2178_v7  ;;  %v12658_v54 = vld [vmem:[%s13838_s16 + $0x20] sm:$0xff]  }
 0x24e   : > { %v1673_v50 = vpop.f32.mrf.mxu2  ;;  %v3558_v52 = vshll.u32 %v12658_v54, 16 }
 0x24f   : > { %v1751_v1 = vadd.f32 %v1673_v50, %v14086_v39  ;;  %v2335_v28 = vpop.f32.mrf.mxu3  ;;  %v11797_v39 = vld [vmem:[%s16671_s4 + $0x50] sm:$0xff]  ;;  %v2183_v51 = vsel %vm710_vm0, %v2173_v17, %v2182_v21 }
 0x250   : > { %v2627_v49 = vpop.f32.mrf.mxu0  ;;  %5587 = vmatpush.bf16.msra.mxu1 %v11797_v39 }
 0x251   : > { %v2413_v10 = vadd.f32 %v2335_v28, %v1751_v1  ;;  %v3521_v1 = vpack.c.b16 %v3473_v41, %v3472_v45 }
 0x252   : > { %v14592_v0 = vpop.f32.mrf.mxu1 }
 0x253   : > { %v2703_v23 = vadd.f32 %v2625_v48, %v2413_v10  ;;  %v1521_v48 = vsel %vm1325_vm1, %v1516_v59, %v1520_v18  ;;  %v3550_v7 = vshll.u32 %v3521_v1, 16  ;;  %v3555_v10 = vshrl.u32 %v12658_v54, 16 }
 0x254   : > { %v4499_v18 = vshrl.u32 %v11755_v22, 16 }
 0x255   : > { %v14599_v58 = vadd.f32 %v3259_v44, %v2703_v23  ;;  %v3107_v44 = vsel %vm1325_vm1, %v3102_v20, %v3106_v63  ;;  %v3552_v59 = vrot.slane %v3550_v7, 4  ;;  %v3557_v20 = vrot.slane %v3555_v10, 3 }
 0x256   : > { %v1675_v30 = vpop.f32.mrf.mxu2  ;;  %v4506_v63 = vshll.u32 %v11756_v15, 16 }
 0x257   : > { %v1752_v26 = vadd.f32 %v1675_v30, %v14101_v62  ;;  %v2337_v50 = vpop.f32.mrf.mxu3  ;;  %v3547_v62 = vshrl.u32 %v3521_v1, 16  ;;  %v12121_v1 = vunpack.c.l.b16 %v12658_v54  ;;  %v12659_v54 = vld [vmem:[%s13838_s16 + $0x28] sm:$0xff]  }
 0x258   : > { %v2630_v28 = vpop.f32.mrf.mxu0 }
 0x259   : > { %v2414_v56 = vadd.f32 %v2337_v50, %v1752_v26  ;;  %v3549_v45 = vrot.slane %v3547_v62, 3 }
 0x25a   : > { %v3264_v31 = vpop.f32.mrf.mxu1 }
 0x25b   : > { %1717 = vmatmul.bf16.gmra.mxu2 %v1521_v48  ;;  %2669 = vmatmul.bf16.gmra.mxu0 %v14572_v34  ;;  %v14608_v8 = vadd.f32 %v2627_v49, %v2414_v56  ;;  %v3560_v34 = vrot.slane %v3558_v52, 4  ;;  %v4503_v49 = vrot.slane %v4501_v46, 1  ;;  %v3553_v48 = vor.u32 %v3552_v59, %v3549_v45  ;;  %v11757_v59 = vld [vmem:[%s13838_s16 + $0x2c] sm:$0xff] }
 0x25c   : > { %2379 = vmatmul.bf16.gmra.mxu3 %v2183_v51  ;;  %v4036_v46 = vpack.c.b16 %v12121_v1, %v3473_v41  ;;  %v3567_v45 = vshll.u32 %v12659_v54, 16 }
 0x25d   : > { %3303 = vmatmul.bf16.gmra.mxu1 %v3107_v44  ;;  %v3561_v56 = vor.u32 %v3560_v34, %v3557_v20  ;;  %v4504_v51 = vor.u32 %v4503_v49, %v4499_v18  ;;  %v4508_v44 = vrot.slane %v4506_v63, 1  ;;  %v4510_v63 = vshrl.u32 %v11756_v15, 16  ;;  %v13226_v15 = vld [vmem:[%s13838_s16 + $0x24] sm:$0xff]  }
 0x25e   : > { %v1678_v39 = vpop.f32.mrf.mxu2  ;;  %v3569_v41 = vrot.slane %v3567_v45, 4  ;;  %v12660_v45 = vld [vmem:[%s13838_s16 + $0x30] sm:$0xff]  }
 0x25f   : > { %v1753_v17 = vadd.f32 %v1678_v39, %v14115_v24  ;;  %v2340_v23 = vpop.f32.mrf.mxu3  ;;  %v3562_v52 = vsel %vm710_vm0, %v3553_v48, %v3561_v56  ;;  %v4509_v39 = vsel %vm1325_vm1, %v4504_v51, %v4508_v44  ;;  %v4512_v51 = vor.u32 %v4510_v63, %v4508_v44 }
 0x260   : > { %v2632_v21 = vpop.f32.mrf.mxu0 }
 0x261   : > { %v2415_v30 = vadd.f32 %v2340_v23, %v1753_v17 }
 0x262   : > { %v14612_v26 = vpop.f32.mrf.mxu1 }
 0x263   : > { %v2705_v50 = vadd.f32 %v2630_v28, %v2415_v30  ;;  %v4514_v30 = vshll.u32 %v11757_v59, 16 }
 0x265   : > { %v14614_v24 = vadd.f32 %v3264_v31, %v2705_v50  ;;  %v3564_v31 = vshrl.u32 %v12659_v54, 16 }
 0x266   : > { %v1680_v62 = vpop.f32.mrf.mxu2 }
 0x267   : > { %v1754_v22 = vadd.f32 %v1680_v62, %v14119_v55  ;;  %v2342_v7 = vpop.f32.mrf.mxu3  ;;  %v3566_v49 = vrot.slane %v3564_v31, 3  ;;  %v4516_v62 = vrot.slane %v4514_v30, 1  ;;  %v4518_v30 = vshrl.u32 %v11757_v59, 16 }
 0x268   : > { %v2635_v10 = vpop.f32.mrf.mxu0 }
 0x269   : > { %v2416_v28 = vadd.f32 %v2342_v7, %v1754_v22  ;;  %v3570_v48 = vor.u32 %v3569_v41, %v3566_v49 }
 0x26a   : > { %v3269_v17 = vpop.f32.mrf.mxu1 }
 0x26b   : > { %3850 = vmatmul.bf16.vlgmr.msra.gmra.mxu2 %v3562_v52  ;;  %4774 = vmatmul.bf16.vlgmr.msra.gmra.mxu0 %v4509_v39  ;;  %v14620_v23 = vadd.f32 %v2632_v21, %v2416_v28  ;;  %v3571_v39 = vsel %vm710_vm0, %v3561_v56, %v3570_v48  ;;  %v4517_v28 = vsel %vm1325_vm1, %v4512_v51, %v4516_v62 }
 0x26c   : > { %4140 = vmatmul.bf16.vlgmr.msra.gmra.mxu3 %v4036_v46 }
 0x26e   : > { %v1683_v18 = vpop.f32.mrf.mxu2 }
 0x26f   : > { %v1755_v55 = vadd.f32 %v1683_v18, %v14130_v11  ;;  %v2345_v20 = vpop.f32.mrf.mxu3  ;;  %v11758_v18 = vld [vmem:[%s13838_s16 + $0x34] sm:$0xff] }
 0x270   : > { %v2637_v34 = vpop.f32.mrf.mxu0 }
 0x271   : > { %v2417_v50 = vadd.f32 %v2345_v20, %v1755_v55 }
 0x272   : > { %v14624_v1 = vpop.f32.mrf.mxu1 }
 0x273   : > { %v2707_v21 = vadd.f32 %v2635_v10, %v2417_v50  ;;  %v3573_v10 = vshrl.u32 %v12660_v45, 16  ;;  %v4522_v50 = vshll.u32 %v11758_v18, 16 }
 0x275   : > { %v14626_v22 = vadd.f32 %v3269_v17, %v2707_v21  ;;  %v3576_v17 = vshll.u32 %v12660_v45, 16  ;;  %v3575_v56 = vrot.slane %v3573_v10, 3 }
 0x276   : > { %v1685_v7 = vpop.f32.mrf.mxu2 }
 0x277   : > { %v1756_v11 = vadd.f32 %v1685_v7, %v14135_v33  ;;  %v2347_v52 = vpop.f32.mrf.mxu3  ;;  %v16693_v33 = vld [vmem:[#allocation3_spill] sm:$0xff]  ;;  %v3578_v63 = vrot.slane %v3576_v17, 4 }
 0x278   : > { %v2640_v46 = vpop.f32.mrf.mxu0 }
 0x279   : > { %v2418_v54 = vadd.f32 %v2347_v52, %v1756_v11  ;;  %v3579_v11 = vor.u32 %v3578_v63, %v3575_v56  ;;  %v4520_v52 = vor.u32 %v4518_v30, %v4516_v62  ;;  %v11759_v63 = vld [vmem:[%s13838_s16 + $0x3c] sm:$0xff] }
 0x27a   : > { %v3274_v31 = vpop.f32.mrf.mxu1 }
 0x27b   : > { %3855 = vmatmul.bf16.gmra.mxu2 %v3571_v39  ;;  %4779 = vmatmul.bf16.gmra.mxu0 %v4517_v28  ;;  %v14633_v44 = vadd.f32 %v2637_v34, %v2418_v54  ;;  %v11796_v34 = vld [vmem:[%s16671_s4 + $0x48] sm:$0xff]  ;;  %v4524_v39 = vrot.slane %v4522_v50, 1  ;;  %v3580_v17 = vsel %vm710_vm0, %v3570_v48, %v3579_v11  ;;  %v16697_v50 = vld [vmem:[#allocation5_spill] sm:$0xff] }
 0x27c   : > { %4145 = vmatmul.bf16.gmra.mxu3 %v13226_v15  ;;  %5588 = vmatpush.bf16.msra.mxu1 %v11796_v34  ;;  %v16695_v54 = vld [vmem:[#allocation4_spill] sm:$0xff] }
 0x27e   : > { %v1688_v55 = vpop.f32.mrf.mxu2 }
 0x27f   : > { %v1757_v20 = vadd.f32 %v1688_v55, %v16693_v33  ;;  %v2350_v49 = vpop.f32.mrf.mxu3  ;;  %v13228_v55 = vld [vmem:[%s13838_s16 + $0x2c] sm:$0xff]   ;;  %v4525_v33 = vsel %vm1325_vm1, %v4520_v52, %v4524_v39  ;;  %v4526_v52 = vshrl.u32 %v11758_v18, 16  ;;  %v13230_v18 = vld [vmem:[%s13838_s16 + $0x34] sm:$0xff]  }
 0x280   : > { %v2642_v41 = vpop.f32.mrf.mxu0 }
 0x281   : > { %v2419_v21 = vadd.f32 %v2350_v49, %v1757_v20 }
 0x282   : > { %v14637_v51 = vpop.f32.mrf.mxu1 }
 0x283   : > { %16694 = vst [vmem:[#allocation3_spill] sm:$0xff] %v14637_v51  ;;  %v2709_v7 = vadd.f32 %v2640_v46, %v2419_v21  ;;  %v12661_v46 = vld [vmem:[%s13838_s16 + $0x38] sm:$0xff]  }
 0x284   : > { %v3585_v56 = vshll.u32 %v12661_v46, 16  ;;  %v16700_v51 = vld [vmem:[#allocation6_spill] sm:$0xff] }
 0x285   : > { %v14642_v15 = vadd.f32 %v3274_v31, %v2709_v7  ;;  %v3582_v31 = vshrl.u32 %v12661_v46, 16 }
 0x286   : > { %v1690_v28 = vpop.f32.mrf.mxu2 }
 0x287   : > { %v1758_v59 = vadd.f32 %v1690_v28, %v16695_v54  ;;  %v2352_v45 = vpop.f32.mrf.mxu3  ;;  %v3584_v48 = vrot.slane %v3582_v31, 3  ;;  %v3587_v28 = vrot.slane %v3585_v56, 4  ;;  %v4530_v54 = vshll.u32 %v11759_v63, 16 }
 0x288   : > { %v2645_v10 = vpop.f32.mrf.mxu0 }
 0x289   : > { %v2420_v20 = vadd.f32 %v2352_v45, %v1758_v59 }
 0x28a   : > { %v3279_v49 = vpop.f32.mrf.mxu1 }
 0x28b   : > { %3860 = vmatmul.bf16.gmra.mxu2 %v3580_v17  ;;  %4784 = vmatmul.bf16.gmra.mxu0 %v4525_v33  ;;  %v14649_v62 = vadd.f32 %v2642_v41, %v2420_v20  ;;  %v3588_v17 = vor.u32 %v3587_v28, %v3584_v48  ;;  %v4532_v33 = vrot.slane %v4530_v54, 1  ;;  %v11760_v48 = vld [vmem:[%s13838_s16 + $0x44] sm:$0xff] }
 0x28c   : > { %4150 = vmatmul.bf16.gmra.mxu3 %v13228_v55  ;;  %v4528_v55 = vor.u32 %v4526_v52, %v4524_v39 }
 0x28d   : > { %16696 = vst [vmem:[#allocation4_spill] sm:$0xff] %v14649_v62  ;;  %v3589_v56 = vsel %vm710_vm0, %v3579_v11, %v3588_v17 }
 0x28e   : > { %v1693_v30 = vpop.f32.mrf.mxu2 }
 0x28f   : > { %v1759_v21 = vadd.f32 %v1693_v30, %v16697_v50  ;;  %v2355_v34 = vpop.f32.mrf.mxu3 }
 0x290   : > { %v2647_v7 = vpop.f32.mrf.mxu0 }
 0x291   : > { %v2421_v59 = vadd.f32 %v2355_v34, %v1759_v21  ;;  %v4533_v21 = vsel %vm1325_vm1, %v4528_v55, %v4532_v33  ;;  %v4534_v55 = vshrl.u32 %v11759_v63, 16  ;;  %v13232_v63 = vld [vmem:[%s13838_s16 + $0x3c] sm:$0xff]  }
 0x292   : > { %v14653_v45 = vpop.f32.mrf.mxu1 }
 0x293   : > { %16698 = vst [vmem:[#allocation5_spill] sm:$0xff] %v14653_v45  ;;  %v2711_v41 = vadd.f32 %v2645_v10, %v2421_v59  ;;  %v12662_v45 = vld [vmem:[%s13838_s16 + $0x40] sm:$0xff]  }
 0x294   : > { %v3591_v10 = vshrl.u32 %v12662_v45, 16 }
 0x295   : > { %v14655_v20 = vadd.f32 %v3279_v49, %v2711_v41  ;;  %v3594_v49 = vshll.u32 %v12662_v45, 16 }
 0x296   : > { %v1695_v46 = vpop.f32.mrf.mxu2  ;;  %v3593_v11 = vrot.slane %v3591_v10, 3 }
 0x297   : > { %16699 = vst [vmem:[#allocation20_spill] sm:$0xff] %v14655_v20  ;;  %v1760_v30 = vadd.f32 %v1695_v46, %v16700_v51  ;;  %v2357_v50 = vpop.f32.mrf.mxu3  ;;  %v16702_v51 = vld [vmem:[#allocation7_spill] sm:$0xff]  ;;  %v3596_v41 = vrot.slane %v3594_v49, 4  ;;  %v4538_v46 = vshll.u32 %v11760_v48, 16 }
 0x298   : > { %v2650_v31 = vpop.f32.mrf.mxu0 }
 0x299   : > { %v2422_v34 = vadd.f32 %v2357_v50, %v1760_v30 }
 0x29a   : > { %v3284_v62 = vpop.f32.mrf.mxu1 }
 0x29b   : > { %3865 = vmatmul.bf16.gmra.mxu2 %v3589_v56  ;;  %4789 = vmatmul.bf16.gmra.mxu0 %v4533_v21  ;;  %v14662_v39 = vadd.f32 %v2647_v7, %v2422_v34  ;;  %v3597_v56 = vor.u32 %v3596_v41, %v3593_v11  ;;  %v4540_v21 = vrot.slane %v4538_v46, 1  ;;  %v11761_v11 = vld [vmem:[%s13838_s16 + $0x4c] sm:$0xff] }
 0x29c   : > { %4155 = vmatmul.bf16.gmra.mxu3 %v13230_v18  ;;  %v4536_v18 = vor.u32 %v4534_v55, %v4532_v33 }
 0x29d   : > { %16701 = vst [vmem:[#allocation6_spill] sm:$0xff] %v14662_v39  ;;  %v16705_v39 = vld [vmem:[#allocation8_spill] sm:$0xff]  ;;  %v3598_v49 = vsel %vm710_vm0, %v3588_v17, %v3597_v56 }
 0x29e   : > { %v1698_v28 = vpop.f32.mrf.mxu2 }
 0x29f   : > { %v1761_v52 = vadd.f32 %v1698_v28, %v16702_v51  ;;  %v2360_v54 = vpop.f32.mrf.mxu3 }
 0x2a0   : > { %v2652_v59 = vpop.f32.mrf.mxu0 }
 0x2a1   : > { %v2423_v30 = vadd.f32 %v2360_v54, %v1761_v52  ;;  %v4541_v52 = vsel %vm1325_vm1, %v4536_v18, %v4540_v21  ;;  %v4546_v18 = vshll.u32 %v11761_v11, 16 }
 0x2a2   : > { %v14666_v50 = vpop.f32.mrf.mxu1 }
 0x2a3   : > { %16703 = vst [vmem:[#allocation7_spill] sm:$0xff] %v14666_v50  ;;  %v2713_v7 = vadd.f32 %v2650_v31, %v2423_v30  ;;  %v12663_v50 = vld [vmem:[%s13838_s16 + $0x48] sm:$0xff]  }
 0x2a4   : > { %v3603_v31 = vshll.u32 %v12663_v50, 16 }
 0x2a5   : > { %v14668_v45 = vadd.f32 %v3284_v62, %v2713_v7  ;;  %v3600_v62 = vshrl.u32 %v12663_v50, 16 }
 0x2a6   : > { %v1700_v34 = vpop.f32.mrf.mxu2  ;;  %v3605_v7 = vrot.slane %v3603_v31, 4  ;;  %v16710_v31 = vld [vmem:[#allocation10_spill] sm:$0xff] }
 0x2a7   : > { %16704 = vst [vmem:[#allocation21_spill] sm:$0xff] %v14668_v45  ;;  %v1762_v28 = vadd.f32 %v1700_v34, %v16705_v39  ;;  %v2362_v51 = vpop.f32.mrf.mxu3  ;;  %v16707_v39 = vld [vmem:[#allocation9_spill] sm:$0xff]  ;;  %v3602_v17 = vrot.slane %v3600_v62, 3  ;;  %v4542_v34 = vshrl.u32 %v11760_v48, 16 }
 0x2a8   : > { %v2655_v10 = vpop.f32.mrf.mxu0  ;;  %v12664_v45 = vld [vmem:[%s13838_s16 + $0x50] sm:$0xff]  }
 0x2a9   : > { %v2424_v54 = vadd.f32 %v2362_v51, %v1762_v28 }
 0x2aa   : > { %v3289_v20 = vpop.f32.mrf.mxu1 }
 0x2ab   : > { %3870 = vmatmul.bf16.gmra.mxu2 %v3598_v49  ;;  %4794 = vmatmul.bf16.gmra.mxu0 %v4541_v52  ;;  %v14675_v33 = vadd.f32 %v2652_v59, %v2424_v54  ;;  %v11795_v59 = vld [vmem:[%s16671_s4 + $0x40] sm:$0xff]  ;;  %v3606_v49 = vor.u32 %v3605_v7, %v3602_v17  ;;  %v4548_v52 = vrot.slane %v4546_v18, 1  ;;  %v3612_v17 = vshll.u32 %v12664_v45, 16  ;;  %v11762_v7 = vld [vmem:[%s13838_s16 + $0x54] sm:$0xff] }
 0x2ac   : > { %4160 = vmatmul.bf16.gmra.mxu3 %v13232_v63  ;;  %5589 = vmatpush.bf16.msra.mxu1 %v11795_v59  ;;  %v4544_v63 = vor.u32 %v4542_v34, %v4540_v21  ;;  %v16712_v18 = vld [vmem:[#allocation11_spill] sm:$0xff] }
 0x2ad   : > { %16706 = vst [vmem:[#allocation8_spill] sm:$0xff] %v14675_v33 }
 0x2ae   : > { %v1703_v41 = vpop.f32.mrf.mxu2 }
 0x2af   : > { %v1763_v55 = vadd.f32 %v1703_v41, %v16707_v39  ;;  %v2365_v46 = vpop.f32.mrf.mxu3 }
 0x2b0   : > { %v2657_v30 = vpop.f32.mrf.mxu0 }
 0x2b1   : > { %v2425_v28 = vadd.f32 %v2365_v46, %v1763_v55  ;;  %v3607_v55 = vsel %vm710_vm0, %v3597_v56, %v3606_v49  ;;  %v13234_v46 = vld [vmem:[%s13838_s16 + $0x44] sm:$0xff]  }
 0x2b2   : > { %v14679_v51 = vpop.f32.mrf.mxu1 }
 0x2b3   : > { %16708 = vst [vmem:[#allocation9_spill] sm:$0xff] %v14679_v51  ;;  %v2715_v50 = vadd.f32 %v2655_v10, %v2425_v28  ;;  %v4549_v51 = vsel %vm1325_vm1, %v4544_v63, %v4548_v52  ;;  %v4550_v63 = vshrl.u32 %v11761_v11, 16  ;;  %v13236_v11 = vld [vmem:[%s13838_s16 + $0x4c] sm:$0xff]  }
 0x2b5   : > { %v14684_v54 = vadd.f32 %v3289_v20, %v2715_v50  ;;  %v3609_v20 = vshrl.u32 %v12664_v45, 16 }
 0x2b6   : > { %v1705_v62 = vpop.f32.mrf.mxu2 }
 0x2b7   : > { %16709 = vst [vmem:[#allocation22_spill] sm:$0xff] %v14684_v54  ;;  %v1764_v48 = vadd.f32 %v1705_v62, %v16710_v31  ;;  %v2367_v41 = vpop.f32.mrf.mxu3  ;;  %v3611_v56 = vrot.slane %v3609_v20, 3  ;;  %v3614_v62 = vrot.slane %v3612_v17, 4  ;;  %v4554_v31 = vshll.u32 %v11762_v7, 16 }
 0x2b8   : > { %v2660_v39 = vpop.f32.mrf.mxu0 }
 0x2b9   : > { %v2426_v33 = vadd.f32 %v2367_v41, %v1764_v48 }
 0x2ba   : > { %v3294_v10 = vpop.f32.mrf.mxu1 }
 0x2bb   : > { %3875 = vmatmul.bf16.gmra.mxu2 %v3607_v55  ;;  %4799 = vmatmul.bf16.gmra.mxu0 %v4549_v51  ;;  %v14691_v21 = vadd.f32 %v2657_v30, %v2426_v33  ;;  %v3615_v51 = vor.u32 %v3614_v62, %v3611_v56  ;;  %v4552_v33 = vor.u32 %v4550_v63, %v4548_v52  ;;  %v4556_v30 = vrot.slane %v4554_v31, 1  ;;  %v14707_v56 = vld [vmem:[%s13838_s16 + $0x5c] sm:$0xff]  ;;  %v16714_v31 = vld [vmem:[#allocation13_spill] sm:$0xff] }
 0x2bc   : > { %4165 = vmatmul.bf16.gmra.mxu3 %v13234_v46 }
 0x2bd   : > { %16711 = vst [vmem:[#allocation10_spill] sm:$0xff] %v14691_v21  ;;  %v3616_v17 = vsel %vm710_vm0, %v3606_v49, %v3615_v51  ;;  %v4557_v54 = vsel %vm1325_vm1, %v4552_v33, %v4556_v30  ;;  %v13768_v49 = vmov 0  }
 0x2be   : > { %v1708_v34 = vpop.f32.mrf.mxu2  ;;  %5160 = vst [vmem:[#allocation2 + $0x10] sm:$0xf] %v13768_v49 }
 0x2bf   : > { %v1765_v28 = vadd.f32 %v1708_v34, %v16712_v18  ;;  %v2370_v59 = vpop.f32.mrf.mxu3  ;;  %v16713_v34 = vld [vmem:[#allocation12_spill] sm:$0xff]  ;;  %5161 = vst [vmem:[#allocation2 + $0x14] sm:$0xf] %v13768_v49 }
 0x2c0   : > { %v2662_v50 = vpop.f32.mrf.mxu0  ;;  %5156 = vst [vmem:[#allocation2] sm:$0xf] %v13768_v49 }
 0x2c1   : > { %v2427_v48 = vadd.f32 %v2370_v59, %v1765_v28  ;;  %5157 = vst [vmem:[#allocation2 + $0x4] sm:$0xf] %v13768_v49 }
 0x2c2   : > { %v14695_v55 = vpop.f32.mrf.mxu1  ;;  %5158 = vst [vmem:[#allocation2 + $0x8] sm:$0xf] %v13768_v49 }
 0x2c3   : > { %v2717_v41 = vadd.f32 %v2660_v39, %v2427_v48  ;;  %v12665_v39 = vld [vmem:[%s13838_s16 + $0x58] sm:$0xff]   ;;  %5159 = vst [vmem:[#allocation2 + $0xc] sm:$0xf] %v13768_v49 }
 0x2c4   : > { %v3621_v59 = vshll.u32 %v12665_v39, 16  ;;  %5162 = vst [vmem:[#allocation2 + $0x18] sm:$0xf] %v13768_v49 }
 0x2c5   : > { %v14697_v45 = vadd.f32 %v3294_v10, %v2717_v41  ;;  %v3618_v10 = vshrl.u32 %v12665_v39, 16  ;;  %5163 = vst [vmem:[#allocation2 + $0x1c] sm:$0xf] %v13768_v49 }
 0x2c6   : > { %v1710_v46 = vpop.f32.mrf.mxu2  ;;  %5164 = vst [vmem:[#allocation2 + $0x20] sm:$0xf] %v13768_v49 }
 0x2c7   : > { %v1766_v18 = vadd.f32 %v1710_v46, %v16713_v34  ;;  %v2372_v21 = vpop.f32.mrf.mxu3  ;;  %v3623_v46 = vrot.slane %v3621_v59, 4  ;;  %v4558_v34 = vshrl.u32 %v11762_v7, 16  ;;  %5165 = vst [vmem:[#allocation2 + $0x24] sm:$0xf] %v13768_v49 }
 0x2c8   : > { %v2665_v20 = vpop.f32.mrf.mxu0  ;;  %5166 = vst [vmem:[#allocation2 + $0x28] sm:$0xf] %v13768_v49 }
 0x2c9   : > { %v2428_v28 = vadd.f32 %v2372_v21, %v1766_v18  ;;  %v3620_v21 = vrot.slane %v3618_v10, 3  ;;  %v16716_v10 = vld [vmem:[#allocation14_spill] sm:$0xff]  ;;  %5167 = vst [vmem:[#allocation2 + $0x2c] sm:$0xf] %v13768_v49 }
 0x2ca   : > { %v3299_v63 = vpop.f32.mrf.mxu1  ;;  %5168 = vst [vmem:[#allocation2 + $0x30] sm:$0xf] %v13768_v49 }
 0x2cb   : > { %3880 = vmatmul.bf16.gmra.mxu2 %v3616_v17  ;;  %4804 = vmatmul.bf16.gmra.mxu0 %v4557_v54  ;;  %v14704_v52 = vadd.f32 %v2662_v50, %v2428_v28  ;;  %v4562_v54 = vshll.u32 %v14707_v56, 16  ;;  %v14716_v17 = vor.u32 %v3623_v46, %v3620_v21  ;;  %v12666_v21 = vld [vmem:[%s13838_s16 + $0x60] sm:$0xff]   ;;  %5169 = vst [vmem:[#allocation2 + $0x34] sm:$0xf] %v13768_v49 }
 0x2cc   : > { %4170 = vmatmul.bf16.gmra.mxu3 %v13236_v11  ;;  %v4560_v11 = vor.u32 %v4558_v34, %v4556_v30  ;;  %v14734_v46 = vld [vmem:[#allocation2 + $0x4] sm:$0xf]  ;;  %5170 = vst [vmem:[#allocation2 + $0x38] sm:$0xf] %v13768_v49 }
 0x2cd   : > { %v4564_v28 = vrot.slane %v4562_v54, 1  ;;  %v3625_v30 = vsel %vm710_vm0, %v3615_v51, %v14716_v17  ;;  %v16675_v34 = vunpack.c.l.b16 %v14734_v46  ;;  %v12815_v54 = vld [vmem:[#allocation2 + $0x8] sm:$0xff]   ;;  %5171 = vst [vmem:[#allocation2 + $0x3c] sm:$0xf] %v13768_v49 }
 0x2ce   : > { %v1713_v62 = vpop.f32.mrf.mxu2  ;;  %5172 = vst [vmem:[#allocation2 + $0x40] sm:$0xf] %v13768_v49 }
 0x2cf   : > { %v1767_v48 = vadd.f32 %v1713_v62, %v16714_v31  ;;  %v2375_v41 = vpop.f32.mrf.mxu3  ;;  %v13238_v31 = vld [vmem:[%s13838_s16 + $0x54] sm:$0xff]   ;;  %5173 = vst [vmem:[#allocation2 + $0x44] sm:$0xf] %v13768_v49 }
 0x2d0   : > { %v2667_v33 = vpop.f32.mrf.mxu0  ;;  %5174 = vst [vmem:[#allocation2 + $0x48] sm:$0xf] %v13768_v49 }
 0x2d1   : > { %v2429_v50 = vadd.f32 %v2375_v41, %v1767_v48  ;;  %v4565_v48 = vsel %vm1325_vm1, %v4560_v11, %v4564_v28  ;;  %v14742_v11 = vld [vmem:[%s13838_s16 + $0x64] sm:$0xff]  ;;  %5175 = vst [vmem:[#allocation2 + $0x4c] sm:$0xf] %v13768_v49 }
 0x2d2   : > { %v14729_v41 = vpop.f32.mrf.mxu1  ;;  %5176 = vst [vmem:[#allocation2 + $0x50] sm:$0xf] %v13768_v49 }
 0x2d3   : > { %v2719_v18 = vadd.f32 %v2665_v20, %v2429_v50  ;;  %16717 = vst [vmem:[#allocation12_spill] sm:$0xff] %v14729_v41  ;;  %v3627_v50 = vshrl.u32 %v12666_v21, 16 }
 0x2d4   : > { %5177 = vst [vmem:[#allocation2 + $0x54] sm:$0xf] %v13768_v49 }
 0x2d5   : > { %v14719_v7 = vadd.f32 %v3299_v63, %v2719_v18  ;;  %v3630_v18 = vshll.u32 %v12666_v21, 16  ;;  %v4566_v21 = vshrl.u32 %v14707_v56, 16  ;;  %5178 = vst [vmem:[#allocation2 + $0x58] sm:$0xf] %v13768_v49 }
 0x2d6   : > { %v1715_v39 = vpop.f32.mrf.mxu2  ;;  %5179 = vst [vmem:[#allocation2 + $0x5c] sm:$0xf] %v13768_v49 }
 0x2d7   : > { %16715 = vst [vmem:[#allocation11_spill] sm:$0xff] %v14719_v7  ;;  %v1768_v59 = vadd.f32 %v1715_v39, %v16716_v10  ;;  %v2377_v62 = vpop.f32.mrf.mxu3  ;;  %v12333_v39 = vunpack.c.l.b16 %v12815_v54  ;;  %v4570_v54 = vshll.u32 %v14742_v11, 16 }
 0x2d8   : > { %v2670_v20 = vpop.f32.mrf.mxu0  ;;  %5180 = vst [vmem:[#allocation2 + $0x60] sm:$0xf] %v13768_v49 }
 0x2d9   : > { %v2430_v63 = vadd.f32 %v2377_v62, %v1768_v59  ;;  %v16719_v59 = vld [vmem:[#allocation15_spill] sm:$0xff]  ;;  %5181 = vst [vmem:[#allocation2 + $0x64] sm:$0xf] %v13768_v49 }
 0x2da   : > { %5182 = vst [vmem:[#allocation2 + $0x68] sm:$0xf] %v13768_v49 }
 0x2db   : > { %3885 = vmatmul.bf16.gmra.mxu2 %v3625_v30  ;;  %4809 = vmatmul.bf16.gmra.mxu0 %v4565_v48  ;;  %v14738_v51 = vadd.f32 %v2667_v33, %v2430_v63  ;;  %v5486_v33 = vpack.c.b16 %v12333_v39, %v16675_v34  ;;  %v3629_v48 = vrot.slane %v3627_v50, 3  ;;  %v3632_v63 = vrot.slane %v3630_v18, 4  ;;  %5183 = vst [vmem:[#allocation2 + $0x6c] sm:$0xf] %v13768_v49 }
 0x2dc   : > { %4175 = vmatmul.bf16.gmra.mxu3 %v13238_v31  ;;  %v4568_v50 = vor.u32 %v4566_v21, %v4564_v28  ;;  %v4572_v18 = vrot.slane %v4570_v54, 1  ;;  %v11794_v28 = vld [vmem:[%s16671_s4 + $0x38] sm:$0xff]  ;;  %v12667_v54 = vld [vmem:[%s13838_s16 + $0x68] sm:$0xff]   ;;  %5184 = vst [vmem:[#allocation2 + $0x70] sm:$0xf] %v13768_v49 }
 0x2dd   : > { %16718 = vst [vmem:[#allocation13_spill] sm:$0xff] %v14738_v51  ;;  %5590 = vmatmul.bf16.vlgmr.msra.gmra.mxu1 %v5486_v33  ;;  %v3304_v51 = vpop.f32.mrf.mxu1  ;;  %6034 = vmatpush.bf16.msrb.mxu2 %v11794_v28 }
 0x2de   : > { %v1718_v10 = vpop.f32.mrf.mxu2  ;;  %5185 = vst [vmem:[#allocation2 + $0x74] sm:$0xf] %v13768_v49 }
 0x2df   : > { %v1769_v62 = vadd.f32 %v1718_v10, %v16719_v59  ;;  %v2380_v30 = vpop.f32.mrf.mxu3  ;;  %v14757_v10 = vor.u32 %v3632_v63, %v3629_v48  ;;  %v16721_v59 = vld [vmem:[#allocation16_spill] sm:$0xff]  ;;  %v13240_v48 = vld [vmem:[%s13838_s16 + $0x5c] sm:$0xff]   ;;  %v4573_v63 = vsel %vm1325_vm1, %v4568_v50, %v4572_v18  ;;  %5186 = vst [vmem:[#allocation2 + $0x78] sm:$0xf] %v13768_v49 }
 0x2e0   : > { %v2672_v31 = vpop.f32.mrf.mxu0  ;;  %v11850_v50 = vld [vmem:[%s16671_s4 + $0x138] sm:$0xff]  ;;  %5187 = vst [vmem:[#allocation2 + $0x7c] sm:$0xf] %v13768_v49 }
 0x2e1   : > { %v2431_v41 = vadd.f32 %v2380_v30, %v1769_v62  ;;  %v3634_v30 = vsel %vm710_vm0, %v14716_v17, %v14757_v10  ;;  %v11842_v17 = vld [vmem:[%s16671_s4 + $0xf8] sm:$0xff]  ;;  %7572 = vmatpush.bf16.msrb.mxu1 %v11850_v50  ;;  %5188 = vst [vmem:[#allocation2 + $0x80] sm:$0xf] %v13768_v49 }
 0x2e2   : > { %7282 = vmatpush.bf16.msrb.mxu0 %v11842_v17  ;;  %5189 = vst [vmem:[#allocation2 + $0x84] sm:$0xf] %v13768_v49  ;;  %v14805_v17 = vld [vmem:[%s16669_s2] ss:$0 sm:$0xff] }
 0x2e3   : > { %v2721_v39 = vadd.f32 %v2670_v20, %v2431_v41  ;;  %v11834_v41 = vld [vmem:[%s16671_s4 + $0xb8] sm:$0xff]  ;;  %5190 = vst [vmem:[#allocation2 + $0x88] sm:$0xf] %v13768_v49 }
 0x2e4   : > { %6620 = vmatpush.bf16.msrb.mxu3 %v11834_v41  ;;  %5191 = vst [vmem:[#allocation2 + $0x8c] sm:$0xf] %v13768_v49 }
 0x2e5   : > { %v14760_v56 = vadd.f32 %v3304_v51, %v2721_v39  ;;  %5192 = vst [vmem:[#allocation2 + $0x90] sm:$0xf] %v13768_v49 }
 0x2e6   : > { %v1720_v33 = vpop.f32.mrf.mxu2  ;;  %5193 = vst [vmem:[#allocation2 + $0x94] sm:$0xf] %v13768_v49 }
 0x2e7   : > { %16720 = vst [vmem:[#allocation14_spill] sm:$0xff] %v14760_v56  ;;  %v1770_v62 = vadd.f32 %v1720_v33, %v16721_v59  ;;  %v2382_v20 = vpop.f32.mrf.mxu3  ;;  %v3636_v33 = vshrl.u32 %v12667_v54, 16  ;;  %v3639_v59 = vshll.u32 %v12667_v54, 16 }
 0x2e8   : > { %v4775_v51 = vpop.f32.mrf.mxu0  ;;  %5194 = vst [vmem:[#allocation2 + $0x98] sm:$0xf] %v13768_v49 }
 0x2e9   : > { %v2432_v21 = vadd.f32 %v2382_v20, %v1770_v62  ;;  %v14792_v62 = vld [vmem:[%s13838_s16 + $0x6c] sm:$0xff]  ;;  %5195 = vst [vmem:[#allocation2 + $0x9c] sm:$0xf] %v13768_v49 }
 0x2ea   : > { %5196 = vst [vmem:[#allocation2 + $0xa0] sm:$0xf] %v13768_v49 }
 0x2eb   : > { %3890 = vmatmul.bf16.gmra.mxu2 %v3634_v30  ;;  %4814 = vmatmul.bf16.gmra.mxu0 %v4573_v63  ;;  %v14781_v39 = vadd.f32 %v2672_v31, %v2432_v21  ;;  %v3638_v30 = vrot.slane %v3636_v33, 3  ;;  %v4574_v63 = vshrl.u32 %v14742_v11, 16  ;;  %v4578_v21 = vshll.u32 %v14792_v62, 16  ;;  %5197 = vst [vmem:[#allocation2 + $0xa4] sm:$0xf] %v13768_v49 }
 0x2ec   : > { %4180 = vmatmul.bf16.gmra.mxu3 %v13240_v48  ;;  %v3641_v48 = vrot.slane %v3639_v59, 4  ;;  %5198 = vst [vmem:[#allocation2 + $0xa8] sm:$0xf] %v13768_v49 }
 0x2ed   : > { %16722 = vst [vmem:[#allocation15_spill] sm:$0xff] %v14781_v39  ;;  %v4576_v11 = vor.u32 %v4574_v63, %v4572_v18  ;;  %v4580_v33 = vrot.slane %v4578_v21, 1  ;;  %v13242_v63 = vld [vmem:[%s13838_s16 + $0x64] sm:$0xff]  }
 0x2ee   : > { %v3851_v31 = vpop.f32.mrf.mxu2  ;;  %v14810_v50 = vor.u32 %v3641_v48, %v3638_v30  ;;  %5199 = vst [vmem:[#allocation2 + $0xac] sm:$0xf] %v13768_v49 }
 0x2ef   : > { %v3971_v20 = vadd.f32 %v3851_v31, %v14280_v57  ;;  %v4141_v28 = vpop.f32.mrf.mxu3  ;;  %v14817_v31 = vld [vmem:[%s16670_s3] ss:$0 sm:$0xff]  ;;  %v4581_v21 = vsel %vm1325_vm1, %v4576_v11, %v4580_v33  ;;  %5200 = vst [vmem:[#allocation2 + $0xb0] sm:$0xf] %v13768_v49 }
 0x2f0   : > { %v4777_v41 = vpop.f32.mrf.mxu0  ;;  %v3643_v48 = vsel %vm710_vm0, %v14757_v10, %v14810_v50  ;;  %5201 = vst [vmem:[#allocation2 + $0xb4] sm:$0xf] %v13768_v49 }
 0x2f1   : > { %v4261_v54 = vadd.f32 %v4141_v28, %v3971_v20  ;;  %v5095_v20 = vlaneseq  ;;  %5202 = vst [vmem:[#allocation2 + $0xb8] sm:$0xf] %v13768_v49 }
 0x2f2   : > { %5203 = vst [vmem:[#allocation2 + $0xbc] sm:$0xf] %v13768_v49 }
 0x2f3   : > { %v4895_v57 = vadd.f32 %v4775_v51, %v4261_v54  ;;  %5204 = vst [vmem:[#allocation2 + $0xc0] sm:$0xf] %v13768_v49 }
 0x2f4   : > { %5205 = vst [vmem:[#allocation2 + $0xc4] sm:$0xf] %v13768_v49 }
 0x2f5   : > { %v4947_v59 = vmul.f32 %v14805_v17, %v4895_v57  ;;  %v12668_v57 = vld [vmem:[%s13838_s16 + $0x70] sm:$0xff]   ;;  %5206 = vst [vmem:[#allocation2 + $0xc8] sm:$0xf] %v13768_v49 }
 0x2f6   : > { %v3853_v51 = vpop.f32.mrf.mxu2  ;;  %v3645_v10 = vshrl.u32 %v12668_v57, 16  ;;  %v3648_v11 = vshll.u32 %v12668_v57, 16  ;;  %v4582_v57 = vshrl.u32 %v14792_v62, 16  ;;  %5207 = vst [vmem:[#allocation2 + $0xcc] sm:$0xf] %v13768_v49 }
 0x2f7   : > { %v3972_v28 = vadd.f32 %v3853_v51, %v14291_v2  ;;  %v4143_v30 = vpop.f32.mrf.mxu3  ;;  %v4999_v2 = vadd.f32 %v14817_v31, %v4947_v59  ;;  %v14832_v51 = vshrl.u32 %v5095_v20, 7  ;;  %5208 = vst [vmem:[#allocation2 + $0xd0] sm:$0xf] %v13768_v49 }
 0x2f8   : > { %v4780_v18 = vpop.f32.mrf.mxu0  ;;  %5209 = vst [vmem:[#allocation2 + $0xd4] sm:$0xf] %v13768_v49 }
 0x2f9   : > { %v4262_v54 = vadd.f32 %v4143_v30, %v3972_v28  ;;  %v14837_v28 = vld [vmem:[%s13838_s16 + $0x74] sm:$0xff]  ;;  %v5047_v59 = vmax.f32 %v4999_v2, 0.0  ;;  %vm5099_vm2 = vcmp.ge.s32.totalorder %v14832_v51, 1  ;;  %5210 = vst [vmem:[#allocation2 + $0xd8] sm:$0xf] %v13768_v49 }
 0x2fa   : > { %v4586_v2 = vshll.u32 %v14837_v28, 16  ;;  %5211 = vst [vmem:[#allocation2 + $0xdc] sm:$0xf] %v13768_v49 }
 0x2fb   : > { %v4896_v34 = vadd.f32 %v4777_v41, %v4262_v54  ;;  %3895 = vmatmul.bf16.gmra.mxu2 %v3643_v48  ;;  %4819 = vmatmul.bf16.gmra.mxu0 %v4581_v21  ;;  %v3647_v54 = vrot.slane %v3645_v10, 3  ;;  %v4584_v10 = vor.u32 %v4582_v57, %v4580_v33 }
 0x2fc   : > { %4185 = vmatmul.bf16.gmra.mxu3 %v13242_v63 }
 0x2fd   : > { %v4948_v30 = vmul.f32 %v14805_v17, %v4896_v34  ;;  %v3650_v34 = vrot.slane %v3648_v11, 4  ;;  %v4588_v11 = vrot.slane %v4586_v2, 1  ;;  %v14866_v2 = vadd.s32 16, %v14832_v51 }
 0x2fe   : > { %v3856_v20 = vpop.f32.mrf.mxu2 }
 0x2ff   : > { %v5000_v41 = vadd.f32 %v14817_v31, %v4948_v30  ;;  %v3973_v48 = vadd.f32 %v3856_v20, %v14299_v6  ;;  %v4146_v63 = vpop.f32.mrf.mxu3  ;;  %v5108_v30 = vsel %vm5099_vm2, %v5047_v59, 0.0  ;;  %v3651_v62 = vor.u32 %v3650_v34, %v3647_v54  ;;  %v12669_v34 = vld [vmem:[%s13838_s16 + $0x78] sm:$0xff]  }
 0x300   : > { %v4782_v21 = vpop.f32.mrf.mxu0  ;;  %v4589_v33 = vsel %vm1325_vm1, %v4584_v10, %v4588_v11  ;;  %vm5104_vm3 = vcmp.le.s32.totalorder %v14866_v2, 16 }
 0x301   : > { %v5048_v39 = vmax.f32 %v5000_v41, 0.0  ;;  %v4263_v56 = vadd.f32 %v4146_v63, %v3973_v48 }
 0x303   : > { %v12214_v6 = vpack.c.bf16 %v5048_v39, %v5108_v30  ;;  %v4897_v20 = vadd.f32 %v4780_v18, %v4263_v56  ;;  %v3652_v56 = vsel %vm710_vm0, %v14810_v50, %v3651_v62  ;;  %v13244_v18 = vld [vmem:[%s13838_s16 + $0x6c] sm:$0xff]   ;;  %v3654_v30 = vshrl.u32 %v12669_v34, 16 }
 0x305   : > { %12791 = vst [vmem:[#allocation2 + $0x10] sm:$0xff] %v12214_v6   ;;  %v4949_v59 = vmul.f32 %v14805_v17, %v4897_v20  ;;  %v3657_v6 = vshll.u32 %v12669_v34, 16  ;;  %v14869_v20 = vld [vmem:[%s13838_s16 + $0x7c] sm:$0xff] }
 0x306   : > { %v3858_v41 = vpop.f32.mrf.mxu2 }
 0x307   : > { %v3974_v39 = vadd.f32 %v3858_v41, %v14313_v53  ;;  %v4148_v48 = vpop.f32.mrf.mxu3  ;;  %v5001_v57 = vadd.f32 %v14817_v31, %v4949_v59 }
 0x308   : > { %v4785_v63 = vpop.f32.mrf.mxu0 }
 0x309   : > { %v4264_v54 = vadd.f32 %v4148_v48, %v3974_v39  ;;  %v5049_v10 = vmax.f32 %v5001_v57, 0.0 }
 0x30b   : > { %v4898_v49 = vadd.f32 %v4782_v21, %v4264_v54  ;;  %3900 = vmatmul.bf16.gmra.mxu2 %v3652_v56  ;;  %4824 = vmatmul.bf16.gmra.mxu0 %v4589_v33  ;;  %v3656_v56 = vrot.slane %v3654_v30, 3  ;;  %v4590_v33 = vshrl.u32 %v14837_v28, 16  ;;  %v4594_v54 = vshll.u32 %v14869_v20, 16  ;;  %v11793_v28 = vld [vmem:[%s16671_s4 + $0x30] sm:$0xff] }
 0x30c   : > { %4190 = vmatmul.bf16.gmra.mxu3 %v13244_v18  ;;  %v13650_v53 = vld [vmem:[#allocation2 + $0xc] sm:$0xff]   ;;  %v3659_v18 = vrot.slane %v3657_v6, 4  ;;  %6035 = vmatpush.bf16.msrb.mxu2 %v11793_v28 }
 0x30d   : > { %v4950_v50 = vmul.f32 %v14805_v17, %v4898_v49  ;;  %5595 = vmatmul.bf16.gmra.mxu1 %v13650_v53  ;;  %v5110_v49 = vsel %vm5104_vm3, %v5049_v10, 0.0  ;;  %v11833_v30 = vld [vmem:[%s16671_s4 + $0xb0] sm:$0xff] }
 0x30e   : > { %v3861_v41 = vpop.f32.mrf.mxu2  ;;  %6621 = vmatpush.bf16.msrb.mxu3 %v11833_v30 }
 0x30f   : > { %v5002_v59 = vadd.f32 %v14817_v31, %v4950_v50  ;;  %v3975_v39 = vadd.f32 %v3861_v41, %v14329_v12  ;;  %v4151_v21 = vpop.f32.mrf.mxu3  ;;  %v3660_v50 = vor.u32 %v3659_v18, %v3656_v56  ;;  %v4592_v12 = vor.u32 %v4590_v33, %v4588_v11  ;;  %v13246_v56 = vld [vmem:[%s13838_s16 + $0x74] sm:$0xff]  }
 0x310   : > { %v4787_v48 = vpop.f32.mrf.mxu0  ;;  %v4596_v41 = vrot.slane %v4594_v54, 1  ;;  %v12670_v54 = vld [vmem:[%s13838_s16 + $0x80] sm:$0xff]  }
 0x311   : > { %v5050_v34 = vmax.f32 %v5002_v59, 0.0  ;;  %v4265_v7 = vadd.f32 %v4151_v21, %v3975_v39  ;;  %v3661_v21 = vsel %vm710_vm0, %v3651_v62, %v3660_v50  ;;  %v3663_v62 = vshrl.u32 %v12670_v54, 16 }
 0x312   : > { %v4597_v18 = vsel %vm1325_vm1, %v4592_v12, %v4596_v41 }
 0x313   : > { %v5111_v57 = vsel %vm5099_vm2, %v5050_v34, 0.0  ;;  %v4899_v6 = vadd.f32 %v4785_v63, %v4265_v7  ;;  %v11849_v7 = vld [vmem:[%s16671_s4 + $0x130] sm:$0xff]  ;;  %v3666_v63 = vshll.u32 %v12670_v54, 16 }
 0x314   : > { %v12219_v53 = vpack.c.bf16 %v5111_v57, %v5110_v49  ;;  %v14900_v57 = vld [vmem:[%s13838_s16 + $0x84] sm:$0xff]  ;;  %7573 = vmatpush.bf16.msrb.mxu1 %v11849_v7 }
 0x315   : > { %v4951_v34 = vmul.f32 %v14805_v17, %v4899_v6 }
 0x316   : > { %12792 = vst [vmem:[#allocation2 + $0x18] sm:$0xff] %v12219_v53   ;;  %v3863_v10 = vpop.f32.mrf.mxu2 }
 0x317   : > { %v3976_v59 = vadd.f32 %v3863_v10, %v14341_v5  ;;  %v4153_v39 = vpop.f32.mrf.mxu3  ;;  %v11841_v5 = vld [vmem:[%s16671_s4 + $0xf0] sm:$0xff] }
 0x318   : > { %v4790_v11 = vpop.f32.mrf.mxu0  ;;  %7283 = vmatpush.bf16.msrb.mxu0 %v11841_v5 }
 0x319   : > { %v4266_v33 = vadd.f32 %v4153_v39, %v3976_v59  ;;  %v3665_v39 = vrot.slane %v3663_v62, 3 }
 0x31b   : > { %v4900_v49 = vadd.f32 %v4787_v48, %v4266_v33  ;;  %3905 = vmatmul.bf16.gmra.mxu2 %v3661_v21  ;;  %4829 = vmatmul.bf16.gmra.mxu0 %v4597_v18  ;;  %v5003_v48 = vadd.f32 %v14817_v31, %v4951_v34  ;;  %v3668_v21 = vrot.slane %v3666_v63, 4  ;;  %v4602_v18 = vshll.u32 %v14900_v57, 16 }
 0x31c   : > { %4195 = vmatmul.bf16.gmra.mxu3 %v13246_v56  ;;  %v4598_v56 = vshrl.u32 %v14869_v20, 16 }
 0x31d   : > { %v4952_v53 = vmul.f32 %v14805_v17, %v4900_v49  ;;  %v13652_v12 = vld [vmem:[#allocation2 + $0x14] sm:$0xff]   ;;  %v5051_v49 = vmax.f32 %v5003_v48, 0.0 }
 0x31e   : > { %v3866_v28 = vpop.f32.mrf.mxu2  ;;  %5600 = vmatmul.bf16.gmra.mxu1 %v13652_v12  ;;  %v4604_v12 = vrot.slane %v4602_v18, 1  ;;  %v11769_v18 = vld [vmem:[%s13838_s16 + $0x8c] sm:$0xff] }
 0x31f   : > { %v5004_v30 = vadd.f32 %v14817_v31, %v4952_v53  ;;  %v3977_v6 = vadd.f32 %v3866_v28, %v14347_v37  ;;  %v4156_v10 = vpop.f32.mrf.mxu3  ;;  %v3669_v37 = vor.u32 %v3668_v21, %v3665_v39  ;;  %v4600_v53 = vor.u32 %v4598_v56, %v4596_v41 }
 0x320   : > { %v4792_v59 = vpop.f32.mrf.mxu0 }
 0x321   : > { %v5052_v33 = vmax.f32 %v5004_v30, 0.0  ;;  %v4267_v54 = vadd.f32 %v4156_v10, %v3977_v6  ;;  %v3670_v48 = vsel %vm710_vm0, %v3660_v50, %v3669_v37  ;;  %v13248_v6 = vld [vmem:[%s13838_s16 + $0x7c] sm:$0xff]   ;;  %v4605_v10 = vsel %vm1325_vm1, %v4600_v53, %v4604_v12 }
 0x323   : > { %v5113_v34 = vsel %vm5104_vm3, %v5052_v33, 0.0  ;;  %v4901_v5 = vadd.f32 %v4790_v11, %v4267_v54  ;;  %v12671_v11 = vld [vmem:[%s13838_s16 + $0x88] sm:$0xff]  }
 0x324   : > { %v12224_v7 = vpack.c.bf16 %v5113_v34, %v5051_v49  ;;  %v3672_v21 = vshrl.u32 %v12671_v11, 16  ;;  %v3675_v56 = vshll.u32 %v12671_v11, 16 }
 0x325   : > { %v4953_v62 = vmul.f32 %v14805_v17, %v4901_v5 }
 0x326   : > { %12793 = vst [vmem:[#allocation2 + $0x20] sm:$0xff] %v12224_v7   ;;  %v3868_v63 = vpop.f32.mrf.mxu2 }
 0x327   : > { %v3978_v20 = vadd.f32 %v3868_v63, %v14358_v32  ;;  %v4158_v28 = vpop.f32.mrf.mxu3  ;;  %v5005_v39 = vadd.f32 %v14817_v31, %v4953_v62  ;;  %v3674_v62 = vrot.slane %v3672_v21, 3  ;;  %v4606_v63 = vshrl.u32 %v14900_v57, 16 }
 0x328   : > { %v4795_v30 = vpop.f32.mrf.mxu0 }
 0x329   : > { %v4268_v33 = vadd.f32 %v4158_v28, %v3978_v20  ;;  %v5053_v49 = vmax.f32 %v5005_v39, 0.0  ;;  %v4610_v20 = vshll.u32 %v11769_v18, 16  ;;  %v4608_v39 = vor.u32 %v4606_v63, %v4604_v12 }
 0x32b   : > { %v4902_v41 = vadd.f32 %v4792_v59, %v4268_v33  ;;  %3910 = vmatmul.bf16.gmra.mxu2 %v3670_v48  ;;  %4834 = vmatmul.bf16.gmra.mxu0 %v4605_v10  ;;  %v3677_v59 = vrot.slane %v3675_v56, 4 }
 0x32c   : > { %4200 = vmatmul.bf16.gmra.mxu3 %v13248_v6  ;;  %v5114_v6 = vsel %vm5099_vm2, %v5053_v49, 0.0 }
 0x32d   : > { %v4954_v32 = vmul.f32 %v14805_v17, %v4902_v41  ;;  %v13654_v54 = vld [vmem:[#allocation2 + $0x1c] sm:$0xff]   ;;  %v3678_v11 = vor.u32 %v3677_v59, %v3674_v62 }
 0x32e   : > { %v3871_v34 = vpop.f32.mrf.mxu2  ;;  %5605 = vmatmul.bf16.gmra.mxu1 %v13654_v54 }
 0x32f   : > { %v5006_v50 = vadd.f32 %v14817_v31, %v4954_v32  ;;  %v3979_v5 = vadd.f32 %v3871_v34, %v14366_v29  ;;  %v4161_v7 = vpop.f32.mrf.mxu3  ;;  %v4612_v29 = vrot.slane %v4610_v20, 1  ;;  %v3679_v54 = vsel %vm710_vm0, %v3669_v37, %v3678_v11  ;;  %v13250_v34 = vld [vmem:[%s13838_s16 + $0x84] sm:$0xff]  }
 0x330   : > { %v4797_v53 = vpop.f32.mrf.mxu0 }
 0x331   : > { %v5054_v28 = vmax.f32 %v5006_v50, 0.0  ;;  %v4269_v48 = vadd.f32 %v4161_v7, %v3979_v5  ;;  %v4613_v49 = vsel %vm1325_vm1, %v4608_v39, %v4612_v29  ;;  %v12672_v5 = vld [vmem:[%s13838_s16 + $0x90] sm:$0xff]   ;;  %v4614_v39 = vshrl.u32 %v11769_v18, 16  ;;  %v11792_v18 = vld [vmem:[%s16671_s4 + $0x28] sm:$0xff] }
 0x332   : > { %v3681_v62 = vshrl.u32 %v12672_v5, 16  ;;  %v3684_v59 = vshll.u32 %v12672_v5, 16  ;;  %v11832_v5 = vld [vmem:[%s16671_s4 + $0xa8] sm:$0xff]  ;;  %6036 = vmatpush.bf16.msrb.mxu2 %v11792_v18 }
 0x333   : > { %v12229_v10 = vpack.c.bf16 %v5054_v28, %v5114_v6  ;;  %v4903_v33 = vadd.f32 %v4795_v30, %v4269_v48  ;;  %6622 = vmatpush.bf16.msrb.mxu3 %v11832_v5 }
 0x335   : > { %12794 = vst [vmem:[#allocation2 + $0x28] sm:$0xff] %v12229_v10   ;;  %v4955_v21 = vmul.f32 %v14805_v17, %v4903_v33  ;;  %v3686_v33 = vrot.slane %v3684_v59, 4 }
 0x336   : > { %v3873_v41 = vpop.f32.mrf.mxu2 }
 0x337   : > { %v3980_v56 = vadd.f32 %v3873_v41, %v14380_v4  ;;  %v4163_v57 = vpop.f32.mrf.mxu3  ;;  %v5007_v30 = vadd.f32 %v14817_v31, %v4955_v21  ;;  %v14932_v4 = vld [vmem:[%s13838_s16 + $0x94] sm:$0xff] }
 0x338   : > { %v4800_v32 = vpop.f32.mrf.mxu0  ;;  %v4618_v41 = vshll.u32 %v14932_v4, 16  ;;  %v4622_v5 = vshrl.u32 %v14932_v4, 16 }
 0x339   : > { %v4270_v50 = vadd.f32 %v4163_v57, %v3980_v56  ;;  %v5055_v37 = vmax.f32 %v5007_v30, 0.0 }
 0x33b   : > { %v4904_v12 = vadd.f32 %v4797_v53, %v4270_v50  ;;  %3915 = vmatmul.bf16.gmra.mxu2 %v3679_v54  ;;  %4839 = vmatmul.bf16.gmra.mxu0 %v4613_v49  ;;  %v3683_v53 = vrot.slane %v3681_v62, 3  ;;  %v5116_v57 = vsel %vm5104_vm3, %v5055_v37, 0.0  ;;  %v4620_v50 = vrot.slane %v4618_v41, 1 }
 0x33c   : > { %4205 = vmatmul.bf16.gmra.mxu3 %v13250_v34  ;;  %v13656_v7 = vld [vmem:[#allocation2 + $0x24] sm:$0xff]  }
 0x33d   : > { %v4956_v63 = vmul.f32 %v14805_v17, %v4904_v12  ;;  %v3687_v49 = vor.u32 %v3686_v33, %v3683_v53  ;;  %v14961_v33 = vld [vmem:[%s13838_s16 + $0x9c] sm:$0xff] }
 0x33e   : > { %v3876_v20 = vpop.f32.mrf.mxu2  ;;  %5610 = vmatmul.bf16.gmra.mxu1 %v13656_v7 }
 0x33f   : > { %v5008_v28 = vadd.f32 %v14817_v31, %v4956_v63  ;;  %v3981_v48 = vadd.f32 %v3876_v20, %v14396_v25  ;;  %v4166_v6 = vpop.f32.mrf.mxu3  ;;  %v4616_v25 = vor.u32 %v4614_v39, %v4612_v29  ;;  %v3688_v59 = vsel %vm710_vm0, %v3678_v11, %v3687_v49  ;;  %v13252_v63 = vld [vmem:[%s13838_s16 + $0x8c] sm:$0xff]  }
 0x340   : > { %v4802_v10 = vpop.f32.mrf.mxu0 }
 0x341   : > { %v5056_v21 = vmax.f32 %v5008_v28, 0.0  ;;  %v4271_v56 = vadd.f32 %v4166_v6, %v3981_v48  ;;  %v4621_v20 = vsel %vm1325_vm1, %v4616_v25, %v4620_v50  ;;  %v12673_v28 = vld [vmem:[%s13838_s16 + $0x98] sm:$0xff]  }
 0x342   : > { %v3690_v11 = vshrl.u32 %v12673_v28, 16  ;;  %v3693_v53 = vshll.u32 %v12673_v28, 16 }
 0x343   : > { %v5117_v54 = vsel %vm5099_vm2, %v5056_v21, 0.0  ;;  %v4905_v30 = vadd.f32 %v4800_v32, %v4271_v56  ;;  %v11848_v32 = vld [vmem:[%s16671_s4 + $0x128] sm:$0xff] }
 0x344   : > { %v12234_v34 = vpack.c.bf16 %v5117_v54, %v5116_v57  ;;  %7574 = vmatpush.bf16.msrb.mxu1 %v11848_v32  ;;  %v3692_v25 = vrot.slane %v3690_v11, 3  ;;  %v3695_v18 = vrot.slane %v3693_v53, 4  ;;  %v13254_v53 = vld [vmem:[%s13838_s16 + $0x94] sm:$0xff]  }
 0x345   : > { %v4957_v48 = vmul.f32 %v14805_v17, %v4905_v30  ;;  %v4626_v30 = vshll.u32 %v14961_v33, 16 }
 0x346   : > { %12795 = vst [vmem:[#allocation2 + $0x30] sm:$0xff] %v12234_v34   ;;  %v3878_v12 = vpop.f32.mrf.mxu2 }
 0x347   : > { %v3982_v7 = vadd.f32 %v3878_v12, %v14408_v47  ;;  %v4168_v62 = vpop.f32.mrf.mxu3  ;;  %v11840_v47 = vld [vmem:[%s16671_s4 + $0xe8] sm:$0xff]  ;;  %v4628_v28 = vrot.slane %v4626_v30, 1 }
 0x348   : > { %v4805_v29 = vpop.f32.mrf.mxu0  ;;  %7284 = vmatpush.bf16.msrb.mxu0 %v11840_v47 }
 0x349   : > { %v4272_v37 = vadd.f32 %v4168_v62, %v3982_v7 }
 0x34b   : > { %v4906_v6 = vadd.f32 %v4802_v10, %v4272_v37  ;;  %3920 = vmatmul.bf16.gmra.mxu2 %v3688_v59  ;;  %4844 = vmatmul.bf16.gmra.mxu0 %v4621_v20  ;;  %v5009_v10 = vadd.f32 %v14817_v31, %v4957_v48  ;;  %v4624_v37 = vor.u32 %v4622_v5, %v4620_v50 }
 0x34c   : > { %4210 = vmatmul.bf16.gmra.mxu3 %v13252_v63 }
 0x34d   : > { %v4958_v39 = vmul.f32 %v14805_v17, %v4906_v6  ;;  %v13658_v41 = vld [vmem:[#allocation2 + $0x2c] sm:$0xff]   ;;  %v5057_v62 = vmax.f32 %v5009_v10, 0.0 }
 0x34e   : > { %v3881_v21 = vpop.f32.mrf.mxu2  ;;  %5615 = vmatmul.bf16.gmra.mxu1 %v13658_v41 }
 0x34f   : > { %v5010_v56 = vadd.f32 %v14817_v31, %v4958_v39  ;;  %v3983_v57 = vadd.f32 %v3881_v21, %v14414_v35  ;;  %v4171_v54 = vpop.f32.mrf.mxu3  ;;  %v3696_v35 = vor.u32 %v3695_v18, %v3692_v25  ;;  %v4629_v39 = vsel %vm1325_vm1, %v4624_v37, %v4628_v28 }
 0x350   : > { %v4807_v34 = vpop.f32.mrf.mxu0 }
 0x351   : > { %v5058_v12 = vmax.f32 %v5010_v56, 0.0  ;;  %v4273_v7 = vadd.f32 %v4171_v54, %v3983_v57  ;;  %v3697_v11 = vsel %vm710_vm0, %v3687_v49, %v3696_v35  ;;  %v11772_v57 = vld [vmem:[%s13838_s16 + $0xa4] sm:$0xff] }
 0x353   : > { %v5119_v59 = vsel %vm5104_vm3, %v5058_v12, 0.0  ;;  %v4907_v63 = vadd.f32 %v4805_v29, %v4273_v7  ;;  %v12674_v29 = vld [vmem:[%s13838_s16 + $0xa0] sm:$0xff]  }
 0x354   : > { %v12239_v20 = vpack.c.bf16 %v5119_v59, %v5057_v62  ;;  %v3699_v21 = vshrl.u32 %v12674_v29, 16  ;;  %v3702_v56 = vshll.u32 %v12674_v29, 16  ;;  %v4630_v62 = vshrl.u32 %v14961_v33, 16 }
 0x355   : > { %v4959_v48 = vmul.f32 %v14805_v17, %v4907_v63  ;;  %v4634_v59 = vshll.u32 %v11772_v57, 16 }
 0x356   : > { %12796 = vst [vmem:[#allocation2 + $0x38] sm:$0xff] %v12239_v20   ;;  %v3883_v6 = vpop.f32.mrf.mxu2  ;;  %v3701_v7 = vrot.slane %v3699_v21, 3 }
 0x357   : > { %v3984_v4 = vadd.f32 %v3883_v6, %v14425_v40  ;;  %v4173_v47 = vpop.f32.mrf.mxu3  ;;  %v5011_v10 = vadd.f32 %v14817_v31, %v4959_v48 }
 0x358   : > { %v4810_v32 = vpop.f32.mrf.mxu0 }
 0x359   : > { %v4274_v41 = vadd.f32 %v4173_v47, %v3984_v4  ;;  %v5059_v25 = vmax.f32 %v5011_v10, 0.0  ;;  %v4632_v47 = vor.u32 %v4630_v62, %v4628_v28  ;;  %v13256_v10 = vld [vmem:[%s13838_s16 + $0x9c] sm:$0xff]  }
 0x35b   : > { %v4908_v50 = vadd.f32 %v4807_v34, %v4274_v41  ;;  %3925 = vmatmul.bf16.gmra.mxu2 %v3697_v11  ;;  %4849 = vmatmul.bf16.gmra.mxu0 %v4629_v39  ;;  %v3704_v34 = vrot.slane %v3702_v56, 4  ;;  %v5120_v37 = vsel %vm5099_vm2, %v5059_v25, 0.0  ;;  %v12675_v56 = vld [vmem:[%s13838_s16 + $0xa8] sm:$0xff]  }
 0x35c   : > { %4215 = vmatmul.bf16.gmra.mxu3 %v13254_v53  ;;  %v3711_v25 = vshll.u32 %v12675_v56, 16 }
 0x35d   : > { %v4960_v40 = vmul.f32 %v14805_v17, %v4908_v50  ;;  %v13660_v54 = vld [vmem:[#allocation2 + $0x34] sm:$0xff]   ;;  %v3705_v4 = vor.u32 %v3704_v34, %v3701_v7 }
 0x35e   : > { %v3886_v18 = vpop.f32.mrf.mxu2  ;;  %5620 = vmatmul.bf16.gmra.mxu1 %v13660_v54  ;;  %v3708_v54 = vshrl.u32 %v12675_v56, 16  ;;  %v3713_v62 = vrot.slane %v3711_v25, 4  ;;  %v12676_v25 = vld [vmem:[%s13838_s16 + $0xb0] sm:$0xff]  }
 0x35f   : > { %v5012_v49 = vadd.f32 %v14817_v31, %v4960_v40  ;;  %v3985_v5 = vadd.f32 %v3886_v18, %v14433_v42  ;;  %v4176_v30 = vpop.f32.mrf.mxu3  ;;  %v4636_v42 = vrot.slane %v4634_v59, 1  ;;  %v3706_v29 = vsel %vm710_vm0, %v3696_v35, %v3705_v4 }
 0x360   : > { %v4812_v12 = vpop.f32.mrf.mxu0  ;;  %v4638_v59 = vshrl.u32 %v11772_v57, 16  ;;  %v11791_v57 = vld [vmem:[%s16671_s4 + $0x20] sm:$0xff] }
 0x361   : > { %v5060_v63 = vmax.f32 %v5012_v49, 0.0  ;;  %v4275_v20 = vadd.f32 %v4176_v30, %v3985_v5  ;;  %v4637_v50 = vsel %vm1325_vm1, %v4632_v47, %v4636_v42  ;;  %6037 = vmatpush.bf16.msrb.mxu2 %v11791_v57 }
 0x363   : > { %v12244_v48 = vpack.c.bf16 %v5060_v63, %v5120_v37  ;;  %v4909_v6 = vadd.f32 %v4810_v32, %v4275_v20  ;;  %v14999_v20 = vpop.f32.mrf.mxu1 }
 0x365   : > { %12797 = vst [vmem:[#allocation2 + $0x40] sm:$0xff] %v12244_v48   ;;  %v4961_v53 = vmul.f32 %v14805_v17, %v4909_v6 }
 0x366   : > { %v3888_v11 = vpop.f32.mrf.mxu2 }
 0x367   : > { %v3986_v39 = vadd.f32 %v3888_v11, %v14447_v13  ;;  %v4178_v33 = vpop.f32.mrf.mxu3  ;;  %v5013_v32 = vadd.f32 %v14817_v31, %v4961_v53  ;;  %v14993_v13 = vld [vmem:[%s13838_s16 + $0xac] sm:$0xff]  ;;  %v4640_v53 = vor.u32 %v4638_v59, %v4636_v42 }
 0x368   : > { %v4815_v41 = vpop.f32.mrf.mxu0  ;;  %v4642_v63 = vshll.u32 %v14993_v13, 16 }
 0x369   : > { %v4276_v21 = vadd.f32 %v4178_v33, %v3986_v39  ;;  %v5061_v35 = vmax.f32 %v5013_v32, 0.0  ;;  %v11831_v33 = vld [vmem:[%s16671_s4 + $0xa0] sm:$0xff] }
 0x36a   : > { %v4644_v39 = vrot.slane %v4642_v63, 1  ;;  %6623 = vmatpush.bf16.msrb.mxu3 %v11831_v33  ;;  %v13258_v32 = vld [vmem:[%s13838_s16 + $0xa4] sm:$0xff]  }
 0x36b   : > { %v4910_v28 = vadd.f32 %v4812_v12, %v4276_v21  ;;  %3930 = vmatmul.bf16.gmra.mxu2 %v3706_v29  ;;  %4854 = vmatmul.bf16.gmra.mxu0 %v4637_v50  ;;  %v3710_v12 = vrot.slane %v3708_v54, 3  ;;  %v5122_v6 = vsel %vm5104_vm3, %v5061_v35, 0.0  ;;  %v15015_v54 = vpop.f32.mrf.mxu1  ;;  %v3720_v35 = vshll.u32 %v12676_v25, 16 }
 0x36c   : > { %4220 = vmatmul.bf16.gmra.mxu3 %v13256_v10  ;;  %v13662_v40 = vld [vmem:[#allocation2 + $0x3c] sm:$0xff]  }
 0x36d   : > { %v4962_v18 = vmul.f32 %v14805_v17, %v4910_v28  ;;  %v3714_v11 = vor.u32 %v3713_v62, %v3710_v12  ;;  %v4645_v28 = vsel %vm1325_vm1, %v4640_v53, %v4644_v39 }
 0x36e   : > { %v3891_v49 = vpop.f32.mrf.mxu2  ;;  %5625 = vmatmul.bf16.gmra.mxu1 %v13662_v40 }
 0x36f   : > { %v5014_v5 = vadd.f32 %v14817_v31, %v4962_v18  ;;  %v3987_v30 = vadd.f32 %v3891_v49, %v14463_v19  ;;  %v4181_v7 = vpop.f32.mrf.mxu3  ;;  %v3715_v42 = vsel %vm710_vm0, %v3705_v4, %v3714_v11  ;;  %v11847_v4 = vld [vmem:[%s16671_s4 + $0x120] sm:$0xff]  ;;  %v3717_v49 = vshrl.u32 %v12676_v25, 16 }
 0x370   : > { %v4817_v34 = vpop.f32.mrf.mxu0  ;;  %7575 = vmatpush.bf16.msrb.mxu1 %v11847_v4 }
 0x371   : > { %v5062_v37 = vmax.f32 %v5014_v5, 0.0  ;;  %v4277_v48 = vadd.f32 %v4181_v7, %v3987_v30  ;;  %v15026_v5 = vld [vmem:[%s13838_s16 + $0xb4] sm:$0xff] }
 0x373   : > { %v5123_v47 = vsel %vm5099_vm2, %v5062_v37, 0.0  ;;  %v4911_v29 = vadd.f32 %v4815_v41, %v4277_v48  ;;  %v3719_v48 = vrot.slane %v3717_v49, 3  ;;  %v12677_v49 = vld [vmem:[%s13838_s16 + $0xb8] sm:$0xff]  }
 0x374   : > { %v12249_v19 = vpack.c.bf16 %v5123_v47, %v5122_v6  ;;  %v3722_v6 = vrot.slane %v3720_v35, 4  ;;  %v4646_v47 = vshrl.u32 %v14993_v13, 16 }
 0x375   : > { %v4963_v18 = vmul.f32 %v14805_v17, %v4911_v29 }
 0x376   : > { %12798 = vst [vmem:[#allocation2 + $0x48] sm:$0xff] %v12249_v19   ;;  %v3893_v10 = vpop.f32.mrf.mxu2  ;;  %v4650_v19 = vshll.u32 %v15026_v5, 16 }
 0x377   : > { %v3988_v50 = vadd.f32 %v3893_v10, %v14475_v14  ;;  %v4183_v21 = vpop.f32.mrf.mxu3  ;;  %v11839_v14 = vld [vmem:[%s16671_s4 + $0xe0] sm:$0xff] }
 0x378   : > { %v4820_v56 = vpop.f32.mrf.mxu0  ;;  %7285 = vmatpush.bf16.msrb.mxu0 %v11839_v14  ;;  %v13260_v14 = vld [vmem:[%s13838_s16 + $0xac] sm:$0xff]  }
 0x379   : > { %v4278_v40 = vadd.f32 %v4183_v21, %v3988_v50  ;;  %v15036_v50 = vpop.f32.mrf.mxu1  ;;  %v3723_v21 = vor.u32 %v3722_v6, %v3719_v48 }
 0x37b   : > { %v4912_v41 = vadd.f32 %v4817_v34, %v4278_v40  ;;  %3935 = vmatmul.bf16.gmra.mxu2 %v3715_v42  ;;  %4859 = vmatmul.bf16.gmra.mxu0 %v4645_v28  ;;  %v5015_v34 = vadd.f32 %v14817_v31, %v4963_v18  ;;  %v4648_v42 = vor.u32 %v4646_v47, %v4644_v39 }
 0x37c   : > { %4225 = vmatmul.bf16.gmra.mxu3 %v13258_v32  ;;  %v4652_v32 = vrot.slane %v4650_v19, 1 }
 0x37d   : > { %v4964_v30 = vmul.f32 %v14805_v17, %v4912_v41  ;;  %v13664_v7 = vld [vmem:[#allocation2 + $0x44] sm:$0xff]   ;;  %v5063_v33 = vmax.f32 %v5015_v34, 0.0  ;;  %v3724_v41 = vsel %vm710_vm0, %v3714_v11, %v3723_v21  ;;  %v15048_v34 = vld [vmem:[%s13838_s16 + $0xbc] sm:$0xff] }
 0x37e   : > { %v3896_v12 = vpop.f32.mrf.mxu2  ;;  %5630 = vmatmul.bf16.gmra.mxu1 %v13664_v7  ;;  %v3726_v7 = vshrl.u32 %v12677_v49, 16 }
 0x37f   : > { %v5016_v62 = vadd.f32 %v14817_v31, %v4964_v30  ;;  %v3989_v59 = vadd.f32 %v3896_v12, %v14481_v38  ;;  %v4186_v63 = vpop.f32.mrf.mxu3 }
 0x380   : > { %v4822_v37 = vpop.f32.mrf.mxu0  ;;  %v3728_v47 = vrot.slane %v3726_v7, 3 }
 0x381   : > { %v5064_v53 = vmax.f32 %v5016_v62, 0.0  ;;  %v4279_v57 = vadd.f32 %v4186_v63, %v3989_v59 }
 0x383   : > { %v5125_v29 = vsel %vm5104_vm3, %v5064_v53, 0.0  ;;  %v4913_v10 = vadd.f32 %v4820_v56, %v4279_v57  ;;  %v4653_v56 = vsel %vm1325_vm1, %v4648_v42, %v4652_v32  ;;  %v4654_v53 = vshrl.u32 %v15026_v5, 16 }
 0x384   : > { %v12254_v38 = vpack.c.bf16 %v5125_v29, %v5063_v33  ;;  %v4658_v57 = vshll.u32 %v15048_v34, 16 }
 0x385   : > { %v4965_v13 = vmul.f32 %v14805_v17, %v4913_v10 }
 0x386   : > { %12799 = vst [vmem:[#allocation2 + $0x50] sm:$0xff] %v12254_v38   ;;  %v3898_v28 = vpop.f32.mrf.mxu2 }
 0x387   : > { %v3990_v40 = vadd.f32 %v3898_v28, %v14492_v16  ;;  %v4188_v25 = vpop.f32.mrf.mxu3  ;;  %v5017_v35 = vadd.f32 %v14817_v31, %v4965_v13  ;;  %v3729_v16 = vshll.u32 %v12677_v49, 16  ;;  %v4656_v28 = vor.u32 %v4654_v53, %v4652_v32  ;;  %v13262_v49 = vld [vmem:[%s13838_s16 + $0xb4] sm:$0xff]  }
 0x388   : > { %v4825_v18 = vpop.f32.mrf.mxu0 }
 0x389   : > { %v4280_v4 = vadd.f32 %v4188_v25, %v3990_v40  ;;  %v5065_v62 = vmax.f32 %v5017_v35, 0.0  ;;  %v3731_v19 = vrot.slane %v3729_v16, 4  ;;  %v4660_v40 = vrot.slane %v4658_v57, 1 }
 0x38a   : > { %v15045_v30 = vpop.f32.mrf.mxu1  ;;  %v4662_v57 = vshrl.u32 %v15048_v34, 16  ;;  %v11790_v34 = vld [vmem:[%s16671_s4 + $0x18] sm:$0xff] }
 0x38b   : > { %v4914_v39 = vadd.f32 %v4822_v37, %v4280_v4  ;;  %3940 = vmatmul.bf16.gmra.mxu2 %v3724_v41  ;;  %4864 = vmatmul.bf16.gmra.mxu0 %v4653_v56  ;;  %v5126_v10 = vsel %vm5099_vm2, %v5065_v62, 0.0  ;;  %v4661_v35 = vsel %vm1325_vm1, %v4656_v28, %v4660_v40  ;;  %v15069_v62 = vld [vmem:[%s13838_s16 + $0xc4] sm:$0xff] }
 0x38c   : > { %4230 = vmatmul.bf16.gmra.mxu3 %v13260_v14  ;;  %v4664_v28 = vor.u32 %v4662_v57, %v4660_v40  ;;  %6038 = vmatpush.bf16.msrb.mxu2 %v11790_v34 }
 0x38d   : > { %v4966_v12 = vmul.f32 %v14805_v17, %v4914_v39  ;;  %v13666_v11 = vld [vmem:[#allocation2 + $0x4c] sm:$0xff]   ;;  %v12678_v39 = vld [vmem:[%s13838_s16 + $0xc0] sm:$0xff]  }
 0x38e   : > { %v3901_v59 = vpop.f32.mrf.mxu2  ;;  %5635 = vmatmul.bf16.gmra.mxu1 %v13666_v11  ;;  %v3738_v11 = vshll.u32 %v12678_v39, 16 }
 0x38f   : > { %v5018_v63 = vadd.f32 %v14817_v31, %v4966_v12  ;;  %v3991_v48 = vadd.f32 %v3901_v59, %v14500_v3  ;;  %v4191_v6 = vpop.f32.mrf.mxu3  ;;  %v3732_v3 = vor.u32 %v3731_v19, %v3728_v47 }
 0x390   : > { %v4827_v37 = vpop.f32.mrf.mxu0  ;;  %v3740_v53 = vrot.slane %v3738_v11, 4 }
 0x391   : > { %v5066_v33 = vmax.f32 %v5018_v63, 0.0  ;;  %v4281_v29 = vadd.f32 %v4191_v6, %v3991_v48  ;;  %v3733_v4 = vsel %vm710_vm0, %v3723_v21, %v3732_v3 }
 0x392   : > { %v15057_v13 = vpop.f32.mrf.mxu1 }
 0x393   : > { %v12259_v38 = vpack.c.bf16 %v5066_v33, %v5126_v10  ;;  %v4915_v42 = vadd.f32 %v4825_v18, %v4281_v29  ;;  %v4666_v33 = vshll.u32 %v15069_v62, 16 }
 0x395   : > { %12800 = vst [vmem:[#allocation2 + $0x58] sm:$0xff] %v12259_v38   ;;  %v4967_v5 = vmul.f32 %v14805_v17, %v4915_v42 }
 0x396   : > { %v3903_v25 = vpop.f32.mrf.mxu2 }
 0x397   : > { %v3992_v41 = vadd.f32 %v3903_v25, %v14514_v60  ;;  %v4193_v14 = vpop.f32.mrf.mxu3  ;;  %v5019_v7 = vadd.f32 %v14817_v31, %v4967_v5  ;;  %v3735_v60 = vshrl.u32 %v12678_v39, 16  ;;  %v4668_v25 = vrot.slane %v4666_v33, 1  ;;  %v11830_v5 = vld [vmem:[%s16671_s4 + $0x98] sm:$0xff] }
 0x398   : > { %v4830_v56 = vpop.f32.mrf.mxu0  ;;  %6624 = vmatpush.bf16.msrb.mxu3 %v11830_v5 }
 0x399   : > { %v4282_v18 = vadd.f32 %v4193_v14, %v3992_v41  ;;  %v5067_v63 = vmax.f32 %v5019_v7, 0.0  ;;  %v3737_v19 = vrot.slane %v3735_v60, 3  ;;  %v4669_v39 = vsel %vm1325_vm1, %v4664_v28, %v4668_v25  ;;  %v11846_v60 = vld [vmem:[%s16671_s4 + $0x118] sm:$0xff] }
 0x39a   : > { %7576 = vmatpush.bf16.msrb.mxu1 %v11846_v60 }
 0x39b   : > { %v4916_v32 = vadd.f32 %v4827_v37, %v4282_v18  ;;  %3945 = vmatmul.bf16.gmra.mxu2 %v3733_v4  ;;  %4869 = vmatmul.bf16.gmra.mxu0 %v4661_v35  ;;  %v15066_v16 = vpop.f32.mrf.mxu1  ;;  %v15082_v42 = vor.u32 %v3740_v53, %v3737_v19  ;;  %v13264_v18 = vld [vmem:[%s13838_s16 + $0xbc] sm:$0xff]  }
 0x39c   : > { %4235 = vmatmul.bf16.gmra.mxu3 %v13262_v49  ;;  %v13668_v12 = vld [vmem:[#allocation2 + $0x54] sm:$0xff]  }
 0x39d   : > { %v4968_v21 = vmul.f32 %v14805_v17, %v4916_v32  ;;  %v5128_v17 = vsel %vm5104_vm3, %v5067_v63, 0.0  ;;  %v3742_v40 = vsel %vm710_vm0, %v3732_v3, %v15082_v42  ;;  %v12679_v32 = vld [vmem:[%s13838_s16 + $0xc8] sm:$0xff]   ;;  %v11838_v3 = vld [vmem:[%s16671_s4 + $0xd8] sm:$0xff] }
 0x39e   : > { %v3906_v59 = vpop.f32.mrf.mxu2  ;;  %5640 = vmatmul.bf16.gmra.mxu1 %v13668_v12  ;;  %v15111_v63 = vld [vmem:[%s13838_s16 + $0xcc] sm:$0xff]  ;;  %7286 = vmatpush.bf16.msrb.mxu0 %v11838_v3 }
 0x39f   : > { %v5020_v48 = vadd.f32 %v14817_v31, %v4968_v21  ;;  %v3993_v6 = vadd.f32 %v3906_v59, %v14530_v9  ;;  %v4196_v47 = vpop.f32.mrf.mxu3  ;;  %v3744_v21 = vshrl.u32 %v12679_v32, 16  ;;  %v3747_v59 = vshll.u32 %v12679_v32, 16 }
 0x3a0   : > { %v4832_v37 = vpop.f32.mrf.mxu0 }
 0x3a1   : > { %v5068_v29 = vmax.f32 %v5020_v48, 0.0  ;;  %v4283_v10 = vadd.f32 %v4196_v47, %v3993_v6  ;;  %v15117_v47 = vld [vmem:[%s16670_s3] ss:$0 sm:$0xff] }
 0x3a3   : > { %v5129_v38 = vsel %vm5099_vm2, %v5068_v29, 0.0  ;;  %v15080_v9 = vpop.f32.mrf.mxu1  ;;  %v4917_v41 = vadd.f32 %v4830_v56, %v4283_v10  ;;  %v15099_v56 = vld [vmem:[%s16669_s2] ss:$0 sm:$0xff]  ;;  %v3746_v10 = vrot.slane %v3744_v21, 3  ;;  %v13266_v21 = vld [vmem:[%s13838_s16 + $0xc4] sm:$0xff]  }
 0x3a4   : > { %v12264_v31 = vpack.c.bf16 %v5129_v38, %v5128_v17  ;;  %v3749_v17 = vrot.slane %v3747_v59, 4  ;;  %v4670_v38 = vshrl.u32 %v15069_v62, 16  ;;  %v16724_v62 = vld [vmem:[#allocation17_spill] sm:$0xff] }
 0x3a6   : > { %12801 = vst [vmem:[#allocation2 + $0x60] sm:$0xff] %v12264_v31   ;;  %v3908_v14 = vpop.f32.mrf.mxu2  ;;  %v4674_v31 = vshll.u32 %v15111_v63, 16 }
 0x3a7   : > { %v3994_v4 = vadd.f32 %v3908_v14, %v14542_v61  ;;  %v4198_v49 = vpop.f32.mrf.mxu3  ;;  %v4969_v61 = vmul.f32 %v15099_v56, %v4917_v41 }
 0x3a8   : > { %v4835_v35 = vpop.f32.mrf.mxu0 }
 0x3a9   : > { %v4284_v7 = vadd.f32 %v4198_v49, %v3994_v4  ;;  %v15128_v49 = vor.u32 %v3749_v17, %v3746_v10 }
 0x3ab   : > { %v4918_v12 = vadd.f32 %v4832_v37, %v4284_v7  ;;  %3950 = vmatmul.bf16.gmra.mxu2 %v3742_v40  ;;  %4874 = vmatmul.bf16.gmra.mxu0 %v4669_v39  ;;  %v15108_v11 = vpop.f32.mrf.mxu1  ;;  %v5021_v37 = vadd.f32 %v15117_v47, %v4969_v61  ;;  %v4672_v40 = vor.u32 %v4670_v38, %v4668_v25  ;;  %v16723_v39 = vld [vmem:[#allocation18_spill] sm:$0xff] }
 0x3ac   : > { %4240 = vmatmul.bf16.gmra.mxu3 %v13264_v18  ;;  %v4676_v18 = vrot.slane %v4674_v31, 1  ;;  %v3334_v7 = vadd.f32 %v16724_v62, %v16723_v39  ;;  %v3405_v31 = vld [vmem:[%s13838_s16 + $0xd8] sm:$0xf]  ;;  %v4678_v62 = vshrl.u32 %v15111_v63, 16  ;;  %v11828_v63 = vld [vmem:[%s16671_s4 + $0x88] sm:$0xff] }
 0x3ad   : > { %v4970_v48 = vmul.f32 %v15099_v56, %v4918_v12  ;;  %v13670_v6 = vld [vmem:[#allocation2 + $0x5c] sm:$0xff]   ;;  %v5069_v5 = vmax.f32 %v5021_v37, 0.0 }
 0x3ae   : > { %v3911_v19 = vpop.f32.mrf.mxu2  ;;  %5645 = vmatmul.bf16.gmra.mxu1 %v13670_v6  ;;  %v4677_v59 = vsel %vm1325_vm1, %v4672_v40, %v4676_v18 }
 0x3af   : > { %v5022_v53 = vadd.f32 %v15117_v47, %v4970_v48  ;;  %v3995_v57 = vadd.f32 %v3911_v19, %v14550_v27  ;;  %v4201_v33 = vpop.f32.mrf.mxu3  ;;  %v15139_v48 = vld [vmem:[%s13838_s16 + $0xd0] sm:$0xff]  }
 0x3b0   : > { %v4837_v29 = vpop.f32.mrf.mxu0 }
 0x3b1   : > { %v5070_v28 = vmax.f32 %v5022_v53, 0.0  ;;  %v4285_v34 = vadd.f32 %v4201_v33, %v3995_v57  ;;  %v3753_v53 = vshrl.u32 %v15139_v48, 16  ;;  %v3756_v57 = vshll.u32 %v15139_v48, 16 }
 0x3b3   : > { %v5131_v41 = vsel %vm5104_vm3, %v5070_v28, 0.0  ;;  %v4919_v14 = vadd.f32 %v4835_v35, %v4285_v34  ;;  %v15126_v27 = vpop.f32.mrf.mxu1  ;;  %v3751_v35 = vsel %vm710_vm0, %v15082_v42, %v15128_v49  ;;  %v15147_v42 = vld [vmem:[%s13838_s16 + $0xd4] sm:$0xff]  ;;  %v3755_v40 = vrot.slane %v3753_v53, 3 }
 0x3b4   : > { %v12269_v4 = vpack.c.bf16 %v5131_v41, %v5069_v5  ;;  %v11789_v5 = vld [vmem:[%s16671_s4 + $0x10] sm:$0xff]  ;;  %v3758_v39 = vrot.slane %v3756_v57, 4 }
 0x3b5   : > { %v4971_v32 = vmul.f32 %v15099_v56, %v4919_v14  ;;  %v11829_v41 = vld [vmem:[%s16671_s4 + $0x90] sm:$0xff]  ;;  %6039 = vmatpush.bf16.msrb.mxu2 %v11789_v5 }
 0x3b6   : > { %12802 = vst [vmem:[#allocation2 + $0x68] sm:$0xff] %v12269_v4   ;;  %v3913_v61 = vpop.f32.mrf.mxu2  ;;  %v11837_v14 = vld [vmem:[%s16671_s4 + $0xd0] sm:$0xff]  ;;  %6625 = vmatpush.bf16.msrb.mxu3 %v11829_v41 }
 0x3b7   : > { %v3996_v12 = vadd.f32 %v3913_v61, %v3334_v7  ;;  %v4203_v3 = vpop.f32.mrf.mxu3  ;;  %v5023_v6 = vadd.f32 %v15117_v47, %v4971_v32  ;;  %7287 = vmatpush.bf16.msrb.mxu0 %v11837_v14  ;;  %v13267_v41 = vld [vmem:[%s13838_s16 + $0xcc] sm:$0xff]  }
 0x3b8   : > { %v4840_v60 = vpop.f32.mrf.mxu0 }
 0x3b9   : > { %v4286_v25 = vadd.f32 %v4203_v3, %v3996_v12  ;;  %v5071_v17 = vmax.f32 %v5023_v6, 0.0  ;;  %v15166_v12 = vunpack.c.l.b16 %v3405_v31  ;;  %v15179_v6 = vor.u32 %v3758_v39, %v3755_v40 }
 0x3ba   : > { %6626 = vmatpush.bf16.msrb.mxu3 %v11828_v63 }
 0x3bb   : > { %v4920_v37 = vadd.f32 %v4837_v29, %v4286_v25  ;;  %3955 = vmatmul.bf16.gmra.mxu2 %v3751_v35  ;;  %4879 = vmatmul.bf16.gmra.mxu0 %v4677_v59  ;;  %v15142_v19 = vpop.f32.mrf.mxu1  ;;  %v5132_v61 = vsel %vm5099_vm2, %v5071_v17, 0.0  ;;  %v11836_v59 = vld [vmem:[%s16671_s4 + $0xc8] sm:$0xff]  ;;  %v3545_v17 = vpack.c.b16 %v15166_v12, %v15166_v12  ;;  %v3760_v5 = vsel %vm710_vm0, %v15128_v49, %v15179_v6 }
 0x3bc   : > { %4245 = vmatmul.bf16.gmra.mxu3 %v13266_v21  ;;  %v11788_v21 = vld [vmem:[%s16671_s4 + $0x8] sm:$0xff]  ;;  %7288 = vmatpush.bf16.msrb.mxu0 %v11836_v59 }
 0x3bd   : > { %v4972_v33 = vmul.f32 %v15099_v56, %v4920_v37  ;;  %v13672_v10 = vld [vmem:[#allocation2 + $0x64] sm:$0xff]   ;;  %v4680_v37 = vor.u32 %v4678_v62, %v4676_v18  ;;  %6040 = vmatpush.bf16.msrb.mxu2 %v11788_v21  ;;  %v3762_v62 = vshrl.u32 %v3545_v17, 16 }
 0x3be   : > { %v3916_v38 = vpop.f32.mrf.mxu2  ;;  %5650 = vmatmul.bf16.gmra.mxu1 %v13672_v10  ;;  %v11787_v18 = vld [vmem:[%s16671_s4] sm:$0xff] }
 0x3bf   : > { %v5024_v28 = vadd.f32 %v15117_v47, %v4972_v33  ;;  %v3997_v29 = vadd.f32 %v3916_v38, %v14575_v36  ;;  %v4206_v34 = vpop.f32.mrf.mxu3  ;;  %v4682_v36 = vshll.u32 %v15147_v42, 16  ;;  %v4357_v33 = vld [vmem:[%s13838_s16 + $0xdc] sm:$0x1]  ;;  %v3764_v63 = vrot.slane %v3762_v62, 3 }
 0x3c0   : > { %v4842_v4 = vpop.f32.mrf.mxu0  ;;  %v4472_v40 = vunpack.c.l.b16 %v4357_v33 }
 0x3c1   : > { %v5072_v7 = vmax.f32 %v5024_v28, 0.0  ;;  %v4287_v32 = vadd.f32 %v4206_v34, %v3997_v29  ;;  %v4684_v53 = vrot.slane %v4682_v36, 1  ;;  %v11835_v29 = vld [vmem:[%s16671_s4 + $0xc0] sm:$0xff]  ;;  %6041 = vmatpush.bf16.msrb.mxu2 %v11787_v18 }
 0x3c2   : > { %7289 = vmatpush.bf16.msrb.mxu0 %v11835_v29  ;;  %v4497_v49 = vpack.c.b16 %v4472_v40, %v4472_v40 }
 0x3c3   : > { %v12274_v3 = vpack.c.bf16 %v5072_v7, %v5132_v61  ;;  %v4921_v35 = vadd.f32 %v4840_v60, %v4287_v32  ;;  %v15177_v25 = vpop.f32.mrf.mxu1  ;;  %v16725_v60 = vld [vmem:[#allocation19_spill] sm:$0xff]  ;;  %v4685_v14 = vsel %vm1325_vm1, %v4680_v37, %v4684_v53  ;;  %v3765_v32 = vshll.u32 %v3545_v17, 16 }
 0x3c4   : > { %v3336_v57 = vadd.f32 %v16725_v60, %v14584_v43  ;;  %v11827_v43 = vld [vmem:[%s16671_s4 + $0x80] sm:$0xff]  ;;  %v4690_v17 = vshll.u32 %v4497_v49, 16 }
 0x3c5   : > { %12803 = vst [vmem:[#allocation2 + $0x70] sm:$0xff] %v12274_v3   ;;  %v4973_v38 = vmul.f32 %v15099_v56, %v4921_v35  ;;  %6627 = vmatpush.bf16.msrb.mxu3 %v11827_v43 }
 0x3c6   : > { %v3918_v10 = vpop.f32.mrf.mxu2  ;;  %v4692_v40 = vrot.slane %v4690_v17, 1 }
 0x3c7   : > { %v3998_v31 = vadd.f32 %v3918_v10, %v3336_v57  ;;  %v4208_v28 = vpop.f32.mrf.mxu3  ;;  %v5025_v36 = vadd.f32 %v15117_v47, %v4973_v38  ;;  %v4686_v10 = vshrl.u32 %v15147_v42, 16  ;;  %v3338_v42 = vadd.f32 %v14592_v0, %v14608_v8  ;;  %v13695_v8 = vld [vmem:[#allocation2 + $0x14] sm:$0xff]  }
 0x3c8   : > { %v4845_v34 = vpop.f32.mrf.mxu0 }
 0x3c9   : > { %v4288_v39 = vadd.f32 %v4208_v28, %v3998_v31  ;;  %v5073_v59 = vmax.f32 %v5025_v36, 0.0  ;;  %v5308_v31 = vld [vmem:[#allocation2] sm:$0x8] }
 0x3cb   : > { %v4922_v7 = vadd.f32 %v4842_v4, %v4288_v39  ;;  %3960 = vmatmul.bf16.gmra.mxu2 %v3760_v5  ;;  %4884 = vmatmul.bf16.gmra.mxu0 %v4685_v14  ;;  %v15202_v61 = vpop.f32.mrf.mxu1  ;;  %v3767_v4 = vrot.slane %v3765_v32, 4  ;;  %v5134_v18 = vsel %vm5104_vm3, %v5073_v59, 0.0  ;;  %v12210_v5 = vunpack.c.h.b16 %v15139_v48  ;;  %v13380_v59 = vld [vmem:[#allocation2 + $0xc] sm:$0x8] }
 0x3cc   : > { %4250 = vmatmul.bf16.gmra.mxu3 %v13267_v41  ;;  %v13674_v3 = vld [vmem:[#allocation2 + $0x6c] sm:$0xff]   ;;  %v4688_v14 = vor.u32 %v4686_v10, %v4684_v53  ;;  %v5712_v39 = vunpack.c.l.b16 %v5308_v31  ;;  %v16726_v53 = vunpack.c.l.b16 %v14734_v46 }
 0x3cd   : > { %v4974_v35 = vmul.f32 %v15099_v56, %v4922_v7  ;;  %v3768_v29 = vor.u32 %v3767_v4, %v3764_v63  ;;  %v4059_v48 = vpack.c.b16 %v15166_v12, %v12210_v5 }
 0x3ce   : > { %v3921_v21 = vpop.f32.mrf.mxu2  ;;  %5655 = vmatmul.bf16.gmra.mxu1 %v13674_v3 }
 0x3cf   : > { %v5026_v37 = vadd.f32 %v15117_v47, %v4974_v35  ;;  %v3999_v60 = vadd.f32 %v3921_v21, %v14599_v58  ;;  %v4211_v57 = vpop.f32.mrf.mxu3  ;;  %v3769_v49 = vsel %vm710_vm0, %v15179_v6, %v3768_v29  ;;  %v4693_v35 = vsel %vm1325_vm1, %v4688_v14, %v4692_v40  ;;  %v11845_v6 = vld [vmem:[%s16671_s4 + $0x110] sm:$0xff] }
 0x3d0   : > { %v4847_v33 = vpop.f32.mrf.mxu0  ;;  %v5713_v21 = vpack.c.b16 %v16726_v53, %v5712_v39  ;;  %7577 = vmatpush.bf16.msrb.mxu1 %v11845_v6  ;;  %v6998_v29 = vshll.u32 %v13695_v8, 16  ;;  %v15233_v40 = vld [vmem:[#allocation2 + $0xc] sm:$0xff] }
 0x3d1   : > { %v5074_v38 = vmax.f32 %v5026_v37, 0.0  ;;  %v4289_v28 = vadd.f32 %v4211_v57, %v3999_v60  ;;  %v13693_v37 = vld [vmem:[#allocation2 + $0xc] sm:$0xf0]   ;;  %v11803_v60 = vld [vmem:[#allocation2 + $0x4] sm:$0xff] }
 0x3d2   : > { %v5739_v57 = vshrl.u32 %v5713_v21, 16  ;;  %v5742_v46 = vshll.u32 %v5713_v21, 16  ;;  %v13381_v4 = vor.u32 %v13693_v37, %v13380_v59  ;;  %v6355_v39 = vshll.u32 %v11803_v60, 16 }
 0x3d3   : > { %v5135_v43 = vsel %vm5099_vm2, %v5074_v38, 0.0  ;;  %v15213_v41 = vpop.f32.mrf.mxu1  ;;  %v4923_v62 = vadd.f32 %v4845_v34, %v4289_v28  ;;  %v13755_v38 = vld [vmem:[#allocation2 + $0x8] sm:$0xff]   ;;  %v6353_v53 = vshrl.u32 %v11803_v60, 16  ;;  %v7000_v37 = vrot.slane %v6998_v29, 4 }
 0x3d4   : > { %v12279_v58 = vpack.c.bf16 %v5135_v43, %v5134_v18  ;;  %v5747_v31 = vshrl.u32 %v13755_v38, 16  ;;  %v5750_v18 = vshll.u32 %v13755_v38, 16  ;;  %v6995_v43 = vshrl.u32 %v13695_v8, 16 }
 0x3d5   : > { %v4975_v0 = vmul.f32 %v15099_v56, %v4923_v62  ;;  %v5741_v62 = vrot.slane %v5739_v57, 3  ;;  %v6357_v8 = vrot.slane %v6355_v39, 1  ;;  %v3340_v60 = vadd.f32 %v14612_v26, %v14620_v23  ;;  %v15246_v26 = vld [vmem:[#allocation2 + $0x10] sm:$0xff]   ;;  %v13697_v23 = vld [vmem:[#allocation2 + $0x1c] sm:$0xff]  }
 0x3d6   : > { %12804 = vst [vmem:[#allocation2 + $0x78] sm:$0xff] %v12279_v58   ;;  %v3923_v36 = vpop.f32.mrf.mxu2  ;;  %v6997_v59 = vrot.slane %v6995_v43, 3 }
 0x3d7   : > { %v4000_v7 = vadd.f32 %v3923_v36, %v3338_v42  ;;  %v4213_v32 = vpop.f32.mrf.mxu3  ;;  %v5744_v36 = vrot.slane %v5742_v46, 4 }
 0x3d8   : > { %v4850_v3 = vpop.f32.mrf.mxu0 }
 0x3d9   : > { %v4290_v63 = vadd.f32 %v4213_v32, %v4000_v7  ;;  %v6987_v7 = vshrl.u32 %v13381_v4, 16  ;;  %v6990_v32 = vshll.u32 %v13381_v4, 16  ;;  %v5745_v46 = vor.u32 %v5744_v36, %v5741_v62 }
 0x3db   : > { %v4924_v34 = vadd.f32 %v4847_v33, %v4290_v63  ;;  %3965 = vmatmul.bf16.gmra.mxu2 %v3769_v49  ;;  %4889 = vmatmul.bf16.gmra.mxu0 %v4693_v35  ;;  %v15227_v12 = vpop.f32.mrf.mxu1  ;;  %v5027_v33 = vadd.f32 %v15117_v47, %v4975_v0  ;;  %v5749_v35 = vrot.slane %v5747_v31, 3  ;;  %v5752_v63 = vrot.slane %v5750_v18, 4 }
 0x3dc   : > { %4255 = vmatmul.bf16.gmra.mxu3 %v4059_v48  ;;  %v6989_v4 = vrot.slane %v6987_v7, 3  ;;  %v6358_v18 = vor.u32 %v6357_v8, %v6353_v53  ;;  %v15256_v8 = vld [vmem:[#allocation2 + $0x14] sm:$0xff] }
 0x3dd   : > { %v4976_v10 = vmul.f32 %v15099_v56, %v4924_v34  ;;  %v13676_v17 = vld [vmem:[#allocation2 + $0x74] sm:$0xff]   ;;  %v5075_v21 = vmax.f32 %v5027_v33, 0.0  ;;  %v6360_v34 = vshll.u32 %v15233_v40, 16  ;;  %v5753_v31 = vor.u32 %v5752_v63, %v5749_v35 }
 0x3de   : > { %v3926_v28 = vpop.f32.mrf.mxu2  ;;  %5660 = vmatmul.bf16.gmra.mxu1 %v13676_v17  ;;  %v7001_v33 = vor.u32 %v7000_v37, %v6997_v59  ;;  %v5756_v35 = vshrl.u32 %v15246_v26, 16  ;;  %v5759_v63 = vshll.u32 %v15246_v26, 16  ;;  %v7004_v59 = vshrl.u32 %v13697_v23, 16 }
 0x3df   : > { %v5028_v5 = vadd.f32 %v15117_v47, %v4976_v10  ;;  %v4001_v58 = vadd.f32 %v3926_v28, %v14614_v24  ;;  %v4216_v14 = vpop.f32.mrf.mxu3  ;;  %v6992_v10 = vrot.slane %v6990_v32, 4  ;;  %v6362_v43 = vrot.slane %v6360_v34, 1 }
 0x3e0   : > { %v4852_v42 = vpop.f32.mrf.mxu0  ;;  %v7007_v37 = vshll.u32 %v13697_v23, 16 }
 0x3e1   : > { %v5076_v49 = vmax.f32 %v5028_v5, 0.0  ;;  %v4291_v48 = vadd.f32 %v4216_v14, %v4001_v58  ;;  %v5754_v5 = vsel %vm710_vm0, %v5745_v46, %v5753_v31  ;;  %v6993_v58 = vor.u32 %v6992_v10, %v6989_v4 }
 0x3e2   : > { %v6363_v7 = vsel %vm1325_vm1, %v6358_v18, %v6362_v43  ;;  %v5758_v4 = vrot.slane %v5756_v35, 3  ;;  %v6368_v18 = vshll.u32 %v15256_v8, 16 }
 0x3e3   : > { %v5137_v24 = vsel %vm5104_vm3, %v5076_v49, 0.0  ;;  %v4925_v0 = vadd.f32 %v4850_v3, %v4291_v48  ;;  %v15238_v57 = vpop.f32.mrf.mxu1  ;;  %v7002_v62 = vsel %vm710_vm0, %v6993_v58, %v7001_v33 }
 0x3e4   : > { %v12284_v6 = vpack.c.bf16 %v5137_v24, %v5075_v21 }
 0x3e5   : > { %v4977_v17 = vmul.f32 %v15099_v56, %v4925_v0 }
 0x3e6   : > { %12805 = vst [vmem:[#allocation2 + $0x80] sm:$0xff] %v12284_v6   ;;  %v3928_v38 = vpop.f32.mrf.mxu2 }
 0x3e7   : > { %v4002_v28 = vadd.f32 %v3928_v38, %v3340_v60  ;;  %v4218_v3 = vpop.f32.mrf.mxu3  ;;  %v5029_v39 = vadd.f32 %v15117_v47, %v4977_v17  ;;  %v5761_v60 = vrot.slane %v5759_v63, 4  ;;  %v7006_v17 = vrot.slane %v7004_v59, 3  ;;  %v15269_v63 = vld [vmem:[#allocation2 + $0x18] sm:$0xff]  }
 0x3e8   : > { %v4855_v29 = vpop.f32.mrf.mxu0  ;;  %v7009_v38 = vrot.slane %v7007_v37, 4 }
 0x3e9   : > { %v4292_v14 = vadd.f32 %v4218_v3, %v4002_v28  ;;  %v5077_v53 = vmax.f32 %v5029_v39, 0.0 }
 0x3ea   : > { %v7010_v39 = vor.u32 %v7009_v38, %v7006_v17 }
 0x3eb   : > { %v4926_v36 = vadd.f32 %v4852_v42, %v4292_v14  ;;  %6042 = vmatmul.bf16.vlgmr.msrb.gmra.mxu2 %v5754_v5  ;;  %7290 = vmatmul.bf16.vlgmr.msrb.gmra.mxu0 %v7002_v62  ;;  %v15249_v32 = vpop.f32.mrf.mxu1  ;;  %v5138_v10 = vsel %vm5099_vm2, %v5077_v53, 0.0  ;;  %v5762_v14 = vor.u32 %v5761_v60, %v5758_v4  ;;  %v15280_v60 = vld [vmem:[#allocation2 + $0x1c] sm:$0xff] }
 0x3ec   : > { %6628 = vmatmul.bf16.vlgmr.msrb.gmra.mxu3 %v6363_v7  ;;  %v6364_v7 = vshrl.u32 %v15233_v40, 16 }
 0x3ed   : > { %v4978_v49 = vmul.f32 %v15099_v56, %v4926_v36  ;;  %v13678_v48 = vld [vmem:[#allocation2 + $0x7c] sm:$0xff]   ;;  %v5763_v53 = vsel %vm710_vm0, %v5753_v31, %v5762_v14  ;;  %v5765_v31 = vshrl.u32 %v15269_v63, 16 }
 0x3ee   : > { %v3931_v21 = vpop.f32.mrf.mxu2  ;;  %5665 = vmatmul.bf16.gmra.mxu1 %v13678_v48  ;;  %v6366_v35 = vor.u32 %v6364_v7, %v6362_v43 }
 0x3ef   : > { %v5030_v42 = vadd.f32 %v15117_v47, %v4978_v49  ;;  %v4003_v24 = vadd.f32 %v3931_v21, %v14626_v22  ;;  %v4221_v0 = vpop.f32.mrf.mxu3  ;;  %v3342_v22 = vadd.f32 %v14624_v1, %v14633_v44  ;;  %v6370_v49 = vrot.slane %v6368_v18, 1  ;;  %v13699_v1 = vld [vmem:[#allocation2 + $0x24] sm:$0xff]  }
 0x3f0   : > { %v4857_v34 = vpop.f32.mrf.mxu0  ;;  %v7011_v21 = vsel %vm710_vm0, %v7001_v33, %v7010_v39  ;;  %v5768_v33 = vshll.u32 %v15269_v63, 16 }
 0x3f1   : > { %v5078_v6 = vmax.f32 %v5030_v42, 0.0  ;;  %v4293_v46 = vadd.f32 %v4221_v0, %v4003_v24  ;;  %v6371_v37 = vsel %vm1325_vm1, %v6366_v35, %v6370_v49  ;;  %v7013_v0 = vshrl.u32 %v13699_v1, 16  ;;  %v16728_v35 = vld [vmem:[#allocation3_spill] sm:$0xff] }
 0x3f2   : > { %v5770_v18 = vrot.slane %v5768_v33, 4 }
 0x3f3   : > { %v12289_v28 = vpack.c.bf16 %v5078_v6, %v5138_v10  ;;  %v4927_v3 = vadd.f32 %v4855_v29, %v4293_v46  ;;  %v15261_v5 = vpop.f32.mrf.mxu1  ;;  %v7016_v6 = vshll.u32 %v13699_v1, 16 }
 0x3f5   : > { %12806 = vst [vmem:[#allocation2 + $0x88] sm:$0xff] %v12289_v28   ;;  %v4979_v62 = vmul.f32 %v15099_v56, %v4927_v3  ;;  %v5767_v28 = vrot.slane %v5765_v31, 3 }
 0x3f6   : > { %v3933_v58 = vpop.f32.mrf.mxu2 }
 0x3f7   : > { %v4004_v23 = vadd.f32 %v3933_v58, %v3342_v22  ;;  %v4223_v36 = vpop.f32.mrf.mxu3  ;;  %v5031_v44 = vadd.f32 %v15117_v47, %v4979_v62  ;;  %v7015_v22 = vrot.slane %v7013_v0, 3  ;;  %v7018_v58 = vrot.slane %v7016_v6, 4 }
 0x3f8   : > { %v4860_v48 = vpop.f32.mrf.mxu0 }
 0x3f9   : > { %v4294_v29 = vadd.f32 %v4223_v36, %v4004_v23  ;;  %v5079_v46 = vmax.f32 %v5031_v44, 0.0  ;;  %v6376_v36 = vshll.u32 %v15280_v60, 16  ;;  %v15291_v44 = vor.u32 %v5770_v18, %v5767_v28 }
 0x3fb   : > { %v4928_v59 = vadd.f32 %v4857_v34, %v4294_v29  ;;  %6047 = vmatmul.bf16.gmra.mxu2 %v5763_v53  ;;  %7295 = vmatmul.bf16.gmra.mxu0 %v7011_v21  ;;  %v15273_v40 = vpop.f32.mrf.mxu1  ;;  %v5140_v62 = vsel %vm5104_vm3, %v5079_v46, 0.0  ;;  %v16727_v29 = vld [vmem:[#allocation4_spill] sm:$0xff]  ;;  %v6378_v31 = vrot.slane %v6376_v36, 1  ;;  %v5772_v46 = vsel %vm710_vm0, %v5762_v14, %v15291_v44 }
 0x3fc   : > { %6633 = vmatmul.bf16.gmra.mxu3 %v6371_v37  ;;  %v13680_v42 = vld [vmem:[#allocation2 + $0x84] sm:$0xff]   ;;  %v3344_v53 = vadd.f32 %v16728_v35, %v16727_v29 }
 0x3fd   : > { %v4980_v43 = vmul.f32 %v15099_v56, %v4928_v59  ;;  %v15293_v59 = vor.u32 %v7018_v58, %v7015_v22  ;;  %v15315_v29 = vld [vmem:[#allocation2 + $0x24] sm:$0xff] }
 0x3fe   : > { %v3936_v24 = vpop.f32.mrf.mxu2  ;;  %5670 = vmatmul.bf16.gmra.mxu1 %v13680_v42 }
 0x3ff   : > { %v5032_v34 = vadd.f32 %v15117_v47, %v4980_v43  ;;  %v4005_v4 = vadd.f32 %v3936_v24, %v14642_v15  ;;  %v4226_v10 = vpop.f32.mrf.mxu3  ;;  %v6372_v43 = vshrl.u32 %v15256_v8, 16  ;;  %v11844_v8 = vld [vmem:[%s16671_s4 + $0x108] sm:$0xff] }
 0x400   : > { %v4862_v17 = vpop.f32.mrf.mxu0  ;;  %7578 = vmatpush.bf16.msrb.mxu1 %v11844_v8 }
 0x401   : > { %v5080_v38 = vmax.f32 %v5032_v34, 0.0  ;;  %v4295_v3 = vadd.f32 %v4226_v10, %v4005_v4  ;;  %v6374_v0 = vor.u32 %v6372_v43, %v6370_v49  ;;  %v15301_v34 = vld [vmem:[#allocation2 + $0x20] sm:$0xff]   ;;  %v13701_v4 = vld [vmem:[#allocation2 + $0x2c] sm:$0xff]  }
 0x402   : > { %v5777_v18 = vshll.u32 %v15301_v34, 16  ;;  %v7022_v22 = vshrl.u32 %v13701_v4, 16  ;;  %v7025_v58 = vshll.u32 %v13701_v4, 16 }
 0x403   : > { %v5141_v23 = vsel %vm5099_vm2, %v5080_v38, 0.0  ;;  %v15287_v7 = vpop.f32.mrf.mxu1  ;;  %v4929_v21 = vadd.f32 %v4860_v48, %v4295_v3  ;;  %v7020_v48 = vsel %vm710_vm0, %v7010_v39, %v15293_v59  ;;  %v6379_v38 = vsel %vm1325_vm1, %v6374_v0, %v6378_v31 }
 0x404   : > { %v12294_v15 = vpack.c.bf16 %v5141_v23, %v5140_v62  ;;  %v5774_v39 = vshrl.u32 %v15301_v34, 16  ;;  %v16729_v23 = vld [vmem:[#allocation20_spill] sm:$0xff]  ;;  %v7024_v43 = vrot.slane %v7022_v22, 3  ;;  %v6380_v22 = vshrl.u32 %v15280_v60, 16 }
 0x405   : > { %v4981_v6 = vmul.f32 %v15099_v56, %v4929_v21 }
 0x406   : > { %12807 = vst [vmem:[#allocation2 + $0x90] sm:$0xff] %v12294_v15   ;;  %v3938_v1 = vpop.f32.mrf.mxu2 }
 0x407   : > { %v4006_v37 = vadd.f32 %v3938_v1, %v3344_v53  ;;  %v4228_v42 = vpop.f32.mrf.mxu3  ;;  %v5033_v3 = vadd.f32 %v15117_v47, %v4981_v6  ;;  %v5776_v1 = vrot.slane %v5774_v39, 3 }
 0x408   : > { %v4865_v24 = vpop.f32.mrf.mxu0 }
 0x409   : > { %v4296_v33 = vadd.f32 %v4228_v42, %v4006_v37  ;;  %v5081_v37 = vmax.f32 %v5033_v3, 0.0  ;;  %v5779_v42 = vrot.slane %v5777_v18, 4 }
 0x40b   : > { %v4930_v10 = vadd.f32 %v4862_v17, %v4296_v33  ;;  %6052 = vmatmul.bf16.gmra.mxu2 %v5772_v46  ;;  %7300 = vmatmul.bf16.gmra.mxu0 %v7020_v48  ;;  %v15307_v49 = vpop.f32.mrf.mxu1  ;;  %v7027_v33 = vrot.slane %v7025_v58, 4  ;;  %v6384_v46 = vshll.u32 %v15315_v29, 16  ;;  %v5780_v39 = vor.u32 %v5779_v42, %v5776_v1  ;;  %v13703_v1 = vld [vmem:[#allocation2 + $0x34] sm:$0xff]  }
 0x40c   : > { %6638 = vmatmul.bf16.gmra.mxu3 %v6379_v38  ;;  %v16731_v38 = vld [vmem:[#allocation5_spill] sm:$0xff] }
 0x40d   : > { %v4982_v14 = vmul.f32 %v15099_v56, %v4930_v10  ;;  %v13682_v28 = vld [vmem:[#allocation2 + $0x8c] sm:$0xff]   ;;  %v16730_v10 = vld [vmem:[#allocation6_spill] sm:$0xff]  ;;  %v7028_v3 = vor.u32 %v7027_v33, %v7024_v43  ;;  %v6386_v58 = vrot.slane %v6384_v46, 1  ;;  %v7034_v46 = vshll.u32 %v13703_v1, 16 }
 0x40e   : > { %v3941_v17 = vpop.f32.mrf.mxu2  ;;  %5675 = vmatmul.bf16.gmra.mxu1 %v13682_v28  ;;  %v3346_v8 = vadd.f32 %v16731_v38, %v16730_v10 }
 0x40f   : > { %v5034_v62 = vadd.f32 %v15117_v47, %v4982_v14  ;;  %v4007_v36 = vadd.f32 %v3941_v17, %v16729_v23  ;;  %v4231_v15 = vpop.f32.mrf.mxu3  ;;  %v6382_v23 = vor.u32 %v6380_v22, %v6378_v31 }
 0x410   : > { %v4867_v35 = vpop.f32.mrf.mxu0 }
 0x411   : > { %v5082_v53 = vmax.f32 %v5034_v62, 0.0  ;;  %v4297_v21 = vadd.f32 %v4231_v15, %v4007_v36  ;;  %v5781_v15 = vsel %vm710_vm0, %v15291_v44, %v5780_v39  ;;  %v6387_v42 = vsel %vm1325_vm1, %v6382_v23, %v6386_v58 }
 0x413   : > { %v5143_v0 = vsel %vm5104_vm3, %v5082_v53, 0.0  ;;  %v4931_v6 = vadd.f32 %v4865_v24, %v4297_v21  ;;  %v15320_v4 = vpop.f32.mrf.mxu1  ;;  %v7029_v53 = vsel %vm710_vm0, %v15293_v59, %v7028_v3  ;;  %v15331_v21 = vld [vmem:[#allocation2 + $0x28] sm:$0xff]  }
 0x414   : > { %v12299_v48 = vpack.c.bf16 %v5143_v0, %v5081_v37  ;;  %v5783_v33 = vshrl.u32 %v15331_v21, 16  ;;  %v5786_v59 = vshll.u32 %v15331_v21, 16 }
 0x415   : > { %v4983_v14 = vmul.f32 %v15099_v56, %v4931_v6  ;;  %v7031_v6 = vshrl.u32 %v13703_v1, 16 }
 0x416   : > { %12808 = vst [vmem:[#allocation2 + $0x98] sm:$0xff] %v12299_v48   ;;  %v3943_v28 = vpop.f32.mrf.mxu2  ;;  %v16733_v48 = vld [vmem:[#allocation21_spill] sm:$0xff] }
 0x417   : > { %v4008_v17 = vadd.f32 %v3943_v28, %v3346_v8  ;;  %v4233_v18 = vpop.f32.mrf.mxu3  ;;  %v5035_v36 = vadd.f32 %v15117_v47, %v4983_v14  ;;  %v15341_v8 = vld [vmem:[#allocation2 + $0x2c] sm:$0xff]  ;;  %v7033_v23 = vrot.slane %v7031_v6, 3 }
 0x418   : > { %v4870_v24 = vpop.f32.mrf.mxu0  ;;  %v6392_v1 = vshll.u32 %v15341_v8, 16 }
 0x419   : > { %v4298_v62 = vadd.f32 %v4233_v18, %v4008_v17  ;;  %v5083_v44 = vmax.f32 %v5035_v36, 0.0  ;;  %v5785_v18 = vrot.slane %v5783_v33, 3  ;;  %v7036_v36 = vrot.slane %v7034_v46, 4 }
 0x41a   : > { %v6394_v6 = vrot.slane %v6392_v1, 1 }
 0x41b   : > { %v4932_v37 = vadd.f32 %v4867_v35, %v4298_v62  ;;  %6057 = vmatmul.bf16.gmra.mxu2 %v5781_v15  ;;  %7305 = vmatmul.bf16.gmra.mxu0 %v7029_v53  ;;  %v15334_v60 = vpop.f32.mrf.mxu1  ;;  %v5144_v22 = vsel %vm5099_vm2, %v5083_v44, 0.0  ;;  %v5788_v62 = vrot.slane %v5786_v59, 4  ;;  %v6388_v59 = vshrl.u32 %v15315_v29, 16 }
 0x41c   : > { %6643 = vmatmul.bf16.gmra.mxu3 %v6387_v42  ;;  %16732 = vst [vmem:[#allocation16_spill] sm:$0xff] %v15334_v60  ;;  %v16735_v42 = vld [vmem:[#allocation8_spill] sm:$0xff] }
 0x41d   : > { %v4984_v31 = vmul.f32 %v15099_v56, %v4932_v37  ;;  %v13684_v43 = vld [vmem:[#allocation2 + $0x94] sm:$0xff]  }
 0x41e   : > { %v3946_v0 = vpop.f32.mrf.mxu2  ;;  %5680 = vmatmul.bf16.gmra.mxu1 %v13684_v43 }
 0x41f   : > { %v5036_v35 = vadd.f32 %v15117_v47, %v4984_v31  ;;  %v4009_v10 = vadd.f32 %v3946_v0, %v16733_v48  ;;  %v4236_v38 = vpop.f32.mrf.mxu3  ;;  %v16736_v31 = vld [vmem:[#allocation7_spill] sm:$0xff]  ;;  %v7037_v48 = vor.u32 %v7036_v36, %v7033_v23 }
 0x420   : > { %v4872_v14 = vpop.f32.mrf.mxu0  ;;  %v3348_v43 = vadd.f32 %v16736_v31, %v16735_v42 }
 0x421   : > { %v5084_v28 = vmax.f32 %v5036_v35, 0.0  ;;  %v4299_v17 = vadd.f32 %v4236_v38, %v4009_v10  ;;  %v5789_v35 = vor.u32 %v5788_v62, %v5785_v18  ;;  %v6390_v38 = vor.u32 %v6388_v59, %v6386_v58 }
 0x423   : > { %v12304_v15 = vpack.c.bf16 %v5084_v28, %v5144_v22  ;;  %v4933_v53 = vadd.f32 %v4870_v24, %v4299_v17  ;;  %v15346_v37 = vpop.f32.mrf.mxu1  ;;  %v5790_v28 = vsel %vm710_vm0, %v5780_v39, %v5789_v35  ;;  %v7038_v17 = vsel %vm710_vm0, %v7028_v3, %v7037_v48  ;;  %v15354_v22 = vld [vmem:[#allocation2 + $0x30] sm:$0xff]  }
 0x424   : > { %16734 = vst [vmem:[#allocation18_spill] sm:$0xff] %v15346_v37  ;;  %v6395_v23 = vsel %vm1325_vm1, %v6390_v38, %v6394_v6  ;;  %v5792_v39 = vshrl.u32 %v15354_v22, 16  ;;  %v5795_v3 = vshll.u32 %v15354_v22, 16 }
 0x425   : > { %12809 = vst [vmem:[#allocation2 + $0xa0] sm:$0xff] %v12304_v15   ;;  %v4985_v33 = vmul.f32 %v15099_v56, %v4933_v53  ;;  %v13705_v15 = vld [vmem:[#allocation2 + $0x3c] sm:$0xff]  }
 0x426   : > { %v3948_v0 = vpop.f32.mrf.mxu2  ;;  %v7040_v1 = vshrl.u32 %v13705_v15, 16  ;;  %v7043_v42 = vshll.u32 %v13705_v15, 16 }
 0x427   : > { %v4010_v10 = vadd.f32 %v3948_v0, %v3348_v43  ;;  %v4238_v44 = vpop.f32.mrf.mxu3  ;;  %v5037_v18 = vadd.f32 %v15117_v47, %v4985_v33  ;;  %v16738_v43 = vld [vmem:[#allocation22_spill] sm:$0xff] }
 0x428   : > { %v4875_v46 = vpop.f32.mrf.mxu0 }
 0x429   : > { %v4300_v24 = vadd.f32 %v4238_v44, %v4010_v10  ;;  %v5085_v31 = vmax.f32 %v5037_v18, 0.0  ;;  %v15365_v10 = vld [vmem:[#allocation2 + $0x34] sm:$0xff] }
 0x42a   : > { %v6400_v18 = vshll.u32 %v15365_v10, 16 }
 0x42b   : > { %v4934_v62 = vadd.f32 %v4872_v14, %v4300_v24  ;;  %6062 = vmatmul.bf16.gmra.mxu2 %v5790_v28  ;;  %7310 = vmatmul.bf16.gmra.mxu0 %v7038_v17  ;;  %v15358_v29 = vpop.f32.mrf.mxu1  ;;  %v5794_v24 = vrot.slane %v5792_v39, 3  ;;  %v5797_v28 = vrot.slane %v5795_v3, 4  ;;  %v7042_v17 = vrot.slane %v7040_v1, 3 }
 0x42c   : > { %6648 = vmatmul.bf16.gmra.mxu3 %v6395_v23  ;;  %16737 = vst [vmem:[#allocation17_spill] sm:$0xff] %v15358_v29  ;;  %v13686_v36 = vld [vmem:[#allocation2 + $0x9c] sm:$0xff]   ;;  %v5146_v23 = vsel %vm5104_vm3, %v5085_v31, 0.0 }
 0x42d   : > { %v4986_v58 = vmul.f32 %v15099_v56, %v4934_v62  ;;  %v7045_v62 = vrot.slane %v7043_v42, 4  ;;  %v15376_v3 = vor.u32 %v5797_v28, %v5794_v24  ;;  %v15386_v24 = vld [vmem:[#allocation2 + $0x38] sm:$0xff]  }
 0x42e   : > { %v3951_v53 = vpop.f32.mrf.mxu2  ;;  %5685 = vmatmul.bf16.gmra.mxu1 %v13686_v36  ;;  %v16740_v36 = vld [vmem:[#allocation10_spill] sm:$0xff] }
 0x42f   : > { %v5038_v14 = vadd.f32 %v15117_v47, %v4986_v58  ;;  %v4011_v0 = vadd.f32 %v3951_v53, %v16738_v43  ;;  %v4241_v33 = vpop.f32.mrf.mxu3  ;;  %v16741_v43 = vld [vmem:[#allocation9_spill] sm:$0xff]  ;;  %v15378_v1 = vor.u32 %v7045_v62, %v7042_v17 }
 0x430   : > { %v4877_v44 = vpop.f32.mrf.mxu0  ;;  %v3350_v29 = vadd.f32 %v16741_v43, %v16740_v36  ;;  %v5799_v36 = vsel %vm710_vm0, %v5789_v35, %v15376_v3 }
 0x431   : > { %v5086_v59 = vmax.f32 %v5038_v14, 0.0  ;;  %v4301_v38 = vadd.f32 %v4241_v33, %v4011_v0  ;;  %v6396_v0 = vshrl.u32 %v15341_v8, 16  ;;  %v6402_v33 = vrot.slane %v6400_v18, 1  ;;  %v11843_v8 = vld [vmem:[%s16671_s4 + $0x100] sm:$0xff] }
 0x432   : > { %7579 = vmatpush.bf16.msrb.mxu1 %v11843_v8 }
 0x433   : > { %v5147_v15 = vsel %vm5099_vm2, %v5086_v59, 0.0  ;;  %v15372_v53 = vpop.f32.mrf.mxu1  ;;  %v4935_v39 = vadd.f32 %v4875_v46, %v4301_v38  ;;  %v7047_v46 = vsel %vm710_vm0, %v7037_v48, %v15378_v1  ;;  %v13707_v38 = vld [vmem:[#allocation2 + $0x44] sm:$0xff]   ;;  %v5801_v48 = vshrl.u32 %v15386_v24, 16 }
 0x434   : > { %v12309_v58 = vpack.c.bf16 %v5147_v15, %v5146_v23  ;;  %16739 = vst [vmem:[#allocation19_spill] sm:$0xff] %v15372_v53  ;;  %v6398_v23 = vor.u32 %v6396_v0, %v6394_v6  ;;  %v7049_v18 = vshrl.u32 %v13707_v38, 16 }
 0x435   : > { %v4987_v15 = vmul.f32 %v15099_v56, %v4935_v39 }
 0x436   : > { %12810 = vst [vmem:[#allocation2 + $0xa8] sm:$0xff] %v12309_v58   ;;  %v3953_v14 = vpop.f32.mrf.mxu2  ;;  %v7052_v58 = vshll.u32 %v13707_v38, 16 }
 0x437   : > { %v4012_v42 = vadd.f32 %v3953_v14, %v3350_v29  ;;  %v4243_v31 = vpop.f32.mrf.mxu3  ;;  %v6403_v29 = vsel %vm1325_vm1, %v6398_v23, %v6402_v33  ;;  %v5039_v62 = vadd.f32 %v15117_v47, %v4987_v15  ;;  %v5803_v23 = vrot.slane %v5801_v48, 3  ;;  %v15412_v48 = vld [vmem:[%s16669_s2] ss:$0 sm:$0xff] }
 0x438   : > { %v4880_v59 = vpop.f32.mrf.mxu0  ;;  %v7051_v15 = vrot.slane %v7049_v18, 3 }
 0x439   : > { %v4302_v37 = vadd.f32 %v4243_v31, %v4012_v42  ;;  %v15400_v42 = vld [vmem:[#allocation2 + $0x3c] sm:$0xff] }
 0x43a   : > { %v6408_v8 = vshll.u32 %v15400_v42, 16 }
 0x43b   : > { %v4936_v28 = vadd.f32 %v4877_v44, %v4302_v37  ;;  %6067 = vmatmul.bf16.gmra.mxu2 %v5799_v36  ;;  %7315 = vmatmul.bf16.gmra.mxu0 %v7047_v46  ;;  %v15392_v6 = vpop.f32.mrf.mxu1  ;;  %v5804_v44 = vshll.u32 %v15386_v24, 16  ;;  %v5087_v36 = vmax.f32 %v5039_v62, 0.0 }
 0x43c   : > { %6653 = vmatmul.bf16.gmra.mxu3 %v6403_v29  ;;  %16742 = vst [vmem:[#allocation4_spill] sm:$0xff] %v15392_v6 }
 0x43d   : > { %v4988_v35 = vmul.f32 %v15099_v56, %v4936_v28  ;;  %v13688_v17 = vld [vmem:[#allocation2 + $0xa4] sm:$0xff]   ;;  %v5806_v46 = vrot.slane %v5804_v44, 4  ;;  %v7054_v28 = vrot.slane %v7052_v58, 4 }
 0x43e   : > { %v3956_v37 = vpop.f32.mrf.mxu2  ;;  %5690 = vmatmul.bf16.gmra.mxu1 %v13688_v17  ;;  %v3352_v17 = vadd.f32 %v14695_v55, %v14704_v52 }
 0x43f   : > { %v5040_v43 = vadd.f32 %v15117_v47, %v4988_v35  ;;  %v4013_v39 = vadd.f32 %v3956_v37, %v14697_v45  ;;  %v4246_v14 = vpop.f32.mrf.mxu3  ;;  %v5807_v44 = vor.u32 %v5806_v46, %v5803_v23  ;;  %v7055_v18 = vor.u32 %v7054_v28, %v7051_v15  ;;  %v13709_v23 = vld [vmem:[#allocation2 + $0x4c] sm:$0xff]  }
 0x440   : > { %v4882_v56 = vpop.f32.mrf.mxu0 }
 0x441   : > { %v5088_v31 = vmax.f32 %v5040_v43, 0.0  ;;  %v4303_v0 = vadd.f32 %v4246_v14, %v4013_v39  ;;  %v6404_v43 = vshrl.u32 %v15365_v10, 16  ;;  %v6410_v39 = vrot.slane %v6408_v8, 1 }
 0x442   : > { %v5808_v52 = vsel %vm710_vm0, %v15376_v3, %v5807_v44  ;;  %v7058_v8 = vshrl.u32 %v13709_v23, 16 }
 0x443   : > { %v5149_v29 = vsel %vm5104_vm3, %v5088_v31, 0.0  ;;  %v4937_v38 = vadd.f32 %v4880_v59, %v4303_v0  ;;  %v15405_v45 = vpop.f32.mrf.mxu1  ;;  %v6406_v0 = vor.u32 %v6404_v43, %v6402_v33 }
 0x444   : > { %v12314_v35 = vpack.c.bf16 %v5149_v29, %v5087_v36  ;;  %16743 = vst [vmem:[#allocation3_spill] sm:$0xff] %v15405_v45  ;;  %v7056_v36 = vsel %vm710_vm0, %v15378_v1, %v7055_v18  ;;  %v15421_v29 = vld [vmem:[#allocation2 + $0x40] sm:$0xff]  }
 0x445   : > { %v4989_v62 = vmul.f32 %v15412_v48, %v4937_v38  ;;  %v6411_v15 = vsel %vm1325_vm1, %v6406_v0, %v6410_v39  ;;  %v5810_v28 = vshrl.u32 %v15421_v29, 16  ;;  %v5813_v1 = vshll.u32 %v15421_v29, 16 }
 0x446   : > { %12811 = vst [vmem:[#allocation2 + $0xb0] sm:$0xff] %v12314_v35   ;;  %v3958_v37 = vpop.f32.mrf.mxu2  ;;  %v7061_v35 = vshll.u32 %v13709_v23, 16  ;;  %v7060_v23 = vrot.slane %v7058_v8, 3 }
 0x447   : > { %v4014_v59 = vadd.f32 %v3958_v37, %v3352_v17  ;;  %v4248_v58 = vpop.f32.mrf.mxu3  ;;  %v5041_v55 = vadd.f32 %v15117_v47, %v4989_v62  ;;  %v16745_v62 = vld [vmem:[#allocation11_spill] sm:$0xff] }
 0x448   : > { %v4885_v14 = vpop.f32.mrf.mxu0 }
 0x449   : > { %v4304_v31 = vadd.f32 %v4248_v58, %v4014_v59  ;;  %v5089_v3 = vmax.f32 %v5041_v55, 0.0  ;;  %v15436_v58 = vld [vmem:[#allocation2 + $0x44] sm:$0xff]  ;;  %v5812_v55 = vrot.slane %v5810_v28, 3 }
 0x44b   : > { %v4938_v46 = vadd.f32 %v4882_v56, %v4304_v31  ;;  %6072 = vmatmul.bf16.gmra.mxu2 %v5808_v52  ;;  %7320 = vmatmul.bf16.gmra.mxu0 %v7056_v36  ;;  %v15424_v10 = vpop.f32.mrf.mxu1  ;;  %v15432_v56 = vld [vmem:[%s16670_s3] ss:$0 sm:$0xff]  ;;  %v5150_v52 = vsel %vm5099_vm2, %v5089_v3, 0.0  ;;  %v5815_v36 = vrot.slane %v5813_v1, 4 }
 0x44c   : > { %6658 = vmatmul.bf16.gmra.mxu3 %v6411_v15  ;;  %16744 = vst [vmem:[#allocation20_spill] sm:$0xff] %v15424_v10 }
 0x44d   : > { %v4990_v33 = vmul.f32 %v15412_v48, %v4938_v46  ;;  %v13690_v47 = vld [vmem:[#allocation2 + $0xac] sm:$0xff]   ;;  %v7063_v46 = vrot.slane %v7061_v35, 4  ;;  %v15448_v28 = vor.u32 %v5815_v36, %v5812_v55  ;;  %v11890_v55 = vld [vmem:[%s16671_s4 + $0x1b8] sm:$0xff] }
 0x44e   : > { %v3961_v38 = vpop.f32.mrf.mxu2  ;;  %5695 = vmatmul.bf16.gmra.mxu1 %v13690_v47  ;;  %v16747_v47 = vld [vmem:[#allocation13_spill] sm:$0xff]  ;;  %8868 = vmatpush.bf16.msra.mxu3 %v11890_v55  ;;  %v11898_v55 = vld [vmem:[%s16671_s4 + $0x1f8] sm:$0xff] }
 0x44f   : > { %v5042_v17 = vadd.f32 %v15432_v56, %v4990_v33  ;;  %v4015_v37 = vadd.f32 %v3961_v38, %v16745_v62  ;;  %v4251_v59 = vpop.f32.mrf.mxu3  ;;  %v6416_v33 = vshll.u32 %v15436_v58, 16  ;;  %v16748_v62 = vld [vmem:[#allocation12_spill] sm:$0xff]  ;;  %v5817_v36 = vsel %vm710_vm0, %v5807_v44, %v15448_v28  ;;  %9158 = vmatpush.bf16.msra.mxu0 %v11898_v55 }
 0x450   : > { %v4887_v43 = vpop.f32.mrf.mxu0  ;;  %v3354_v45 = vadd.f32 %v16748_v62, %v16747_v47 }
 0x451   : > { %v5090_v31 = vmax.f32 %v5042_v17, 0.0  ;;  %v4305_v0 = vadd.f32 %v4251_v59, %v4015_v37  ;;  %v15450_v37 = vor.u32 %v7063_v46, %v7060_v23  ;;  %v6418_v35 = vrot.slane %v6416_v33, 1 }
 0x453   : > { %v15440_v15 = vpack.c.bf16 %v5090_v31, %v5150_v52  ;;  %v4939_v10 = vadd.f32 %v4885_v14, %v4305_v0  ;;  %v15443_v38 = vpop.f32.mrf.mxu1  ;;  %v6412_v14 = vshrl.u32 %v15400_v42, 16  ;;  %v11882_v52 = vld [vmem:[%s16671_s4 + $0x178] sm:$0xff] }
 0x454   : > { %16746 = vst [vmem:[#allocation6_spill] sm:$0xff] %v15443_v38  ;;  %v13711_v42 = vld [vmem:[#allocation2 + $0x54] sm:$0xff]   ;;  %8206 = vmatpush.bf16.msra.mxu2 %v11882_v52 }
 0x455   : > { %12812 = vst [vmem:[#allocation2 + $0xb8] sm:$0xff] %v15440_v15   ;;  %v4991_v3 = vmul.f32 %v15412_v48, %v4939_v10  ;;  %v6414_v0 = vor.u32 %v6412_v14, %v6410_v39  ;;  %v15464_v10 = vld [vmem:[#allocation2 + $0x48] sm:$0xff]   ;;  %v16750_v14 = vld [vmem:[#allocation14_spill] sm:$0xff] }
 0x456   : > { %v3963_v17 = vpop.f32.mrf.mxu2  ;;  %v5819_v62 = vshrl.u32 %v15464_v10, 16 }
 0x457   : > { %v4016_v1 = vadd.f32 %v3963_v17, %v3354_v45  ;;  %v4253_v8 = vpop.f32.mrf.mxu3  ;;  %v7065_v45 = vsel %vm710_vm0, %v7055_v18, %v15450_v37  ;;  %v5043_v23 = vadd.f32 %v15432_v56, %v4991_v3  ;;  %v6419_v46 = vsel %vm1325_vm1, %v6414_v0, %v6418_v35 }
 0x458   : > { %v4890_v59 = vpop.f32.mrf.mxu0  ;;  %v5822_v17 = vshll.u32 %v15464_v10, 16  ;;  %v7070_v3 = vshll.u32 %v13711_v42, 16 }
 0x459   : > { %v4306_v31 = vadd.f32 %v4253_v8, %v4016_v1  ;;  %v7067_v1 = vshrl.u32 %v13711_v42, 16 }
 0x45a   : > { %v7072_v42 = vrot.slane %v7070_v3, 4 }
 0x45b   : > { %v4940_v39 = vadd.f32 %v4887_v43, %v4306_v31  ;;  %6077 = vmatmul.bf16.gmra.mxu2 %v5817_v36  ;;  %7325 = vmatmul.bf16.gmra.mxu0 %v7065_v45  ;;  %v15468_v33 = vpop.f32.mrf.mxu1  ;;  %v5091_v43 = vmax.f32 %v5043_v23, 0.0  ;;  %v15475_v36 = vld [vmem:[#allocation2 + $0x4c] sm:$0xff]  ;;  %v7069_v38 = vrot.slane %v7067_v1, 3  ;;  %v11930_v23 = vld [vmem:[%s16671_s4 + $0x238] sm:$0xff] }
 0x45c   : > { %6663 = vmatmul.bf16.gmra.mxu3 %v6419_v46  ;;  %16749 = vst [vmem:[#allocation5_spill] sm:$0xff] %v15468_v33  ;;  %v13691_v47 = vld [vmem:[#allocation2 + $0xb4] sm:$0xff]   ;;  %v5824_v33 = vrot.slane %v5822_v17, 4  ;;  %9792 = vmatpush.bf16.msra.mxu1 %v11930_v23  ;;  %v16752_v17 = vld [vmem:[#allocation15_spill] sm:$0xff] }
 0x45d   : > { %v4992_v44 = vmul.f32 %v15412_v48, %v4940_v39  ;;  %v5821_v39 = vrot.slane %v5819_v62, 3  ;;  %v6424_v62 = vshll.u32 %v15475_v36, 16  ;;  %v3356_v1 = vadd.f32 %v14999_v20, %v16752_v17  ;;  %v13713_v23 = vld [vmem:[#allocation2 + $0x5c] sm:$0xff]  }
 0x45e   : > { %v3966_v18 = vpop.f32.mrf.mxu2  ;;  %5700 = vmatmul.bf16.gmra.mxu1 %v13691_v47  ;;  %v5152_v47 = vsel %vm5104_vm3, %v5091_v43, 0.0 }
 0x45f   : > { %v5044_v8 = vadd.f32 %v15432_v56, %v4992_v44  ;;  %v4017_v31 = vadd.f32 %v3966_v18, %v16750_v14  ;;  %v4256_v0 = vpop.f32.mrf.mxu3  ;;  %v15497_v6 = vrot.slane %v6424_v62, 1 }
 0x460   : > { %v4892_v52 = vpop.f32.mrf.mxu0 }
 0x461   : > { %v5092_v45 = vmax.f32 %v5044_v8, 0.0  ;;  %v4307_v46 = vadd.f32 %v4256_v0, %v4017_v31  ;;  %v15492_v31 = vor.u32 %v5824_v33, %v5821_v39  ;;  %v15494_v0 = vor.u32 %v7072_v42, %v7069_v38 }
 0x462   : > { %v7076_v42 = vshrl.u32 %v13713_v23, 16 }
 0x463   : > { %v5153_v44 = vsel %vm5099_vm2, %v5092_v45, 0.0  ;;  %v15488_v8 = vpop.f32.mrf.mxu1  ;;  %v4941_v3 = vadd.f32 %v4890_v59, %v4307_v46  ;;  %v6420_v45 = vshrl.u32 %v15436_v58, 16  ;;  %v5826_v59 = vsel %vm710_vm0, %v15448_v28, %v15492_v31 }
 0x464   : > { %v12324_v18 = vpack.c.bf16 %v5153_v44, %v5152_v47  ;;  %16751 = vst [vmem:[#allocation21_spill] sm:$0xff] %v15488_v8  ;;  %v15499_v47 = vld [vmem:[#allocation2 + $0x50] sm:$0xff]   ;;  %v7074_v38 = vsel %vm710_vm0, %v15450_v37, %v15494_v0  ;;  %v5945_v37 = vshrl.u32 %v15440_v15, 16 }
 0x465   : > { %v6422_v8 = vor.u32 %v6420_v45, %v6418_v35  ;;  %v4993_v20 = vmul.f32 %v15412_v48, %v4941_v3  ;;  %v5828_v39 = vshrl.u32 %v15499_v47, 16  ;;  %v5831_v46 = vshll.u32 %v15499_v47, 16 }
 0x466   : > { %12813 = vst [vmem:[#allocation2 + $0xc0] sm:$0xff] %v12324_v18   ;;  %v3968_v14 = vpop.f32.mrf.mxu2  ;;  %v7079_v18 = vshll.u32 %v13713_v23, 16  ;;  %v5948_v3 = vshll.u32 %v15440_v15, 16  ;;  %v5947_v53 = vrot.slane %v5945_v37, 3 }
 0x467   : > { %v4018_v43 = vadd.f32 %v3968_v14, %v3356_v1  ;;  %v4258_v51 = vpop.f32.mrf.mxu3  ;;  %v6427_v58 = vsel %vm1325_vm1, %v6422_v8, %v15497_v6  ;;  %v12422_v8 = vunpack.c.h.b16 %v15440_v15  ;;  %v5830_v45 = vrot.slane %v5828_v39, 3 }
 0x468   : > { %v7291_v55 = vpop.f32.mrf.mxu0  ;;  %v5950_v15 = vrot.slane %v5948_v3, 4 }
 0x469   : > { %v4308_v44 = vadd.f32 %v4258_v51, %v4018_v43 }
 0x46b   : > { %v4942_v33 = vadd.f32 %v4892_v52, %v4308_v44  ;;  %6082 = vmatmul.bf16.gmra.mxu2 %v5826_v59  ;;  %7330 = vmatmul.bf16.gmra.mxu0 %v7074_v38  ;;  %v15511_v35 = vpop.f32.mrf.mxu1  ;;  %v5045_v52 = vadd.f32 %v15432_v56, %v4993_v20  ;;  %v15521_v44 = vld [vmem:[#allocation2 + $0x54] sm:$0xff]  ;;  %v5833_v38 = vrot.slane %v5831_v46, 4 }
 0x46c   : > { %6668 = vmatmul.bf16.gmra.mxu3 %v6427_v58  ;;  %16753 = vst [vmem:[#allocation8_spill] sm:$0xff] %v15511_v35  ;;  %v7081_v35 = vrot.slane %v7079_v18, 4  ;;  %v6432_v39 = vshll.u32 %v15521_v44, 16 }
 0x46d   : > { %v4994_v28 = vmul.f32 %v15412_v48, %v4942_v33  ;;  %v5356_v62 = vld [vmem:[#allocation2 + $0xc0] sm:$0xf]  ;;  %v7078_v33 = vrot.slane %v7076_v42, 3  ;;  %v5834_v37 = vor.u32 %v5833_v38, %v5830_v45  ;;  %v13715_v45 = vld [vmem:[#allocation2 + $0x64] sm:$0xff]  }
 0x46e   : > { %v6043_v17 = vpop.f32.mrf.mxu2  ;;  %v5485_v1 = vunpack.c.l.b16 %v5356_v62  ;;  %v5093_v62 = vmax.f32 %v5045_v52, 0.0 }
 0x46f   : > { %v5046_v14 = vadd.f32 %v15432_v56, %v4994_v28  ;;  %v6044_v43 = vadd.f32 %v6043_v17, %v15015_v54  ;;  %v6629_v51 = vpop.f32.mrf.mxu3  ;;  %v7082_v52 = vor.u32 %v7081_v35, %v7078_v33  ;;  %v5835_v35 = vsel %vm710_vm0, %v15492_v31, %v5834_v37 }
 0x470   : > { %v7293_v48 = vpop.f32.mrf.mxu0  ;;  %v5509_v23 = vpack.c.b16 %v5485_v1, %v12422_v8  ;;  %v5737_v59 = vpack.c.b16 %v5485_v1, %v5485_v1  ;;  %v15530_v1 = vor.u32 %v5950_v15, %v5947_v53 }
 0x471   : > { %v5094_v20 = vmax.f32 %v5046_v14, 0.0  ;;  %v6749_v58 = vadd.f32 %v6629_v51, %v6044_v43  ;;  %v6428_v43 = vshrl.u32 %v15475_v36, 16  ;;  %v6434_v51 = vrot.slane %v6432_v39, 1  ;;  %v15544_v36 = vld [vmem:[#allocation2 + $0x58] sm:$0xff]  }
 0x472   : > { %5705 = vmatmul.bf16.gmra.mxu1 %v5509_v23  ;;  %v5954_v60 = vshrl.u32 %v5737_v59, 16  ;;  %v5957_v56 = vshll.u32 %v5737_v59, 16  ;;  %v7083_v53 = vsel %vm710_vm0, %v15494_v0, %v7082_v52  ;;  %v5840_v31 = vshll.u32 %v15544_v36, 16 }
 0x473   : > { %v5155_v54 = vsel %vm5104_vm3, %v5094_v20, 0.0  ;;  %v15526_v28 = vadd.f32 %v7291_v55, %v6749_v58  ;;  %v15528_v8 = vpop.f32.mrf.mxu1  ;;  %v6430_v59 = vor.u32 %v6428_v43, %v15497_v6  ;;  %v5837_v6 = vshrl.u32 %v15544_v36, 16 }
 0x474   : > { %v12329_v17 = vpack.c.bf16 %v5155_v54, %v5093_v62  ;;  %v5956_v46 = vrot.slane %v5954_v60, 3  ;;  %v5959_v42 = vrot.slane %v5957_v56, 4  ;;  %v7085_v58 = vshrl.u32 %v13715_v45, 16  ;;  %v15553_v56 = vld [vmem:[#allocation2 + $0x5c] sm:$0xff] }
 0x475   : > { %v7088_v62 = vshll.u32 %v13715_v45, 16 }
 0x476   : > { %12814 = vst [vmem:[#allocation2 + $0xc8] sm:$0xff] %v12329_v17   ;;  %v6045_v18 = vpop.f32.mrf.mxu2  ;;  %v5960_v3 = vor.u32 %v5959_v42, %v5956_v46  ;;  %v5842_v17 = vrot.slane %v5840_v31, 4  ;;  %v7087_v46 = vrot.slane %v7085_v58, 3  ;;  %v15572_v58 = vld [vmem:[#allocation2 + $0x60] sm:$0xff]  }
 0x477   : > { %v6046_v14 = vadd.f32 %v6045_v18, %v15036_v50  ;;  %v6631_v2 = vpop.f32.mrf.mxu3  ;;  %v6435_v50 = vsel %vm1325_vm1, %v6430_v59, %v6434_v51  ;;  %v7090_v42 = vrot.slane %v7088_v62, 4  ;;  %v6440_v18 = vshll.u32 %v15553_v56, 16 }
 0x478   : > { %v7296_v55 = vpop.f32.mrf.mxu0  ;;  %v15536_v23 = vsel %vm710_vm0, %v15530_v1, %v5960_v3 }
 0x479   : > { %v6750_v60 = vadd.f32 %v6631_v2, %v6046_v14 }
 0x47b   : > { %6087 = vmatmul.bf16.gmra.mxu2 %v5835_v35  ;;  %7335 = vmatmul.bf16.gmra.mxu0 %v7083_v53  ;;  %v15546_v38 = vadd.f32 %v7293_v48, %v6750_v60  ;;  %v15548_v33 = vpop.f32.mrf.mxu1  ;;  %v5839_v48 = vrot.slane %v5837_v6, 3  ;;  %v6436_v35 = vshrl.u32 %v15521_v44, 16  ;;  %v6442_v53 = vrot.slane %v6440_v18, 1  ;;  %v11897_v18 = vld [vmem:[%s16671_s4 + $0x1f0] sm:$0xff] }
 0x47c   : > { %6673 = vmatmul.bf16.gmra.mxu3 %v6435_v50  ;;  %9159 = vmatpush.bf16.msra.mxu0 %v11897_v18 }
 0x47d   : > { %v5843_v43 = vor.u32 %v5842_v17, %v5839_v48  ;;  %v6438_v50 = vor.u32 %v6436_v35, %v6434_v51 }
 0x47e   : > { %v6048_v20 = vpop.f32.mrf.mxu2 }
 0x47f   : > { %v6049_v0 = vadd.f32 %v6048_v20, %v15045_v30  ;;  %v6634_v15 = vpop.f32.mrf.mxu3  ;;  %v7091_v30 = vor.u32 %v7090_v42, %v7087_v46  ;;  %v11881_v20 = vld [vmem:[%s16671_s4 + $0x170] sm:$0xff]  ;;  %v5844_v6 = vsel %vm710_vm0, %v5834_v37, %v5843_v43  ;;  %v6443_v44 = vsel %vm1325_vm1, %v6438_v50, %v6442_v53  ;;  %v15581_v46 = vld [vmem:[#allocation2 + $0x64] sm:$0xff] }
 0x480   : > { %v7298_v54 = vpop.f32.mrf.mxu0  ;;  %8207 = vmatpush.bf16.msra.mxu2 %v11881_v20  ;;  %v5849_v37 = vshll.u32 %v15572_v58, 16 }
 0x481   : > { %v6751_v39 = vadd.f32 %v6634_v15, %v6049_v0  ;;  %v7092_v31 = vsel %vm710_vm0, %v7082_v52, %v7091_v30  ;;  %v5846_v15 = vshrl.u32 %v15572_v58, 16 }
 0x482   : > { %7580 = vmatmul.bf16.vlgmr.msrb.gmra.mxu1 %v15246_v26 }
 0x483   : > { %v15557_v3 = vadd.f32 %v7296_v55, %v6751_v39  ;;  %v15559_v14 = vpop.f32.mrf.mxu1  ;;  %v11889_v55 = vld [vmem:[%s16671_s4 + $0x1b0] sm:$0xff] }
 0x484   : > { %8869 = vmatpush.bf16.msra.mxu3 %v11889_v55 }
 0x486   : > { %v6050_v2 = vpop.f32.mrf.mxu2 }
 0x487   : > { %v6051_v60 = vadd.f32 %v6050_v2, %v15057_v13  ;;  %v6636_v59 = vpop.f32.mrf.mxu3  ;;  %v13717_v13 = vld [vmem:[#allocation2 + $0x6c] sm:$0xff]   ;;  %v5848_v2 = vrot.slane %v5846_v15, 3 }
 0x488   : > { %v7301_v26 = vpop.f32.mrf.mxu0  ;;  %v7094_v52 = vshrl.u32 %v13717_v13, 16  ;;  %v7097_v39 = vshll.u32 %v13717_v13, 16 }
 0x489   : > { %v6752_v45 = vadd.f32 %v6636_v59, %v6051_v60  ;;  %v5851_v60 = vrot.slane %v5849_v37, 4 }
 0x48a   : > { %v7096_v59 = vrot.slane %v7094_v52, 3  ;;  %v7099_v35 = vrot.slane %v7097_v39, 4 }
 0x48b   : > { %6092 = vmatmul.bf16.gmra.mxu2 %v5844_v6  ;;  %7340 = vmatmul.bf16.gmra.mxu0 %v7092_v31  ;;  %v15574_v51 = vadd.f32 %v7298_v54, %v6752_v45  ;;  %v15576_v62 = vpop.f32.mrf.mxu1  ;;  %v11929_v45 = vld [vmem:[%s16671_s4 + $0x230] sm:$0xff]  ;;  %v5852_v6 = vor.u32 %v5851_v60, %v5848_v2 }
 0x48c   : > { %6678 = vmatmul.bf16.gmra.mxu3 %v6443_v44  ;;  %9793 = vmatpush.bf16.msra.mxu1 %v11929_v45  ;;  %v7100_v31 = vor.u32 %v7099_v35, %v7096_v59  ;;  %v6444_v44 = vshrl.u32 %v15553_v56, 16  ;;  %v11816_v35 = vld [vmem:[#allocation2 + $0x6c] sm:$0xff] }
 0x48d   : > { %v5853_v39 = vsel %vm710_vm0, %v5843_v43, %v5852_v6 }
 0x48e   : > { %v6053_v0 = vpop.f32.mrf.mxu2  ;;  %v6446_v52 = vor.u32 %v6444_v44, %v6442_v53  ;;  %v6456_v44 = vshll.u32 %v11816_v35, 16 }
 0x48f   : > { %v6054_v48 = vadd.f32 %v6053_v0, %v15066_v16  ;;  %v6639_v17 = vpop.f32.mrf.mxu3  ;;  %v6448_v16 = vshll.u32 %v15581_v46, 16 }
 0x490   : > { %v7303_v42 = vpop.f32.mrf.mxu0 }
 0x491   : > { %v6753_v54 = vadd.f32 %v6639_v17, %v6054_v48  ;;  %v6450_v0 = vrot.slane %v6448_v16, 1  ;;  %v13719_v48 = vld [vmem:[#allocation2 + $0x74] sm:$0xff]  }
 0x492   : > { %7585 = vmatmul.bf16.gmra.mxu1 %v15269_v63  ;;  %v7103_v43 = vshrl.u32 %v13719_v48, 16  ;;  %v7106_v60 = vshll.u32 %v13719_v48, 16 }
 0x493   : > { %v15591_v50 = vadd.f32 %v7301_v26, %v6753_v54  ;;  %v15593_v20 = vpop.f32.mrf.mxu1  ;;  %v7101_v26 = vsel %vm710_vm0, %v7091_v30, %v7100_v31  ;;  %v6451_v17 = vsel %vm1325_vm1, %v6446_v52, %v6450_v0  ;;  %v15600_v54 = vld [vmem:[#allocation2 + $0x68] sm:$0xff]  }
 0x494   : > { %v5855_v2 = vshrl.u32 %v15600_v54, 16  ;;  %v5858_v53 = vshll.u32 %v15600_v54, 16 }
 0x496   : > { %v6055_v55 = vpop.f32.mrf.mxu2 }
 0x497   : > { %v6056_v63 = vadd.f32 %v6055_v55, %v15080_v9  ;;  %v6641_v13 = vpop.f32.mrf.mxu3  ;;  %v5860_v55 = vrot.slane %v5858_v53, 4 }
 0x498   : > { %v7306_v15 = vpop.f32.mrf.mxu0 }
 0x499   : > { %v6754_v37 = vadd.f32 %v6641_v13, %v6056_v63  ;;  %v7105_v63 = vrot.slane %v7103_v43, 3  ;;  %v7108_v13 = vrot.slane %v7106_v60, 4 }
 0x49b   : > { %6097 = vmatmul.bf16.gmra.mxu2 %v5853_v39  ;;  %7345 = vmatmul.bf16.gmra.mxu0 %v7101_v26  ;;  %v15602_v18 = vadd.f32 %v7303_v42, %v6754_v37  ;;  %v15604_v9 = vpop.f32.mrf.mxu1  ;;  %v5857_v42 = vrot.slane %v5855_v2, 3  ;;  %v7109_v48 = vor.u32 %v7108_v13, %v7105_v63 }
 0x49c   : > { %6683 = vmatmul.bf16.gmra.mxu3 %v6451_v17 }
 0x49d   : > { %v5861_v26 = vor.u32 %v5860_v55, %v5857_v42  ;;  %v7110_v43 = vsel %vm710_vm0, %v7100_v31, %v7109_v48 }
 0x49e   : > { %v6058_v56 = vpop.f32.mrf.mxu2 }
 0x49f   : > { %v6059_v30 = vadd.f32 %v6058_v56, %v15108_v11  ;;  %v6644_v59 = vpop.f32.mrf.mxu3  ;;  %v6452_v56 = vshrl.u32 %v15581_v46, 16  ;;  %v5862_v53 = vsel %vm710_vm0, %v5852_v6, %v5861_v26 }
 0x4a0   : > { %v7308_v45 = vpop.f32.mrf.mxu0 }
 0x4a1   : > { %v6755_v16 = vadd.f32 %v6644_v59, %v6059_v30  ;;  %v6458_v30 = vrot.slane %v6456_v44, 1  ;;  %v6454_v2 = vor.u32 %v6452_v56, %v6450_v0  ;;  %v15628_v44 = vld [vmem:[#allocation2 + $0x74] sm:$0xff] }
 0x4a2   : > { %7590 = vmatmul.bf16.gmra.mxu1 %v15301_v34 }
 0x4a3   : > { %v15610_v37 = vadd.f32 %v7306_v15, %v6755_v16  ;;  %v15612_v52 = vpop.f32.mrf.mxu1  ;;  %v13721_v15 = vld [vmem:[#allocation2 + $0x7c] sm:$0xff]   ;;  %v6459_v60 = vsel %vm1325_vm1, %v6454_v2, %v6458_v30  ;;  %v15619_v16 = vld [vmem:[#allocation2 + $0x70] sm:$0xff]   ;;  %v6464_v2 = vshll.u32 %v15628_v44, 16 }
 0x4a4   : > { %16754 = vst [vmem:[#allocation7_spill] sm:$0xff] %v15612_v52  ;;  %v5864_v55 = vshrl.u32 %v15619_v16, 16  ;;  %v5867_v0 = vshll.u32 %v15619_v16, 16  ;;  %v7112_v6 = vshrl.u32 %v13721_v15, 16  ;;  %v7115_v63 = vshll.u32 %v13721_v15, 16 }
 0x4a5   : > { %v6460_v52 = vshrl.u32 %v11816_v35, 16  ;;  %v15646_v35 = vld [vmem:[#allocation2 + $0x78] sm:$0xff]  }
 0x4a6   : > { %v6060_v39 = vpop.f32.mrf.mxu2  ;;  %v7114_v56 = vrot.slane %v7112_v6, 3 }
 0x4a7   : > { %v6061_v11 = vadd.f32 %v6060_v39, %v15126_v27  ;;  %v6646_v17 = vpop.f32.mrf.mxu3 }
 0x4a8   : > { %v7311_v59 = vpop.f32.mrf.mxu0 }
 0x4a9   : > { %v6756_v34 = vadd.f32 %v6646_v17, %v6061_v11  ;;  %v5869_v17 = vrot.slane %v5867_v0, 4  ;;  %v11880_v0 = vld [vmem:[%s16671_s4 + $0x168] sm:$0xff] }
 0x4aa   : > { %8208 = vmatpush.bf16.msra.mxu2 %v11880_v0 }
 0x4ab   : > { %6102 = vmatmul.bf16.gmra.mxu2 %v5862_v53  ;;  %7350 = vmatmul.bf16.gmra.mxu0 %v7110_v43  ;;  %v15621_v42 = vadd.f32 %v7308_v45, %v6756_v34  ;;  %v15623_v27 = vpop.f32.mrf.mxu1  ;;  %v5866_v45 = vrot.slane %v5864_v55, 3  ;;  %v7117_v34 = vrot.slane %v7115_v63, 4  ;;  %v6462_v55 = vor.u32 %v6460_v52, %v6458_v30 }
 0x4ac   : > { %6688 = vmatmul.bf16.gmra.mxu3 %v6459_v60  ;;  %16755 = vst [vmem:[#allocation22_spill] sm:$0xff] %v15623_v27 }
 0x4ad   : > { %v5870_v60 = vor.u32 %v5869_v17, %v5866_v45  ;;  %v5873_v45 = vshrl.u32 %v15646_v35, 16 }
 0x4ae   : > { %v6063_v46 = vpop.f32.mrf.mxu2 }
 0x4af   : > { %v6064_v31 = vadd.f32 %v6063_v46, %v15142_v19  ;;  %v6649_v13 = vpop.f32.mrf.mxu3  ;;  %v7118_v19 = vor.u32 %v7117_v34, %v7114_v56  ;;  %v5871_v6 = vsel %vm710_vm0, %v5861_v26, %v5870_v60  ;;  %v5876_v26 = vshll.u32 %v15646_v35, 16 }
 0x4b0   : > { %v7313_v39 = vpop.f32.mrf.mxu0 }
 0x4b1   : > { %v6757_v11 = vadd.f32 %v6649_v13, %v6064_v31  ;;  %v6466_v31 = vrot.slane %v6464_v2, 1  ;;  %v7119_v63 = vsel %vm710_vm0, %v7109_v48, %v7118_v19  ;;  %v15655_v2 = vld [vmem:[#allocation2 + $0x7c] sm:$0xff] }
 0x4b2   : > { %7595 = vmatmul.bf16.gmra.mxu1 %v15331_v21 }
 0x4b3   : > { %v15632_v53 = vadd.f32 %v7311_v59, %v6757_v11  ;;  %v15634_v43 = vpop.f32.mrf.mxu1  ;;  %v11888_v59 = vld [vmem:[%s16671_s4 + $0x1a8] sm:$0xff] }
 0x4b4   : > { %16756 = vst [vmem:[#allocation10_spill] sm:$0xff] %v15634_v43  ;;  %v13723_v11 = vld [vmem:[#allocation2 + $0x84] sm:$0xff]   ;;  %8870 = vmatpush.bf16.msra.mxu3 %v11888_v59 }
 0x4b5   : > { %v7121_v48 = vshrl.u32 %v13723_v11, 16  ;;  %v7124_v17 = vshll.u32 %v13723_v11, 16 }
 0x4b6   : > { %v6065_v15 = vpop.f32.mrf.mxu2 }
 0x4b7   : > { %v6066_v46 = vadd.f32 %v6065_v15, %v15177_v25  ;;  %v6651_v27 = vpop.f32.mrf.mxu3  ;;  %v6467_v25 = vsel %vm1325_vm1, %v6462_v55, %v6466_v31  ;;  %v5878_v55 = vrot.slane %v5876_v26, 4  ;;  %v7123_v0 = vrot.slane %v7121_v48, 3 }
 0x4b8   : > { %v7316_v13 = vpop.f32.mrf.mxu0  ;;  %v7126_v59 = vrot.slane %v7124_v17, 4  ;;  %v6468_v26 = vshrl.u32 %v15628_v44, 16 }
 0x4b9   : > { %v6758_v21 = vadd.f32 %v6651_v27, %v6066_v46  ;;  %v11896_v46 = vld [vmem:[%s16671_s4 + $0x1e8] sm:$0xff] }
 0x4ba   : > { %9160 = vmatpush.bf16.msra.mxu0 %v11896_v46 }
 0x4bb   : > { %6107 = vmatmul.bf16.gmra.mxu2 %v5871_v6  ;;  %7355 = vmatmul.bf16.gmra.mxu0 %v7119_v63  ;;  %v15648_v52 = vadd.f32 %v7313_v39, %v6758_v21  ;;  %v15650_v30 = vpop.f32.mrf.mxu1  ;;  %v5875_v21 = vrot.slane %v5873_v45, 3  ;;  %v11928_v6 = vld [vmem:[%s16671_s4 + $0x228] sm:$0xff] }
 0x4bc   : > { %6693 = vmatmul.bf16.gmra.mxu3 %v6467_v25  ;;  %16757 = vst [vmem:[#allocation9_spill] sm:$0xff] %v15650_v30  ;;  %9794 = vmatpush.bf16.msra.mxu1 %v11928_v6  ;;  %v6470_v30 = vor.u32 %v6468_v26, %v6466_v31  ;;  %v11819_v6 = vld [vmem:[#allocation2 + $0x84] sm:$0xff] }
 0x4bd   : > { %v6480_v26 = vshll.u32 %v11819_v6, 16 }
 0x4be   : > { %v6068_v27 = vpop.f32.mrf.mxu2 }
 0x4bf   : > { %v6069_v56 = vadd.f32 %v6068_v27, %v15202_v61  ;;  %v6654_v34 = vpop.f32.mrf.mxu3  ;;  %v6472_v61 = vshll.u32 %v15655_v2, 16  ;;  %v5879_v27 = vor.u32 %v5878_v55, %v5875_v21  ;;  %v15674_v21 = vld [vmem:[#allocation2 + $0x80] sm:$0xff]  }
 0x4c0   : > { %v7318_v15 = vpop.f32.mrf.mxu0  ;;  %v5885_v31 = vshll.u32 %v15674_v21, 16 }
 0x4c1   : > { %v6759_v39 = vadd.f32 %v6654_v34, %v6069_v56  ;;  %v7127_v56 = vor.u32 %v7126_v59, %v7123_v0  ;;  %v6474_v48 = vrot.slane %v6472_v61, 1  ;;  %v5880_v43 = vsel %vm710_vm0, %v5870_v60, %v5879_v27 }
 0x4c2   : > { %7600 = vmatmul.bf16.gmra.mxu1 %v15354_v22  ;;  %v5882_v0 = vshrl.u32 %v15674_v21, 16 }
 0x4c3   : > { %v15665_v63 = vadd.f32 %v7316_v13, %v6759_v39  ;;  %v15667_v11 = vpop.f32.mrf.mxu1  ;;  %v7128_v13 = vsel %vm710_vm0, %v7118_v19, %v7127_v56  ;;  %v13725_v39 = vld [vmem:[#allocation2 + $0x8c] sm:$0xff]   ;;  %v6475_v46 = vsel %vm1325_vm1, %v6470_v30, %v6474_v48 }
 0x4c4   : > { %16758 = vst [vmem:[#allocation11_spill] sm:$0xff] %v15667_v11  ;;  %v7130_v60 = vshrl.u32 %v13725_v39, 16  ;;  %v7133_v59 = vshll.u32 %v13725_v39, 16  ;;  %v6476_v11 = vshrl.u32 %v15655_v2, 16 }
 0x4c6   : > { %v6070_v25 = vpop.f32.mrf.mxu2 }
 0x4c7   : > { %v6071_v22 = vadd.f32 %v6070_v25, %v15213_v41  ;;  %v6656_v45 = vpop.f32.mrf.mxu3  ;;  %v5887_v25 = vrot.slane %v5885_v31, 4 }
 0x4c8   : > { %v7321_v17 = vpop.f32.mrf.mxu0 }
 0x4c9   : > { %v6760_v34 = vadd.f32 %v6656_v45, %v6071_v22  ;;  %v7132_v22 = vrot.slane %v7130_v60, 3  ;;  %v7135_v45 = vrot.slane %v7133_v59, 4 }
 0x4cb   : > { %6112 = vmatmul.bf16.gmra.mxu2 %v5880_v43  ;;  %7360 = vmatmul.bf16.gmra.mxu0 %v7128_v13  ;;  %v15676_v55 = vadd.f32 %v7318_v15, %v6760_v34  ;;  %v15678_v41 = vpop.f32.mrf.mxu1  ;;  %v5884_v15 = vrot.slane %v5882_v0, 3  ;;  %v7136_v39 = vor.u32 %v7135_v45, %v7132_v22  ;;  %v6478_v0 = vor.u32 %v6476_v11, %v6474_v48  ;;  %v15702_v45 = vld [vmem:[#allocation2 + $0x8c] sm:$0xff] }
 0x4cc   : > { %6698 = vmatmul.bf16.gmra.mxu3 %v6475_v46  ;;  %16759 = vst [vmem:[#allocation13_spill] sm:$0xff] %v15678_v41 }
 0x4cd   : > { %v5888_v41 = vor.u32 %v5887_v25, %v5884_v15  ;;  %v7137_v60 = vsel %vm710_vm0, %v7127_v56, %v7136_v39 }
 0x4ce   : > { %v6073_v44 = vpop.f32.mrf.mxu2 }
 0x4cf   : > { %v6074_v19 = vadd.f32 %v6073_v44, %v15227_v12  ;;  %v6659_v43 = vpop.f32.mrf.mxu3  ;;  %v5889_v31 = vsel %vm710_vm0, %v5879_v27, %v5888_v41 }
 0x4d0   : > { %v7323_v30 = vpop.f32.mrf.mxu0 }
 0x4d1   : > { %v6761_v61 = vadd.f32 %v6659_v43, %v6074_v19  ;;  %v6482_v19 = vrot.slane %v6480_v26, 1 }
 0x4d2   : > { %7605 = vmatmul.bf16.gmra.mxu1 %v15386_v24 }
 0x4d3   : > { %v15684_v34 = vadd.f32 %v7321_v17, %v6761_v61  ;;  %v15686_v13 = vpop.f32.mrf.mxu1  ;;  %v13727_v17 = vld [vmem:[#allocation2 + $0x94] sm:$0xff]   ;;  %v6483_v59 = vsel %vm1325_vm1, %v6478_v0, %v6482_v19  ;;  %v15693_v61 = vld [vmem:[#allocation2 + $0x88] sm:$0xff]   ;;  %v6488_v0 = vshll.u32 %v15702_v45, 16 }
 0x4d4   : > { %16760 = vst [vmem:[#allocation12_spill] sm:$0xff] %v15686_v13  ;;  %v5891_v25 = vshrl.u32 %v15693_v61, 16  ;;  %v5894_v11 = vshll.u32 %v15693_v61, 16  ;;  %v7139_v27 = vshrl.u32 %v13727_v17, 16  ;;  %v7142_v48 = vshll.u32 %v13727_v17, 16 }
 0x4d5   : > { %v6484_v13 = vshrl.u32 %v11819_v6, 16  ;;  %v15720_v6 = vld [vmem:[#allocation2 + $0x90] sm:$0xff]  }
 0x4d6   : > { %v6075_v46 = vpop.f32.mrf.mxu2 }
 0x4d7   : > { %v6076_v12 = vadd.f32 %v6075_v46, %v15238_v57  ;;  %v6661_v44 = vpop.f32.mrf.mxu3 }
 0x4d8   : > { %v7326_v43 = vpop.f32.mrf.mxu0 }
 0x4d9   : > { %v6762_v24 = vadd.f32 %v6661_v44, %v6076_v12  ;;  %v5896_v12 = vrot.slane %v5894_v11, 4  ;;  %v7141_v44 = vrot.slane %v7139_v27, 3  ;;  %v11879_v11 = vld [vmem:[%s16671_s4 + $0x160] sm:$0xff] }
 0x4da   : > { %8209 = vmatpush.bf16.msra.mxu2 %v11879_v11 }
 0x4db   : > { %6117 = vmatmul.bf16.gmra.mxu2 %v5889_v31  ;;  %7365 = vmatmul.bf16.gmra.mxu0 %v7137_v60  ;;  %v15695_v15 = vadd.f32 %v7323_v30, %v6762_v24  ;;  %v15697_v57 = vpop.f32.mrf.mxu1  ;;  %v5893_v30 = vrot.slane %v5891_v25, 3  ;;  %v7144_v24 = vrot.slane %v7142_v48, 4  ;;  %v6486_v25 = vor.u32 %v6484_v13, %v6482_v19 }
 0x4dc   : > { %6703 = vmatmul.bf16.gmra.mxu3 %v6483_v59  ;;  %16761 = vst [vmem:[#allocation14_spill] sm:$0xff] %v15697_v57 }
 0x4dd   : > { %v5897_v59 = vor.u32 %v5896_v12, %v5893_v30  ;;  %v7145_v17 = vor.u32 %v7144_v24, %v7141_v44  ;;  %v5900_v30 = vshrl.u32 %v15720_v6, 16  ;;  %v5903_v12 = vshll.u32 %v15720_v6, 16 }
 0x4de   : > { %v6078_v2 = vpop.f32.mrf.mxu2 }
 0x4df   : > { %v6079_v56 = vadd.f32 %v6078_v2, %v15249_v32  ;;  %v6664_v22 = vpop.f32.mrf.mxu3  ;;  %v5898_v27 = vsel %vm710_vm0, %v5888_v41, %v5897_v59  ;;  %v7146_v48 = vsel %vm710_vm0, %v7136_v39, %v7145_v17 }
 0x4e0   : > { %v7328_v26 = vpop.f32.mrf.mxu0 }
 0x4e1   : > { %v6763_v46 = vadd.f32 %v6664_v22, %v6079_v56  ;;  %v6490_v56 = vrot.slane %v6488_v0, 1 }
 0x4e2   : > { %7610 = vmatmul.bf16.gmra.mxu1 %v15421_v29 }
 0x4e3   : > { %v15706_v31 = vadd.f32 %v7326_v43, %v6763_v46  ;;  %v15708_v57 = vpop.f32.mrf.mxu1  ;;  %v11887_v43 = vld [vmem:[%s16671_s4 + $0x1a0] sm:$0xff] }
 0x4e4   : > { %16762 = vst [vmem:[#allocation15_spill] sm:$0xff] %v15708_v57  ;;  %v13729_v46 = vld [vmem:[#allocation2 + $0x9c] sm:$0xff]   ;;  %8871 = vmatpush.bf16.msra.mxu3 %v11887_v43 }
 0x4e5   : > { %v7148_v41 = vshrl.u32 %v13729_v46, 16  ;;  %v7151_v44 = vshll.u32 %v13729_v46, 16 }
 0x4e6   : > { %v6080_v60 = vpop.f32.mrf.mxu2 }
 0x4e7   : > { %v6081_v32 = vadd.f32 %v6080_v60, %v15261_v5  ;;  %v6666_v2 = vpop.f32.mrf.mxu3  ;;  %v6491_v5 = vsel %vm1325_vm1, %v6486_v25, %v6490_v56  ;;  %v15729_v60 = vld [vmem:[#allocation2 + $0x94] sm:$0xff]  ;;  %v5905_v25 = vrot.slane %v5903_v12, 4  ;;  %v7150_v11 = vrot.slane %v7148_v41, 3 }
 0x4e8   : > { %v7331_v22 = vpop.f32.mrf.mxu0  ;;  %v7153_v43 = vrot.slane %v7151_v44, 4  ;;  %v6492_v12 = vshrl.u32 %v15702_v45, 16 }
 0x4e9   : > { %v6764_v29 = vadd.f32 %v6666_v2, %v6081_v32  ;;  %v11895_v2 = vld [vmem:[%s16671_s4 + $0x1e0] sm:$0xff] }
 0x4ea   : > { %9161 = vmatpush.bf16.msra.mxu0 %v11895_v2 }
 0x4eb   : > { %6122 = vmatmul.bf16.gmra.mxu2 %v5898_v27  ;;  %7370 = vmatmul.bf16.gmra.mxu0 %v7146_v48  ;;  %v15722_v13 = vadd.f32 %v7328_v26, %v6764_v29  ;;  %v5902_v29 = vrot.slane %v5900_v30, 3  ;;  %v6496_v27 = vshll.u32 %v15729_v60, 16 }
 0x4ec   : > { %6708 = vmatmul.bf16.gmra.mxu3 %v6491_v5 }
 0x4ed   : > { %v5906_v5 = vor.u32 %v5905_v25, %v5902_v29  ;;  %v6498_v41 = vrot.slane %v6496_v27, 1  ;;  %v15748_v29 = vld [vmem:[#allocation2 + $0x98] sm:$0xff]  }
 0x4ee   : > { %v6083_v19 = vpop.f32.mrf.mxu2  ;;  %v5909_v45 = vshrl.u32 %v15748_v29, 16 }
 0x4ef   : > { %v6084_v39 = vadd.f32 %v6083_v19, %v15273_v40  ;;  %v6669_v24 = vpop.f32.mrf.mxu3  ;;  %v15727_v0 = vpop.f32.mrf.mxu1  ;;  %v11927_v40 = vld [vmem:[%s16671_s4 + $0x220] sm:$0xff]  ;;  %v7154_v19 = vor.u32 %v7153_v43, %v7150_v11  ;;  %v5907_v57 = vsel %vm710_vm0, %v5897_v59, %v5906_v5  ;;  %v5912_v11 = vshll.u32 %v15748_v29, 16 }
 0x4f0   : > { %16763 = vst [vmem:[#allocation23_spill] sm:$0xff] %v15727_v0  ;;  %v7333_v32 = vpop.f32.mrf.mxu0  ;;  %9795 = vmatpush.bf16.msra.mxu1 %v11927_v40  ;;  %v6494_v0 = vor.u32 %v6492_v12, %v6490_v56 }
 0x4f1   : > { %v6765_v26 = vadd.f32 %v6669_v24, %v6084_v39 }
 0x4f2   : > { %7615 = vmatmul.bf16.gmra.mxu1 %v15464_v10  ;;  %v6499_v2 = vsel %vm1325_vm1, %v6494_v0, %v6498_v41 }
 0x4f3   : > { %v15739_v48 = vadd.f32 %v7331_v22, %v6765_v26  ;;  %v7155_v22 = vsel %vm710_vm0, %v7145_v17, %v7154_v19  ;;  %v13731_v26 = vld [vmem:[#allocation2 + $0xa4] sm:$0xff]  }
 0x4f4   : > { %v7157_v56 = vshrl.u32 %v13731_v26, 16  ;;  %v7160_v43 = vshll.u32 %v13731_v26, 16 }
 0x4f6   : > { %v6085_v46 = vpop.f32.mrf.mxu2  ;;  %v7162_v12 = vrot.slane %v7160_v43, 4 }
 0x4f7   : > { %v6086_v39 = vadd.f32 %v6085_v46, %v15287_v7  ;;  %v6671_v10 = vpop.f32.mrf.mxu3  ;;  %v15742_v30 = vpop.f32.mrf.mxu1  ;;  %v5911_v46 = vrot.slane %v5909_v45, 3 }
 0x4f8   : > { %16764 = vst [vmem:[#allocation24_spill] sm:$0xff] %v15742_v30  ;;  %v7336_v44 = vpop.f32.mrf.mxu0 }
 0x4f9   : > { %v6766_v24 = vadd.f32 %v6671_v10, %v6086_v39  ;;  %v5914_v39 = vrot.slane %v5912_v11, 4  ;;  %v7159_v10 = vrot.slane %v7157_v56, 3 }
 0x4fb   : > { %6127 = vmatmul.bf16.gmra.mxu2 %v5907_v57  ;;  %7375 = vmatmul.bf16.gmra.mxu0 %v7155_v22  ;;  %v15750_v7 = vadd.f32 %v7333_v32, %v6766_v24  ;;  %v15755_v57 = vld [vmem:[#allocation2 + $0x9c] sm:$0xff]  ;;  %v5915_v26 = vor.u32 %v5914_v39, %v5911_v46 }
 0x4fc   : > { %6713 = vmatmul.bf16.gmra.mxu3 %v6499_v2  ;;  %v6504_v24 = vshll.u32 %v15755_v57, 16  ;;  %v7163_v2 = vor.u32 %v7162_v12, %v7159_v10 }
 0x4fd   : > { %v5916_v43 = vsel %vm710_vm0, %v5906_v5, %v5915_v26  ;;  %v16767_v5 = vld [vmem:[#allocation16_spill] sm:$0xff] }
 0x4fe   : > { %v6088_v25 = vpop.f32.mrf.mxu2 }
 0x4ff   : > { %v6089_v59 = vadd.f32 %v6088_v25, %v15307_v49  ;;  %v6674_v17 = vpop.f32.mrf.mxu3  ;;  %v7581_v40 = vpop.f32.mrf.mxu1 }
 0x500   : > { %v15758_v0 = vadd.f32 %v7581_v40, %v15526_v28  ;;  %v7338_v27 = vpop.f32.mrf.mxu0  ;;  %v6500_v40 = vshrl.u32 %v15729_v60, 16 }
 0x501   : > { %v6767_v32 = vadd.f32 %v6674_v17, %v6089_v59  ;;  %v6506_v59 = vrot.slane %v6504_v24, 1  ;;  %v13733_v17 = vld [vmem:[#allocation2 + $0xac] sm:$0xff]   ;;  %v15779_v24 = vld [vmem:[#allocation2 + $0xa4] sm:$0xff] }
 0x502   : > { %16765 = vst [vmem:[#allocation25_spill] sm:$0xff] %v15758_v0  ;;  %7620 = vmatmul.bf16.gmra.mxu1 %v15499_v47  ;;  %v6502_v56 = vor.u32 %v6500_v40, %v6498_v41  ;;  %v7166_v41 = vshrl.u32 %v13733_v17, 16  ;;  %v7169_v39 = vshll.u32 %v13733_v17, 16 }
 0x503   : > { %v15762_v22 = vadd.f32 %v7336_v44, %v6767_v32  ;;  %v7164_v44 = vsel %vm710_vm0, %v7154_v19, %v7163_v2 }
 0x504   : > { %v6507_v32 = vsel %vm1325_vm1, %v6502_v56, %v6506_v59  ;;  %v7171_v56 = vrot.slane %v7169_v39, 4  ;;  %v11886_v39 = vld [vmem:[%s16671_s4 + $0x198] sm:$0xff] }
 0x505   : > { %8872 = vmatpush.bf16.msra.mxu3 %v11886_v39 }
 0x506   : > { %v6090_v49 = vpop.f32.mrf.mxu2 }
 0x507   : > { %v6091_v25 = vadd.f32 %v6090_v49, %v15320_v4  ;;  %v6676_v30 = vpop.f32.mrf.mxu3  ;;  %v7583_v28 = vpop.f32.mrf.mxu1  ;;  %v15772_v4 = vld [vmem:[#allocation2 + $0xa0] sm:$0xff]  }
 0x508   : > { %v15767_v47 = vadd.f32 %v7583_v28, %v15546_v38  ;;  %v7341_v45 = vpop.f32.mrf.mxu0  ;;  %v5918_v38 = vshrl.u32 %v15772_v4, 16 }
 0x509   : > { %v6768_v11 = vadd.f32 %v6676_v30, %v6091_v25  ;;  %v5921_v30 = vshll.u32 %v15772_v4, 16 }
 0x50a   : > { %16766 = vst [vmem:[#allocation26_spill] sm:$0xff] %v15767_v47  ;;  %v5920_v28 = vrot.slane %v5918_v38, 3 }
 0x50b   : > { %6132 = vmatmul.bf16.gmra.mxu2 %v5916_v43  ;;  %7380 = vmatmul.bf16.gmra.mxu0 %v7164_v44  ;;  %v15774_v46 = vadd.f32 %v7338_v27, %v6768_v11  ;;  %v5923_v40 = vrot.slane %v5921_v30, 4  ;;  %v7168_v11 = vrot.slane %v7166_v41, 3  ;;  %v6512_v43 = vshll.u32 %v15779_v24, 16 }
 0x50c   : > { %6718 = vmatmul.bf16.gmra.mxu3 %v6507_v32 }
 0x50d   : > { %v5924_v32 = vor.u32 %v5923_v40, %v5920_v28  ;;  %v15802_v28 = vld [vmem:[#allocation2 + $0xa8] sm:$0xff]  }
 0x50e   : > { %v6093_v60 = vpop.f32.mrf.mxu2  ;;  %v5930_v40 = vshll.u32 %v15802_v28, 16 }
 0x50f   : > { %v6094_v10 = vadd.f32 %v6093_v60, %v16767_v5  ;;  %v6679_v19 = vpop.f32.mrf.mxu3  ;;  %v7586_v12 = vpop.f32.mrf.mxu1  ;;  %v7172_v60 = vor.u32 %v7171_v56, %v7168_v11  ;;  %v16768_v5 = vld [vmem:[#allocation18_spill] sm:$0xff] }
 0x510   : > { %v15782_v49 = vadd.f32 %v7586_v12, %v15557_v3  ;;  %v7343_v25 = vpop.f32.mrf.mxu0  ;;  %v6508_v12 = vshrl.u32 %v15755_v57, 16  ;;  %v13735_v57 = vld [vmem:[#allocation2 + $0xb4] sm:$0xff]  }
 0x511   : > { %v6769_v27 = vadd.f32 %v6679_v19, %v6094_v10  ;;  %v6514_v10 = vrot.slane %v6512_v43, 1  ;;  %v5925_v19 = vsel %vm710_vm0, %v5915_v26, %v5924_v32  ;;  %v7175_v26 = vshrl.u32 %v13735_v57, 16 }
 0x512   : > { %7625 = vmatmul.bf16.gmra.mxu1 %v15544_v36  ;;  %v6510_v41 = vor.u32 %v6508_v12, %v6506_v59  ;;  %v7178_v11 = vshll.u32 %v13735_v57, 16 }
 0x513   : > { %v15786_v44 = vadd.f32 %v7341_v45, %v6769_v27  ;;  %v11878_v45 = vld [vmem:[%s16671_s4 + $0x158] sm:$0xff]  ;;  %v7173_v27 = vsel %vm710_vm0, %v7163_v2, %v7172_v60  ;;  %v16770_v2 = vld [vmem:[#allocation17_spill] sm:$0xff]  ;;  %v7177_v39 = vrot.slane %v7175_v26, 3 }
 0x514   : > { %8210 = vmatpush.bf16.msra.mxu2 %v11878_v45  ;;  %v5932_v45 = vrot.slane %v5930_v40, 4  ;;  %v6516_v40 = vshrl.u32 %v15779_v24, 16 }
 0x516   : > { %v6095_v17 = vpop.f32.mrf.mxu2 }
 0x517   : > { %v6096_v47 = vadd.f32 %v6095_v17, %v16768_v5  ;;  %v6681_v0 = vpop.f32.mrf.mxu3  ;;  %v7588_v3 = vpop.f32.mrf.mxu1  ;;  %v15809_v5 = vld [vmem:[#allocation2 + $0xac] sm:$0xff] }
 0x518   : > { %v15791_v36 = vadd.f32 %v7588_v3, %v15574_v51  ;;  %v7346_v38 = vpop.f32.mrf.mxu0  ;;  %v6515_v51 = vsel %vm1325_vm1, %v6510_v41, %v6514_v10  ;;  %v6520_v57 = vshll.u32 %v15809_v5, 16 }
 0x519   : > { %v6770_v30 = vadd.f32 %v6681_v0, %v6096_v47  ;;  %v5927_v47 = vshrl.u32 %v15802_v28, 16 }
 0x51a   : > { %16769 = vst [vmem:[#allocation16_spill] sm:$0xff] %v15791_v36  ;;  %v6522_v26 = vrot.slane %v6520_v57, 1  ;;  %v6518_v36 = vor.u32 %v6516_v40, %v6514_v10 }
 0x51b   : > { %6137 = vmatmul.bf16.gmra.mxu2 %v5925_v19  ;;  %7385 = vmatmul.bf16.gmra.mxu0 %v7173_v27  ;;  %v15804_v0 = vadd.f32 %v7343_v25, %v6770_v30  ;;  %v11894_v30 = vld [vmem:[%s16671_s4 + $0x1d8] sm:$0xff]  ;;  %v5929_v41 = vrot.slane %v5927_v47, 3  ;;  %v7180_v19 = vrot.slane %v7178_v11, 4 }
 0x51c   : > { %6723 = vmatmul.bf16.gmra.mxu3 %v6515_v51  ;;  %v11926_v27 = vld [vmem:[%s16671_s4 + $0x218] sm:$0xff]  ;;  %9162 = vmatpush.bf16.msra.mxu0 %v11894_v30 }
 0x51d   : > { %9796 = vmatpush.bf16.msra.mxu1 %v11926_v27  ;;  %v13737_v30 = vld [vmem:[#allocation2 + $0xbc] sm:$0xff]  }
 0x51e   : > { %v6098_v59 = vpop.f32.mrf.mxu2  ;;  %v7184_v10 = vshrl.u32 %v13737_v30, 16  ;;  %v7187_v27 = vshll.u32 %v13737_v30, 16 }
 0x51f   : > { %v6099_v56 = vadd.f32 %v6098_v59, %v16770_v2  ;;  %v6684_v43 = vpop.f32.mrf.mxu3  ;;  %v7591_v17 = vpop.f32.mrf.mxu1  ;;  %v5933_v59 = vor.u32 %v5932_v45, %v5929_v41  ;;  %v7181_v2 = vor.u32 %v7180_v19, %v7177_v39  ;;  %v6523_v41 = vsel %vm1325_vm1, %v6518_v36, %v6522_v26  ;;  %v15832_v45 = vld [vmem:[#allocation2 + $0xb0] sm:$0xff]  }
 0x520   : > { %v15812_v3 = vadd.f32 %v7591_v17, %v15591_v50  ;;  %v7348_v25 = vpop.f32.mrf.mxu0  ;;  %v5939_v19 = vshll.u32 %v15832_v45, 16  ;;  %v7189_v40 = vrot.slane %v7187_v27, 4 }
 0x521   : > { %v6771_v12 = vadd.f32 %v6684_v43, %v6099_v56  ;;  %v16772_v56 = vld [vmem:[#allocation19_spill] sm:$0xff] }
 0x522   : > { %16771 = vst [vmem:[#allocation18_spill] sm:$0xff] %v15812_v3  ;;  %7630 = vmatmul.bf16.gmra.mxu1 %v15572_v58 }
 0x523   : > { %v15822_v50 = vadd.f32 %v7346_v38, %v6771_v12  ;;  %v5934_v38 = vsel %vm710_vm0, %v5924_v32, %v5933_v59  ;;  %v7182_v12 = vsel %vm710_vm0, %v7172_v60, %v7181_v2  ;;  %v16773_v32 = vld [vmem:[#allocation4_spill] sm:$0xff] }
 0x526   : > { %v6100_v51 = vpop.f32.mrf.mxu2 }
 0x527   : > { %v6101_v43 = vadd.f32 %v6100_v51, %v16772_v56  ;;  %v6686_v58 = vpop.f32.mrf.mxu3  ;;  %v7593_v47 = vpop.f32.mrf.mxu1  ;;  %v15839_v56 = vld [vmem:[#allocation2 + $0xb4] sm:$0xff] }
 0x528   : > { %v15827_v11 = vadd.f32 %v7593_v47, %v15602_v18  ;;  %v7351_v17 = vpop.f32.mrf.mxu0  ;;  %v5936_v18 = vshrl.u32 %v15832_v45, 16  ;;  %v7186_v47 = vrot.slane %v7184_v10, 3 }
 0x529   : > { %v6772_v3 = vadd.f32 %v6686_v58, %v6101_v43  ;;  %v5941_v58 = vrot.slane %v5939_v19, 4 }
 0x52b   : > { %6142 = vmatmul.bf16.gmra.mxu2 %v5934_v38  ;;  %7390 = vmatmul.bf16.gmra.mxu0 %v7182_v12  ;;  %v15834_v39 = vadd.f32 %v7348_v25, %v6772_v3  ;;  %v5938_v25 = vrot.slane %v5936_v18, 3  ;;  %v6528_v38 = vshll.u32 %v15839_v56, 16 }
 0x52c   : > { %6728 = vmatmul.bf16.gmra.mxu3 %v6523_v41 }
 0x52d   : > { %v15848_v41 = vor.u32 %v5941_v58, %v5938_v25 }
 0x52e   : > { %v6103_v24 = vpop.f32.mrf.mxu2 }
 0x52f   : > { %v6104_v57 = vadd.f32 %v6103_v24, %v16773_v32  ;;  %v6689_v60 = vpop.f32.mrf.mxu3  ;;  %v7596_v51 = vpop.f32.mrf.mxu1  ;;  %v15850_v24 = vor.u32 %v7189_v40, %v7186_v47  ;;  %v16775_v32 = vld [vmem:[#allocation3_spill] sm:$0xff]  ;;  %v16776_v47 = vld [vmem:[#allocation20_spill] sm:$0xff] }
 0x530   : > { %v15842_v36 = vadd.f32 %v7596_v51, %v15610_v37  ;;  %v7353_v43 = vpop.f32.mrf.mxu0 }
 0x531   : > { %v6773_v3 = vadd.f32 %v6689_v60, %v6104_v57  ;;  %v6524_v57 = vshrl.u32 %v15809_v5, 16  ;;  %v7191_v60 = vsel %vm710_vm0, %v7181_v2, %v15850_v24 }
 0x532   : > { %16774 = vst [vmem:[#allocation17_spill] sm:$0xff] %v15842_v36  ;;  %7635 = vmatmul.bf16.gmra.mxu1 %v15600_v54  ;;  %v6530_v54 = vrot.slane %v6528_v38, 1 }
 0x533   : > { %v15846_v12 = vadd.f32 %v7351_v17, %v6773_v3  ;;  %v6526_v27 = vor.u32 %v6524_v57, %v6522_v26  ;;  %v5943_v17 = vsel %vm710_vm0, %v5933_v59, %v15848_v41  ;;  %v13738_v3 = vld [vmem:[#allocation2 + $0xc4] sm:$0xff]  }
 0x535   : > { %v6531_v25 = vsel %vm1325_vm1, %v6526_v27, %v6530_v54  ;;  %v15881_v27 = vld [vmem:[#allocation2 + $0xc8] sm:$0xff]  }
 0x536   : > { %v6105_v30 = vpop.f32.mrf.mxu2 }
 0x537   : > { %v6106_v37 = vadd.f32 %v6105_v30, %v16775_v32  ;;  %v6691_v51 = vpop.f32.mrf.mxu3  ;;  %v7598_v36 = vpop.f32.mrf.mxu1  ;;  %v15865_v30 = vld [vmem:[#allocation2 + $0xbc] sm:$0xff] }
 0x538   : > { %v15855_v18 = vadd.f32 %v7598_v36, %v15621_v42  ;;  %v7356_v19 = vpop.f32.mrf.mxu0  ;;  %v7193_v42 = vshrl.u32 %v13738_v3, 16  ;;  %v7196_v36 = vshll.u32 %v13738_v3, 16 }
 0x539   : > { %v6774_v10 = vadd.f32 %v6691_v51, %v6106_v37  ;;  %v11885_v37 = vld [vmem:[%s16671_s4 + $0x190] sm:$0xff] }
 0x53a   : > { %v11893_v51 = vld [vmem:[%s16671_s4 + $0x1d0] sm:$0xff]  ;;  %v7195_v57 = vrot.slane %v7193_v42, 3  ;;  %8873 = vmatpush.bf16.msra.mxu3 %v11885_v37  ;;  %v12518_v42 = vunpack.c.h.b16 %v15881_v27  ;;  %v6211_v37 = vld [vmem:[#allocation2 + $0xc4] sm:$0x1] }
 0x53b   : > { %6147 = vmatmul.bf16.gmra.mxu2 %v5943_v17  ;;  %7395 = vmatmul.bf16.gmra.mxu0 %v7191_v60  ;;  %v15862_v58 = vadd.f32 %v7353_v43, %v6774_v10  ;;  %v11877_v43 = vld [vmem:[%s16671_s4 + $0x150] sm:$0xff]  ;;  %v7198_v10 = vrot.slane %v7196_v36, 4  ;;  %v11876_v17 = vld [vmem:[%s16671_s4 + $0x148] sm:$0xff]  ;;  %v16777_v36 = vld [vmem:[#allocation6_spill] sm:$0xff] }
 0x53c   : > { %6733 = vmatmul.bf16.gmra.mxu3 %v6531_v25  ;;  %8211 = vmatpush.bf16.msra.mxu2 %v11877_v43  ;;  %v11884_v60 = vld [vmem:[%s16671_s4 + $0x188] sm:$0xff] }
 0x53d   : > { %9163 = vmatpush.bf16.msra.mxu0 %v11893_v51 }
 0x53e   : > { %v6108_v5 = vpop.f32.mrf.mxu2  ;;  %8874 = vmatpush.bf16.msra.mxu3 %v11884_v60  ;;  %v6326_v60 = vunpack.c.l.b16 %v6211_v37 }
 0x53f   : > { %v6109_v40 = vadd.f32 %v6108_v5, %v16776_v47  ;;  %v6694_v26 = vpop.f32.mrf.mxu3  ;;  %v7601_v38 = vpop.f32.mrf.mxu1  ;;  %v15894_v5 = vor.u32 %v7198_v10, %v7195_v57  ;;  %v11875_v10 = vld [vmem:[%s16671_s4 + $0x140] sm:$0xff] }
 0x540   : > { %v15868_v59 = vadd.f32 %v7601_v38, %v15632_v53  ;;  %v7358_v2 = vpop.f32.mrf.mxu0  ;;  %v6536_v53 = vshll.u32 %v15865_v30, 16  ;;  %v6532_v38 = vshrl.u32 %v15839_v56, 16  ;;  %8212 = vmatpush.bf16.msra.mxu2 %v11876_v17  ;;  %v11891_v56 = vld [vmem:[%s16671_s4 + $0x1c0] sm:$0xff] }
 0x541   : > { %v6775_v32 = vadd.f32 %v6694_v26, %v6109_v40 }
 0x542   : > { %7640 = vmatmul.bf16.gmra.mxu1 %v15619_v16  ;;  %v11892_v16 = vld [vmem:[%s16671_s4 + $0x1c8] sm:$0xff]  ;;  %v6538_v43 = vrot.slane %v6536_v53, 1  ;;  %v6534_v57 = vor.u32 %v6532_v38, %v6530_v54  ;;  %v7200_v54 = vsel %vm710_vm0, %v15850_v24, %v15894_v5  ;;  %v6985_v53 = vpack.c.b16 %v12518_v42, %v12518_v42 }
 0x543   : > { %v15889_v3 = vadd.f32 %v7356_v19, %v6775_v32  ;;  %9164 = vmatpush.bf16.msra.mxu0 %v11892_v16  ;;  %v6351_v24 = vpack.c.b16 %v6326_v60, %v6326_v60  ;;  %v16780_v60 = vld [vmem:[#allocation21_spill] sm:$0xff] }
 0x544   : > { %v6539_v17 = vsel %vm1325_vm1, %v6534_v57, %v6538_v43  ;;  %8213 = vmatpush.bf16.msra.mxu2 %v11875_v10 }
 0x545   : > { %v6544_v10 = vshll.u32 %v6351_v24, 16 }
 0x546   : > { %v6110_v25 = vpop.f32.mrf.mxu2 }
 0x547   : > { %v6111_v47 = vadd.f32 %v6110_v25, %v16777_v36  ;;  %v6696_v40 = vpop.f32.mrf.mxu3  ;;  %v7603_v26 = vpop.f32.mrf.mxu1  ;;  %v11883_v25 = vld [vmem:[%s16671_s4 + $0x180] sm:$0xff]  ;;  %9165 = vmatpush.bf16.msra.mxu0 %v11891_v56  ;;  %v6540_v56 = vshrl.u32 %v15865_v30, 16 }
 0x548   : > { %v15900_v19 = vadd.f32 %v7603_v26, %v15648_v52  ;;  %v7361_v32 = vpop.f32.mrf.mxu0  ;;  %v5952_v52 = vsel %vm710_vm0, %v15848_v41, %v15530_v1  ;;  %8875 = vmatpush.bf16.msra.mxu3 %v11883_v25  ;;  %v16778_v1 = vld [vmem:[#allocation5_spill] sm:$0xff] }
 0x549   : > { %v6776_v51 = vadd.f32 %v6696_v40, %v6111_v47  ;;  %v7202_v47 = vshrl.u32 %v6985_v53, 16  ;;  %v7205_v40 = vshll.u32 %v6985_v53, 16 }
 0x54b   : > { %6152 = vmatmul.bf16.gmra.mxu2 %v5952_v52  ;;  %7400 = vmatmul.bf16.gmra.mxu0 %v7200_v54  ;;  %v15918_v16 = vadd.f32 %v7358_v2, %v6776_v51  ;;  %v7204_v2 = vrot.slane %v7202_v47, 3  ;;  %v7207_v37 = vrot.slane %v7205_v40, 4  ;;  %v11925_v51 = vld [vmem:[%s16671_s4 + $0x210] sm:$0xff]  ;;  %v6542_v47 = vor.u32 %v6540_v56, %v6538_v43  ;;  %v16782_v56 = vld [vmem:[#allocation8_spill] sm:$0xff] }
 0x54c   : > { %6738 = vmatmul.bf16.gmra.mxu3 %v6539_v17  ;;  %9797 = vmatpush.bf16.msra.mxu1 %v11925_v51  ;;  %v8384_v17 = vld [vmem:[#allocation2 + $0x1c] sm:$0xf]  ;;  %v6546_v40 = vrot.slane %v6544_v10, 1  ;;  %v11851_v43 = vld [vmem:[#allocation2 + $0x10] sm:$0xff] }
 0x54d   : > { %v7208_v53 = vor.u32 %v7207_v37, %v7204_v2  ;;  %v8499_v24 = vunpack.c.l.b16 %v8384_v17  ;;  %v12862_v37 = vld [vmem:[#allocation2 + $0x20] sm:$0xff]   ;;  %v15941_v10 = vld [vmem:[#allocation2 + $0x18] sm:$0xff] }
 0x54e   : > { %v6113_v36 = vpop.f32.mrf.mxu2 }
 0x54f   : > { %v6114_v41 = vadd.f32 %v6113_v36, %v16778_v1  ;;  %v6699_v26 = vpop.f32.mrf.mxu3  ;;  %v7606_v38 = vpop.f32.mrf.mxu1  ;;  %v7209_v30 = vsel %vm710_vm0, %v15894_v5, %v7208_v53  ;;  %v8584_v5 = vshll.u32 %v12862_v37, 16 }
 0x550   : > { %v15922_v42 = vadd.f32 %v7606_v38, %v15665_v63  ;;  %v7363_v57 = vpop.f32.mrf.mxu0  ;;  %v8383_v63 = vld [vmem:[#allocation2 + $0x18] sm:$0x8] }
 0x551   : > { %v6777_v52 = vadd.f32 %v6699_v26, %v6114_v41 }
 0x552   : > { %16779 = vst [vmem:[#allocation19_spill] sm:$0xff] %v15922_v42  ;;  %7645 = vmatmul.bf16.gmra.mxu1 %v15646_v35 }
 0x553   : > { %v15928_v25 = vadd.f32 %v7361_v32, %v6777_v52  ;;  %v8498_v32 = vunpack.c.l.b16 %v8383_v63  ;;  %v6547_v52 = vsel %vm1325_vm1, %v6542_v47, %v6546_v40  ;;  %v7946_v47 = vshll.u32 %v15941_v10, 16 }
 0x555   : > { %v8547_v51 = vpack.c.b16 %v8499_v24, %v8498_v32 }
 0x556   : > { %v6115_v54 = vpop.f32.mrf.mxu2 }
 0x557   : > { %v6116_v36 = vadd.f32 %v6115_v54, %v16780_v60  ;;  %v6701_v1 = vpop.f32.mrf.mxu3  ;;  %v7608_v35 = vpop.f32.mrf.mxu1  ;;  %v8581_v60 = vshrl.u32 %v12862_v37, 16 }
 0x558   : > { %v15933_v41 = vadd.f32 %v7608_v35, %v15676_v55  ;;  %v7366_v26 = vpop.f32.mrf.mxu0  ;;  %v8576_v35 = vshll.u32 %v8547_v51, 16 }
 0x559   : > { %v6778_v38 = vadd.f32 %v6701_v1, %v6116_v36  ;;  %v7941_v36 = vshll.u32 %v11851_v43, 16  ;;  %v8573_v1 = vshrl.u32 %v8547_v51, 16  ;;  %v8583_v40 = vrot.slane %v8581_v60, 3 }
 0x55a   : > { %16781 = vst [vmem:[#allocation4_spill] sm:$0xff] %v15933_v41 }
 0x55b   : > { %6157 = vmatmul.bf16.gmra.mxu2 %v15536_v23  ;;  %7405 = vmatmul.bf16.gmra.mxu0 %v7209_v30  ;;  %v15939_v2 = vadd.f32 %v7363_v57, %v6778_v38  ;;  %v8586_v38 = vrot.slane %v8584_v5, 4  ;;  %v7943_v30 = vrot.slane %v7941_v36, 1 }
 0x55c   : > { %6743 = vmatmul.bf16.gmra.mxu3 %v6547_v52  ;;  %v8575_v52 = vrot.slane %v8573_v1, 3  ;;  %v11853_v1 = vld [vmem:[#allocation2 + $0x20] sm:$0xff] }
 0x55d   : > { %v8587_v51 = vor.u32 %v8586_v38, %v8583_v40 }
 0x55e   : > { %v6118_v55 = vpop.f32.mrf.mxu2 }
 0x55f   : > { %v6119_v54 = vadd.f32 %v6118_v55, %v16782_v56  ;;  %v6704_v63 = vpop.f32.mrf.mxu3  ;;  %v7611_v17 = vpop.f32.mrf.mxu1  ;;  %v8578_v55 = vrot.slane %v8576_v35, 4  ;;  %v12521_v56 = vunpack.c.l.b16 %v12862_v37 }
 0x560   : > { %v15945_v23 = vadd.f32 %v7611_v17, %v15684_v34  ;;  %v7368_v53 = vpop.f32.mrf.mxu0  ;;  %v7939_v34 = vshrl.u32 %v11851_v43, 16  ;;  %v7948_v17 = vrot.slane %v7946_v47, 1 }
 0x561   : > { %v6779_v57 = vadd.f32 %v6704_v63, %v6119_v54 }
 0x562   : > { %16783 = vst [vmem:[#allocation3_spill] sm:$0xff] %v15945_v23  ;;  %7650 = vmatmul.bf16.gmra.mxu1 %v15674_v21  ;;  %v7944_v60 = vor.u32 %v7943_v30, %v7939_v34 }
 0x563   : > { %v15949_v32 = vadd.f32 %v7366_v26, %v6779_v57  ;;  %v8579_v26 = vor.u32 %v8578_v55, %v8575_v52  ;;  %v9062_v57 = vpack.c.b16 %v12521_v56, %v8499_v24  ;;  %v7954_v52 = vshll.u32 %v11853_v1, 16 }
 0x564   : > { %v7949_v36 = vsel %vm1325_vm1, %v7944_v60, %v7948_v17 }
 0x565   : > { %v8588_v37 = vsel %vm710_vm0, %v8579_v26, %v8587_v51 }
 0x566   : > { %v6120_v41 = vpop.f32.mrf.mxu2 }
 0x567   : > { %v6121_v23 = vadd.f32 %v6120_v41, %v15528_v8  ;;  %v6706_v54 = vpop.f32.mrf.mxu3  ;;  %v7613_v63 = vpop.f32.mrf.mxu1  ;;  %v12863_v8 = vld [vmem:[#allocation2 + $0x28] sm:$0xff]  }
 0x568   : > { %v15953_v21 = vadd.f32 %v7613_v63, %v15695_v15  ;;  %v7371_v42 = vpop.f32.mrf.mxu0  ;;  %v8590_v40 = vshrl.u32 %v12863_v8, 16 }
 0x569   : > { %v6780_v5 = vadd.f32 %v6706_v54, %v6121_v23  ;;  %v8593_v23 = vshll.u32 %v12863_v8, 16  ;;  %v7950_v54 = vshrl.u32 %v15941_v10, 16 }
 0x56b   : > { %8214 = vmatmul.bf16.vlgmr.msra.gmra.mxu2 %v7949_v36  ;;  %9166 = vmatmul.bf16.vlgmr.msra.gmra.mxu0 %v9062_v57  ;;  %v15957_v43 = vadd.f32 %v7368_v53, %v6780_v5  ;;  %v8592_v53 = vrot.slane %v8590_v40, 3  ;;  %v8595_v55 = vrot.slane %v8593_v23, 4  ;;  %v7952_v36 = vor.u32 %v7950_v54, %v7948_v17 }
 0x56c   : > { %8876 = vmatmul.bf16.vlgmr.msra.gmra.mxu3 %v8588_v37  ;;  %v13499_v37 = vld [vmem:[#allocation2 + $0x24] sm:$0xff]   ;;  %v7958_v54 = vshrl.u32 %v11853_v1, 16 }
 0x56d   : > { %v8596_v26 = vor.u32 %v8595_v55, %v8592_v53 }
 0x56e   : > { %v6123_v41 = vpop.f32.mrf.mxu2 }
 0x56f   : > { %v6124_v15 = vadd.f32 %v6123_v41, %v15548_v33  ;;  %v6709_v35 = vpop.f32.mrf.mxu3  ;;  %v7616_v47 = vpop.f32.mrf.mxu1  ;;  %v7956_v33 = vrot.slane %v7954_v52, 1 }
 0x570   : > { %v15961_v24 = vadd.f32 %v7616_v47, %v15706_v31  ;;  %v7373_v38 = vpop.f32.mrf.mxu0 }
 0x571   : > { %v6781_v30 = vadd.f32 %v6709_v35, %v6124_v15  ;;  %v7957_v8 = vsel %vm1325_vm1, %v7952_v36, %v7956_v33  ;;  %v11854_v15 = vld [vmem:[#allocation2 + $0x28] sm:$0xff] }
 0x572   : > { %7655 = vmatmul.bf16.gmra.mxu1 %v15693_v61 }
 0x573   : > { %v15964_v56 = vadd.f32 %v7371_v42, %v6781_v30  ;;  %v8597_v42 = vsel %vm710_vm0, %v8587_v51, %v8596_v26  ;;  %v7962_v51 = vshll.u32 %v11854_v15, 16 }
 0x576   : > { %v6125_v34 = vpop.f32.mrf.mxu2 }
 0x577   : > { %v6126_v63 = vadd.f32 %v6125_v34, %v15559_v14  ;;  %v6711_v60 = vpop.f32.mrf.mxu3  ;;  %v7618_v5 = vpop.f32.mrf.mxu1  ;;  %v12864_v14 = vld [vmem:[#allocation2 + $0x30] sm:$0xff]  }
 0x578   : > { %v15969_v31 = vadd.f32 %v7618_v5, %v15722_v13  ;;  %v7376_v57 = vpop.f32.mrf.mxu0  ;;  %v8599_v40 = vshrl.u32 %v12864_v14, 16  ;;  %v8602_v17 = vshll.u32 %v12864_v14, 16 }
 0x579   : > { %v6782_v61 = vadd.f32 %v6711_v60, %v6126_v63  ;;  %v7964_v63 = vrot.slane %v7962_v51, 1 }
 0x57a   : > { %v8601_v53 = vrot.slane %v8599_v40, 3  ;;  %v8604_v55 = vrot.slane %v8602_v17, 4 }
 0x57b   : > { %8219 = vmatmul.bf16.gmra.mxu2 %v7957_v8  ;;  %9171 = vmatmul.bf16.gmra.mxu0 %v13499_v37  ;;  %v15973_v10 = vadd.f32 %v7373_v38, %v6782_v61  ;;  %v11924_v38 = vld [vmem:[%s16671_s4 + $0x208] sm:$0xff]  ;;  %v7960_v37 = vor.u32 %v7958_v54, %v7956_v33 }
 0x57c   : > { %8881 = vmatmul.bf16.gmra.mxu3 %v8597_v42  ;;  %9798 = vmatpush.bf16.msra.mxu1 %v11924_v38  ;;  %v8605_v36 = vor.u32 %v8604_v55, %v8601_v53  ;;  %v13501_v42 = vld [vmem:[#allocation2 + $0x2c] sm:$0xff]  }
 0x57d   : > { %v7965_v14 = vsel %vm1325_vm1, %v7960_v37, %v7964_v63 }
 0x57e   : > { %v6128_v41 = vpop.f32.mrf.mxu2 }
 0x57f   : > { %v6129_v35 = vadd.f32 %v6128_v41, %v15576_v62  ;;  %v6714_v13 = vpop.f32.mrf.mxu3  ;;  %v7621_v47 = vpop.f32.mrf.mxu1 }
 0x580   : > { %v15977_v23 = vadd.f32 %v7621_v47, %v15739_v48  ;;  %v7378_v30 = vpop.f32.mrf.mxu0 }
 0x581   : > { %v6783_v52 = vadd.f32 %v6714_v13, %v6129_v35  ;;  %v11855_v35 = vld [vmem:[#allocation2 + $0x30] sm:$0xff] }
 0x582   : > { %7660 = vmatmul.bf16.gmra.mxu1 %v15720_v6 }
 0x583   : > { %v15983_v34 = vadd.f32 %v7376_v57, %v6783_v52  ;;  %v8606_v57 = vsel %vm710_vm0, %v8596_v26, %v8605_v36  ;;  %v7970_v26 = vshll.u32 %v11855_v35, 16 }
 0x585   : > { %v7972_v54 = vrot.slane %v7970_v26, 1 }
 0x586   : > { %v6130_v62 = vpop.f32.mrf.mxu2 }
 0x587   : > { %v6131_v48 = vadd.f32 %v6130_v62, %v15593_v20  ;;  %v6716_v60 = vpop.f32.mrf.mxu3  ;;  %v7623_v5 = vpop.f32.mrf.mxu1  ;;  %v12865_v20 = vld [vmem:[#allocation2 + $0x38] sm:$0xff]   ;;  %v7966_v62 = vshrl.u32 %v11854_v15, 16 }
 0x588   : > { %v15987_v6 = vadd.f32 %v7623_v5, %v15750_v7  ;;  %v7381_v61 = vpop.f32.mrf.mxu0  ;;  %v8608_v40 = vshrl.u32 %v12865_v20, 16  ;;  %v8611_v33 = vshll.u32 %v12865_v20, 16  ;;  %v12866_v20 = vld [vmem:[#allocation2 + $0x40] sm:$0xff]  }
 0x589   : > { %v6784_v8 = vadd.f32 %v6716_v60, %v6131_v48 }
 0x58a   : > { %v8613_v38 = vrot.slane %v8611_v33, 4  ;;  %v8617_v33 = vshrl.u32 %v12866_v20, 16 }
 0x58b   : > { %8224 = vmatmul.bf16.gmra.mxu2 %v7965_v14  ;;  %9176 = vmatmul.bf16.gmra.mxu0 %v13501_v42  ;;  %v15991_v1 = vadd.f32 %v7378_v30, %v6784_v8  ;;  %v8610_v30 = vrot.slane %v8608_v40, 3  ;;  %v7968_v42 = vor.u32 %v7966_v62, %v7964_v63  ;;  %v8620_v63 = vshll.u32 %v12866_v20, 16 }
 0x58c   : > { %8886 = vmatmul.bf16.gmra.mxu3 %v8606_v57 }
 0x58d   : > { %v8614_v37 = vor.u32 %v8613_v38, %v8610_v30  ;;  %v7973_v57 = vsel %vm1325_vm1, %v7968_v42, %v7972_v54  ;;  %v8622_v38 = vrot.slane %v8620_v63, 4 }
 0x58e   : > { %v6133_v41 = vpop.f32.mrf.mxu2 }
 0x58f   : > { %v6134_v13 = vadd.f32 %v6133_v41, %v15604_v9  ;;  %v6719_v7 = vpop.f32.mrf.mxu3  ;;  %v7626_v47 = vpop.f32.mrf.mxu1  ;;  %v16784_v9 = vld [vmem:[#allocation7_spill] sm:$0xff] }
 0x590   : > { %v15995_v17 = vadd.f32 %v7626_v47, %v15762_v22  ;;  %v7383_v52 = vpop.f32.mrf.mxu0 }
 0x591   : > { %v6785_v51 = vadd.f32 %v6719_v7, %v6134_v13  ;;  %v11856_v13 = vld [vmem:[#allocation2 + $0x38] sm:$0xff] }
 0x592   : > { %7665 = vmatmul.bf16.gmra.mxu1 %v15748_v29  ;;  %v13503_v29 = vld [vmem:[#allocation2 + $0x34] sm:$0xff]  }
 0x593   : > { %v15998_v53 = vadd.f32 %v7381_v61, %v6785_v51  ;;  %v8615_v61 = vsel %vm710_vm0, %v8605_v36, %v8614_v37  ;;  %v16785_v7 = vld [vmem:[#allocation22_spill] sm:$0xff]  ;;  %v7978_v36 = vshll.u32 %v11856_v13, 16 }
 0x596   : > { %v6135_v55 = vpop.f32.mrf.mxu2 }
 0x597   : > { %v6136_v48 = vadd.f32 %v6135_v55, %v16784_v9  ;;  %v6721_v60 = vpop.f32.mrf.mxu3  ;;  %v7628_v5 = vpop.f32.mrf.mxu1  ;;  %v7974_v9 = vshrl.u32 %v11855_v35, 16 }
 0x598   : > { %v16002_v22 = vadd.f32 %v7628_v5, %v15774_v46  ;;  %v7386_v8 = vpop.f32.mrf.mxu0 }
 0x599   : > { %v6786_v14 = vadd.f32 %v6721_v60, %v6136_v48  ;;  %v7980_v48 = vrot.slane %v7978_v36, 1  ;;  %v16786_v60 = vld [vmem:[#allocation10_spill] sm:$0xff] }
 0x59b   : > { %8229 = vmatmul.bf16.gmra.mxu2 %v7973_v57  ;;  %9181 = vmatmul.bf16.gmra.mxu0 %v13503_v29  ;;  %v16006_v15 = vadd.f32 %v7383_v52, %v6786_v14  ;;  %v8619_v52 = vrot.slane %v8617_v33, 3 }
 0x59c   : > { %8891 = vmatmul.bf16.gmra.mxu3 %v8615_v61  ;;  %v7976_v61 = vor.u32 %v7974_v9, %v7972_v54 }
 0x59d   : > { %v8623_v29 = vor.u32 %v8622_v38, %v8619_v52 }
 0x59e   : > { %v6138_v41 = vpop.f32.mrf.mxu2 }
 0x59f   : > { %v6139_v47 = vadd.f32 %v6138_v41, %v16785_v7  ;;  %v6724_v46 = vpop.f32.mrf.mxu3  ;;  %v7631_v40 = vpop.f32.mrf.mxu1  ;;  %v7981_v41 = vsel %vm1325_vm1, %v7976_v61, %v7980_v48  ;;  %v12867_v7 = vld [vmem:[#allocation2 + $0x48] sm:$0xff]   ;;  %v16788_v61 = vld [vmem:[#allocation11_spill] sm:$0xff] }
 0x5a0   : > { %v16010_v51 = vadd.f32 %v7631_v40, %v15786_v44  ;;  %v7388_v26 = vpop.f32.mrf.mxu0  ;;  %v16787_v40 = vld [vmem:[#allocation9_spill] sm:$0xff]  ;;  %v8629_v54 = vshll.u32 %v12867_v7, 16 }
 0x5a1   : > { %v6787_v30 = vadd.f32 %v6724_v46, %v6139_v47  ;;  %v11857_v46 = vld [vmem:[#allocation2 + $0x40] sm:$0xff] }
 0x5a2   : > { %7670 = vmatmul.bf16.gmra.mxu1 %v15772_v4  ;;  %v13505_v4 = vld [vmem:[#allocation2 + $0x3c] sm:$0xff]   ;;  %v8631_v9 = vrot.slane %v8629_v54, 4  ;;  %v16789_v54 = vld [vmem:[#allocation13_spill] sm:$0xff] }
 0x5a3   : > { %v16013_v55 = vadd.f32 %v7386_v8, %v6787_v30  ;;  %v8624_v8 = vsel %vm710_vm0, %v8614_v37, %v8623_v29  ;;  %v8626_v30 = vshrl.u32 %v12867_v7, 16  ;;  %v7986_v37 = vshll.u32 %v11857_v46, 16 }
 0x5a6   : > { %v6140_v62 = vpop.f32.mrf.mxu2 }
 0x5a7   : > { %v6141_v5 = vadd.f32 %v6140_v62, %v16786_v60  ;;  %v6726_v42 = vpop.f32.mrf.mxu3  ;;  %v7633_v14 = vpop.f32.mrf.mxu1  ;;  %v8628_v62 = vrot.slane %v8626_v30, 3  ;;  %v11858_v30 = vld [vmem:[#allocation2 + $0x48] sm:$0xff] }
 0x5a8   : > { %v16017_v44 = vadd.f32 %v7633_v14, %v15804_v0  ;;  %v7391_v57 = vpop.f32.mrf.mxu0  ;;  %v7988_v14 = vrot.slane %v7986_v37, 1 }
 0x5a9   : > { %v6788_v20 = vadd.f32 %v6726_v42, %v6141_v5  ;;  %v7982_v42 = vshrl.u32 %v11856_v13, 16 }
 0x5ab   : > { %8234 = vmatmul.bf16.gmra.mxu2 %v7981_v41  ;;  %9186 = vmatmul.bf16.gmra.mxu0 %v13505_v4  ;;  %v16021_v35 = vadd.f32 %v7388_v26, %v6788_v20  ;;  %v11923_v26 = vld [vmem:[%s16671_s4 + $0x200] sm:$0xff]  ;;  %v8632_v41 = vor.u32 %v8631_v9, %v8628_v62  ;;  %v7984_v7 = vor.u32 %v7982_v42, %v7980_v48 }
 0x5ac   : > { %8896 = vmatmul.bf16.gmra.mxu3 %v8624_v8  ;;  %9799 = vmatpush.bf16.msra.mxu1 %v11923_v26 }
 0x5ae   : > { %v6143_v47 = vpop.f32.mrf.mxu2 }
 0x5af   : > { %v6144_v33 = vadd.f32 %v6143_v47, %v16787_v40  ;;  %v6729_v0 = vpop.f32.mrf.mxu3  ;;  %v7636_v63 = vpop.f32.mrf.mxu1  ;;  %v13507_v40 = vld [vmem:[#allocation2 + $0x44] sm:$0xff]  }
 0x5b0   : > { %v16025_v36 = vadd.f32 %v7636_v63, %v15822_v50  ;;  %v7393_v52 = vpop.f32.mrf.mxu0 }
 0x5b1   : > { %v6789_v38 = vadd.f32 %v6729_v0, %v6144_v33  ;;  %v7989_v33 = vsel %vm1325_vm1, %v7984_v7, %v7988_v14  ;;  %v12868_v0 = vld [vmem:[#allocation2 + $0x50] sm:$0xff]   ;;  %v16790_v7 = vld [vmem:[#allocation12_spill] sm:$0xff] }
 0x5b2   : > { %7675 = vmatmul.bf16.gmra.mxu1 %v15802_v28  ;;  %v8635_v26 = vshrl.u32 %v12868_v0, 16  ;;  %v8638_v48 = vshll.u32 %v12868_v0, 16 }
 0x5b3   : > { %v16031_v60 = vadd.f32 %v7391_v57, %v6789_v38  ;;  %v8633_v57 = vsel %vm710_vm0, %v8623_v29, %v8632_v41  ;;  %v7994_v29 = vshll.u32 %v11858_v30, 16 }
 0x5b4   : > { %v8640_v42 = vrot.slane %v8638_v48, 4  ;;  %v16791_v48 = vld [vmem:[#allocation14_spill] sm:$0xff] }
 0x5b6   : > { %v6145_v5 = vpop.f32.mrf.mxu2 }
 0x5b7   : > { %v6146_v50 = vadd.f32 %v6145_v5, %v16788_v61  ;;  %v6731_v20 = vpop.f32.mrf.mxu3  ;;  %v7638_v4 = vpop.f32.mrf.mxu1 }
 0x5b8   : > { %v16035_v28 = vadd.f32 %v7638_v4, %v15834_v39  ;;  %v7396_v8 = vpop.f32.mrf.mxu0  ;;  %v7996_v4 = vrot.slane %v7994_v29, 1 }
 0x5b9   : > { %v6790_v47 = vadd.f32 %v6731_v20, %v6146_v50  ;;  %v7990_v20 = vshrl.u32 %v11857_v46, 16 }
 0x5bb   : > { %8239 = vmatmul.bf16.gmra.mxu2 %v7989_v33  ;;  %9191 = vmatmul.bf16.gmra.mxu0 %v13507_v40  ;;  %v16039_v13 = vadd.f32 %v7393_v52, %v6790_v47  ;;  %v8637_v52 = vrot.slane %v8635_v26, 3  ;;  %v11859_v26 = vld [vmem:[#allocation2 + $0x50] sm:$0xff] }
 0x5bc   : > { %8901 = vmatmul.bf16.gmra.mxu3 %v8633_v57 }
 0x5bd   : > { %v8641_v57 = vor.u32 %v8640_v42, %v8637_v52 }
 0x5be   : > { %v6148_v63 = vpop.f32.mrf.mxu2 }
 0x5bf   : > { %v6149_v38 = vadd.f32 %v6148_v63, %v16789_v54  ;;  %v6734_v39 = vpop.f32.mrf.mxu3  ;;  %v7641_v37 = vpop.f32.mrf.mxu1  ;;  %v7992_v63 = vor.u32 %v7990_v20, %v7988_v14 }
 0x5c0   : > { %v16043_v62 = vadd.f32 %v7641_v37, %v15846_v12  ;;  %v7398_v9 = vpop.f32.mrf.mxu0 }
 0x5c1   : > { %v6791_v5 = vadd.f32 %v6734_v39, %v6149_v38  ;;  %v7997_v38 = vsel %vm1325_vm1, %v7992_v63, %v7996_v4  ;;  %v12869_v39 = vld [vmem:[#allocation2 + $0x58] sm:$0xff]   ;;  %v7998_v63 = vshrl.u32 %v11858_v30, 16 }
 0x5c2   : > { %7680 = vmatmul.bf16.gmra.mxu1 %v15832_v45  ;;  %v13509_v45 = vld [vmem:[#allocation2 + $0x4c] sm:$0xff]   ;;  %v8644_v52 = vshrl.u32 %v12869_v39, 16  ;;  %v8647_v14 = vshll.u32 %v12869_v39, 16 }
 0x5c3   : > { %v16046_v61 = vadd.f32 %v7396_v8, %v6791_v5  ;;  %v8642_v8 = vsel %vm710_vm0, %v8632_v41, %v8641_v57  ;;  %v8002_v41 = vshll.u32 %v11859_v26, 16 }
 0x5c6   : > { %v6150_v50 = vpop.f32.mrf.mxu2 }
 0x5c7   : > { %v6151_v47 = vadd.f32 %v6150_v50, %v16790_v7  ;;  %v6736_v40 = vpop.f32.mrf.mxu3  ;;  %v7643_v33 = vpop.f32.mrf.mxu1  ;;  %v12859_v7 = vld [vmem:[#allocation2 + $0xb8] sm:$0xff]  }
 0x5c8   : > { %v16050_v12 = vadd.f32 %v7643_v33, %v15862_v58  ;;  %v7401_v0 = vpop.f32.mrf.mxu0 }
 0x5c9   : > { %v6792_v54 = vadd.f32 %v6736_v40, %v6151_v47  ;;  %v8649_v47 = vrot.slane %v8647_v14, 4  ;;  %v12870_v14 = vld [vmem:[#allocation2 + $0x60] sm:$0xff]  }
 0x5cb   : > { %8244 = vmatmul.bf16.gmra.mxu2 %v7997_v38  ;;  %9196 = vmatmul.bf16.gmra.mxu0 %v13509_v45  ;;  %v16054_v46 = vadd.f32 %v7398_v9, %v6792_v54  ;;  %v8646_v9 = vrot.slane %v8644_v52, 3  ;;  %v8004_v54 = vrot.slane %v8002_v41, 1  ;;  %v16792_v45 = vld [vmem:[#allocation15_spill] sm:$0xff] }
 0x5cc   : > { %8906 = vmatmul.bf16.gmra.mxu3 %v8642_v8  ;;  %v16794_v41 = vld [vmem:[#allocation23_spill] sm:$0xff] }
 0x5cd   : > { %v8650_v39 = vor.u32 %v8649_v47, %v8646_v9 }
 0x5ce   : > { %v6153_v37 = vpop.f32.mrf.mxu2 }
 0x5cf   : > { %v6154_v5 = vadd.f32 %v6153_v37, %v16791_v48  ;;  %v6739_v58 = vpop.f32.mrf.mxu3  ;;  %v7646_v29 = vpop.f32.mrf.mxu1 }
 0x5d0   : > { %v16058_v42 = vadd.f32 %v7646_v29, %v15889_v3  ;;  %v7403_v50 = vpop.f32.mrf.mxu0  ;;  %v13511_v29 = vld [vmem:[#allocation2 + $0x54] sm:$0xff]  }
 0x5d1   : > { %v6793_v20 = vadd.f32 %v6739_v58, %v6154_v5  ;;  %v8000_v5 = vor.u32 %v7998_v63, %v7996_v4  ;;  %v8656_v4 = vshll.u32 %v12870_v14, 16 }
 0x5d2   : > { %7685 = vmatmul.bf16.gmra.mxu1 %v12859_v7  ;;  %v11860_v7 = vld [vmem:[#allocation2 + $0x58] sm:$0xff] }
 0x5d3   : > { %v16060_v40 = vadd.f32 %v7401_v0, %v6793_v20  ;;  %v8005_v52 = vsel %vm1325_vm1, %v8000_v5, %v8004_v54  ;;  %v8651_v0 = vsel %vm710_vm0, %v8641_v57, %v8650_v39  ;;  %v8010_v57 = vshll.u32 %v11860_v7, 16 }
 0x5d6   : > { %v6155_v33 = vpop.f32.mrf.mxu2 }
 0x5d7   : > { %v6156_v38 = vadd.f32 %v6155_v33, %v16792_v45  ;;  %v6741_v8 = vpop.f32.mrf.mxu3  ;;  %v7648_v37 = vpop.f32.mrf.mxu1  ;;  %v8653_v33 = vshrl.u32 %v12870_v14, 16 }
 0x5d8   : > { %v16064_v3 = vadd.f32 %v7648_v37, %v15918_v16  ;;  %v7406_v48 = vpop.f32.mrf.mxu0  ;;  %v8658_v37 = vrot.slane %v8656_v4, 4  ;;  %v12871_v4 = vld [vmem:[#allocation2 + $0x68] sm:$0xff]  }
 0x5d9   : > { %v6794_v58 = vadd.f32 %v6741_v8, %v6156_v38  ;;  %v12860_v8 = vld [vmem:[#allocation2 + $0xc0] sm:$0xff]  }
 0x5da   : > { %16793 = vst [vmem:[#allocation20_spill] sm:$0xff] %v16064_v3 }
 0x5db   : > { %8249 = vmatmul.bf16.gmra.mxu2 %v8005_v52  ;;  %9201 = vmatmul.bf16.gmra.mxu0 %v13511_v29  ;;  %v16068_v30 = vadd.f32 %v7403_v50, %v6794_v58  ;;  %v8655_v50 = vrot.slane %v8653_v33, 3  ;;  %v8006_v29 = vshrl.u32 %v11859_v26, 16  ;;  %v8012_v52 = vrot.slane %v8010_v57, 1  ;;  %v16084_v57 = vld [vmem:[#allocation2 + $0x60] sm:$0xff] }
 0x5dc   : > { %8911 = vmatmul.bf16.gmra.mxu3 %v8651_v0  ;;  %v16795_v0 = vld [vmem:[#allocation24_spill] sm:$0xff] }
 0x5dd   : > { %v8659_v14 = vor.u32 %v8658_v37, %v8655_v50  ;;  %v16797_v50 = vld [vmem:[#allocation25_spill] sm:$0xff] }
 0x5de   : > { %v6158_v20 = vpop.f32.mrf.mxu2 }
 0x5df   : > { %v6159_v9 = vadd.f32 %v6158_v20, %v16794_v41  ;;  %v6744_v16 = vpop.f32.mrf.mxu3  ;;  %v7651_v47 = vpop.f32.mrf.mxu1 }
 0x5e0   : > { %v16072_v63 = vadd.f32 %v7651_v47, %v15928_v25  ;;  %v7408_v45 = vpop.f32.mrf.mxu0 }
 0x5e1   : > { %v6795_v38 = vadd.f32 %v6744_v16, %v6159_v9  ;;  %v8008_v9 = vor.u32 %v8006_v29, %v8004_v54  ;;  %v8662_v54 = vshrl.u32 %v12871_v4, 16 }
 0x5e2   : > { %7690 = vmatmul.bf16.gmra.mxu1 %v12860_v8  ;;  %v13513_v8 = vld [vmem:[#allocation2 + $0x5c] sm:$0xff]  }
 0x5e3   : > { %v16074_v5 = vadd.f32 %v7406_v48, %v6795_v38  ;;  %v8013_v33 = vsel %vm1325_vm1, %v8008_v9, %v8012_v52  ;;  %v8660_v48 = vsel %vm710_vm0, %v8650_v39, %v8659_v14  ;;  %v8018_v39 = vshll.u32 %v16084_v57, 16  ;;  %v11899_v9 = vld [vmem:[#allocation2 + $0x1c] sm:$0xff] }
 0x5e6   : > { %v6160_v58 = vpop.f32.mrf.mxu2 }
 0x5e7   : > { %v6161_v20 = vadd.f32 %v6160_v58, %v16795_v0  ;;  %v6746_v41 = vpop.f32.mrf.mxu3  ;;  %v7653_v3 = vpop.f32.mrf.mxu1  ;;  %v8665_v58 = vshll.u32 %v12871_v4, 16  ;;  %v16799_v4 = vld [vmem:[#allocation26_spill] sm:$0xff] }
 0x5e8   : > { %v16078_v25 = vadd.f32 %v7653_v3, %v15939_v2  ;;  %v9167_v47 = vpop.f32.mrf.mxu0 }
 0x5e9   : > { %v6796_v16 = vadd.f32 %v6746_v41, %v6161_v20  ;;  %v8667_v41 = vrot.slane %v8665_v58, 4 }
 0x5ea   : > { %16796 = vst [vmem:[#allocation6_spill] sm:$0xff] %v16078_v25  ;;  %v13515_v25 = vld [vmem:[#allocation2 + $0x64] sm:$0xff]  }
 0x5eb   : > { %8254 = vmatmul.bf16.gmra.mxu2 %v8013_v33  ;;  %9206 = vmatmul.bf16.gmra.mxu0 %v13513_v8  ;;  %v16082_v26 = vadd.f32 %v7408_v45, %v6796_v16  ;;  %v8664_v45 = vrot.slane %v8662_v54, 3  ;;  %v16094_v8 = vld [vmem:[#allocation2 + $0x24] sm:$0xff] }
 0x5ec   : > { %8916 = vmatmul.bf16.gmra.mxu3 %v8660_v48  ;;  %v8014_v48 = vshrl.u32 %v11860_v7, 16 }
 0x5ee   : > { %v8215_v38 = vpop.f32.mrf.mxu2  ;;  %v8016_v54 = vor.u32 %v8014_v48, %v8012_v52 }
 0x5ef   : > { %v8335_v2 = vadd.f32 %v8215_v38, %v16797_v50  ;;  %v8877_v3 = vpop.f32.mrf.mxu3  ;;  %v7656_v37 = vpop.f32.mrf.mxu1  ;;  %v8020_v38 = vrot.slane %v8018_v39, 1 }
 0x5f0   : > { %v16088_v29 = vadd.f32 %v7656_v37, %v15949_v32  ;;  %v9169_v0 = vpop.f32.mrf.mxu0 }
 0x5f1   : > { %v8997_v20 = vadd.f32 %v8877_v3, %v8335_v2  ;;  %v9527_v2 = vshll.u32 %v11899_v9, 16 }
 0x5f2   : > { %16798 = vst [vmem:[#allocation5_spill] sm:$0xff] %v16088_v29  ;;  %7695 = vmatmul.bf16.gmra.mxu1 %v15881_v27  ;;  %v8668_v29 = vor.u32 %v8667_v41, %v8664_v45  ;;  %v12872_v45 = vld [vmem:[#allocation2 + $0x70] sm:$0xff]   ;;  %v9525_v41 = vshrl.u32 %v11899_v9, 16 }
 0x5f3   : > { %v16092_v16 = vadd.f32 %v9167_v47, %v8997_v20  ;;  %v9532_v47 = vshll.u32 %v16094_v8, 16  ;;  %v8021_v20 = vsel %vm1325_vm1, %v8016_v54, %v8020_v38  ;;  %v9529_v39 = vrot.slane %v9527_v2, 1 }
 0x5f4   : > { %v8669_v7 = vsel %vm710_vm0, %v8659_v14, %v8668_v29  ;;  %v8671_v54 = vshrl.u32 %v12872_v45, 16 }
 0x5f6   : > { %v8217_v33 = vpop.f32.mrf.mxu2 }
 0x5f7   : > { %v8336_v50 = vadd.f32 %v8217_v33, %v16799_v4  ;;  %v8879_v32 = vpop.f32.mrf.mxu3  ;;  %v7658_v37 = vpop.f32.mrf.mxu1 }
 0x5f8   : > { %v16098_v27 = vadd.f32 %v7658_v37, %v15957_v43  ;;  %v9172_v3 = vpop.f32.mrf.mxu0  ;;  %v9534_v43 = vrot.slane %v9532_v47, 1  ;;  %v16105_v37 = vld [vmem:[#allocation2 + $0x68] sm:$0xff] }
 0x5f9   : > { %v8998_v58 = vadd.f32 %v8879_v32, %v8336_v50  ;;  %v9530_v32 = vor.u32 %v9529_v39, %v9525_v41  ;;  %v8026_v9 = vshll.u32 %v16105_v37, 16  ;;  %v8022_v39 = vshrl.u32 %v16084_v57, 16  ;;  %v16801_v41 = vld [vmem:[#allocation16_spill] sm:$0xff] }
 0x5fb   : > { %8259 = vmatmul.bf16.gmra.mxu2 %v8021_v20  ;;  %9211 = vmatmul.bf16.gmra.mxu0 %v13515_v25  ;;  %v16103_v33 = vadd.f32 %v9169_v0, %v8998_v58  ;;  %v8674_v20 = vshll.u32 %v12872_v45, 16  ;;  %v9535_v2 = vsel %vm1325_vm1, %v9530_v32, %v9534_v43  ;;  %v8673_v58 = vrot.slane %v8671_v54, 3 }
 0x5fc   : > { %8921 = vmatmul.bf16.gmra.mxu3 %v8669_v7  ;;  %v8028_v45 = vrot.slane %v8026_v9, 1 }
 0x5fd   : > { %v8676_v47 = vrot.slane %v8674_v20, 4  ;;  %v13517_v20 = vld [vmem:[#allocation2 + $0x6c] sm:$0xff]  }
 0x5fe   : > { %v8220_v4 = vpop.f32.mrf.mxu2 }
 0x5ff   : > { %v8337_v52 = vadd.f32 %v8220_v4, %v15782_v49  ;;  %v8882_v48 = vpop.f32.mrf.mxu3  ;;  %v7661_v50 = vpop.f32.mrf.mxu1  ;;  %v16115_v49 = vld [vmem:[#allocation2 + $0x2c] sm:$0xff] }
 0x600   : > { %v16109_v14 = vadd.f32 %v7661_v50, %v15964_v56  ;;  %v9174_v25 = vpop.f32.mrf.mxu0 }
 0x601   : > { %v8999_v0 = vadd.f32 %v8882_v48, %v8337_v52  ;;  %v8677_v52 = vor.u32 %v8676_v47, %v8673_v58  ;;  %v9536_v58 = vshrl.u32 %v16094_v8, 16  ;;  %v16128_v47 = vld [vmem:[#allocation2 + $0x70] sm:$0xff] }
 0x602   : > { %16800 = vst [vmem:[#allocation21_spill] sm:$0xff] %v16109_v14  ;;  %9800 = vmatmul.bf16.vlgmr.msra.gmra.mxu1 %v9535_v2  ;;  %v8024_v2 = vor.u32 %v8022_v39, %v8020_v38  ;;  %v16803_v38 = vld [vmem:[#allocation18_spill] sm:$0xff]  ;;  %v8034_v8 = vshll.u32 %v16128_v47, 16 }
 0x603   : > { %v16113_v7 = vadd.f32 %v9172_v3, %v8999_v0  ;;  %v9540_v3 = vshll.u32 %v16115_v49, 16  ;;  %v8678_v57 = vsel %vm710_vm0, %v8668_v29, %v8677_v52 }
 0x604   : > { %v8029_v0 = vsel %vm1325_vm1, %v8024_v2, %v8028_v45 }
 0x606   : > { %v8222_v4 = vpop.f32.mrf.mxu2 }
 0x607   : > { %v8338_v56 = vadd.f32 %v8222_v4, %v16801_v41  ;;  %v8884_v50 = vpop.f32.mrf.mxu3  ;;  %v7663_v14 = vpop.f32.mrf.mxu1  ;;  %v12873_v4 = vld [vmem:[#allocation2 + $0x78] sm:$0xff]  }
 0x608   : > { %v16120_v48 = vadd.f32 %v7663_v14, %v15973_v10  ;;  %v9177_v32 = vpop.f32.mrf.mxu0  ;;  %v9542_v10 = vrot.slane %v9540_v3, 1  ;;  %v8680_v2 = vshrl.u32 %v12873_v4, 16 }
 0x609   : > { %v9000_v54 = vadd.f32 %v8884_v50, %v8338_v56  ;;  %v9538_v50 = vor.u32 %v9536_v58, %v9534_v43  ;;  %v8030_v43 = vshrl.u32 %v16105_v37, 16 }
 0x60a   : > { %16802 = vst [vmem:[#allocation8_spill] sm:$0xff] %v16120_v48  ;;  %v8682_v3 = vrot.slane %v8680_v2, 3 }
 0x60b   : > { %8264 = vmatmul.bf16.gmra.mxu2 %v8029_v0  ;;  %9216 = vmatmul.bf16.gmra.mxu0 %v13517_v20  ;;  %v16125_v9 = vadd.f32 %v9174_v25, %v9000_v54  ;;  %v8683_v0 = vshll.u32 %v12873_v4, 16  ;;  %v9543_v20 = vsel %vm1325_vm1, %v9538_v50, %v9542_v10  ;;  %v8036_v4 = vrot.slane %v8034_v8, 1 }
 0x60c   : > { %8926 = vmatmul.bf16.gmra.mxu3 %v8678_v57 }
 0x60d   : > { %v8685_v57 = vrot.slane %v8683_v0, 4  ;;  %v13519_v0 = vld [vmem:[#allocation2 + $0x74] sm:$0xff]  }
 0x60e   : > { %v8225_v14 = vpop.f32.mrf.mxu2 }
 0x60f   : > { %v8339_v39 = vadd.f32 %v8225_v14, %v16803_v38  ;;  %v8887_v41 = vpop.f32.mrf.mxu3  ;;  %v7666_v56 = vpop.f32.mrf.mxu1  ;;  %v16138_v14 = vld [vmem:[#allocation2 + $0x34] sm:$0xff] }
 0x610   : > { %v16132_v29 = vadd.f32 %v7666_v56, %v15983_v34  ;;  %v9179_v25 = vpop.f32.mrf.mxu0 }
 0x611   : > { %v9001_v54 = vadd.f32 %v8887_v41, %v8339_v39  ;;  %v8686_v39 = vor.u32 %v8685_v57, %v8682_v3  ;;  %v9544_v3 = vshrl.u32 %v16115_v49, 16 }
 0x612   : > { %9805 = vmatmul.bf16.gmra.mxu1 %v9543_v20  ;;  %v8032_v20 = vor.u32 %v8030_v43, %v8028_v45  ;;  %v16805_v45 = vld [vmem:[#allocation17_spill] sm:$0xff] }
 0x613   : > { %v16136_v48 = vadd.f32 %v9177_v32, %v9001_v54  ;;  %v9548_v32 = vshll.u32 %v16138_v14, 16  ;;  %v8687_v37 = vsel %vm710_vm0, %v8677_v52, %v8686_v39 }
 0x614   : > { %v8037_v54 = vsel %vm1325_vm1, %v8032_v20, %v8036_v4 }
 0x616   : > { %v8227_v38 = vpop.f32.mrf.mxu2 }
 0x617   : > { %v8340_v34 = vadd.f32 %v8227_v38, %v15827_v11  ;;  %v8889_v58 = vpop.f32.mrf.mxu3  ;;  %v7668_v56 = vpop.f32.mrf.mxu1  ;;  %v12874_v11 = vld [vmem:[#allocation2 + $0x80] sm:$0xff]   ;;  %v16151_v38 = vld [vmem:[#allocation2 + $0x78] sm:$0xff] }
 0x618   : > { %v16143_v41 = vadd.f32 %v7668_v56, %v15991_v1  ;;  %v9182_v50 = vpop.f32.mrf.mxu0  ;;  %v9550_v1 = vrot.slane %v9548_v32, 1  ;;  %v9546_v56 = vor.u32 %v9544_v3, %v9542_v10  ;;  %v8689_v20 = vshrl.u32 %v12874_v11, 16 }
 0x619   : > { %v9002_v2 = vadd.f32 %v8889_v58, %v8340_v34  ;;  %v8042_v49 = vshll.u32 %v16151_v38, 16  ;;  %v8038_v10 = vshrl.u32 %v16128_v47, 16 }
 0x61a   : > { %16804 = vst [vmem:[#allocation7_spill] sm:$0xff] %v16143_v41  ;;  %v8691_v32 = vrot.slane %v8689_v20, 3 }
 0x61b   : > { %8269 = vmatmul.bf16.gmra.mxu2 %v8037_v54  ;;  %9221 = vmatmul.bf16.gmra.mxu0 %v13519_v0  ;;  %v16148_v8 = vadd.f32 %v9179_v25, %v9002_v2  ;;  %v8692_v54 = vshll.u32 %v12874_v11, 16  ;;  %v9551_v0 = vsel %vm1325_vm1, %v9546_v56, %v9550_v1  ;;  %v8044_v11 = vrot.slane %v8042_v49, 1 }
 0x61c   : > { %8931 = vmatmul.bf16.gmra.mxu3 %v8687_v37 }
 0x61d   : > { %v8694_v37 = vrot.slane %v8692_v54, 4  ;;  %v13521_v54 = vld [vmem:[#allocation2 + $0x7c] sm:$0xff]  }
 0x61e   : > { %v8230_v57 = vpop.f32.mrf.mxu2 }
 0x61f   : > { %v8341_v43 = vadd.f32 %v8230_v57, %v16805_v45  ;;  %v8892_v34 = vpop.f32.mrf.mxu3  ;;  %v7671_v58 = vpop.f32.mrf.mxu1  ;;  %v16161_v57 = vld [vmem:[#allocation2 + $0x3c] sm:$0xff] }
 0x620   : > { %v16155_v52 = vadd.f32 %v7671_v58, %v15998_v53  ;;  %v9184_v25 = vpop.f32.mrf.mxu0 }
 0x621   : > { %v9003_v2 = vadd.f32 %v8892_v34, %v8341_v43  ;;  %v8695_v43 = vor.u32 %v8694_v37, %v8691_v32  ;;  %v9552_v32 = vshrl.u32 %v16138_v14, 16 }
 0x622   : > { %9810 = vmatmul.bf16.gmra.mxu1 %v9551_v0  ;;  %v8040_v0 = vor.u32 %v8038_v10, %v8036_v4 }
 0x623   : > { %v16159_v41 = vadd.f32 %v9182_v50, %v9003_v2  ;;  %v9556_v50 = vshll.u32 %v16161_v57, 16  ;;  %v8696_v47 = vsel %vm710_vm0, %v8686_v39, %v8695_v43 }
 0x624   : > { %v8045_v2 = vsel %vm1325_vm1, %v8040_v0, %v8044_v11 }
 0x626   : > { %v8232_v45 = vpop.f32.mrf.mxu2 }
 0x627   : > { %v8342_v53 = vadd.f32 %v8232_v45, %v15855_v18  ;;  %v8894_v3 = vpop.f32.mrf.mxu3  ;;  %v7673_v58 = vpop.f32.mrf.mxu1  ;;  %v12875_v18 = vld [vmem:[#allocation2 + $0x88] sm:$0xff]   ;;  %v16174_v45 = vld [vmem:[#allocation2 + $0x80] sm:$0xff] }
 0x628   : > { %v16166_v34 = vadd.f32 %v7673_v58, %v16006_v15  ;;  %v9187_v56 = vpop.f32.mrf.mxu0  ;;  %v9558_v15 = vrot.slane %v9556_v50, 1  ;;  %v8698_v58 = vshrl.u32 %v12875_v18, 16  ;;  %v8701_v0 = vshll.u32 %v12875_v18, 16 }
 0x629   : > { %v9004_v20 = vadd.f32 %v8894_v3, %v8342_v53  ;;  %v9554_v3 = vor.u32 %v9552_v32, %v9550_v1  ;;  %v8050_v14 = vshll.u32 %v16174_v45, 16  ;;  %v8046_v1 = vshrl.u32 %v16151_v38, 16 }
 0x62a   : > { %v8700_v50 = vrot.slane %v8698_v58, 3 }
 0x62b   : > { %8274 = vmatmul.bf16.gmra.mxu2 %v8045_v2  ;;  %9226 = vmatmul.bf16.gmra.mxu0 %v13521_v54  ;;  %v16171_v49 = vadd.f32 %v9184_v25, %v9004_v20  ;;  %v9559_v54 = vsel %vm1325_vm1, %v9554_v3, %v9558_v15  ;;  %v8703_v2 = vrot.slane %v8701_v0, 4  ;;  %v8052_v18 = vrot.slane %v8050_v14, 1  ;;  %v13523_v0 = vld [vmem:[#allocation2 + $0x84] sm:$0xff]  }
 0x62c   : > { %8936 = vmatmul.bf16.gmra.mxu3 %v8696_v47 }
 0x62e   : > { %v8235_v37 = vpop.f32.mrf.mxu2 }
 0x62f   : > { %v8343_v4 = vadd.f32 %v8235_v37, %v15868_v59  ;;  %v8897_v10 = vpop.f32.mrf.mxu3  ;;  %v7676_v53 = vpop.f32.mrf.mxu1  ;;  %v16184_v59 = vld [vmem:[#allocation2 + $0x44] sm:$0xff] }
 0x630   : > { %v16178_v39 = vadd.f32 %v7676_v53, %v16013_v55  ;;  %v9189_v25 = vpop.f32.mrf.mxu0 }
 0x631   : > { %v9005_v20 = vadd.f32 %v8897_v10, %v8343_v4  ;;  %v8704_v4 = vor.u32 %v8703_v2, %v8700_v50  ;;  %v9560_v50 = vshrl.u32 %v16161_v57, 16 }
 0x632   : > { %9815 = vmatmul.bf16.gmra.mxu1 %v9559_v54  ;;  %v8048_v54 = vor.u32 %v8046_v1, %v8044_v11  ;;  %v16807_v11 = vld [vmem:[#allocation19_spill] sm:$0xff] }
 0x633   : > { %v16182_v47 = vadd.f32 %v9187_v56, %v9005_v20  ;;  %v9564_v56 = vshll.u32 %v16184_v59, 16  ;;  %v8705_v38 = vsel %vm710_vm0, %v8695_v43, %v8704_v4 }
 0x634   : > { %v8053_v20 = vsel %vm1325_vm1, %v8048_v54, %v8052_v18 }
 0x636   : > { %v8237_v37 = vpop.f32.mrf.mxu2 }
 0x637   : > { %v8344_v55 = vadd.f32 %v8237_v37, %v15900_v19  ;;  %v8899_v32 = vpop.f32.mrf.mxu3  ;;  %v7678_v53 = vpop.f32.mrf.mxu1  ;;  %v12876_v19 = vld [vmem:[#allocation2 + $0x90] sm:$0xff]   ;;  %v16197_v37 = vld [vmem:[#allocation2 + $0x88] sm:$0xff] }
 0x638   : > { %v16189_v10 = vadd.f32 %v7678_v53, %v16021_v35  ;;  %v9192_v3 = vpop.f32.mrf.mxu0  ;;  %v9566_v35 = vrot.slane %v9564_v56, 1  ;;  %v9562_v53 = vor.u32 %v9560_v50, %v9558_v15  ;;  %v8707_v54 = vshrl.u32 %v12876_v19, 16  ;;  %v16809_v50 = vld [vmem:[#allocation4_spill] sm:$0xff] }
 0x639   : > { %v9006_v58 = vadd.f32 %v8899_v32, %v8344_v55  ;;  %v8058_v57 = vshll.u32 %v16197_v37, 16  ;;  %v8054_v15 = vshrl.u32 %v16174_v45, 16 }
 0x63a   : > { %16806 = vst [vmem:[#allocation22_spill] sm:$0xff] %v16189_v10  ;;  %v8709_v56 = vrot.slane %v8707_v54, 3 }
 0x63b   : > { %8279 = vmatmul.bf16.gmra.mxu2 %v8053_v20  ;;  %9231 = vmatmul.bf16.gmra.mxu0 %v13523_v0  ;;  %v16194_v14 = vadd.f32 %v9189_v25, %v9006_v58  ;;  %v8710_v20 = vshll.u32 %v12876_v19, 16  ;;  %v9567_v0 = vsel %vm1325_vm1, %v9562_v53, %v9566_v35  ;;  %v8060_v19 = vrot.slane %v8058_v57, 1 }
 0x63c   : > { %8941 = vmatmul.bf16.gmra.mxu3 %v8705_v38 }
 0x63d   : > { %v8712_v38 = vrot.slane %v8710_v20, 4  ;;  %v13525_v20 = vld [vmem:[#allocation2 + $0x8c] sm:$0xff]  }
 0x63e   : > { %v8240_v2 = vpop.f32.mrf.mxu2 }
 0x63f   : > { %v8345_v1 = vadd.f32 %v8240_v2, %v16807_v11  ;;  %v8902_v55 = vpop.f32.mrf.mxu3  ;;  %v7681_v32 = vpop.f32.mrf.mxu1  ;;  %v16207_v2 = vld [vmem:[#allocation2 + $0x4c] sm:$0xff] }
 0x640   : > { %v16201_v43 = vadd.f32 %v7681_v32, %v16031_v60  ;;  %v9194_v25 = vpop.f32.mrf.mxu0 }
 0x641   : > { %v9007_v58 = vadd.f32 %v8902_v55, %v8345_v1  ;;  %v8713_v1 = vor.u32 %v8712_v38, %v8709_v56  ;;  %v9568_v56 = vshrl.u32 %v16184_v59, 16  ;;  %v16220_v38 = vld [vmem:[#allocation2 + $0x90] sm:$0xff] }
 0x642   : > { %16808 = vst [vmem:[#allocation10_spill] sm:$0xff] %v16201_v43  ;;  %9820 = vmatmul.bf16.gmra.mxu1 %v9567_v0  ;;  %v8056_v0 = vor.u32 %v8054_v15, %v8052_v18  ;;  %v16811_v18 = vld [vmem:[#allocation3_spill] sm:$0xff]  ;;  %v8066_v59 = vshll.u32 %v16220_v38, 16 }
 0x643   : > { %v16205_v10 = vadd.f32 %v9192_v3, %v9007_v58  ;;  %v9572_v3 = vshll.u32 %v16207_v2, 16  ;;  %v8714_v45 = vsel %vm710_vm0, %v8704_v4, %v8713_v1 }
 0x644   : > { %v8061_v58 = vsel %vm1325_vm1, %v8056_v0, %v8060_v19 }
 0x646   : > { %v8242_v11 = vpop.f32.mrf.mxu2 }
 0x647   : > { %v8346_v60 = vadd.f32 %v8242_v11, %v16809_v50  ;;  %v8904_v32 = vpop.f32.mrf.mxu3  ;;  %v7683_v43 = vpop.f32.mrf.mxu1  ;;  %v12877_v11 = vld [vmem:[#allocation2 + $0x98] sm:$0xff]  }
 0x648   : > { %v16212_v55 = vadd.f32 %v7683_v43, %v16039_v13  ;;  %v9197_v53 = vpop.f32.mrf.mxu0  ;;  %v9574_v13 = vrot.slane %v9572_v3, 1  ;;  %v8716_v0 = vshrl.u32 %v12877_v11, 16 }
 0x649   : > { %v9008_v54 = vadd.f32 %v8904_v32, %v8346_v60  ;;  %v9570_v32 = vor.u32 %v9568_v56, %v9566_v35  ;;  %v8062_v35 = vshrl.u32 %v16197_v37, 16 }
 0x64a   : > { %16810 = vst [vmem:[#allocation9_spill] sm:$0xff] %v16212_v55  ;;  %v8718_v3 = vrot.slane %v8716_v0, 3 }
 0x64b   : > { %8284 = vmatmul.bf16.gmra.mxu2 %v8061_v58  ;;  %9236 = vmatmul.bf16.gmra.mxu0 %v13525_v20  ;;  %v16217_v57 = vadd.f32 %v9194_v25, %v9008_v54  ;;  %v8719_v58 = vshll.u32 %v12877_v11, 16  ;;  %v9575_v20 = vsel %vm1325_vm1, %v9570_v32, %v9574_v13  ;;  %v8068_v11 = vrot.slane %v8066_v59, 1 }
 0x64c   : > { %8946 = vmatmul.bf16.gmra.mxu3 %v8714_v45 }
 0x64d   : > { %v8721_v45 = vrot.slane %v8719_v58, 4  ;;  %v13527_v58 = vld [vmem:[#allocation2 + $0x94] sm:$0xff]  }
 0x64e   : > { %v8245_v43 = vpop.f32.mrf.mxu2 }
 0x64f   : > { %v8347_v15 = vadd.f32 %v8245_v43, %v16811_v18  ;;  %v8907_v50 = vpop.f32.mrf.mxu3  ;;  %v7686_v60 = vpop.f32.mrf.mxu1  ;;  %v16230_v43 = vld [vmem:[#allocation2 + $0x54] sm:$0xff] }
 0x650   : > { %v16224_v4 = vadd.f32 %v7686_v60, %v16046_v61  ;;  %v9199_v25 = vpop.f32.mrf.mxu0 }
 0x651   : > { %v9009_v54 = vadd.f32 %v8907_v50, %v8347_v15  ;;  %v8722_v15 = vor.u32 %v8721_v45, %v8718_v3  ;;  %v9576_v3 = vshrl.u32 %v16207_v2, 16 }
 0x652   : > { %9825 = vmatmul.bf16.gmra.mxu1 %v9575_v20  ;;  %v8064_v20 = vor.u32 %v8062_v35, %v8060_v19 }
 0x653   : > { %v16228_v55 = vadd.f32 %v9197_v53, %v9009_v54  ;;  %v9580_v53 = vshll.u32 %v16230_v43, 16  ;;  %v8723_v37 = vsel %vm710_vm0, %v8713_v1, %v8722_v15 }
 0x654   : > { %v8069_v54 = vsel %vm1325_vm1, %v8064_v20, %v8068_v11 }
 0x656   : > { %v8247_v18 = vpop.f32.mrf.mxu2 }
 0x657   : > { %v8348_v61 = vadd.f32 %v8247_v18, %v15953_v21  ;;  %v8909_v56 = vpop.f32.mrf.mxu3  ;;  %v7688_v60 = vpop.f32.mrf.mxu1  ;;  %v12878_v21 = vld [vmem:[#allocation2 + $0xa0] sm:$0xff]   ;;  %v16243_v18 = vld [vmem:[#allocation2 + $0x98] sm:$0xff] }
 0x658   : > { %v16235_v50 = vadd.f32 %v7688_v60, %v16054_v46  ;;  %v9202_v32 = vpop.f32.mrf.mxu0  ;;  %v9582_v46 = vrot.slane %v9580_v53, 1  ;;  %v8725_v60 = vshrl.u32 %v12878_v21, 16  ;;  %v8728_v20 = vshll.u32 %v12878_v21, 16 }
 0x659   : > { %v9010_v0 = vadd.f32 %v8909_v56, %v8348_v61  ;;  %v9578_v56 = vor.u32 %v9576_v3, %v9574_v13  ;;  %v8074_v2 = vshll.u32 %v16243_v18, 16  ;;  %v8070_v13 = vshrl.u32 %v16220_v38, 16 }
 0x65a   : > { %v8727_v53 = vrot.slane %v8725_v60, 3 }
 0x65b   : > { %8289 = vmatmul.bf16.gmra.mxu2 %v8069_v54  ;;  %9241 = vmatmul.bf16.gmra.mxu0 %v13527_v58  ;;  %v16240_v59 = vadd.f32 %v9199_v25, %v9010_v0  ;;  %v9583_v58 = vsel %vm1325_vm1, %v9578_v56, %v9582_v46  ;;  %v8730_v54 = vrot.slane %v8728_v20, 4  ;;  %v8076_v21 = vrot.slane %v8074_v2, 1  ;;  %v13529_v20 = vld [vmem:[#allocation2 + $0x9c] sm:$0xff]  }
 0x65c   : > { %8951 = vmatmul.bf16.gmra.mxu3 %v8723_v37 }
 0x65e   : > { %v8250_v45 = vpop.f32.mrf.mxu2 }
 0x65f   : > { %v8349_v19 = vadd.f32 %v8250_v45, %v15961_v24  ;;  %v8912_v35 = vpop.f32.mrf.mxu3  ;;  %v7691_v61 = vpop.f32.mrf.mxu1  ;;  %v16253_v24 = vld [vmem:[#allocation2 + $0x5c] sm:$0xff] }
 0x660   : > { %v16247_v1 = vadd.f32 %v7691_v61, %v16060_v40  ;;  %v9204_v25 = vpop.f32.mrf.mxu0 }
 0x661   : > { %v9011_v0 = vadd.f32 %v8912_v35, %v8349_v19  ;;  %v8731_v19 = vor.u32 %v8730_v54, %v8727_v53  ;;  %v9584_v53 = vshrl.u32 %v16230_v43, 16 }
 0x662   : > { %9830 = vmatmul.bf16.gmra.mxu1 %v9583_v58  ;;  %v8072_v58 = vor.u32 %v8070_v13, %v8068_v11 }
 0x663   : > { %v16251_v37 = vadd.f32 %v9202_v32, %v9011_v0  ;;  %v9588_v32 = vshll.u32 %v16253_v24, 16  ;;  %v8732_v38 = vsel %vm710_vm0, %v8722_v15, %v8731_v19 }
 0x664   : > { %v8077_v0 = vsel %vm1325_vm1, %v8072_v58, %v8076_v21 }
 0x666   : > { %v8252_v45 = vpop.f32.mrf.mxu2 }
 0x667   : > { %v8350_v40 = vadd.f32 %v8252_v45, %v15969_v31  ;;  %v8914_v3 = vpop.f32.mrf.mxu3  ;;  %v7693_v61 = vpop.f32.mrf.mxu1  ;;  %v12879_v31 = vld [vmem:[#allocation2 + $0xa8] sm:$0xff]   ;;  %v16266_v45 = vld [vmem:[#allocation2 + $0xa0] sm:$0xff] }
 0x668   : > { %v16258_v35 = vadd.f32 %v7693_v61, %v16068_v30  ;;  %v9207_v56 = vpop.f32.mrf.mxu0  ;;  %v9590_v30 = vrot.slane %v9588_v32, 1  ;;  %v8734_v61 = vshrl.u32 %v12879_v31, 16  ;;  %v8737_v58 = vshll.u32 %v12879_v31, 16 }
 0x669   : > { %v9012_v60 = vadd.f32 %v8914_v3, %v8350_v40  ;;  %v9586_v3 = vor.u32 %v9584_v53, %v9582_v46  ;;  %v8082_v43 = vshll.u32 %v16266_v45, 16  ;;  %v8078_v46 = vshrl.u32 %v16243_v18, 16 }
 0x66a   : > { %v8736_v32 = vrot.slane %v8734_v61, 3 }
 0x66b   : > { %8294 = vmatmul.bf16.gmra.mxu2 %v8077_v0  ;;  %9246 = vmatmul.bf16.gmra.mxu0 %v13529_v20  ;;  %v16263_v2 = vadd.f32 %v9204_v25, %v9012_v60  ;;  %v9591_v20 = vsel %vm1325_vm1, %v9586_v3, %v9590_v30  ;;  %v8739_v0 = vrot.slane %v8737_v58, 4  ;;  %v8084_v31 = vrot.slane %v8082_v43, 1  ;;  %v13531_v58 = vld [vmem:[#allocation2 + $0xa4] sm:$0xff]  }
 0x66c   : > { %8956 = vmatmul.bf16.gmra.mxu3 %v8732_v38 }
 0x66e   : > { %v8255_v54 = vpop.f32.mrf.mxu2 }
 0x66f   : > { %v8351_v11 = vadd.f32 %v8255_v54, %v15977_v23  ;;  %v8917_v13 = vpop.f32.mrf.mxu3  ;;  %v7696_v40 = vpop.f32.mrf.mxu1  ;;  %v16276_v23 = vld [vmem:[#allocation2 + $0x64] sm:$0xff] }
 0x670   : > { %v16270_v15 = vadd.f32 %v7696_v40, %v16074_v5  ;;  %v9209_v25 = vpop.f32.mrf.mxu0 }
 0x671   : > { %v9013_v60 = vadd.f32 %v8917_v13, %v8351_v11  ;;  %v8740_v11 = vor.u32 %v8739_v0, %v8736_v32 }
 0x672   : > { %16812 = vst [vmem:[#allocation11_spill] sm:$0xff] %v16270_v15  ;;  %9835 = vmatmul.bf16.gmra.mxu1 %v9591_v20  ;;  %v8080_v20 = vor.u32 %v8078_v46, %v8076_v21  ;;  %v16292_v21 = vld [vmem:[%s16672_s5] ss:$0 sm:$0xff] }
 0x673   : > { %v16274_v38 = vadd.f32 %v9207_v56, %v9013_v60  ;;  %v9596_v56 = vshll.u32 %v16276_v23, 16  ;;  %v8741_v18 = vsel %vm710_vm0, %v8731_v19, %v8740_v11 }
 0x674   : > { %v8085_v60 = vsel %vm1325_vm1, %v8080_v20, %v8084_v31 }
 0x675   : > { %v9598_v32 = vrot.slane %v9596_v56, 1 }
 0x676   : > { %v8257_v54 = vpop.f32.mrf.mxu2 }
 0x677   : > { %v8352_v5 = vadd.f32 %v8257_v54, %v15987_v6  ;;  %v8919_v53 = vpop.f32.mrf.mxu3  ;;  %v7698_v40 = vpop.f32.mrf.mxu1  ;;  %v12880_v6 = vld [vmem:[#allocation2 + $0xb0] sm:$0xff]   ;;  %v16294_v54 = vld [vmem:[#allocation2 + $0xa8] sm:$0xff] }
 0x678   : > { %v16281_v13 = vadd.f32 %v7698_v40, %v16082_v26  ;;  %v9212_v3 = vpop.f32.mrf.mxu0  ;;  %v9592_v26 = vshrl.u32 %v16253_v24, 16  ;;  %v8746_v40 = vshll.u32 %v12880_v6, 16  ;;  %v16301_v24 = vld [vmem:[%s16673_s6] ss:$0 sm:$0xff] }
 0x679   : > { %v9014_v61 = vadd.f32 %v8919_v53, %v8352_v5  ;;  %v8743_v53 = vshrl.u32 %v12880_v6, 16 }
 0x67a   : > { %16813 = vst [vmem:[#allocation13_spill] sm:$0xff] %v16281_v13 }
 0x67b   : > { %8299 = vmatmul.bf16.gmra.mxu2 %v8085_v60  ;;  %9251 = vmatmul.bf16.gmra.mxu0 %v13531_v58  ;;  %v16286_v43 = vadd.f32 %v9209_v25, %v9014_v61  ;;  %v9594_v25 = vor.u32 %v9592_v26, %v9590_v30  ;;  %v8745_v30 = vrot.slane %v8743_v53, 3  ;;  %v16315_v26 = vld [vmem:[#allocation2 + $0x6c] sm:$0xff] }
 0x67c   : > { %8961 = vmatmul.bf16.gmra.mxu3 %v8741_v18  ;;  %v8748_v18 = vrot.slane %v8746_v40, 4  ;;  %v9604_v13 = vshll.u32 %v16315_v26, 16 }
 0x67d   : > { %v9599_v58 = vsel %vm1325_vm1, %v9594_v25, %v9598_v32 }
 0x67e   : > { %v8260_v0 = vpop.f32.mrf.mxu2  ;;  %v8749_v40 = vor.u32 %v8748_v18, %v8745_v30  ;;  %v9606_v18 = vrot.slane %v9604_v13, 1 }
 0x67f   : > { %v8353_v46 = vadd.f32 %v8260_v0, %v15995_v17  ;;  %v8922_v19 = vpop.f32.mrf.mxu3  ;;  %v9801_v5 = vpop.f32.mrf.mxu1  ;;  %v8090_v17 = vshll.u32 %v16294_v54, 16 }
 0x680   : > { %v9921_v20 = vadd.f32 %v9801_v5, %v16092_v16  ;;  %v9214_v60 = vpop.f32.mrf.mxu0 }
 0x681   : > { %v9015_v61 = vadd.f32 %v8922_v19, %v8353_v46  ;;  %v8086_v19 = vshrl.u32 %v16266_v45, 16  ;;  %v8092_v5 = vrot.slane %v8090_v17, 1  ;;  %v8750_v45 = vsel %vm710_vm0, %v8740_v11, %v8749_v40 }
 0x682   : > { %v9973_v56 = vmul.f32 %v16292_v21, %v9921_v20  ;;  %9840 = vmatmul.bf16.gmra.mxu1 %v9599_v58 }
 0x683   : > { %v16307_v6 = vadd.f32 %v9212_v3, %v9015_v61  ;;  %v8088_v61 = vor.u32 %v8086_v19, %v8084_v31  ;;  %v9600_v31 = vshrl.u32 %v16276_v23, 16  ;;  %v16329_v19 = vld [vmem:[#allocation2 + $0xb0] sm:$0xff] }
 0x684   : > { %v10025_v16 = vadd.f32 %v16301_v24, %v9973_v56  ;;  %v13533_v56 = vld [vmem:[#allocation2 + $0xac] sm:$0xff]   ;;  %v8098_v13 = vshll.u32 %v16329_v19, 16 }
 0x686   : > { %v10073_v0 = vmax.f32 %v10025_v16, 0.0  ;;  %v8262_v46 = vpop.f32.mrf.mxu2  ;;  %v8093_v16 = vsel %vm1325_vm1, %v8088_v61, %v8092_v5 }
 0x687   : > { %v8354_v25 = vadd.f32 %v8262_v46, %v16002_v22  ;;  %v8924_v53 = vpop.f32.mrf.mxu3  ;;  %v9803_v3 = vpop.f32.mrf.mxu1 }
 0x688   : > { %10121 = vst [vmem:[%s16313_s9 - $0x1] sm:$0xfe] %v10073_v0  ;;  %v9922_v20 = vadd.f32 %v9803_v3, %v16103_v33  ;;  %v9217_v30 = vpop.f32.mrf.mxu0  ;;  %v12881_v33 = vld [vmem:[#allocation2 + $0xb8] sm:$0xff]   ;;  %v9602_v3 = vor.u32 %v9600_v31, %v9598_v32  ;;  %v8094_v31 = vshrl.u32 %v16294_v54, 16 }
 0x689   : > { %v9016_v58 = vadd.f32 %v8924_v53, %v8354_v25 }
 0x68a   : > { %v9974_v15 = vmul.f32 %v16292_v21, %v9922_v20  ;;  %v8755_v20 = vshll.u32 %v12881_v33, 16 }
 0x68b   : > { %8304 = vmatmul.bf16.gmra.mxu2 %v8093_v16  ;;  %9256 = vmatmul.bf16.gmra.mxu0 %v13533_v56  ;;  %v16325_v22 = vadd.f32 %v9214_v60, %v9016_v58  ;;  %v8752_v60 = vshrl.u32 %v12881_v33, 16  ;;  %v9607_v58 = vsel %vm1325_vm1, %v9602_v3, %v9606_v18 }
 0x68c   : > { %v10026_v17 = vadd.f32 %v16301_v24, %v9974_v15  ;;  %8966 = vmatmul.bf16.gmra.mxu3 %v8750_v45  ;;  %v8757_v16 = vrot.slane %v8755_v20, 4  ;;  %v16340_v45 = vld [vmem:[#allocation2 + $0x74] sm:$0xff] }
 0x68d   : > { %v8754_v56 = vrot.slane %v8752_v60, 3  ;;  %v13535_v20 = vld [vmem:[#allocation2 + $0xb4] sm:$0xff]  }
 0x68e   : > { %v10074_v0 = vmax.f32 %v10026_v17, 0.0  ;;  %v8265_v46 = vpop.f32.mrf.mxu2 }
 0x68f   : > { %v8355_v25 = vadd.f32 %v8265_v46, %v16010_v51  ;;  %v8927_v53 = vpop.f32.mrf.mxu3  ;;  %v9806_v11 = vpop.f32.mrf.mxu1 }
 0x690   : > { %10122 = vst [vmem:[%s16313_s9 + $0x7] sm:$0xff] %v10074_v0  ;;  %v9923_v15 = vadd.f32 %v9806_v11, %v16113_v7  ;;  %v9219_v33 = vpop.f32.mrf.mxu0  ;;  %v8100_v0 = vrot.slane %v8098_v13, 1  ;;  %v8758_v11 = vor.u32 %v8757_v16, %v8754_v56 }
 0x691   : > { %v9017_v61 = vadd.f32 %v8927_v53, %v8355_v25 }
 0x692   : > { %v9975_v23 = vmul.f32 %v16292_v21, %v9923_v15  ;;  %9845 = vmatmul.bf16.gmra.mxu1 %v9607_v58  ;;  %v9612_v15 = vshll.u32 %v16340_v45, 16  ;;  %v8759_v54 = vsel %vm710_vm0, %v8749_v40, %v8758_v11 }
 0x693   : > { %v16337_v51 = vadd.f32 %v9217_v30, %v9017_v61  ;;  %v8096_v30 = vor.u32 %v8094_v31, %v8092_v5  ;;  %v9608_v5 = vshrl.u32 %v16315_v26, 16 }
 0x694   : > { %v10027_v32 = vadd.f32 %v16301_v24, %v9975_v23  ;;  %v9614_v13 = vrot.slane %v9612_v15, 1 }
 0x695   : > { %v8101_v58 = vsel %vm1325_vm1, %v8096_v30, %v8100_v0  ;;  %v9610_v40 = vor.u32 %v9608_v5, %v9606_v18 }
 0x696   : > { %v10075_v17 = vmax.f32 %v10027_v32, 0.0  ;;  %v8267_v7 = vpop.f32.mrf.mxu2  ;;  %v16354_v32 = vld [vmem:[#allocation2 + $0xb8] sm:$0xff] }
 0x697   : > { %v8356_v46 = vadd.f32 %v8267_v7, %v16017_v44  ;;  %v8929_v25 = vpop.f32.mrf.mxu3  ;;  %v9808_v53 = vpop.f32.mrf.mxu1  ;;  %v9615_v30 = vsel %vm1325_vm1, %v9610_v40, %v9614_v13  ;;  %v13537_v40 = vld [vmem:[#allocation2 + $0xbc] sm:$0xff]  }
 0x698   : > { %10123 = vst [vmem:[%s16313_s9 + $0xf] sm:$0x1] %v10075_v17  ;;  %v9924_v3 = vadd.f32 %v9808_v53, %v16125_v9  ;;  %v12882_v9 = vld [vmem:[#allocation2 + $0xc0] sm:$0xff]  }
 0x699   : > { %v9018_v60 = vadd.f32 %v8929_v25, %v8356_v46  ;;  %v8761_v46 = vshrl.u32 %v12882_v9, 16  ;;  %v8764_v25 = vshll.u32 %v12882_v9, 16 }
 0x69a   : > { %v9976_v61 = vmul.f32 %v16292_v21, %v9924_v3 }
 0x69b   : > { %8309 = vmatmul.bf16.gmra.mxu2 %v8101_v58  ;;  %9261 = vmatmul.bf16.gmra.mxu0 %v13535_v20  ;;  %v16350_v44 = vadd.f32 %v9219_v33, %v9018_v60  ;;  %v9222_v33 = vpop.f32.mrf.mxu0  ;;  %v8106_v60 = vshll.u32 %v16354_v32, 16  ;;  %v8763_v20 = vrot.slane %v8761_v46, 3 }
 0x69c   : > { %v10028_v23 = vadd.f32 %v16301_v24, %v9976_v61  ;;  %8971 = vmatmul.bf16.gmra.mxu3 %v8759_v54  ;;  %v16365_v61 = vld [vmem:[#allocation2 + $0x7c] sm:$0xff] }
 0x69d   : > { %v9620_v46 = vshll.u32 %v16365_v61, 16 }
 0x69e   : > { %v10076_v56 = vmax.f32 %v10028_v23, 0.0  ;;  %v8270_v16 = vpop.f32.mrf.mxu2  ;;  %v8108_v23 = vrot.slane %v8106_v60, 1  ;;  %v11873_v60 = vld [vmem:[#allocation2 + $0xc0] sm:$0xff] }
 0x69f   : > { %v8357_v17 = vadd.f32 %v8270_v16, %v16025_v36  ;;  %v8932_v7 = vpop.f32.mrf.mxu3  ;;  %v9811_v31 = vpop.f32.mrf.mxu1  ;;  %v8766_v36 = vrot.slane %v8764_v25, 4 }
 0x6a0   : > { %10124 = vst [vmem:[%s16313_s9 + $0xf] sm:$0xfe] %v10076_v56  ;;  %v9925_v53 = vadd.f32 %v9811_v31, %v16136_v48  ;;  %v8102_v48 = vshrl.u32 %v16329_v19, 16 }
 0x6a1   : > { %v9019_v3 = vadd.f32 %v8932_v7, %v8357_v17  ;;  %v8767_v56 = vor.u32 %v8766_v36, %v8763_v20 }
 0x6a2   : > { %v9977_v26 = vmul.f32 %v16292_v21, %v9925_v53  ;;  %9850 = vmatmul.bf16.gmra.mxu1 %v9615_v30  ;;  %v8104_v7 = vor.u32 %v8102_v48, %v8100_v0  ;;  %v9616_v0 = vshrl.u32 %v16340_v45, 16  ;;  %v9622_v30 = vrot.slane %v9620_v46, 1 }
 0x6a3   : > { %v16362_v15 = vadd.f32 %v9222_v33, %v9019_v3  ;;  %v9224_v25 = vpop.f32.mrf.mxu0 }
 0x6a4   : > { %v10029_v18 = vadd.f32 %v16301_v24, %v9977_v26  ;;  %v8109_v53 = vsel %vm1325_vm1, %v8104_v7, %v8108_v23  ;;  %v9618_v36 = vor.u32 %v9616_v0, %v9614_v13  ;;  %v8110_v13 = vshrl.u32 %v16354_v32, 16  ;;  %v16394_v0 = vld [vmem:[#allocation2 + $0xd0] sm:$0xff]  }
 0x6a6   : > { %v10077_v58 = vmax.f32 %v10029_v18, 0.0  ;;  %v8272_v54 = vpop.f32.mrf.mxu2 }
 0x6a7   : > { %v8358_v9 = vadd.f32 %v8272_v54, %v16035_v28  ;;  %v9813_v5 = vpop.f32.mrf.mxu1  ;;  %v8934_v16 = vpop.f32.mrf.mxu3  ;;  %v8768_v28 = vsel %vm710_vm0, %v8758_v11, %v8767_v56  ;;  %v9623_v54 = vsel %vm1325_vm1, %v9618_v36, %v9622_v30 }
 0x6a8   : > { %10125 = vst [vmem:[%s16313_s9 + $0x17] sm:$0xff] %v10077_v58  ;;  %v9926_v17 = vadd.f32 %v9813_v5, %v16148_v8  ;;  %v12883_v8 = vld [vmem:[#allocation2 + $0xc8] sm:$0xff]  }
 0x6a9   : > { %v9020_v31 = vadd.f32 %v8934_v16, %v8358_v9  ;;  %v8770_v18 = vshrl.u32 %v12883_v8, 16  ;;  %v8773_v58 = vshll.u32 %v12883_v8, 16  ;;  %v8114_v9 = vshll.u32 %v11873_v60, 16 }
 0x6aa   : > { %v9978_v33 = vmul.f32 %v16292_v21, %v9926_v17  ;;  %v16384_v17 = vld [vmem:[#allocation2 + $0x84] sm:$0xff] }
 0x6ab   : > { %8314 = vmatmul.bf16.gmra.mxu2 %v8109_v53  ;;  %9266 = vmatmul.bf16.gmra.mxu0 %v13537_v40  ;;  %v16375_v19 = vadd.f32 %v9224_v25, %v9020_v31  ;;  %v8772_v5 = vrot.slane %v8770_v18, 3  ;;  %v8775_v16 = vrot.slane %v8773_v58, 4  ;;  %v8116_v31 = vrot.slane %v8114_v9, 1 }
 0x6ac   : > { %v10030_v3 = vadd.f32 %v16301_v24, %v9978_v33  ;;  %8976 = vmatmul.bf16.gmra.mxu3 %v8768_v28  ;;  %v8112_v25 = vor.u32 %v8110_v13, %v8108_v23  ;;  %v13539_v33 = vld [vmem:[#allocation2 + $0xc4] sm:$0xff]   ;;  %v9628_v53 = vshll.u32 %v16384_v17, 16  ;;  %v8779_v58 = vshrl.u32 %v16394_v0, 16 }
 0x6ad   : > { %v8776_v46 = vor.u32 %v8775_v16, %v8772_v5 }
 0x6ae   : > { %v10078_v26 = vmax.f32 %v10030_v3, 0.0  ;;  %v8117_v3 = vsel %vm1325_vm1, %v8112_v25, %v8116_v31  ;;  %v9630_v23 = vrot.slane %v9628_v53, 1  ;;  %v8781_v5 = vrot.slane %v8779_v58, 3 }
 0x6af   : > { %v9816_v20 = vpop.f32.mrf.mxu1  ;;  %v8777_v8 = vsel %vm710_vm0, %v8767_v56, %v8776_v46 }
 0x6b0   : > { %10126 = vst [vmem:[%s16313_s9 + $0x1f] sm:$0x1] %v10078_v26  ;;  %v9927_v11 = vadd.f32 %v9816_v20, %v16159_v41  ;;  %v11874_v20 = vld [vmem:[#allocation2 + $0xc8] sm:$0xff] }
 0x6b1   : > { %v8122_v9 = vshll.u32 %v11874_v20, 16 }
 0x6b2   : > { %v9979_v48 = vmul.f32 %v16292_v21, %v9927_v11  ;;  %9855 = vmatmul.bf16.gmra.mxu1 %v9623_v54  ;;  %v8782_v11 = vshll.u32 %v16394_v0, 16 }
 0x6b4   : > { %v10031_v45 = vadd.f32 %v16301_v24, %v9979_v48  ;;  %v8784_v16 = vrot.slane %v8782_v11, 4 }
 0x6b6   : > { %v10079_v7 = vmax.f32 %v10031_v45, 0.0 }
 0x6b7   : > { %v9818_v40 = vpop.f32.mrf.mxu1 }
 0x6b8   : > { %10127 = vst [vmem:[%s16313_s9 + $0x1f] sm:$0xfe] %v10079_v7  ;;  %v9928_v41 = vadd.f32 %v9818_v40, %v16171_v49  ;;  %v9624_v49 = vshrl.u32 %v16365_v61, 16  ;;  %v8431_v61 = vld [vmem:[#allocation2 + $0xd8] sm:$0xf]  ;;  %v8118_v40 = vshrl.u32 %v11873_v60, 16 }
 0x6b9   : > { %v8546_v7 = vunpack.c.l.b16 %v8431_v61 }
 0x6ba   : > { %v9980_v28 = vmul.f32 %v16292_v21, %v9928_v41  ;;  %v9626_v18 = vor.u32 %v9624_v49, %v9622_v30  ;;  %v16404_v30 = vld [vmem:[#allocation2 + $0x8c] sm:$0xff]  ;;  %v8124_v41 = vrot.slane %v8122_v9, 1 }
 0x6bb   : > { %8319 = vmatmul.bf16.gmra.mxu2 %v8117_v3  ;;  %9271 = vmatmul.bf16.gmra.mxu0 %v13539_v33  ;;  %v7797_v33 = vld [vmem:[#allocation2 + $0xd0] sm:$0x1] }
 0x6bc   : > { %v10032_v32 = vadd.f32 %v16301_v24, %v9980_v28  ;;  %8981 = vmatmul.bf16.gmra.mxu3 %v8777_v8  ;;  %v9631_v54 = vsel %vm1325_vm1, %v9626_v18, %v9630_v23  ;;  %v8120_v28 = vor.u32 %v8118_v40, %v8116_v31  ;;  %v13540_v3 = vld [vmem:[#allocation2 + $0xcc] sm:$0xff]   ;;  %v9636_v8 = vshll.u32 %v16404_v30, 16 }
 0x6be   : > { %v10080_v26 = vmax.f32 %v10032_v32, 0.0  ;;  %v8571_v32 = vpack.c.b16 %v8546_v7, %v8546_v7  ;;  %v9638_v31 = vrot.slane %v9636_v8, 1 }
 0x6bf   : > { %v9821_v36 = vpop.f32.mrf.mxu1 }
 0x6c0   : > { %10128 = vst [vmem:[%s16313_s9 + $0x27] sm:$0xff] %v10080_v26  ;;  %v9929_v56 = vadd.f32 %v9821_v36, %v16182_v47  ;;  %v8785_v47 = vor.u32 %v8784_v16, %v8781_v5  ;;  %v8125_v26 = vsel %vm1325_vm1, %v8120_v28, %v8124_v41  ;;  %v7912_v36 = vunpack.c.l.b16 %v7797_v33 }
 0x6c1   : > { %v8788_v58 = vshrl.u32 %v8571_v32, 16  ;;  %v8791_v11 = vshll.u32 %v8571_v32, 16 }
 0x6c2   : > { %v9981_v48 = vmul.f32 %v16292_v21, %v9929_v56  ;;  %9860 = vmatmul.bf16.gmra.mxu1 %v9631_v54  ;;  %v8786_v60 = vsel %vm710_vm0, %v8776_v46, %v8785_v47  ;;  %v7937_v54 = vpack.c.b16 %v7912_v36, %v7912_v36 }
 0x6c3   : > { %v8790_v46 = vrot.slane %v8788_v58, 3  ;;  %v8793_v16 = vrot.slane %v8791_v11, 4 }
 0x6c4   : > { %v10033_v45 = vadd.f32 %v16301_v24, %v9981_v48 }
 0x6c5   : > { %v8794_v33 = vor.u32 %v8793_v16, %v8790_v46 }
 0x6c6   : > { %v10081_v13 = vmax.f32 %v10033_v45, 0.0 }
 0x6c7   : > { %v9823_v25 = vpop.f32.mrf.mxu1 }
 0x6c8   : > { %10129 = vst [vmem:[%s16313_s9 + $0x2f] sm:$0x1] %v10081_v13  ;;  %v9930_v53 = vadd.f32 %v9823_v25, %v16194_v14  ;;  %v9632_v14 = vshrl.u32 %v16384_v17, 16  ;;  %v8130_v13 = vshll.u32 %v7937_v54, 16  ;;  %v12610_v17 = vunpack.c.h.b16 %v16394_v0 }
 0x6c9   : > { %v8126_v25 = vshrl.u32 %v11874_v20, 16 }
 0x6ca   : > { %v9982_v49 = vmul.f32 %v16292_v21, %v9930_v53  ;;  %v9634_v9 = vor.u32 %v9632_v14, %v9630_v23  ;;  %v11914_v53 = vld [vmem:[#allocation2 + $0x94] sm:$0xff]  ;;  %v9085_v8 = vpack.c.b16 %v8546_v7, %v12610_v17 }
 0x6cb   : > { %8324 = vmatmul.bf16.gmra.mxu2 %v8125_v26  ;;  %9276 = vmatmul.bf16.gmra.mxu0 %v13540_v3  ;;  %v8128_v28 = vor.u32 %v8126_v25, %v8124_v41  ;;  %v8132_v3 = vrot.slane %v8130_v13, 1  ;;  %v9644_v26 = vshll.u32 %v11914_v53, 16  ;;  %v9640_v41 = vshrl.u32 %v16404_v30, 16  ;;  %v11916_v25 = vld [vmem:[#allocation2 + $0xa4] sm:$0xff] }
 0x6cc   : > { %v10034_v18 = vadd.f32 %v16301_v24, %v9982_v49  ;;  %8986 = vmatmul.bf16.gmra.mxu3 %v8786_v60  ;;  %v9639_v5 = vsel %vm1325_vm1, %v9634_v9, %v9638_v31  ;;  %v8795_v49 = vsel %vm710_vm0, %v8785_v47, %v8794_v33 }
 0x6cd   : > { %v8133_v0 = vsel %vm1325_vm1, %v8128_v28, %v8132_v3  ;;  %v9646_v7 = vrot.slane %v9644_v26, 1  ;;  %v9642_v14 = vor.u32 %v9640_v41, %v9638_v31  ;;  %v9660_v28 = vshll.u32 %v11916_v25, 16  ;;  %v16450_v41 = vpop.f32.mrf.mxu2 }
 0x6ce   : > { %v10082_v56 = vmax.f32 %v10034_v18, 0.0 }
 0x6cf   : > { %v9826_v48 = vpop.f32.mrf.mxu1  ;;  %v9647_v47 = vsel %vm1325_vm1, %v9642_v14, %v9646_v7 }
 0x6d0   : > { %10130 = vst [vmem:[%s16313_s9 + $0x2f] sm:$0xfe] %v10082_v56  ;;  %v9931_v61 = vadd.f32 %v9826_v48, %v16205_v10  ;;  %v11915_v56 = vld [vmem:[#allocation2 + $0x9c] sm:$0xff] }
 0x6d1   : > { %v9652_v9 = vshll.u32 %v11915_v56, 16 }
 0x6d2   : > { %v9983_v45 = vmul.f32 %v16292_v21, %v9931_v61  ;;  %9865 = vmatmul.bf16.gmra.mxu1 %v9639_v5  ;;  %v9648_v61 = vshrl.u32 %v11914_v53, 16 }
 0x6d3   : > { %v9654_v5 = vrot.slane %v9652_v9, 1 }
 0x6d4   : > { %v10035_v40 = vadd.f32 %v16301_v24, %v9983_v45  ;;  %v9650_v45 = vor.u32 %v9648_v61, %v9646_v7  ;;  %v11917_v7 = vld [vmem:[#allocation2 + $0xac] sm:$0xff] }
 0x6d6   : > { %v10083_v23 = vmax.f32 %v10035_v40, 0.0  ;;  %v9655_v17 = vsel %vm1325_vm1, %v9650_v45, %v9654_v5 }
 0x6d7   : > { %v9828_v10 = vpop.f32.mrf.mxu1 }
 0x6d8   : > { %10131 = vst [vmem:[%s16313_s9 + $0x37] sm:$0xff] %v10083_v23  ;;  %v9932_v32 = vadd.f32 %v9828_v10, %v16217_v57 }
 0x6da   : > { %v9984_v36 = vmul.f32 %v16292_v21, %v9932_v32 }
 0x6db   : > { %8329 = vmatmul.bf16.gmra.mxu2 %v8133_v0  ;;  %9281 = vmatmul.bf16.gmra.mxu0 %v9085_v8  ;;  %v9662_v8 = vrot.slane %v9660_v28, 1 }
 0x6dc   : > { %v10036_v20 = vadd.f32 %v16301_v24, %v9984_v36  ;;  %8991 = vmatmul.bf16.gmra.mxu3 %v8795_v49 }
 0x6de   : > { %v10084_v60 = vmax.f32 %v10036_v20, 0.0 }
 0x6df   : > { %v9831_v18 = vpop.f32.mrf.mxu1 }
 0x6e0   : > { %10132 = vst [vmem:[%s16313_s9 + $0x3f] sm:$0x1] %v10084_v60  ;;  %v9933_v57 = vadd.f32 %v9831_v18, %v16228_v55 }
 0x6e2   : > { %v9985_v58 = vmul.f32 %v16292_v21, %v9933_v57  ;;  %9870 = vmatmul.bf16.gmra.mxu1 %v9647_v47  ;;  %v9668_v57 = vshll.u32 %v11917_v7, 16 }
 0x6e4   : > { %v10037_v11 = vadd.f32 %v16301_v24, %v9985_v58 }
 0x6e6   : > { %v10085_v54 = vmax.f32 %v10037_v11, 0.0  ;;  %v9664_v11 = vshrl.u32 %v11916_v25, 16 }
 0x6e7   : > { %v9833_v48 = vpop.f32.mrf.mxu1 }
 0x6e8   : > { %10133 = vst [vmem:[%s16313_s9 + $0x3f] sm:$0xfe] %v10085_v54  ;;  %v9934_v30 = vadd.f32 %v9833_v48, %v16240_v59  ;;  %v16458_v54 = vpop.f32.mrf.mxu0 }
 0x6ea   : > { %v9986_v31 = vmul.f32 %v16292_v21, %v9934_v30  ;;  %v16460_v30 = vpop.f32.mrf.mxu2 }
 0x6ec   : > { %v10038_v55 = vadd.f32 %v16301_v24, %v9986_v31  ;;  %v9666_v31 = vor.u32 %v9664_v11, %v9662_v8 }
 0x6ee   : > { %v10086_v46 = vmax.f32 %v10038_v55, 0.0 }
 0x6ef   : > { %v9836_v16 = vpop.f32.mrf.mxu1 }
 0x6f0   : > { %10134 = vst [vmem:[%s16313_s9 + $0x47] sm:$0xff] %v10086_v46  ;;  %v9935_v13 = vadd.f32 %v9836_v16, %v16251_v37  ;;  %v9656_v37 = vshrl.u32 %v11915_v56, 16  ;;  %v9670_v56 = vrot.slane %v9668_v57, 1  ;;  %v11918_v16 = vld [vmem:[#allocation2 + $0xb4] sm:$0xff] }
 0x6f2   : > { %v9987_v40 = vmul.f32 %v16292_v21, %v9935_v13  ;;  %9875 = vmatmul.bf16.gmra.mxu1 %v9655_v17  ;;  %v9658_v26 = vor.u32 %v9656_v37, %v9654_v5  ;;  %v9671_v55 = vsel %vm1325_vm1, %v9666_v31, %v9670_v56  ;;  %v16469_v17 = vpop.f32.mrf.mxu0 }
 0x6f4   : > { %v10039_v59 = vadd.f32 %v16301_v24, %v9987_v40  ;;  %v9663_v0 = vsel %vm1325_vm1, %v9658_v26, %v9662_v8 }
 0x6f6   : > { %v10087_v33 = vmax.f32 %v10039_v59, 0.0  ;;  %v16473_v59 = vpop.f32.mrf.mxu2 }
 0x6f7   : > { %v9838_v23 = vpop.f32.mrf.mxu1 }
 0x6f8   : > { %10135 = vst [vmem:[%s16313_s9 + $0x4f] sm:$0x1] %v10087_v33  ;;  %v9936_v53 = vadd.f32 %v9838_v23, %v16263_v2  ;;  %v9672_v23 = vshrl.u32 %v11917_v7, 16 }
 0x6fa   : > { %v9988_v3 = vmul.f32 %v16292_v21, %v9936_v53  ;;  %v9674_v37 = vor.u32 %v9672_v23, %v9670_v56 }
 0x6fc   : > { %v10040_v10 = vadd.f32 %v16301_v24, %v9988_v3 }
 0x6fe   : > { %v10088_v32 = vmax.f32 %v10040_v10, 0.0  ;;  %v16485_v26 = vpop.f32.mrf.mxu2 }
 0x6ff   : > { %v9841_v49 = vpop.f32.mrf.mxu1 }
 0x700   : > { %10136 = vst [vmem:[%s16313_s9 + $0x4f] sm:$0xfe] %v10088_v32  ;;  %v9937_v36 = vadd.f32 %v9841_v49, %v16274_v38  ;;  %v16455_v38 = vpop.f32.mrf.mxu3  ;;  %v16482_v32 = vpop.f32.mrf.mxu0 }
 0x702   : > { %v9989_v20 = vmul.f32 %v16292_v21, %v9937_v36  ;;  %9880 = vmatmul.bf16.gmra.mxu1 %v9663_v0  ;;  %v11919_v0 = vld [vmem:[#allocation2 + $0xbc] sm:$0xff] }
 0x704   : > { %v10041_v2 = vadd.f32 %v16301_v24, %v9989_v20 }
 0x706   : > { %v10089_v60 = vmax.f32 %v10041_v2, 0.0 }
 0x707   : > { %v9843_v18 = vpop.f32.mrf.mxu1 }
 0x708   : > { %10137 = vst [vmem:[%s16313_s9 + $0x57] sm:$0xff] %v10089_v60  ;;  %v9938_v14 = vadd.f32 %v9843_v18, %v16286_v43  ;;  %v16467_v46 = vpop.f32.mrf.mxu3 }
 0x70a   : > { %v9990_v47 = vmul.f32 %v16292_v21, %v9938_v14  ;;  %v16493_v14 = vpop.f32.mrf.mxu0 }
 0x70c   : > { %v10042_v58 = vadd.f32 %v16301_v24, %v9990_v47  ;;  %v16496_v47 = vpop.f32.mrf.mxu2 }
 0x70e   : > { %v10090_v48 = vmax.f32 %v10042_v58, 0.0  ;;  %v9680_v58 = vshrl.u32 %v11918_v16, 16 }
 0x70f   : > { %v9846_v9 = vpop.f32.mrf.mxu1 }
 0x710   : > { %10138 = vst [vmem:[%s16313_s9 + $0x5f] sm:$0x1] %v10090_v48  ;;  %v9939_v43 = vadd.f32 %v9846_v9, %v16307_v6  ;;  %v9676_v6 = vshll.u32 %v11918_v16, 16  ;;  %v16477_v3 = vpop.f32.mrf.mxu3  ;;  %v8359_v16 = vadd.f32 %v16450_v41, %v16043_v62  ;;  %v9688_v62 = vshrl.u32 %v11919_v0, 16 }
 0x712   : > { %v9991_v61 = vmul.f32 %v16292_v21, %v9939_v43  ;;  %9885 = vmatmul.bf16.gmra.mxu1 %v9671_v55  ;;  %v9678_v53 = vrot.slane %v9676_v6, 1 }
 0x714   : > { %v10043_v5 = vadd.f32 %v16301_v24, %v9991_v61  ;;  %v9682_v9 = vor.u32 %v9680_v58, %v9678_v53 }
 0x716   : > { %v10091_v45 = vmax.f32 %v10043_v5, 0.0  ;;  %v11920_v5 = vld [vmem:[#allocation2 + $0xc4] sm:$0xff] }
 0x717   : > { %v9848_v13 = vpop.f32.mrf.mxu1 }
 0x718   : > { %10139 = vst [vmem:[%s16313_s9 + $0x5f] sm:$0xfe] %v10091_v45  ;;  %v9940_v40 = vadd.f32 %v9848_v13, %v16325_v22  ;;  %v9679_v22 = vsel %vm1325_vm1, %v9674_v37, %v9678_v53  ;;  %v16490_v60 = vpop.f32.mrf.mxu3  ;;  %v16507_v45 = vpop.f32.mrf.mxu0 }
 0x71a   : > { %v9992_v25 = vmul.f32 %v16292_v21, %v9940_v40  ;;  %v16509_v40 = vpop.f32.mrf.mxu2 }
 0x71c   : > { %v10044_v33 = vadd.f32 %v16301_v24, %v9992_v25  ;;  %v9692_v25 = vshll.u32 %v11920_v5, 16 }
 0x71e   : > { %v10092_v28 = vmax.f32 %v10044_v33, 0.0  ;;  %v9021_v33 = vadd.f32 %v16455_v38, %v8359_v16  ;;  %v9694_v41 = vrot.slane %v9692_v25, 1 }
 0x71f   : > { %v9851_v10 = vpop.f32.mrf.mxu1 }
 0x720   : > { %10140 = vst [vmem:[%s16313_s9 + $0x67] sm:$0xff] %v10092_v28  ;;  %v9941_v8 = vadd.f32 %v9851_v10, %v16337_v51  ;;  %v9684_v51 = vshll.u32 %v11919_v0, 16  ;;  %v16502_v55 = vpop.f32.mrf.mxu3  ;;  %v8360_v10 = vadd.f32 %v16460_v30, %v16050_v12 }
 0x722   : > { %v9993_v49 = vmul.f32 %v16292_v21, %v9941_v8  ;;  %9890 = vmatmul.bf16.gmra.mxu1 %v9679_v22  ;;  %v9686_v11 = vrot.slane %v9684_v51, 1  ;;  %v9311_v8 = vadd.f32 %v16458_v54, %v9021_v33  ;;  %v9022_v0 = vadd.f32 %v16467_v46, %v8360_v10 }
 0x723   : > { %v8361_v54 = vadd.f32 %v16473_v59, %v16058_v42 }
 0x724   : > { %v10045_v36 = vadd.f32 %v16301_v24, %v9993_v49  ;;  %v9687_v31 = vsel %vm1325_vm1, %v9682_v9, %v9686_v11  ;;  %v9690_v49 = vor.u32 %v9688_v62, %v9686_v11  ;;  %v9696_v9 = vshrl.u32 %v11920_v5, 16 }
 0x725   : > { %v9023_v46 = vadd.f32 %v16477_v3, %v8361_v54 }
 0x726   : > { %v10093_v20 = vmax.f32 %v10045_v36, 0.0  ;;  %v16524_v36 = vpop.f32.mrf.mxu2 }
 0x727   : > { %v9853_v2 = vpop.f32.mrf.mxu1 }
 0x728   : > { %10141 = vst [vmem:[%s16313_s9 + $0x6f] sm:$0x1] %v10093_v20  ;;  %v9942_v7 = vadd.f32 %v9853_v2, %v16350_v44  ;;  %v16516_v28 = vpop.f32.mrf.mxu3  ;;  %v9695_v20 = vsel %vm1325_vm1, %v9690_v49, %v9694_v41 }
 0x72a   : > { %v9994_v18 = vmul.f32 %v16292_v21, %v9942_v7  ;;  %v9312_v7 = vadd.f32 %v16469_v17, %v9022_v0  ;;  %v9698_v17 = vor.u32 %v9696_v9, %v9694_v41  ;;  %v9383_v0 = vld [vmem:[#allocation2 + $0xdc] sm:$0x1] }
 0x72c   : > { %v10046_v57 = vadd.f32 %v16301_v24, %v9994_v18 }
 0x72e   : > { %v10094_v56 = vmax.f32 %v10046_v57, 0.0  ;;  %v11921_v57 = vld [vmem:[#allocation2 + $0xcc] sm:$0xff] }
 0x72f   : > { %v9856_v48 = vpop.f32.mrf.mxu1  ;;  %v9700_v42 = vshll.u32 %v11921_v57, 16 }
 0x730   : > { %10142 = vst [vmem:[%s16313_s9 + $0x6f] sm:$0xfe] %v10094_v56  ;;  %v9943_v44 = vadd.f32 %v9856_v48, %v16362_v15  ;;  %v16533_v51 = vpop.f32.mrf.mxu3  ;;  %v16540_v48 = vpop.f32.mrf.mxu2 }
 0x732   : > { %v9995_v43 = vmul.f32 %v16292_v21, %v9943_v44  ;;  %9895 = vmatmul.bf16.gmra.mxu1 %v9687_v31  ;;  %v16814_v44 = vld [vmem:[#allocation20_spill] sm:$0xff] }
 0x733   : > { %v8362_v31 = vadd.f32 %v16485_v26, %v16814_v44 }
 0x734   : > { %v10047_v61 = vadd.f32 %v16301_v24, %v9995_v43 }
 0x735   : > { %v9024_v5 = vadd.f32 %v16490_v60, %v8362_v31 }
 0x736   : > { %v10095_v13 = vmax.f32 %v10047_v61, 0.0  ;;  %v9313_v61 = vadd.f32 %v16482_v32, %v9023_v46  ;;  %v11922_v32 = vld [vmem:[#allocation2 + $0xd4] sm:$0xff] }
 0x737   : > { %v9858_v6 = vpop.f32.mrf.mxu1  ;;  %v9314_v41 = vadd.f32 %v16493_v14, %v9024_v5 }
 0x738   : > { %10143 = vst [vmem:[%s16313_s9 + $0x77] sm:$0xff] %v10095_v13  ;;  %v9944_v15 = vadd.f32 %v9858_v6, %v16375_v19  ;;  %v16521_v19 = vpop.f32.mrf.mxu0  ;;  %v9702_v13 = vrot.slane %v9700_v42, 1  ;;  %v16547_v6 = vpop.f32.mrf.mxu3 }
 0x73a   : > { %v9996_v23 = vmul.f32 %v16292_v21, %v9944_v15  ;;  %v9703_v15 = vsel %vm1325_vm1, %v9698_v17, %v9702_v13 }
 0x73c   : > { %v10048_v53 = vadd.f32 %v16301_v24, %v9996_v23  ;;  %v8295_v23 = vpop.f32.mrf.mxu2 }
 0x73e   : > { %v10096_v37 = vmax.f32 %v10048_v53, 0.0  ;;  %v8363_v53 = vadd.f32 %v16496_v47, %v16072_v63  ;;  %v16815_v63 = vld [vmem:[#allocation6_spill] sm:$0xff] }
 0x73f   : > { %v9861_v22 = vpop.f32.mrf.mxu1  ;;  %v8364_v47 = vadd.f32 %v16509_v40, %v16815_v63 }
 0x740   : > { %10144 = vst [vmem:[%s16313_s9 + $0x7f] sm:$0x1] %v10096_v37  ;;  %v9945_v38 = vadd.f32 %v9861_v22, %v9311_v8  ;;  %v16537_v11 = vpop.f32.mrf.mxu0  ;;  %v9708_v8 = vshll.u32 %v11922_v32, 16  ;;  %v9025_v60 = vadd.f32 %v16502_v55, %v8363_v53  ;;  %v8957_v49 = vpop.f32.mrf.mxu3 }
 0x741   : > { %v9026_v46 = vadd.f32 %v16516_v28, %v8364_v47 }
 0x742   : > { %v9997_v2 = vmul.f32 %v16292_v21, %v9945_v38  ;;  %9900 = vmatmul.bf16.gmra.mxu1 %v9695_v20  ;;  %v9704_v38 = vshrl.u32 %v11921_v57, 16 }
 0x743   : > { %v9316_v44 = vadd.f32 %v16521_v19, %v9026_v46  ;;  %v16595_v46 = vld [vmem:[%s16672_s5] ss:$0 sm:$0xff] }
 0x744   : > { %v10049_v12 = vadd.f32 %v16301_v24, %v9997_v2  ;;  %v9706_v2 = vor.u32 %v9704_v38, %v9702_v13 }
 0x746   : > { %v10097_v30 = vmax.f32 %v10049_v12, 0.0  ;;  %v9710_v12 = vrot.slane %v9708_v8, 1 }
 0x747   : > { %v9863_v18 = vpop.f32.mrf.mxu1 }
 0x748   : > { %10145 = vst [vmem:[%s16313_s9 + $0x7f] sm:$0xfe] %v10097_v30  ;;  %v9946_v58 = vadd.f32 %v9863_v18, %v9312_v7  ;;  %v16552_v33 = vpop.f32.mrf.mxu0  ;;  %v9315_v30 = vadd.f32 %v16507_v45, %v9025_v60  ;;  %v8297_v7 = vpop.f32.mrf.mxu2  ;;  %v9711_v57 = vsel %vm1325_vm1, %v9706_v2, %v9710_v12 }
 0x749   : > { %v8959_v42 = vpop.f32.mrf.mxu3 }
 0x74a   : > { %v9998_v56 = vmul.f32 %v16292_v21, %v9946_v58  ;;  %v9498_v58 = vunpack.c.l.b16 %v9383_v0 }
 0x74c   : > { %v10050_v59 = vadd.f32 %v16301_v24, %v9998_v56  ;;  %v9523_v9 = vpack.c.b16 %v9498_v58, %v9498_v58 }
 0x74e   : > { %v10098_v43 = vmax.f32 %v10050_v59, 0.0  ;;  %v16816_v59 = vld [vmem:[#allocation5_spill] sm:$0xff] }
 0x74f   : > { %v9866_v16 = vpop.f32.mrf.mxu1  ;;  %v8365_v45 = vadd.f32 %v16524_v36, %v16816_v59  ;;  %v8366_v36 = vadd.f32 %v16540_v48, %v16098_v27  ;;  %v16817_v27 = vld [vmem:[#allocation21_spill] sm:$0xff] }
 0x750   : > { %10146 = vst [vmem:[%s16313_s9 + $0x87] sm:$0xff] %v10098_v43  ;;  %v9947_v3 = vadd.f32 %v9866_v16, %v9313_v61  ;;  %v9247_v14 = vpop.f32.mrf.mxu0  ;;  %v9712_v43 = vshrl.u32 %v11922_v32, 16  ;;  %v9716_v61 = vshll.u32 %v9523_v9, 16  ;;  %v8300_v13 = vpop.f32.mrf.mxu2  ;;  %v8367_v48 = vadd.f32 %v8295_v23, %v16817_v27 }
 0x751   : > { %v8962_v53 = vpop.f32.mrf.mxu3  ;;  %v8369_v9 = vadd.f32 %v8300_v13, %v16132_v29  ;;  %v16819_v29 = vld [vmem:[#allocation7_spill] sm:$0xff] }
 0x752   : > { %v9999_v25 = vmul.f32 %v16292_v21, %v9947_v3  ;;  %9905 = vmatmul.bf16.gmra.mxu1 %v9703_v15  ;;  %v9027_v3 = vadd.f32 %v16533_v51, %v8365_v45  ;;  %v9714_v5 = vor.u32 %v9712_v43, %v9710_v12  ;;  %v9028_v51 = vadd.f32 %v16547_v6, %v8366_v36 }
 0x753   : > { %v9029_v12 = vadd.f32 %v8957_v49, %v8367_v48 }
 0x754   : > { %v10051_v26 = vadd.f32 %v16301_v24, %v9999_v25  ;;  %v9718_v25 = vrot.slane %v9716_v61, 1  ;;  %v9317_v32 = vadd.f32 %v16537_v11, %v9027_v3  ;;  %v9318_v38 = vadd.f32 %v16552_v33, %v9028_v51 }
 0x755   : > { %v9319_v23 = vadd.f32 %v9247_v14, %v9029_v12 }
 0x756   : > { %v10099_v62 = vmax.f32 %v10051_v26, 0.0 }
 0x757   : > { %v9868_v10 = vpop.f32.mrf.mxu1 }
 0x758   : > { %10147 = vst [vmem:[%s16313_s9 + $0x8f] sm:$0x1] %v10099_v62  ;;  %v9948_v37 = vadd.f32 %v9868_v10, %v9314_v41  ;;  %v9249_v16 = vpop.f32.mrf.mxu0  ;;  %v9719_v41 = vsel %vm1325_vm1, %v9714_v5, %v9718_v25  ;;  %v8302_v60 = vpop.f32.mrf.mxu2 }
 0x759   : > { %v8964_v2 = vpop.f32.mrf.mxu3  ;;  %v8370_v61 = vadd.f32 %v8302_v60, %v16819_v29 }
 0x75a   : > { %v10000_v22 = vmul.f32 %v16292_v21, %v9948_v37 }
 0x75b   : > { %v9032_v25 = vadd.f32 %v8964_v2, %v8370_v61 }
 0x75c   : > { %v10052_v20 = vadd.f32 %v16301_v24, %v10000_v22 }
 0x75e   : > { %v10100_v54 = vmax.f32 %v10052_v20, 0.0 }
 0x75f   : > { %v9871_v18 = vpop.f32.mrf.mxu1 }
 0x760   : > { %10148 = vst [vmem:[%s16313_s9 + $0x8f] sm:$0xfe] %v10100_v54  ;;  %v9949_v55 = vadd.f32 %v9871_v18, %v9315_v30  ;;  %v9252_v37 = vpop.f32.mrf.mxu0  ;;  %v8305_v54 = vpop.f32.mrf.mxu2  ;;  %v16818_v30 = vld [vmem:[#allocation8_spill] sm:$0xff] }
 0x761   : > { %v8368_v18 = vadd.f32 %v8297_v7, %v16818_v30  ;;  %v8967_v49 = vpop.f32.mrf.mxu3 }
 0x762   : > { %v10001_v56 = vmul.f32 %v16292_v21, %v9949_v55  ;;  %9910 = vmatmul.bf16.gmra.mxu1 %v9711_v57 }
 0x763   : > { %v9030_v33 = vadd.f32 %v8959_v42, %v8368_v18 }
 0x764   : > { %v10053_v40 = vadd.f32 %v16301_v24, %v10001_v56 }
 0x765   : > { %v9320_v14 = vadd.f32 %v9249_v16, %v9030_v33  ;;  %v16820_v33 = vld [vmem:[#allocation22_spill] sm:$0xff] }
 0x766   : > { %v10101_v17 = vmax.f32 %v10053_v40, 0.0 }
 0x767   : > { %v9873_v31 = vpop.f32.mrf.mxu1 }
 0x768   : > { %10149 = vst [vmem:[%s16313_s9 + $0x97] sm:$0xff] %v10101_v17  ;;  %v9950_v28 = vadd.f32 %v9873_v31, %v9316_v44  ;;  %v9254_v63 = vpop.f32.mrf.mxu0  ;;  %v8307_v59 = vpop.f32.mrf.mxu2  ;;  %v9031_v17 = vadd.f32 %v8962_v53, %v8369_v9  ;;  %v16605_v31 = vld [vmem:[%s16673_s6] ss:$0 sm:$0xff] }
 0x769   : > { %v8969_v43 = vpop.f32.mrf.mxu3  ;;  %v9322_v53 = vadd.f32 %v9254_v63, %v9032_v25  ;;  %v8372_v27 = vadd.f32 %v8307_v59, %v16166_v34 }
 0x76a   : > { %v10002_v15 = vmul.f32 %v16292_v21, %v9950_v28  ;;  %v9321_v16 = vadd.f32 %v9252_v37, %v9031_v17  ;;  %v16821_v17 = vld [vmem:[#allocation10_spill] sm:$0xff] }
 0x76c   : > { %v10054_v26 = vadd.f32 %v16301_v24, %v10002_v15 }
 0x76e   : > { %v10102_v19 = vmax.f32 %v10054_v26, 0.0 }
 0x76f   : > { %v9876_v62 = vpop.f32.mrf.mxu1 }
 0x770   : > { %10150 = vst [vmem:[%s16313_s9 + $0x9f] sm:$0x1] %v10102_v19  ;;  %v9951_v10 = vadd.f32 %v9876_v62, %v9317_v32  ;;  %v9257_v7 = vpop.f32.mrf.mxu0  ;;  %v8310_v5 = vpop.f32.mrf.mxu2  ;;  %v8371_v19 = vadd.f32 %v8305_v54, %v16155_v52 }
 0x771   : > { %v8972_v62 = vpop.f32.mrf.mxu3 }
 0x772   : > { %v10003_v8 = vmul.f32 %v16292_v21, %v9951_v10  ;;  %9915 = vmatmul.bf16.gmra.mxu1 %v9719_v41  ;;  %v9033_v51 = vadd.f32 %v8967_v49, %v8371_v19 }
 0x774   : > { %v10055_v22 = vadd.f32 %v16301_v24, %v10003_v8 }
 0x776   : > { %v10103_v11 = vmax.f32 %v10055_v22, 0.0 }
 0x777   : > { %v9878_v20 = vpop.f32.mrf.mxu1 }
 0x778   : > { %10151 = vst [vmem:[%s16313_s9 + $0x9f] sm:$0xfe] %v10103_v11  ;;  %v9952_v0 = vadd.f32 %v9878_v20, %v9318_v38  ;;  %v9259_v3 = vpop.f32.mrf.mxu0  ;;  %v8312_v60 = vpop.f32.mrf.mxu2  ;;  %v9323_v11 = vadd.f32 %v9257_v7, %v9033_v51 }
 0x779   : > { %v8974_v20 = vpop.f32.mrf.mxu3 }
 0x77a   : > { %v10004_v6 = vmul.f32 %v16292_v21, %v9952_v0  ;;  %v9034_v0 = vadd.f32 %v8969_v43, %v8372_v27 }
 0x77c   : > { %v10056_v47 = vadd.f32 %v16301_v24, %v10004_v6  ;;  %v9324_v30 = vadd.f32 %v9259_v3, %v9034_v0 }
 0x77e   : > { %v10104_v58 = vmax.f32 %v10056_v47, 0.0  ;;  %v8373_v47 = vadd.f32 %v8310_v5, %v16178_v39  ;;  %v16822_v5 = vld [vmem:[#allocation9_spill] sm:$0xff] }
 0x77f   : > { %v9881_v55 = vpop.f32.mrf.mxu1 }
 0x780   : > { %10152 = vst [vmem:[%s16313_s9 + $0xa7] sm:$0xff] %v10104_v58  ;;  %v9953_v57 = vadd.f32 %v9881_v55, %v9319_v23  ;;  %v9262_v37 = vpop.f32.mrf.mxu0  ;;  %v8315_v63 = vpop.f32.mrf.mxu2  ;;  %v9035_v58 = vadd.f32 %v8972_v62, %v8373_v47 }
 0x781   : > { %v8977_v55 = vpop.f32.mrf.mxu3 }
 0x782   : > { %v10005_v21 = vmul.f32 %v16595_v46, %v9953_v57  ;;  %v9325_v9 = vadd.f32 %v9262_v37, %v9035_v58 }
 0x784   : > { %v10057_v56 = vadd.f32 %v16301_v24, %v10005_v21  ;;  %v8374_v21 = vadd.f32 %v8312_v60, %v16820_v33 }
 0x786   : > { %v10105_v40 = vmax.f32 %v10057_v56, 0.0 }
 0x787   : > { %v9883_v45 = vpop.f32.mrf.mxu1 }
 0x788   : > { %10153 = vst [vmem:[%s16313_s9 + $0xaf] sm:$0x1] %v10105_v40  ;;  %v9954_v42 = vadd.f32 %v9883_v45, %v9320_v14  ;;  %v9264_v12 = vpop.f32.mrf.mxu0  ;;  %v8317_v7 = vpop.f32.mrf.mxu2  ;;  %v9036_v14 = vadd.f32 %v8974_v20, %v8374_v21 }
 0x789   : > { %v8376_v25 = vadd.f32 %v8317_v7, %v16822_v5 }
 0x78a   : > { %v10006_v44 = vmul.f32 %v16595_v46, %v9954_v42  ;;  %v8979_v42 = vpop.f32.mrf.mxu3  ;;  %v9326_v43 = vadd.f32 %v9264_v12, %v9036_v14 }
 0x78b   : > { %v9038_v62 = vadd.f32 %v8979_v42, %v8376_v25 }
 0x78c   : > { %v10058_v24 = vadd.f32 %v16605_v31, %v10006_v44  ;;  %v8375_v44 = vadd.f32 %v8315_v63, %v16821_v17 }
 0x78e   : > { %v10106_v28 = vmax.f32 %v10058_v24, 0.0 }
 0x78f   : > { %v9886_v13 = vpop.f32.mrf.mxu1 }
 0x790   : > { %10154 = vst [vmem:[%s16313_s9 + $0xaf] sm:$0xfe] %v10106_v28  ;;  %v9955_v15 = vadd.f32 %v9886_v13, %v9321_v16  ;;  %v9267_v49 = vpop.f32.mrf.mxu0  ;;  %v8320_v16 = vpop.f32.mrf.mxu2  ;;  %v9037_v13 = vadd.f32 %v8977_v55, %v8375_v44 }
 0x792   : > { %v10007_v26 = vmul.f32 %v16595_v46, %v9955_v15  ;;  %v8982_v19 = vpop.f32.mrf.mxu3 }
 0x794   : > { %v10059_v36 = vadd.f32 %v16605_v31, %v10007_v26 }
 0x796   : > { %v10107_v32 = vmax.f32 %v10059_v36, 0.0  ;;  %v9327_v36 = vadd.f32 %v9267_v49, %v9037_v13 }
 0x797   : > { %v9888_v41 = vpop.f32.mrf.mxu1 }
 0x798   : > { %10155 = vst [vmem:[%s16313_s9 + $0xb7] sm:$0xff] %v10107_v32  ;;  %v9956_v10 = vadd.f32 %v9888_v41, %v9322_v53  ;;  %v9269_v61 = vpop.f32.mrf.mxu0  ;;  %v8322_v51 = vpop.f32.mrf.mxu2 }
 0x799   : > { %v8378_v12 = vadd.f32 %v8322_v51, %v16235_v50 }
 0x79a   : > { %v10008_v8 = vmul.f32 %v16595_v46, %v9956_v10 }
 0x79c   : > { %v10060_v22 = vadd.f32 %v16605_v31, %v10008_v8  ;;  %v8377_v8 = vadd.f32 %v8320_v16, %v16224_v4 }
 0x79e   : > { %v10108_v48 = vmax.f32 %v10060_v22, 0.0  ;;  %v9328_v22 = vadd.f32 %v9269_v61, %v9038_v62 }
 0x79f   : > { %v9891_v52 = vpop.f32.mrf.mxu1 }
 0x7a0   : > { %10156 = vst [vmem:[%s16313_s9 + $0xbf] sm:$0x1] %v10108_v48  ;;  %v9957_v38 = vadd.f32 %v9891_v52, %v9323_v11  ;;  %v9272_v41 = vpop.f32.mrf.mxu0  ;;  %v8984_v11 = vpop.f32.mrf.mxu3  ;;  %v9039_v52 = vadd.f32 %v8982_v19, %v8377_v8  ;;  %v16824_v19 = vld [vmem:[#allocation13_spill] sm:$0xff] }
 0x7a2   : > { %v10009_v2 = vmul.f32 %v16595_v46, %v9957_v38  ;;  %v9329_v63 = vadd.f32 %v9272_v41, %v9039_v52 }
 0x7a4   : > { %v10061_v6 = vadd.f32 %v16605_v31, %v10009_v2  ;;  %v8325_v2 = vpop.f32.mrf.mxu2 }
 0x7a6   : > { %v10109_v54 = vmax.f32 %v10061_v6, 0.0 }
 0x7a7   : > { %v9893_v34 = vpop.f32.mrf.mxu1 }
 0x7a8   : > { %10157 = vst [vmem:[%s16313_s9 + $0xbf] sm:$0xfe] %v10109_v54  ;;  %v9958_v18 = vadd.f32 %v9893_v34, %v9324_v30  ;;  %v9274_v20 = vpop.f32.mrf.mxu0  ;;  %v9040_v54 = vadd.f32 %v8984_v11, %v8378_v12  ;;  %v8987_v34 = vpop.f32.mrf.mxu3 }
 0x7aa   : > { %v10010_v23 = vmul.f32 %v16595_v46, %v9958_v18 }
 0x7ac   : > { %v10062_v57 = vadd.f32 %v16605_v31, %v10010_v23  ;;  %v8379_v23 = vadd.f32 %v8325_v2, %v16247_v1  ;;  %v8327_v33 = vpop.f32.mrf.mxu2 }
 0x7ae   : > { %v10110_v56 = vmax.f32 %v10062_v57, 0.0  ;;  %v9330_v57 = vadd.f32 %v9274_v20, %v9040_v54  ;;  %v9041_v49 = vadd.f32 %v8987_v34, %v8379_v23 }
 0x7af   : > { %v9896_v39 = vpop.f32.mrf.mxu1 }
 0x7b0   : > { %10158 = vst [vmem:[%s16313_s9 + $0xc7] sm:$0xff] %v10110_v56  ;;  %v9959_v40 = vadd.f32 %v9896_v39, %v9325_v9  ;;  %v9277_v58 = vpop.f32.mrf.mxu0  ;;  %v8989_v7 = vpop.f32.mrf.mxu3  ;;  %v8380_v39 = vadd.f32 %v8327_v33, %v16258_v35 }
 0x7b1   : > { %v9331_v14 = vadd.f32 %v9277_v58, %v9041_v49 }
 0x7b2   : > { %v10011_v59 = vmul.f32 %v16595_v46, %v9959_v40  ;;  %v9042_v17 = vadd.f32 %v8989_v7, %v8380_v39 }
 0x7b4   : > { %v10063_v45 = vadd.f32 %v16605_v31, %v10011_v59  ;;  %v8330_v42 = vpop.f32.mrf.mxu2 }
 0x7b6   : > { %v10111_v24 = vmax.f32 %v10063_v45, 0.0 }
 0x7b7   : > { %v9898_v29 = vpop.f32.mrf.mxu1 }
 0x7b8   : > { %10159 = vst [vmem:[%s16313_s9 + $0xcf] sm:$0x1] %v10111_v24  ;;  %v9960_v28 = vadd.f32 %v9898_v29, %v9326_v43  ;;  %v9279_v45 = vpop.f32.mrf.mxu0  ;;  %v8992_v43 = vpop.f32.mrf.mxu3  ;;  %v16823_v29 = vld [vmem:[#allocation11_spill] sm:$0xff] }
 0x7b9   : > { %v8381_v61 = vadd.f32 %v8330_v42, %v16823_v29  ;;  %v9332_v16 = vadd.f32 %v9279_v45, %v9042_v17 }
 0x7ba   : > { %v10012_v3 = vmul.f32 %v16595_v46, %v9960_v28 }
 0x7bc   : > { %v10064_v15 = vadd.f32 %v16605_v31, %v10012_v3  ;;  %v8332_v25 = vpop.f32.mrf.mxu2 }
 0x7be   : > { %v10112_v26 = vmax.f32 %v10064_v15, 0.0  ;;  %v9043_v15 = vadd.f32 %v8992_v43, %v8381_v61 }
 0x7bf   : > { %v9901_v32 = vpop.f32.mrf.mxu1 }
 0x7c0   : > { %10160 = vst [vmem:[%s16313_s9 + $0xcf] sm:$0xfe] %v10112_v26  ;;  %v9961_v53 = vadd.f32 %v9901_v32, %v9327_v36  ;;  %v9282_v3 = vpop.f32.mrf.mxu0  ;;  %v8382_v32 = vadd.f32 %v8332_v25, %v16824_v19  ;;  %v8994_v62 = vpop.f32.mrf.mxu3 }
 0x7c1   : > { %v9333_v36 = vadd.f32 %v9282_v3, %v9043_v15 }
 0x7c2   : > { %v10013_v10 = vmul.f32 %v16595_v46, %v9961_v53  ;;  %v9044_v51 = vadd.f32 %v8994_v62, %v8382_v32 }
 0x7c4   : > { %v10065_v37 = vadd.f32 %v16605_v31, %v10013_v10 }
 0x7c6   : > { %v10113_v60 = vmax.f32 %v10065_v37, 0.0 }
 0x7c7   : > { %v9903_v27 = vpop.f32.mrf.mxu1 }
 0x7c8   : > { %10161 = vst [vmem:[%s16313_s9 + $0xd7] sm:$0xff] %v10113_v60  ;;  %v9962_v48 = vadd.f32 %v9903_v27, %v9328_v22  ;;  %v9284_v8 = vpop.f32.mrf.mxu0 }
 0x7c9   : > { %v9334_v22 = vadd.f32 %v9284_v8, %v9044_v51 }
 0x7ca   : > { %v10014_v38 = vmul.f32 %v16595_v46, %v9962_v48 }
 0x7cc   : > { %v10066_v0 = vadd.f32 %v16605_v31, %v10014_v38 }
 0x7ce   : > { %v10114_v6 = vmax.f32 %v10066_v0, 0.0 }
 0x7cf   : > { %v9906_v4 = vpop.f32.mrf.mxu1 }
 0x7d0   : > { %10162 = vst [vmem:[%s16313_s9 + $0xdf] sm:$0x1] %v10114_v6  ;;  %v9963_v47 = vadd.f32 %v9906_v4, %v9329_v63 }
 0x7d2   : > { %v10015_v30 = vmul.f32 %v16595_v46, %v9963_v47 }
 0x7d4   : > { %v10067_v18 = vadd.f32 %v16605_v31, %v10015_v30 }
 0x7d6   : > { %v10115_v55 = vmax.f32 %v10067_v18, 0.0 }
 0x7d7   : > { %v9908_v50 = vpop.f32.mrf.mxu1 }
 0x7d8   : > { %10163 = vst [vmem:[%s16313_s9 + $0xdf] sm:$0xfe] %v10115_v55  ;;  %v9964_v21 = vadd.f32 %v9908_v50, %v9330_v57 }
 0x7da   : > { %v10016_v56 = vmul.f32 %v16595_v46, %v9964_v21 }
 0x7dc   : > { %v10068_v9 = vadd.f32 %v16605_v31, %v10016_v56 }
 0x7de   : > { %v10116_v40 = vmax.f32 %v10068_v9, 0.0 }
 0x7df   : > { %v9911_v59 = vpop.f32.mrf.mxu1 }
 0x7e0   : > { %10164 = vst [vmem:[%s16313_s9 + $0xe7] sm:$0xff] %v10116_v40  ;;  %v9965_v1 = vadd.f32 %v9911_v59, %v9331_v14 }
 0x7e2   : > { %v10017_v44 = vmul.f32 %v16595_v46, %v9965_v1 }
 0x7e4   : > { %v10069_v24 = vadd.f32 %v16605_v31, %v10017_v44 }
 0x7e6   : > { %v10117_v28 = vmax.f32 %v10069_v24, 0.0 }
 0x7e7   : > { %v9913_v35 = vpop.f32.mrf.mxu1 }
 0x7e8   : > { %10165 = vst [vmem:[%s16313_s9 + $0xef] sm:$0x1] %v10117_v28  ;;  %v9966_v13 = vadd.f32 %v9913_v35, %v9332_v16 }
 0x7ea   : > { %v10018_v5 = vmul.f32 %v16595_v46, %v9966_v13 }
 0x7ec   : > { %v10070_v26 = vadd.f32 %v16605_v31, %v10018_v5 }
 0x7ee   : > { %v10118_v53 = vmax.f32 %v10070_v26, 0.0 }
 0x7ef   : > { %v9916_v41 = vpop.f32.mrf.mxu1 }
 0x7f0   : > { %10166 = vst [vmem:[%s16313_s9 + $0xef] sm:$0xfe] %v10118_v53  ;;  %v9967_v10 = vadd.f32 %v9916_v41, %v9333_v36 }
 0x7f2   : > { %v10019_v37 = vmul.f32 %v16595_v46, %v9967_v10 }
 0x7f4   : > { %v10071_v60 = vadd.f32 %v16605_v31, %v10019_v37 }
 0x7f6   : > { %v10119_v27 = vmax.f32 %v10071_v60, 0.0 }
 0x7f7   : > { %v9918_v48 = vpop.f32.mrf.mxu1 }
 0x7f8   : > { %10167 = vst [vmem:[%s16313_s9 + $0xf7] sm:$0xff] %v10119_v27  ;;  %v9968_v11 = vadd.f32 %v9918_v48, %v9334_v22 }
 0x7fa   : > { %v10020_v52 = vmul.f32 %v16595_v46, %v9968_v11 }
 0x7fc   : > { %v10072_v38 = vadd.f32 %v16605_v31, %v10020_v52 }
 0x7fe   : > { %v10120_v20 = vmax.f32 %v10072_v38, 0.0 }
 0x800   : > { %10168 = vst [vmem:[%s16313_s9 + $0xff] sm:$0x1] %v10120_v20 }
 0x801 PF: > { %s17_s24 = sadd.s32 1, %s13766_s24  }
 0x802   : > { %p14_p4 = scmp.ge.s32.totalorder %s17_s24, 4  }
 0x804   :  { %16 = sbr.rel (!%p14_p4) target bundleno = 1 (0x1), region = 94 }

</bundles_post_ra>
